<compile_context>
chip_gen: v7x
topology: tpu7x:2x2x1
jax: 0.10.0
libtpu: 0.0.40
codegen_flags: <defaults>
</compile_context>

<pallas_src>
import numpy as np
import jax
import jax.numpy as jnp
from jax.experimental import pallas as pl
from jax.experimental.pallas import tpu as pltpu

LRELU_SLOPE = 0.2
IN_EPS = 1e-5   # PyTorch InstanceNorm2d default eps

# ---------------------------------------------------------------------------
# Geometry constants for the specialised config (48x48x4 input):
#   initial conv 7x7/s2/p3 : 48 -> 24
#   down    conv 4x4/s2/p1 : 24 -> 12   (padded 26 -> four 13x13 phase grids)
#   res     conv 3x3/s1/p1 : 12 -> 12   (zero-padded 14x14 working buffer)
#   final   conv 4x4/s1/p1 : 12 -> 11
# ---------------------------------------------------------------------------
_G = 13                     # phase-grid side for the down conv (26 / 2)
_GG = _G * _G               # 169
_PW = 14                    # padded side of the 12x12 stage
_PB = _PW * _PW             # 196
_SPAN_DN = 11 * _G + 12     # 155: down-conv lane span (incl. garbage lanes)
_SPAN_RES = 11 * _PW + 12   # 166: 3x3 res-conv span
_SPAN_FIN = 10 * _PW + 11   # 151: 4x4 final-conv span
_K1 = 7 * 7 * 4 + 1         # 197: im2col K for the initial conv (+ bias row)
_M1 = 4 * _GG               # 676: 4 phase groups x 13x13 columns
_OUT_LANES = 128            # 121 valid output lanes (11x11), padded to 128
_B = 2                      # samples lane-packed per grid step

# Static tap lane-offsets (tap order = kh-major, kw-minor — matches weights).
_OFFS_DN = tuple(((kh % 2) * 2 + (kw % 2)) * _GG + (kh // 2) * _G + (kw // 2)
                 for kh in range(4) for kw in range(4))
_OFFS_33 = tuple(kh * _PW + kw for kh in range(3) for kw in range(3))
_OFFS_44 = tuple(kh * _PW + kw for kh in range(4) for kw in range(4))


# ---------------------------------------------------------------------------
# Fused whole-network kernel (one grid step == _B lane-packed samples).
# ---------------------------------------------------------------------------
def _make_fused_kernel(use_sigmoid, B):
    f32 = jnp.float32
    bf16 = jnp.bfloat16

    def lrelu(v):
        return jnp.where(v >= 0, v, LRELU_SLOPE * v)

    def kernel(rhs1_ref, w1t_ref, wd_ref, bd_ref, s2_ref, s3_ref,
               wres_ref, bres_ref, wf_ref, bf_ref, sf_ref, m166_ref, o_ref):
        mask = m166_ref[...]                                     # [1,166] f32

        def per_sample(buf, seg, off, span):
            # buf: [C, B*seg] -> [C, B*span]; lanes s*seg+off .. +span per sample.
            return jnp.concatenate(
                [buf[:, s * seg + off: s * seg + off + span] for s in range(B)],
                axis=1)

        def stacked_rhs(buf_bf, seg, offs, span):
            # K-stacked conv RHS: rows grouped (tap, Cin), lanes (sample, pos).
            return jnp.concatenate(
                [per_sample(buf_bf, seg, off, span) for off in offs], axis=0)

        def instnorm(v):
            # Per-sample InstanceNorm over the 144 valid lanes; stats in f32.
            outs = []
            for s in range(B):
                vs = v[:, s * _SPAN_RES:(s + 1) * _SPAN_RES]
                mean = jnp.sum(vs * mask, axis=1, keepdims=True) * (1.0 / 144.0)
                cen = (vs - mean) * mask              # garbage lanes -> exactly 0
                var = jnp.sum(cen * cen, axis=1, keepdims=True) * (1.0 / 144.0)
                outs.append(cen * jax.lax.rsqrt(var + IN_EPS))
            return jnp.concatenate(outs, axis=1)

        # ---- initial 7x7/s2 conv: ONE dot over all phases & samples --------
        # rhs1_ref[0] is [197, B*676]; bias folded in via the trailing "ones"
        # row; zero-pad columns stay zero through LReLU.
        a1 = lrelu(jnp.dot(w1t_ref[...], rhs1_ref[0],
                           preferred_element_type=f32))          # [16, B*676]

        # ---- downsample 4x4/s2 conv, K-stacked (K = 16 taps * 16 Cin) ------
        rhs_dn = stacked_rhs(a1.astype(bf16), _M1, _OFFS_DN, _SPAN_DN)  # [256,B*155]
        y = lrelu(jnp.dot(wd_ref[...], rhs_dn,
                          preferred_element_type=f32) + bd_ref[...])    # [32,B*155]
        # Scatter valid lanes into the zero-padded 14x14 layout (0/1 matmul).
        xbuf = jnp.dot(y.astype(bf16), s2_ref[...],
                       preferred_element_type=f32)               # [32, B*196]

        # ---- two residual blocks --------------------------------------------
        # TODO(synk): ResidualDiscriminatorBlock source was not provided; it is
        # implemented as conv3x3 -> InstanceNorm -> LReLU -> conv3x3 ->
        # InstanceNorm -> +skip -> LReLU (conditional norm disabled).
        for blk in range(2):
            rhs_a = stacked_rhs(xbuf.astype(bf16), _PB, _OFFS_33, _SPAN_RES)
            h = lrelu(instnorm(jnp.dot(wres_ref[2 * blk], rhs_a,
                                       preferred_element_type=f32)
                               + bres_ref[2 * blk]))             # [32, B*166]
            hbuf = jnp.dot(h.astype(bf16), s3_ref[...],
                           preferred_element_type=f32)           # [32, B*196]
            rhs_b = stacked_rhs(hbuf.astype(bf16), _PB, _OFFS_33, _SPAN_RES)
            z = instnorm(jnp.dot(wres_ref[2 * blk + 1], rhs_b,
                                 preferred_element_type=f32)
                         + bres_ref[2 * blk + 1])                # [32, B*166]
            z = lrelu(z + per_sample(xbuf, _PB, 15, _SPAN_RES))  # f32 skip add
            xbuf = jnp.dot(z.astype(bf16), s3_ref[...],
                           preferred_element_type=f32)           # [32, B*196]

        # ---- final 4x4/s1 conv, K-stacked (K = 16 taps * 32 Cin) -----------
        rhs_f = stacked_rhs(xbuf.astype(bf16), _PB, _OFFS_44, _SPAN_FIN)  # [512,B*151]
        logits = (jnp.dot(wf_ref[...], rhs_f,
                          preferred_element_type=f32) + bf_ref[...])      # [8, B*151]
        gathered = jnp.dot(logits.astype(bf16), sf_ref[...],
                           preferred_element_type=f32)           # [8, B*128]
        row0 = gathered[0:1, :]
        if use_sigmoid:
            row0 = jax.nn.sigmoid(row0)                          # f32 sigmoid
        o_ref[0] = row0

    return kernel


# ---------------------------------------------------------------------------
# One-time wrapper-side layout glue (runs in XLA once per forward).
# ---------------------------------------------------------------------------
def _build_rhs1(x_nhwc):
    """im2col of the 48x48x4 input into the kernel's column layout.

    Columns are ordered as 4 stride-phase groups x 13x13 positions of the
    zero-padded 24x24 initial-conv output grid; a trailing "ones" row lets the
    kernel fold the conv bias into the matmul while pad columns stay zero.
    """
    N = x_nhwc.shape[0]
    xp = jnp.pad(x_nhwc, ((0, 0), (3, 3), (3, 3), (0, 0)))           # [N,54,54,4]
    idx = 2 * np.arange(24)[:, None] + np.arange(7)[None, :]         # [24,7]
    patches = xp[:, idx[:, :, None, None], idx[None, None, :, :], :]  # [N,24,7,24,7,4]
    patches = patches.transpose(0, 1, 3, 2, 4, 5).reshape(N, 24, 24, 196)
    ones = jnp.ones((N, 24, 24, 1), jnp.float32)
    patches = jnp.concatenate([patches, ones], axis=-1)              # [N,24,24,197]
    pp = jnp.pad(patches, ((0, 0), (1, 1), (1, 1), (0, 0)))          # [N,26,26,197]
    groups = jnp.stack([pp[:, a::2, b::2, :] for a in (0, 1) for b in (0, 1)],
                       axis=1)                                       # [N,4,13,13,197]
    return groups.reshape(N, _M1, _K1).transpose(0, 2, 1)            # [N,197,676]


def _selection_constants(B):
    # S2: down-conv span (13-stride rows) -> zero-padded 14x14 buffer.
    s2 = np.zeros((_SPAN_DN, _PB), np.float32)
    for m in range(_SPAN_DN):
        o, p = divmod(m, _G)
        if p < 12:
            s2[m, (o + 1) * _PW + (p + 1)] = 1.0
    # S3: res-conv span (14-stride rows) -> zero-padded 14x14 buffer (+15 shift).
    s3 = np.zeros((_SPAN_RES, _PB), np.float32)
    for m in range(_SPAN_RES):
        if m % _PW < 12:
            s3[m, m + 15] = 1.0
    # SF: final-conv span -> dense 11x11 output lanes (padded to 128).
    sf = np.zeros((_SPAN_FIN, _OUT_LANES), np.float32)
    for m in range(_SPAN_FIN):
        o, p = divmod(m, _PW)
        if p < 11:
            sf[m, o * 11 + p] = 1.0
    # Block-diagonal versions for B lane-packed samples (0/1 -> exact in bf16).
    eye = np.eye(B, dtype=np.float32)
    s2b = np.kron(eye, s2)
    s3b = np.kron(eye, s3)
    sfb = np.kron(eye, sf)
    m166 = (np.arange(_SPAN_RES) % _PW < 12).astype(np.float32).reshape(1, _SPAN_RES)
    return (jnp.asarray(s2b, jnp.bfloat16), jnp.asarray(s3b, jnp.bfloat16),
            jnp.asarray(sfb, jnp.bfloat16), jnp.asarray(m166, jnp.float32))


# ---------------------------------------------------------------------------
# Discriminator: config, parameter init, forward pass.
# ---------------------------------------------------------------------------
class Config:
    landsat_channels = 4
    landsat_resolution = 48
    base_filters = 16
    max_filters = 64
    n_layers = 3
    angle_dim = 4
    use_conditional_disc = False
    norm_type = "instance"
    use_sigmoid = True


def _init_conv(key, KH, KW, Cin, Cout):
    kw_key, kb_key = jax.random.split(key)
    bound = 1.0 / float(np.sqrt(KH * KW * Cin))
    w = jax.random.uniform(kw_key, (KH, KW, Cin, Cout), jnp.float32, -bound, bound)
    b = jax.random.uniform(kb_key, (Cout,), jnp.float32, -bound, bound)
    return w, b


def init_params(cfg, key):
    n_layers = min(cfg.n_layers,
                   max(1, int(np.log2(cfg.landsat_resolution / 24.0))))
    params = {}
    key, k = jax.random.split(key)
    params["init"] = _init_conv(k, 7, 7, cfg.landsat_channels, cfg.base_filters)
    layers = []
    in_ch = cfg.base_filters
    for _ in range(n_layers):
        out_ch = min(in_ch * 2, cfg.max_filters)
        key, k = jax.random.split(key)
        down = _init_conv(k, 4, 4, in_ch, out_ch)
        res = []
        for _ in range(2):
            key, k1 = jax.random.split(key)
            key, k2 = jax.random.split(key)
            res.append((_init_conv(k1, 3, 3, out_ch, out_ch),
                        _init_conv(k2, 3, 3, out_ch, out_ch)))
        layers.append({"down": down, "res": res})
        in_ch = out_ch
    params["layers"] = layers
    key, k = jax.random.split(key)
    params["final"] = _init_conv(k, 4, 4, in_ch, 1)
    return params


def landsat8_discriminator_forward(x_nchw, params, *, use_sigmoid=True, angles=None):
    # `angles` only feeds conditional normalisation, which is disabled here
    # (use_conditional_disc=False), so it is unused.
    del angles
    assert len(params["layers"]) == 1, "fused kernel specialised to 1 down layer"
    assert x_nchw.shape[1:] == (4, 48, 48), "fused kernel specialised to 4x48x48"
    f32 = jnp.float32
    bf16 = jnp.bfloat16
    B = _B

    N = x_nchw.shape[0]
    NB = -(-N // B)                      # grid steps (B samples per step)
    n_pad = NB * B - N

    x = jnp.transpose(x_nchw, (0, 2, 3, 1)).astype(f32)              # NHWC
    if n_pad:
        x = jnp.concatenate([x, jnp.zeros((n_pad, 48, 48, 4), f32)], axis=0)

    # im2col for the stem, lane-packed over B samples, emitted in bf16.
    rhs1 = _build_rhs1(x)                                            # [NB*B,197,676]
    rhs1 = (rhs1.reshape(NB, B, _K1, _M1).transpose(0, 2, 1, 3)
                 .reshape(NB, _K1, B * _M1).astype(bf16))            # [NB,197,B*676]

    # Weights in lane-dense, stacked-K layouts (bf16); biases stay f32.
    w1, b1 = params["init"]                                          # [7,7,4,16],[16]
    w1t = jnp.concatenate([w1.reshape(196, 16).T, b1.reshape(16, 1)],
                          axis=1).astype(bf16)                       # [16,197]

    layer = params["layers"][0]
    wd, bd = layer["down"]                                           # [4,4,16,32],[32]
    wd_k = wd.reshape(16, 16, 32).transpose(2, 0, 1).reshape(32, 256).astype(bf16)
    bd2 = bd.reshape(32, 1)

    wres_l, bres_l = [], []
    for (wa, ba), (wb, bb) in layer["res"]:
        for w_, b_ in ((wa, ba), (wb, bb)):
            wres_l.append(w_.reshape(9, 32, 32).transpose(2, 0, 1).reshape(32, 288))
            bres_l.append(b_.reshape(32, 1))
    wres = jnp.stack(wres_l).astype(bf16)                            # [4,32,288]
    bres = jnp.stack(bres_l)                                         # [4,32,1]

    wfp, bfp = params["final"]                                       # [4,4,32,1],[1]
    wf_k = wfp.reshape(16, 32, 1).transpose(2, 0, 1).reshape(1, 512)
    wf_k = jnp.concatenate([wf_k, jnp.zeros((7, 512), f32)], axis=0).astype(bf16)
    bf8 = jnp.concatenate([bfp.reshape(1, 1), jnp.zeros((7, 1), f32)], axis=0)

    s2b, s3b, sfb, m166 = _selection_constants(B)

    mac = (16 * _K1 * B * _M1
           + 32 * 256 * B * _SPAN_DN
           + 32 * (B * _SPAN_DN) * (B * _PB)
           + 4 * 32 * 288 * B * _SPAN_RES
           + 4 * 32 * (B * _SPAN_RES) * (B * _PB)
           + 8 * 512 * B * _SPAN_FIN
           + 8 * (B * _SPAN_FIN) * (B * _OUT_LANES))
    cost = pl.CostEstimate(
        flops=int(2 * NB * mac),
        transcendentals=int(NB * (4 * 32 * B + (B * _OUT_LANES if use_sigmoid else 0))),
        bytes_accessed=int(2 * rhs1.size
                           + 2 * (w1t.size + wd_k.size + wres.size + wf_k.size
                                  + s2b.size + s3b.size + sfb.size)
                           + 4 * (bd2.size + bres.size + bf8.size + m166.size)
                           + 4 * NB * B * _OUT_LANES))

    def full(shape):
        return pl.BlockSpec(shape, lambda n, _nd=len(shape): (0,) * _nd)

    out = pl.pallas_call(
        _make_fused_kernel(use_sigmoid, B),
        out_shape=jax.ShapeDtypeStruct((NB, 1, B * _OUT_LANES), f32),
        grid=(NB,),
        in_specs=[
            pl.BlockSpec((1, _K1, B * _M1), lambda n: (n, 0, 0)),  # packed im2col
            full((16, _K1)),                                       # stem weights+bias
            full((32, 256)),                                       # down conv, K-stacked
            full((32, 1)),                                         # down conv bias
            full((B * _SPAN_DN, B * _PB)),                         # S2 scatter (blockdiag)
            full((B * _SPAN_RES, B * _PB)),                        # S3 pad-shift (blockdiag)
            full((4, 32, 288)),                                    # res convs, K-stacked
            full((4, 32, 1)),                                      # res conv biases
            full((8, 512)),                                        # final conv, K-stacked
            full((8, 1)),                                          # final conv bias
            full((B * _SPAN_FIN, B * _OUT_LANES)),                 # SF gather (blockdiag)
            full((1, _SPAN_RES)),                                  # valid-lane mask
        ],
        out_specs=pl.BlockSpec((1, 1, B * _OUT_LANES), lambda n: (n, 0, 0)),
        compiler_params=pltpu.CompilerParams(
            dimension_semantics=("parallel",)),
        cost_estimate=cost,
    )(rhs1, w1t, wd_k, bd2, s2b, s3b, wres, bres, wf_k, bf8, sfb, m166)

    out = out.reshape(NB * B, _OUT_LANES)[:N, :121]
    return out.reshape(N, 1, 11, 11)                                 # NCHW [N,1,11,11]


# ---------------------------------------------------------------------------
# Pure-JAX reference (for correctness checking only; f32 throughout).
# ---------------------------------------------------------------------------
def _ref_forward(x_nchw, params, *, use_sigmoid=True):
    def conv(x, w, b, stride, padding):
        y = jax.lax.conv_general_dilated(
            x, w, (stride, stride), [(padding, padding), (padding, padding)],
            dimension_numbers=("NCHW", "HWIO", "NCHW"))
        return y + b.reshape(1, -1, 1, 1)

    def lrelu(x):
        return jnp.where(x >= 0, x, LRELU_SLOPE * x)

    def inorm(x):
        m = jnp.mean(x, axis=(2, 3), keepdims=True)
        v = jnp.mean(jnp.square(x - m), axis=(2, 3), keepdims=True)
        return (x - m) * jax.lax.rsqrt(v + IN_EPS)

    w, b = params["init"]
    x = lrelu(conv(x_nchw, w, b, 2, 3))
    for layer in params["layers"]:
        w, b = layer["down"]
        x = lrelu(conv(x, w, b, 2, 1))
        for (w1, b1), (w2, b2) in layer["res"]:
            h = lrelu(inorm(conv(x, w1, b1, 1, 1)))
            x = lrelu(inorm(conv(h, w2, b2, 1, 1)) + x)
    w, b = params["final"]
    x = conv(x, w, b, 1, 1)
    if use_sigmoid:
        x = jax.nn.sigmoid(x)
    return x


if __name__ == "__main__":
    cfg = Config()
    key = jax.random.PRNGKey(0)
    key, pkey, xkey = jax.random.split(key, 3)
    params = init_params(cfg, pkey)
    x = jax.random.normal(
        xkey,
        (2, cfg.landsat_channels, cfg.landsat_resolution, cfg.landsat_resolution),
        jnp.float32)

    fwd = jax.jit(lambda xx: landsat8_discriminator_forward(
        xx, params, use_sigmoid=cfg.use_sigmoid))
    out = jax.block_until_ready(fwd(x))

    # 48 -> initial(7,s2,p3) 24 -> down(4,s2,p1) 12 -> final(4,s1,p1) 11
    assert out.shape == (2, 1, 11, 11), out.shape
    assert bool(jnp.all(jnp.isfinite(out)))

    ref = jax.block_until_ready(_ref_forward(x, params, use_sigmoid=cfg.use_sigmoid))
    # bf16 MXU operands (f32 accumulation / f32 norm stats) -> ~1e-3-level
    # absolute deviation from the f32 reference; 1e-2 tolerance is a real check
    # (a wrong network differs by >0.1).
    np.testing.assert_allclose(np.asarray(out), np.asarray(ref),
                               rtol=1e-2, atol=1e-2)

    print("KERNEL_OK")
</pallas_src>

<mosaic_0001>
module attributes {stable_mosaic.version = 11 : i64} {
  func.func @kernel(%arg0: i32, %arg1: memref<1x197x1352xbf16, #tpu.memory_space<vmem>>, %arg2: memref<16x197xbf16, #tpu.memory_space<vmem>>, %arg3: memref<32x256xbf16, #tpu.memory_space<vmem>>, %arg4: memref<32x1xf32, #tpu.memory_space<vmem>>, %arg5: memref<310x392xbf16, #tpu.memory_space<vmem>>, %arg6: memref<332x392xbf16, #tpu.memory_space<vmem>>, %arg7: memref<4x32x288xbf16, #tpu.memory_space<vmem>>, %arg8: memref<4x32x1xf32, #tpu.memory_space<vmem>>, %arg9: memref<8x512xbf16, #tpu.memory_space<vmem>>, %arg10: memref<8x1xf32, #tpu.memory_space<vmem>>, %arg11: memref<302x256xbf16, #tpu.memory_space<vmem>>, %arg12: memref<1x166xf32, #tpu.memory_space<vmem>>, %arg13: memref<1x1x256xf32, #tpu.memory_space<vmem>>) attributes {dimension_semantics = [#tpu.dimension_semantics<parallel>], iteration_bounds = array<i64: 1>, scalar_prefetch = 0 : i64, scratch_operands = 0 : i64, tpu.core_type = #tpu.core_type<tc>, window_params = [{transform_indices = @transform_0, window_bounds = array<i64: 1, 197, 1352>}, {pipeline_mode = #tpu.pipeline_mode<synchronous>, transform_indices = @transform_1, window_bounds = array<i64: 16, 197>}, {pipeline_mode = #tpu.pipeline_mode<synchronous>, transform_indices = @transform_2, window_bounds = array<i64: 32, 256>}, {pipeline_mode = #tpu.pipeline_mode<synchronous>, transform_indices = @transform_3, window_bounds = array<i64: 32, 1>}, {pipeline_mode = #tpu.pipeline_mode<synchronous>, transform_indices = @transform_4, window_bounds = array<i64: 310, 392>}, {pipeline_mode = #tpu.pipeline_mode<synchronous>, transform_indices = @transform_5, window_bounds = array<i64: 332, 392>}, {pipeline_mode = #tpu.pipeline_mode<synchronous>, transform_indices = @transform_6, window_bounds = array<i64: 4, 32, 288>}, {pipeline_mode = #tpu.pipeline_mode<synchronous>, transform_indices = @transform_7, window_bounds = array<i64: 4, 32, 1>}, {pipeline_mode = #tpu.pipeline_mode<synchronous>, transform_indices = @transform_8, window_bounds = array<i64: 8, 512>}, {pipeline_mode = #tpu.pipeline_mode<synchronous>, transform_indices = @transform_9, window_bounds = array<i64: 8, 1>}, {pipeline_mode = #tpu.pipeline_mode<synchronous>, transform_indices = @transform_10, window_bounds = array<i64: 302, 256>}, {pipeline_mode = #tpu.pipeline_mode<synchronous>, transform_indices = @transform_11, window_bounds = array<i64: 1, 166>}, {transform_indices = @transform_12, window_bounds = array<i64: 1, 1, 256>}]} {
    %c0 = arith.constant 0 : index
    %c0_0 = arith.constant 0 : index
    %0 = vector.load %arg12[%c0, %c0_0] : memref<1x166xf32, #tpu.memory_space<vmem>>, vector<1x166xf32>
    %c0_1 = arith.constant 0 : index
    %c0_2 = arith.constant 0 : index
    %1 = vector.load %arg2[%c0_1, %c0_2] : memref<16x197xbf16, #tpu.memory_space<vmem>>, vector<16x197xbf16>
    %c0_3 = arith.constant 0 : index
    %c0_4 = arith.constant 0 : index
    %c0_5 = arith.constant 0 : index
    %2 = vector.load %arg1[%c0_3, %c0_4, %c0_5] : memref<1x197x1352xbf16, #tpu.memory_space<vmem>>, vector<1x197x1352xbf16>
    %3 = vector.shape_cast %2 : vector<1x197x1352xbf16> to vector<197x1352xbf16>
    %cst = arith.constant dense<0.000000e+00> : vector<16x1352xf32>
    %4 = tpu.matmul %1, %3, %cst {dimension_numbers = #tpu.dot_dimension_numbers<[1], [0], [0], [1], [0, 0, 1, 1], [], []>} : vector<16x197xbf16>, vector<197x1352xbf16>, vector<16x1352xf32> -> vector<16x1352xf32>
    %cst_6 = arith.constant 0.000000e+00 : f32
    %5 = vector.broadcast %cst_6 : f32 to vector<16x1352xf32>
    %6 = arith.cmpf oge, %4, %5 : vector<16x1352xf32>
    %cst_7 = arith.constant 2.000000e-01 : f32
    %7 = vector.broadcast %cst_7 : f32 to vector<16x1352xf32>
    %8 = arith.mulf %7, %4 : vector<16x1352xf32>
    %9 = arith.select %6, %4, %8 : vector<16x1352xi1>, vector<16x1352xf32>
    %10 = arith.truncf %9 : vector<16x1352xf32> to vector<16x1352xbf16>
    %11 = vector.extract_strided_slice %10 {offsets = [0, 0], sizes = [16, 155], strides = [1, 1]} : vector<16x1352xbf16> to vector<16x155xbf16>
    %12 = vector.extract_strided_slice %10 {offsets = [0, 676], sizes = [16, 155], strides = [1, 1]} : vector<16x1352xbf16> to vector<16x155xbf16>
    %13 = tpu.concatenate %11, %12 in 1 : vector<16x155xbf16>, vector<16x155xbf16> -> vector<16x310xbf16>
    %14 = vector.extract_strided_slice %10 {offsets = [0, 169], sizes = [16, 155], strides = [1, 1]} : vector<16x1352xbf16> to vector<16x155xbf16>
    %15 = vector.extract_strided_slice %10 {offsets = [0, 845], sizes = [16, 155], strides = [1, 1]} : vector<16x1352xbf16> to vector<16x155xbf16>
    %16 = tpu.concatenate %14, %15 in 1 : vector<16x155xbf16>, vector<16x155xbf16> -> vector<16x310xbf16>
    %17 = vector.extract_strided_slice %10 {offsets = [0, 1], sizes = [16, 155], strides = [1, 1]} : vector<16x1352xbf16> to vector<16x155xbf16>
    %18 = vector.extract_strided_slice %10 {offsets = [0, 677], sizes = [16, 155], strides = [1, 1]} : vector<16x1352xbf16> to vector<16x155xbf16>
    %19 = tpu.concatenate %17, %18 in 1 : vector<16x155xbf16>, vector<16x155xbf16> -> vector<16x310xbf16>
    %20 = vector.extract_strided_slice %10 {offsets = [0, 170], sizes = [16, 155], strides = [1, 1]} : vector<16x1352xbf16> to vector<16x155xbf16>
    %21 = vector.extract_strided_slice %10 {offsets = [0, 846], sizes = [16, 155], strides = [1, 1]} : vector<16x1352xbf16> to vector<16x155xbf16>
    %22 = tpu.concatenate %20, %21 in 1 : vector<16x155xbf16>, vector<16x155xbf16> -> vector<16x310xbf16>
    %23 = vector.extract_strided_slice %10 {offsets = [0, 338], sizes = [16, 155], strides = [1, 1]} : vector<16x1352xbf16> to vector<16x155xbf16>
    %24 = vector.extract_strided_slice %10 {offsets = [0, 1014], sizes = [16, 155], strides = [1, 1]} : vector<16x1352xbf16> to vector<16x155xbf16>
    %25 = tpu.concatenate %23, %24 in 1 : vector<16x155xbf16>, vector<16x155xbf16> -> vector<16x310xbf16>
    %26 = vector.extract_strided_slice %10 {offsets = [0, 507], sizes = [16, 155], strides = [1, 1]} : vector<16x1352xbf16> to vector<16x155xbf16>
    %27 = vector.extract_strided_slice %10 {offsets = [0, 1183], sizes = [16, 155], strides = [1, 1]} : vector<16x1352xbf16> to vector<16x155xbf16>
    %28 = tpu.concatenate %26, %27 in 1 : vector<16x155xbf16>, vector<16x155xbf16> -> vector<16x310xbf16>
    %29 = vector.extract_strided_slice %10 {offsets = [0, 339], sizes = [16, 155], strides = [1, 1]} : vector<16x1352xbf16> to vector<16x155xbf16>
    %30 = vector.extract_strided_slice %10 {offsets = [0, 1015], sizes = [16, 155], strides = [1, 1]} : vector<16x1352xbf16> to vector<16x155xbf16>
    %31 = tpu.concatenate %29, %30 in 1 : vector<16x155xbf16>, vector<16x155xbf16> -> vector<16x310xbf16>
    %32 = vector.extract_strided_slice %10 {offsets = [0, 508], sizes = [16, 155], strides = [1, 1]} : vector<16x1352xbf16> to vector<16x155xbf16>
    %33 = vector.extract_strided_slice %10 {offsets = [0, 1184], sizes = [16, 155], strides = [1, 1]} : vector<16x1352xbf16> to vector<16x155xbf16>
    %34 = tpu.concatenate %32, %33 in 1 : vector<16x155xbf16>, vector<16x155xbf16> -> vector<16x310xbf16>
    %35 = vector.extract_strided_slice %10 {offsets = [0, 13], sizes = [16, 155], strides = [1, 1]} : vector<16x1352xbf16> to vector<16x155xbf16>
    %36 = vector.extract_strided_slice %10 {offsets = [0, 689], sizes = [16, 155], strides = [1, 1]} : vector<16x1352xbf16> to vector<16x155xbf16>
    %37 = tpu.concatenate %35, %36 in 1 : vector<16x155xbf16>, vector<16x155xbf16> -> vector<16x310xbf16>
    %38 = vector.extract_strided_slice %10 {offsets = [0, 182], sizes = [16, 155], strides = [1, 1]} : vector<16x1352xbf16> to vector<16x155xbf16>
    %39 = vector.extract_strided_slice %10 {offsets = [0, 858], sizes = [16, 155], strides = [1, 1]} : vector<16x1352xbf16> to vector<16x155xbf16>
    %40 = tpu.concatenate %38, %39 in 1 : vector<16x155xbf16>, vector<16x155xbf16> -> vector<16x310xbf16>
    %41 = vector.extract_strided_slice %10 {offsets = [0, 14], sizes = [16, 155], strides = [1, 1]} : vector<16x1352xbf16> to vector<16x155xbf16>
    %42 = vector.extract_strided_slice %10 {offsets = [0, 690], sizes = [16, 155], strides = [1, 1]} : vector<16x1352xbf16> to vector<16x155xbf16>
    %43 = tpu.concatenate %41, %42 in 1 : vector<16x155xbf16>, vector<16x155xbf16> -> vector<16x310xbf16>
    %44 = vector.extract_strided_slice %10 {offsets = [0, 183], sizes = [16, 155], strides = [1, 1]} : vector<16x1352xbf16> to vector<16x155xbf16>
    %45 = vector.extract_strided_slice %10 {offsets = [0, 859], sizes = [16, 155], strides = [1, 1]} : vector<16x1352xbf16> to vector<16x155xbf16>
    %46 = tpu.concatenate %44, %45 in 1 : vector<16x155xbf16>, vector<16x155xbf16> -> vector<16x310xbf16>
    %47 = vector.extract_strided_slice %10 {offsets = [0, 351], sizes = [16, 155], strides = [1, 1]} : vector<16x1352xbf16> to vector<16x155xbf16>
    %48 = vector.extract_strided_slice %10 {offsets = [0, 1027], sizes = [16, 155], strides = [1, 1]} : vector<16x1352xbf16> to vector<16x155xbf16>
    %49 = tpu.concatenate %47, %48 in 1 : vector<16x155xbf16>, vector<16x155xbf16> -> vector<16x310xbf16>
    %50 = vector.extract_strided_slice %10 {offsets = [0, 520], sizes = [16, 155], strides = [1, 1]} : vector<16x1352xbf16> to vector<16x155xbf16>
    %51 = vector.extract_strided_slice %10 {offsets = [0, 1196], sizes = [16, 155], strides = [1, 1]} : vector<16x1352xbf16> to vector<16x155xbf16>
    %52 = tpu.concatenate %50, %51 in 1 : vector<16x155xbf16>, vector<16x155xbf16> -> vector<16x310xbf16>
    %53 = vector.extract_strided_slice %10 {offsets = [0, 352], sizes = [16, 155], strides = [1, 1]} : vector<16x1352xbf16> to vector<16x155xbf16>
    %54 = vector.extract_strided_slice %10 {offsets = [0, 1028], sizes = [16, 155], strides = [1, 1]} : vector<16x1352xbf16> to vector<16x155xbf16>
    %55 = tpu.concatenate %53, %54 in 1 : vector<16x155xbf16>, vector<16x155xbf16> -> vector<16x310xbf16>
    %56 = vector.extract_strided_slice %10 {offsets = [0, 521], sizes = [16, 155], strides = [1, 1]} : vector<16x1352xbf16> to vector<16x155xbf16>
    %57 = vector.extract_strided_slice %10 {offsets = [0, 1197], sizes = [16, 155], strides = [1, 1]} : vector<16x1352xbf16> to vector<16x155xbf16>
    %58 = tpu.concatenate %56, %57 in 1 : vector<16x155xbf16>, vector<16x155xbf16> -> vector<16x310xbf16>
    %59 = tpu.concatenate %13, %16, %19, %22, %25, %28, %31, %34, %37, %40, %43, %46, %49, %52, %55, %58 in 0 : vector<16x310xbf16>, vector<16x310xbf16>, vector<16x310xbf16>, vector<16x310xbf16>, vector<16x310xbf16>, vector<16x310xbf16>, vector<16x310xbf16>, vector<16x310xbf16>, vector<16x310xbf16>, vector<16x310xbf16>, vector<16x310xbf16>, vector<16x310xbf16>, vector<16x310xbf16>, vector<16x310xbf16>, vector<16x310xbf16>, vector<16x310xbf16> -> vector<256x310xbf16>
    %c0_8 = arith.constant 0 : index
    %c0_9 = arith.constant 0 : index
    %60 = vector.load %arg3[%c0_8, %c0_9] : memref<32x256xbf16, #tpu.memory_space<vmem>>, vector<32x256xbf16>
    %cst_10 = arith.constant dense<0.000000e+00> : vector<32x310xf32>
    %61 = tpu.matmul %60, %59, %cst_10 {dimension_numbers = #tpu.dot_dimension_numbers<[1], [0], [0], [1], [0, 0, 1, 1], [], []>} : vector<32x256xbf16>, vector<256x310xbf16>, vector<32x310xf32> -> vector<32x310xf32>
    %c0_11 = arith.constant 0 : index
    %c0_12 = arith.constant 0 : index
    %62 = vector.load %arg4[%c0_11, %c0_12] : memref<32x1xf32, #tpu.memory_space<vmem>>, vector<32x1xf32>
    %63 = vector.broadcast %62 : vector<32x1xf32> to vector<32x310xf32>
    %64 = arith.addf %61, %63 : vector<32x310xf32>
    %cst_13 = arith.constant 0.000000e+00 : f32
    %65 = vector.broadcast %cst_13 : f32 to vector<32x310xf32>
    %66 = arith.cmpf oge, %64, %65 : vector<32x310xf32>
    %cst_14 = arith.constant 2.000000e-01 : f32
    %67 = vector.broadcast %cst_14 : f32 to vector<32x310xf32>
    %68 = arith.mulf %67, %64 : vector<32x310xf32>
    %69 = arith.select %66, %64, %68 : vector<32x310xi1>, vector<32x310xf32>
    %70 = arith.truncf %69 : vector<32x310xf32> to vector<32x310xbf16>
    %c0_15 = arith.constant 0 : index
    %c0_16 = arith.constant 0 : index
    %71 = vector.load %arg5[%c0_15, %c0_16] : memref<310x392xbf16, #tpu.memory_space<vmem>>, vector<310x392xbf16>
    %cst_17 = arith.constant dense<0.000000e+00> : vector<32x392xf32>
    %72 = tpu.matmul %70, %71, %cst_17 {dimension_numbers = #tpu.dot_dimension_numbers<[1], [0], [0], [1], [0, 0, 1, 1], [], []>} : vector<32x310xbf16>, vector<310x392xbf16>, vector<32x392xf32> -> vector<32x392xf32>
    %73 = arith.truncf %72 : vector<32x392xf32> to vector<32x392xbf16>
    %74 = vector.extract_strided_slice %73 {offsets = [0, 0], sizes = [32, 166], strides = [1, 1]} : vector<32x392xbf16> to vector<32x166xbf16>
    %75 = vector.extract_strided_slice %73 {offsets = [0, 196], sizes = [32, 166], strides = [1, 1]} : vector<32x392xbf16> to vector<32x166xbf16>
    %76 = tpu.concatenate %74, %75 in 1 : vector<32x166xbf16>, vector<32x166xbf16> -> vector<32x332xbf16>
    %77 = vector.extract_strided_slice %73 {offsets = [0, 1], sizes = [32, 166], strides = [1, 1]} : vector<32x392xbf16> to vector<32x166xbf16>
    %78 = vector.extract_strided_slice %73 {offsets = [0, 197], sizes = [32, 166], strides = [1, 1]} : vector<32x392xbf16> to vector<32x166xbf16>
    %79 = tpu.concatenate %77, %78 in 1 : vector<32x166xbf16>, vector<32x166xbf16> -> vector<32x332xbf16>
    %80 = vector.extract_strided_slice %73 {offsets = [0, 2], sizes = [32, 166], strides = [1, 1]} : vector<32x392xbf16> to vector<32x166xbf16>
    %81 = vector.extract_strided_slice %73 {offsets = [0, 198], sizes = [32, 166], strides = [1, 1]} : vector<32x392xbf16> to vector<32x166xbf16>
    %82 = tpu.concatenate %80, %81 in 1 : vector<32x166xbf16>, vector<32x166xbf16> -> vector<32x332xbf16>
    %83 = vector.extract_strided_slice %73 {offsets = [0, 14], sizes = [32, 166], strides = [1, 1]} : vector<32x392xbf16> to vector<32x166xbf16>
    %84 = vector.extract_strided_slice %73 {offsets = [0, 210], sizes = [32, 166], strides = [1, 1]} : vector<32x392xbf16> to vector<32x166xbf16>
    %85 = tpu.concatenate %83, %84 in 1 : vector<32x166xbf16>, vector<32x166xbf16> -> vector<32x332xbf16>
    %86 = vector.extract_strided_slice %73 {offsets = [0, 15], sizes = [32, 166], strides = [1, 1]} : vector<32x392xbf16> to vector<32x166xbf16>
    %87 = vector.extract_strided_slice %73 {offsets = [0, 211], sizes = [32, 166], strides = [1, 1]} : vector<32x392xbf16> to vector<32x166xbf16>
    %88 = tpu.concatenate %86, %87 in 1 : vector<32x166xbf16>, vector<32x166xbf16> -> vector<32x332xbf16>
    %89 = vector.extract_strided_slice %73 {offsets = [0, 16], sizes = [32, 166], strides = [1, 1]} : vector<32x392xbf16> to vector<32x166xbf16>
    %90 = vector.extract_strided_slice %73 {offsets = [0, 212], sizes = [32, 166], strides = [1, 1]} : vector<32x392xbf16> to vector<32x166xbf16>
    %91 = tpu.concatenate %89, %90 in 1 : vector<32x166xbf16>, vector<32x166xbf16> -> vector<32x332xbf16>
    %92 = vector.extract_strided_slice %73 {offsets = [0, 28], sizes = [32, 166], strides = [1, 1]} : vector<32x392xbf16> to vector<32x166xbf16>
    %93 = vector.extract_strided_slice %73 {offsets = [0, 224], sizes = [32, 166], strides = [1, 1]} : vector<32x392xbf16> to vector<32x166xbf16>
    %94 = tpu.concatenate %92, %93 in 1 : vector<32x166xbf16>, vector<32x166xbf16> -> vector<32x332xbf16>
    %95 = vector.extract_strided_slice %73 {offsets = [0, 29], sizes = [32, 166], strides = [1, 1]} : vector<32x392xbf16> to vector<32x166xbf16>
    %96 = vector.extract_strided_slice %73 {offsets = [0, 225], sizes = [32, 166], strides = [1, 1]} : vector<32x392xbf16> to vector<32x166xbf16>
    %97 = tpu.concatenate %95, %96 in 1 : vector<32x166xbf16>, vector<32x166xbf16> -> vector<32x332xbf16>
    %98 = vector.extract_strided_slice %73 {offsets = [0, 30], sizes = [32, 166], strides = [1, 1]} : vector<32x392xbf16> to vector<32x166xbf16>
    %99 = vector.extract_strided_slice %73 {offsets = [0, 226], sizes = [32, 166], strides = [1, 1]} : vector<32x392xbf16> to vector<32x166xbf16>
    %100 = tpu.concatenate %98, %99 in 1 : vector<32x166xbf16>, vector<32x166xbf16> -> vector<32x332xbf16>
    %101 = tpu.concatenate %76, %79, %82, %85, %88, %91, %94, %97, %100 in 0 : vector<32x332xbf16>, vector<32x332xbf16>, vector<32x332xbf16>, vector<32x332xbf16>, vector<32x332xbf16>, vector<32x332xbf16>, vector<32x332xbf16>, vector<32x332xbf16>, vector<32x332xbf16> -> vector<288x332xbf16>
    %c0_18 = arith.constant 0 : index
    %c0_19 = arith.constant 0 : index
    %c0_20 = arith.constant 0 : index
    %102 = vector.load %arg7[%c0_18, %c0_19, %c0_20] : memref<4x32x288xbf16, #tpu.memory_space<vmem>>, vector<1x32x288xbf16>
    %103 = vector.shape_cast %102 : vector<1x32x288xbf16> to vector<32x288xbf16>
    %cst_21 = arith.constant dense<0.000000e+00> : vector<32x332xf32>
    %104 = tpu.matmul %103, %101, %cst_21 {dimension_numbers = #tpu.dot_dimension_numbers<[1], [0], [0], [1], [0, 0, 1, 1], [], []>} : vector<32x288xbf16>, vector<288x332xbf16>, vector<32x332xf32> -> vector<32x332xf32>
    %c0_22 = arith.constant 0 : index
    %c0_23 = arith.constant 0 : index
    %c0_24 = arith.constant 0 : index
    %105 = vector.load %arg8[%c0_22, %c0_23, %c0_24] : memref<4x32x1xf32, #tpu.memory_space<vmem>>, vector<1x32x1xf32>
    %106 = vector.shape_cast %105 : vector<1x32x1xf32> to vector<32x1xf32>
    %107 = vector.broadcast %106 : vector<32x1xf32> to vector<32x332xf32>
    %108 = arith.addf %104, %107 : vector<32x332xf32>
    %109 = vector.extract_strided_slice %108 {offsets = [0, 0], sizes = [32, 166], strides = [1, 1]} : vector<32x332xf32> to vector<32x166xf32>
    %110 = vector.broadcast %0 : vector<1x166xf32> to vector<32x166xf32>
    %111 = arith.mulf %109, %110 : vector<32x166xf32>
    %cst_25 = arith.constant dense<0.000000e+00> : vector<32xf32>
    %112 = vector.multi_reduction <add>, %111, %cst_25 [1] : vector<32x166xf32> to vector<32xf32>
    %113 = vector.shape_cast %112 : vector<32xf32> to vector<32x1xf32>
    %cst_26 = arith.constant 0.0069444445 : f32
    %114 = vector.broadcast %cst_26 : f32 to vector<32x1xf32>
    %115 = arith.mulf %113, %114 : vector<32x1xf32>
    %116 = vector.broadcast %115 : vector<32x1xf32> to vector<32x166xf32>
    %117 = arith.subf %109, %116 : vector<32x166xf32>
    %118 = vector.broadcast %0 : vector<1x166xf32> to vector<32x166xf32>
    %119 = arith.mulf %117, %118 : vector<32x166xf32>
    %120 = arith.mulf %119, %119 : vector<32x166xf32>
    %cst_27 = arith.constant dense<0.000000e+00> : vector<32xf32>
    %121 = vector.multi_reduction <add>, %120, %cst_27 [1] : vector<32x166xf32> to vector<32xf32>
    %122 = vector.shape_cast %121 : vector<32xf32> to vector<32x1xf32>
    %cst_28 = arith.constant 0.0069444445 : f32
    %123 = vector.broadcast %cst_28 : f32 to vector<32x1xf32>
    %124 = arith.mulf %122, %123 : vector<32x1xf32>
    %cst_29 = arith.constant 9.99999974E-6 : f32
    %125 = vector.broadcast %cst_29 : f32 to vector<32x1xf32>
    %126 = arith.addf %124, %125 : vector<32x1xf32>
    %127 = math.rsqrt %126 : vector<32x1xf32>
    %128 = vector.broadcast %127 : vector<32x1xf32> to vector<32x166xf32>
    %129 = arith.mulf %119, %128 : vector<32x166xf32>
    %130 = vector.extract_strided_slice %108 {offsets = [0, 166], sizes = [32, 166], strides = [1, 1]} : vector<32x332xf32> to vector<32x166xf32>
    %131 = vector.broadcast %0 : vector<1x166xf32> to vector<32x166xf32>
    %132 = arith.mulf %130, %131 : vector<32x166xf32>
    %cst_30 = arith.constant dense<0.000000e+00> : vector<32xf32>
    %133 = vector.multi_reduction <add>, %132, %cst_30 [1] : vector<32x166xf32> to vector<32xf32>
    %134 = vector.shape_cast %133 : vector<32xf32> to vector<32x1xf32>
    %cst_31 = arith.constant 0.0069444445 : f32
    %135 = vector.broadcast %cst_31 : f32 to vector<32x1xf32>
    %136 = arith.mulf %134, %135 : vector<32x1xf32>
    %137 = vector.broadcast %136 : vector<32x1xf32> to vector<32x166xf32>
    %138 = arith.subf %130, %137 : vector<32x166xf32>
    %139 = vector.broadcast %0 : vector<1x166xf32> to vector<32x166xf32>
    %140 = arith.mulf %138, %139 : vector<32x166xf32>
    %141 = arith.mulf %140, %140 : vector<32x166xf32>
    %cst_32 = arith.constant dense<0.000000e+00> : vector<32xf32>
    %142 = vector.multi_reduction <add>, %141, %cst_32 [1] : vector<32x166xf32> to vector<32xf32>
    %143 = vector.shape_cast %142 : vector<32xf32> to vector<32x1xf32>
    %cst_33 = arith.constant 0.0069444445 : f32
    %144 = vector.broadcast %cst_33 : f32 to vector<32x1xf32>
    %145 = arith.mulf %143, %144 : vector<32x1xf32>
    %cst_34 = arith.constant 9.99999974E-6 : f32
    %146 = vector.broadcast %cst_34 : f32 to vector<32x1xf32>
    %147 = arith.addf %145, %146 : vector<32x1xf32>
    %148 = math.rsqrt %147 : vector<32x1xf32>
    %149 = vector.broadcast %148 : vector<32x1xf32> to vector<32x166xf32>
    %150 = arith.mulf %140, %149 : vector<32x166xf32>
    %151 = tpu.concatenate %129, %150 in 1 : vector<32x166xf32>, vector<32x166xf32> -> vector<32x332xf32>
    %cst_35 = arith.constant 0.000000e+00 : f32
    %152 = vector.broadcast %cst_35 : f32 to vector<32x332xf32>
    %153 = arith.cmpf oge, %151, %152 : vector<32x332xf32>
    %cst_36 = arith.constant 2.000000e-01 : f32
    %154 = vector.broadcast %cst_36 : f32 to vector<32x332xf32>
    %155 = arith.mulf %154, %151 : vector<32x332xf32>
    %156 = arith.select %153, %151, %155 : vector<32x332xi1>, vector<32x332xf32>
    %157 = arith.truncf %156 : vector<32x332xf32> to vector<32x332xbf16>
    %c0_37 = arith.constant 0 : index
    %c0_38 = arith.constant 0 : index
    %158 = vector.load %arg6[%c0_37, %c0_38] : memref<332x392xbf16, #tpu.memory_space<vmem>>, vector<332x392xbf16>
    %cst_39 = arith.constant dense<0.000000e+00> : vector<32x392xf32>
    %159 = tpu.matmul %157, %158, %cst_39 {dimension_numbers = #tpu.dot_dimension_numbers<[1], [0], [0], [1], [0, 0, 1, 1], [], []>} : vector<32x332xbf16>, vector<332x392xbf16>, vector<32x392xf32> -> vector<32x392xf32>
    %160 = arith.truncf %159 : vector<32x392xf32> to vector<32x392xbf16>
    %161 = vector.extract_strided_slice %160 {offsets = [0, 0], sizes = [32, 166], strides = [1, 1]} : vector<32x392xbf16> to vector<32x166xbf16>
    %162 = vector.extract_strided_slice %160 {offsets = [0, 196], sizes = [32, 166], strides = [1, 1]} : vector<32x392xbf16> to vector<32x166xbf16>
    %163 = tpu.concatenate %161, %162 in 1 : vector<32x166xbf16>, vector<32x166xbf16> -> vector<32x332xbf16>
    %164 = vector.extract_strided_slice %160 {offsets = [0, 1], sizes = [32, 166], strides = [1, 1]} : vector<32x392xbf16> to vector<32x166xbf16>
    %165 = vector.extract_strided_slice %160 {offsets = [0, 197], sizes = [32, 166], strides = [1, 1]} : vector<32x392xbf16> to vector<32x166xbf16>
    %166 = tpu.concatenate %164, %165 in 1 : vector<32x166xbf16>, vector<32x166xbf16> -> vector<32x332xbf16>
    %167 = vector.extract_strided_slice %160 {offsets = [0, 2], sizes = [32, 166], strides = [1, 1]} : vector<32x392xbf16> to vector<32x166xbf16>
    %168 = vector.extract_strided_slice %160 {offsets = [0, 198], sizes = [32, 166], strides = [1, 1]} : vector<32x392xbf16> to vector<32x166xbf16>
    %169 = tpu.concatenate %167, %168 in 1 : vector<32x166xbf16>, vector<32x166xbf16> -> vector<32x332xbf16>
    %170 = vector.extract_strided_slice %160 {offsets = [0, 14], sizes = [32, 166], strides = [1, 1]} : vector<32x392xbf16> to vector<32x166xbf16>
    %171 = vector.extract_strided_slice %160 {offsets = [0, 210], sizes = [32, 166], strides = [1, 1]} : vector<32x392xbf16> to vector<32x166xbf16>
    %172 = tpu.concatenate %170, %171 in 1 : vector<32x166xbf16>, vector<32x166xbf16> -> vector<32x332xbf16>
    %173 = vector.extract_strided_slice %160 {offsets = [0, 15], sizes = [32, 166], strides = [1, 1]} : vector<32x392xbf16> to vector<32x166xbf16>
    %174 = vector.extract_strided_slice %160 {offsets = [0, 211], sizes = [32, 166], strides = [1, 1]} : vector<32x392xbf16> to vector<32x166xbf16>
    %175 = tpu.concatenate %173, %174 in 1 : vector<32x166xbf16>, vector<32x166xbf16> -> vector<32x332xbf16>
    %176 = vector.extract_strided_slice %160 {offsets = [0, 16], sizes = [32, 166], strides = [1, 1]} : vector<32x392xbf16> to vector<32x166xbf16>
    %177 = vector.extract_strided_slice %160 {offsets = [0, 212], sizes = [32, 166], strides = [1, 1]} : vector<32x392xbf16> to vector<32x166xbf16>
    %178 = tpu.concatenate %176, %177 in 1 : vector<32x166xbf16>, vector<32x166xbf16> -> vector<32x332xbf16>
    %179 = vector.extract_strided_slice %160 {offsets = [0, 28], sizes = [32, 166], strides = [1, 1]} : vector<32x392xbf16> to vector<32x166xbf16>
    %180 = vector.extract_strided_slice %160 {offsets = [0, 224], sizes = [32, 166], strides = [1, 1]} : vector<32x392xbf16> to vector<32x166xbf16>
    %181 = tpu.concatenate %179, %180 in 1 : vector<32x166xbf16>, vector<32x166xbf16> -> vector<32x332xbf16>
    %182 = vector.extract_strided_slice %160 {offsets = [0, 29], sizes = [32, 166], strides = [1, 1]} : vector<32x392xbf16> to vector<32x166xbf16>
    %183 = vector.extract_strided_slice %160 {offsets = [0, 225], sizes = [32, 166], strides = [1, 1]} : vector<32x392xbf16> to vector<32x166xbf16>
    %184 = tpu.concatenate %182, %183 in 1 : vector<32x166xbf16>, vector<32x166xbf16> -> vector<32x332xbf16>
    %185 = vector.extract_strided_slice %160 {offsets = [0, 30], sizes = [32, 166], strides = [1, 1]} : vector<32x392xbf16> to vector<32x166xbf16>
    %186 = vector.extract_strided_slice %160 {offsets = [0, 226], sizes = [32, 166], strides = [1, 1]} : vector<32x392xbf16> to vector<32x166xbf16>
    %187 = tpu.concatenate %185, %186 in 1 : vector<32x166xbf16>, vector<32x166xbf16> -> vector<32x332xbf16>
    %188 = tpu.concatenate %163, %166, %169, %172, %175, %178, %181, %184, %187 in 0 : vector<32x332xbf16>, vector<32x332xbf16>, vector<32x332xbf16>, vector<32x332xbf16>, vector<32x332xbf16>, vector<32x332xbf16>, vector<32x332xbf16>, vector<32x332xbf16>, vector<32x332xbf16> -> vector<288x332xbf16>
    %c1 = arith.constant 1 : index
    %c0_40 = arith.constant 0 : index
    %c0_41 = arith.constant 0 : index
    %189 = vector.load %arg7[%c1, %c0_40, %c0_41] : memref<4x32x288xbf16, #tpu.memory_space<vmem>>, vector<1x32x288xbf16>
    %190 = vector.shape_cast %189 : vector<1x32x288xbf16> to vector<32x288xbf16>
    %cst_42 = arith.constant dense<0.000000e+00> : vector<32x332xf32>
    %191 = tpu.matmul %190, %188, %cst_42 {dimension_numbers = #tpu.dot_dimension_numbers<[1], [0], [0], [1], [0, 0, 1, 1], [], []>} : vector<32x288xbf16>, vector<288x332xbf16>, vector<32x332xf32> -> vector<32x332xf32>
    %c1_43 = arith.constant 1 : index
    %c0_44 = arith.constant 0 : index
    %c0_45 = arith.constant 0 : index
    %192 = vector.load %arg8[%c1_43, %c0_44, %c0_45] : memref<4x32x1xf32, #tpu.memory_space<vmem>>, vector<1x32x1xf32>
    %193 = vector.shape_cast %192 : vector<1x32x1xf32> to vector<32x1xf32>
    %194 = vector.broadcast %193 : vector<32x1xf32> to vector<32x332xf32>
    %195 = arith.addf %191, %194 : vector<32x332xf32>
    %196 = vector.extract_strided_slice %195 {offsets = [0, 0], sizes = [32, 166], strides = [1, 1]} : vector<32x332xf32> to vector<32x166xf32>
    %197 = vector.broadcast %0 : vector<1x166xf32> to vector<32x166xf32>
    %198 = arith.mulf %196, %197 : vector<32x166xf32>
    %cst_46 = arith.constant dense<0.000000e+00> : vector<32xf32>
    %199 = vector.multi_reduction <add>, %198, %cst_46 [1] : vector<32x166xf32> to vector<32xf32>
    %200 = vector.shape_cast %199 : vector<32xf32> to vector<32x1xf32>
    %cst_47 = arith.constant 0.0069444445 : f32
    %201 = vector.broadcast %cst_47 : f32 to vector<32x1xf32>
    %202 = arith.mulf %200, %201 : vector<32x1xf32>
    %203 = vector.broadcast %202 : vector<32x1xf32> to vector<32x166xf32>
    %204 = arith.subf %196, %203 : vector<32x166xf32>
    %205 = vector.broadcast %0 : vector<1x166xf32> to vector<32x166xf32>
    %206 = arith.mulf %204, %205 : vector<32x166xf32>
    %207 = arith.mulf %206, %206 : vector<32x166xf32>
    %cst_48 = arith.constant dense<0.000000e+00> : vector<32xf32>
    %208 = vector.multi_reduction <add>, %207, %cst_48 [1] : vector<32x166xf32> to vector<32xf32>
    %209 = vector.shape_cast %208 : vector<32xf32> to vector<32x1xf32>
    %cst_49 = arith.constant 0.0069444445 : f32
    %210 = vector.broadcast %cst_49 : f32 to vector<32x1xf32>
    %211 = arith.mulf %209, %210 : vector<32x1xf32>
    %cst_50 = arith.constant 9.99999974E-6 : f32
    %212 = vector.broadcast %cst_50 : f32 to vector<32x1xf32>
    %213 = arith.addf %211, %212 : vector<32x1xf32>
    %214 = math.rsqrt %213 : vector<32x1xf32>
    %215 = vector.broadcast %214 : vector<32x1xf32> to vector<32x166xf32>
    %216 = arith.mulf %206, %215 : vector<32x166xf32>
    %217 = vector.extract_strided_slice %195 {offsets = [0, 166], sizes = [32, 166], strides = [1, 1]} : vector<32x332xf32> to vector<32x166xf32>
    %218 = vector.broadcast %0 : vector<1x166xf32> to vector<32x166xf32>
    %219 = arith.mulf %217, %218 : vector<32x166xf32>
    %cst_51 = arith.constant dense<0.000000e+00> : vector<32xf32>
    %220 = vector.multi_reduction <add>, %219, %cst_51 [1] : vector<32x166xf32> to vector<32xf32>
    %221 = vector.shape_cast %220 : vector<32xf32> to vector<32x1xf32>
    %cst_52 = arith.constant 0.0069444445 : f32
    %222 = vector.broadcast %cst_52 : f32 to vector<32x1xf32>
    %223 = arith.mulf %221, %222 : vector<32x1xf32>
    %224 = vector.broadcast %223 : vector<32x1xf32> to vector<32x166xf32>
    %225 = arith.subf %217, %224 : vector<32x166xf32>
    %226 = vector.broadcast %0 : vector<1x166xf32> to vector<32x166xf32>
    %227 = arith.mulf %225, %226 : vector<32x166xf32>
    %228 = arith.mulf %227, %227 : vector<32x166xf32>
    %cst_53 = arith.constant dense<0.000000e+00> : vector<32xf32>
    %229 = vector.multi_reduction <add>, %228, %cst_53 [1] : vector<32x166xf32> to vector<32xf32>
    %230 = vector.shape_cast %229 : vector<32xf32> to vector<32x1xf32>
    %cst_54 = arith.constant 0.0069444445 : f32
    %231 = vector.broadcast %cst_54 : f32 to vector<32x1xf32>
    %232 = arith.mulf %230, %231 : vector<32x1xf32>
    %cst_55 = arith.constant 9.99999974E-6 : f32
    %233 = vector.broadcast %cst_55 : f32 to vector<32x1xf32>
    %234 = arith.addf %232, %233 : vector<32x1xf32>
    %235 = math.rsqrt %234 : vector<32x1xf32>
    %236 = vector.broadcast %235 : vector<32x1xf32> to vector<32x166xf32>
    %237 = arith.mulf %227, %236 : vector<32x166xf32>
    %238 = tpu.concatenate %216, %237 in 1 : vector<32x166xf32>, vector<32x166xf32> -> vector<32x332xf32>
    %239 = vector.extract_strided_slice %72 {offsets = [0, 15], sizes = [32, 166], strides = [1, 1]} : vector<32x392xf32> to vector<32x166xf32>
    %240 = vector.extract_strided_slice %72 {offsets = [0, 211], sizes = [32, 166], strides = [1, 1]} : vector<32x392xf32> to vector<32x166xf32>
    %241 = tpu.concatenate %239, %240 in 1 : vector<32x166xf32>, vector<32x166xf32> -> vector<32x332xf32>
    %242 = arith.addf %238, %241 : vector<32x332xf32>
    %cst_56 = arith.constant 0.000000e+00 : f32
    %243 = vector.broadcast %cst_56 : f32 to vector<32x332xf32>
    %244 = arith.cmpf oge, %242, %243 : vector<32x332xf32>
    %cst_57 = arith.constant 2.000000e-01 : f32
    %245 = vector.broadcast %cst_57 : f32 to vector<32x332xf32>
    %246 = arith.mulf %245, %242 : vector<32x332xf32>
    %247 = arith.select %244, %242, %246 : vector<32x332xi1>, vector<32x332xf32>
    %248 = arith.truncf %247 : vector<32x332xf32> to vector<32x332xbf16>
    %c0_58 = arith.constant 0 : index
    %c0_59 = arith.constant 0 : index
    %249 = vector.load %arg6[%c0_58, %c0_59] : memref<332x392xbf16, #tpu.memory_space<vmem>>, vector<332x392xbf16>
    %cst_60 = arith.constant dense<0.000000e+00> : vector<32x392xf32>
    %250 = tpu.matmul %248, %249, %cst_60 {dimension_numbers = #tpu.dot_dimension_numbers<[1], [0], [0], [1], [0, 0, 1, 1], [], []>} : vector<32x332xbf16>, vector<332x392xbf16>, vector<32x392xf32> -> vector<32x392xf32>
    %251 = arith.truncf %250 : vector<32x392xf32> to vector<32x392xbf16>
    %252 = vector.extract_strided_slice %251 {offsets = [0, 0], sizes = [32, 166], strides = [1, 1]} : vector<32x392xbf16> to vector<32x166xbf16>
    %253 = vector.extract_strided_slice %251 {offsets = [0, 196], sizes = [32, 166], strides = [1, 1]} : vector<32x392xbf16> to vector<32x166xbf16>
    %254 = tpu.concatenate %252, %253 in 1 : vector<32x166xbf16>, vector<32x166xbf16> -> vector<32x332xbf16>
    %255 = vector.extract_strided_slice %251 {offsets = [0, 1], sizes = [32, 166], strides = [1, 1]} : vector<32x392xbf16> to vector<32x166xbf16>
    %256 = vector.extract_strided_slice %251 {offsets = [0, 197], sizes = [32, 166], strides = [1, 1]} : vector<32x392xbf16> to vector<32x166xbf16>
    %257 = tpu.concatenate %255, %256 in 1 : vector<32x166xbf16>, vector<32x166xbf16> -> vector<32x332xbf16>
    %258 = vector.extract_strided_slice %251 {offsets = [0, 2], sizes = [32, 166], strides = [1, 1]} : vector<32x392xbf16> to vector<32x166xbf16>
    %259 = vector.extract_strided_slice %251 {offsets = [0, 198], sizes = [32, 166], strides = [1, 1]} : vector<32x392xbf16> to vector<32x166xbf16>
    %260 = tpu.concatenate %258, %259 in 1 : vector<32x166xbf16>, vector<32x166xbf16> -> vector<32x332xbf16>
    %261 = vector.extract_strided_slice %251 {offsets = [0, 14], sizes = [32, 166], strides = [1, 1]} : vector<32x392xbf16> to vector<32x166xbf16>
    %262 = vector.extract_strided_slice %251 {offsets = [0, 210], sizes = [32, 166], strides = [1, 1]} : vector<32x392xbf16> to vector<32x166xbf16>
    %263 = tpu.concatenate %261, %262 in 1 : vector<32x166xbf16>, vector<32x166xbf16> -> vector<32x332xbf16>
    %264 = vector.extract_strided_slice %251 {offsets = [0, 15], sizes = [32, 166], strides = [1, 1]} : vector<32x392xbf16> to vector<32x166xbf16>
    %265 = vector.extract_strided_slice %251 {offsets = [0, 211], sizes = [32, 166], strides = [1, 1]} : vector<32x392xbf16> to vector<32x166xbf16>
    %266 = tpu.concatenate %264, %265 in 1 : vector<32x166xbf16>, vector<32x166xbf16> -> vector<32x332xbf16>
    %267 = vector.extract_strided_slice %251 {offsets = [0, 16], sizes = [32, 166], strides = [1, 1]} : vector<32x392xbf16> to vector<32x166xbf16>
    %268 = vector.extract_strided_slice %251 {offsets = [0, 212], sizes = [32, 166], strides = [1, 1]} : vector<32x392xbf16> to vector<32x166xbf16>
    %269 = tpu.concatenate %267, %268 in 1 : vector<32x166xbf16>, vector<32x166xbf16> -> vector<32x332xbf16>
    %270 = vector.extract_strided_slice %251 {offsets = [0, 28], sizes = [32, 166], strides = [1, 1]} : vector<32x392xbf16> to vector<32x166xbf16>
    %271 = vector.extract_strided_slice %251 {offsets = [0, 224], sizes = [32, 166], strides = [1, 1]} : vector<32x392xbf16> to vector<32x166xbf16>
    %272 = tpu.concatenate %270, %271 in 1 : vector<32x166xbf16>, vector<32x166xbf16> -> vector<32x332xbf16>
    %273 = vector.extract_strided_slice %251 {offsets = [0, 29], sizes = [32, 166], strides = [1, 1]} : vector<32x392xbf16> to vector<32x166xbf16>
    %274 = vector.extract_strided_slice %251 {offsets = [0, 225], sizes = [32, 166], strides = [1, 1]} : vector<32x392xbf16> to vector<32x166xbf16>
    %275 = tpu.concatenate %273, %274 in 1 : vector<32x166xbf16>, vector<32x166xbf16> -> vector<32x332xbf16>
    %276 = vector.extract_strided_slice %251 {offsets = [0, 30], sizes = [32, 166], strides = [1, 1]} : vector<32x392xbf16> to vector<32x166xbf16>
    %277 = vector.extract_strided_slice %251 {offsets = [0, 226], sizes = [32, 166], strides = [1, 1]} : vector<32x392xbf16> to vector<32x166xbf16>
    %278 = tpu.concatenate %276, %277 in 1 : vector<32x166xbf16>, vector<32x166xbf16> -> vector<32x332xbf16>
    %279 = tpu.concatenate %254, %257, %260, %263, %266, %269, %272, %275, %278 in 0 : vector<32x332xbf16>, vector<32x332xbf16>, vector<32x332xbf16>, vector<32x332xbf16>, vector<32x332xbf16>, vector<32x332xbf16>, vector<32x332xbf16>, vector<32x332xbf16>, vector<32x332xbf16> -> vector<288x332xbf16>
    %c2 = arith.constant 2 : index
    %c0_61 = arith.constant 0 : index
    %c0_62 = arith.constant 0 : index
    %280 = vector.load %arg7[%c2, %c0_61, %c0_62] : memref<4x32x288xbf16, #tpu.memory_space<vmem>>, vector<1x32x288xbf16>
    %281 = vector.shape_cast %280 : vector<1x32x288xbf16> to vector<32x288xbf16>
    %cst_63 = arith.constant dense<0.000000e+00> : vector<32x332xf32>
    %282 = tpu.matmul %281, %279, %cst_63 {dimension_numbers = #tpu.dot_dimension_numbers<[1], [0], [0], [1], [0, 0, 1, 1], [], []>} : vector<32x288xbf16>, vector<288x332xbf16>, vector<32x332xf32> -> vector<32x332xf32>
    %c2_64 = arith.constant 2 : index
    %c0_65 = arith.constant 0 : index
    %c0_66 = arith.constant 0 : index
    %283 = vector.load %arg8[%c2_64, %c0_65, %c0_66] : memref<4x32x1xf32, #tpu.memory_space<vmem>>, vector<1x32x1xf32>
    %284 = vector.shape_cast %283 : vector<1x32x1xf32> to vector<32x1xf32>
    %285 = vector.broadcast %284 : vector<32x1xf32> to vector<32x332xf32>
    %286 = arith.addf %282, %285 : vector<32x332xf32>
    %287 = vector.extract_strided_slice %286 {offsets = [0, 0], sizes = [32, 166], strides = [1, 1]} : vector<32x332xf32> to vector<32x166xf32>
    %288 = vector.broadcast %0 : vector<1x166xf32> to vector<32x166xf32>
    %289 = arith.mulf %287, %288 : vector<32x166xf32>
    %cst_67 = arith.constant dense<0.000000e+00> : vector<32xf32>
    %290 = vector.multi_reduction <add>, %289, %cst_67 [1] : vector<32x166xf32> to vector<32xf32>
    %291 = vector.shape_cast %290 : vector<32xf32> to vector<32x1xf32>
    %cst_68 = arith.constant 0.0069444445 : f32
    %292 = vector.broadcast %cst_68 : f32 to vector<32x1xf32>
    %293 = arith.mulf %291, %292 : vector<32x1xf32>
    %294 = vector.broadcast %293 : vector<32x1xf32> to vector<32x166xf32>
    %295 = arith.subf %287, %294 : vector<32x166xf32>
    %296 = vector.broadcast %0 : vector<1x166xf32> to vector<32x166xf32>
    %297 = arith.mulf %295, %296 : vector<32x166xf32>
    %298 = arith.mulf %297, %297 : vector<32x166xf32>
    %cst_69 = arith.constant dense<0.000000e+00> : vector<32xf32>
    %299 = vector.multi_reduction <add>, %298, %cst_69 [1] : vector<32x166xf32> to vector<32xf32>
    %300 = vector.shape_cast %299 : vector<32xf32> to vector<32x1xf32>
    %cst_70 = arith.constant 0.0069444445 : f32
    %301 = vector.broadcast %cst_70 : f32 to vector<32x1xf32>
    %302 = arith.mulf %300, %301 : vector<32x1xf32>
    %cst_71 = arith.constant 9.99999974E-6 : f32
    %303 = vector.broadcast %cst_71 : f32 to vector<32x1xf32>
    %304 = arith.addf %302, %303 : vector<32x1xf32>
    %305 = math.rsqrt %304 : vector<32x1xf32>
    %306 = vector.broadcast %305 : vector<32x1xf32> to vector<32x166xf32>
    %307 = arith.mulf %297, %306 : vector<32x166xf32>
    %308 = vector.extract_strided_slice %286 {offsets = [0, 166], sizes = [32, 166], strides = [1, 1]} : vector<32x332xf32> to vector<32x166xf32>
    %309 = vector.broadcast %0 : vector<1x166xf32> to vector<32x166xf32>
    %310 = arith.mulf %308, %309 : vector<32x166xf32>
    %cst_72 = arith.constant dense<0.000000e+00> : vector<32xf32>
    %311 = vector.multi_reduction <add>, %310, %cst_72 [1] : vector<32x166xf32> to vector<32xf32>
    %312 = vector.shape_cast %311 : vector<32xf32> to vector<32x1xf32>
    %cst_73 = arith.constant 0.0069444445 : f32
    %313 = vector.broadcast %cst_73 : f32 to vector<32x1xf32>
    %314 = arith.mulf %312, %313 : vector<32x1xf32>
    %315 = vector.broadcast %314 : vector<32x1xf32> to vector<32x166xf32>
    %316 = arith.subf %308, %315 : vector<32x166xf32>
    %317 = vector.broadcast %0 : vector<1x166xf32> to vector<32x166xf32>
    %318 = arith.mulf %316, %317 : vector<32x166xf32>
    %319 = arith.mulf %318, %318 : vector<32x166xf32>
    %cst_74 = arith.constant dense<0.000000e+00> : vector<32xf32>
    %320 = vector.multi_reduction <add>, %319, %cst_74 [1] : vector<32x166xf32> to vector<32xf32>
    %321 = vector.shape_cast %320 : vector<32xf32> to vector<32x1xf32>
    %cst_75 = arith.constant 0.0069444445 : f32
    %322 = vector.broadcast %cst_75 : f32 to vector<32x1xf32>
    %323 = arith.mulf %321, %322 : vector<32x1xf32>
    %cst_76 = arith.constant 9.99999974E-6 : f32
    %324 = vector.broadcast %cst_76 : f32 to vector<32x1xf32>
    %325 = arith.addf %323, %324 : vector<32x1xf32>
    %326 = math.rsqrt %325 : vector<32x1xf32>
    %327 = vector.broadcast %326 : vector<32x1xf32> to vector<32x166xf32>
    %328 = arith.mulf %318, %327 : vector<32x166xf32>
    %329 = tpu.concatenate %307, %328 in 1 : vector<32x166xf32>, vector<32x166xf32> -> vector<32x332xf32>
    %cst_77 = arith.constant 0.000000e+00 : f32
    %330 = vector.broadcast %cst_77 : f32 to vector<32x332xf32>
    %331 = arith.cmpf oge, %329, %330 : vector<32x332xf32>
    %cst_78 = arith.constant 2.000000e-01 : f32
    %332 = vector.broadcast %cst_78 : f32 to vector<32x332xf32>
    %333 = arith.mulf %332, %329 : vector<32x332xf32>
    %334 = arith.select %331, %329, %333 : vector<32x332xi1>, vector<32x332xf32>
    %335 = arith.truncf %334 : vector<32x332xf32> to vector<32x332xbf16>
    %c0_79 = arith.constant 0 : index
    %c0_80 = arith.constant 0 : index
    %336 = vector.load %arg6[%c0_79, %c0_80] : memref<332x392xbf16, #tpu.memory_space<vmem>>, vector<332x392xbf16>
    %cst_81 = arith.constant dense<0.000000e+00> : vector<32x392xf32>
    %337 = tpu.matmul %335, %336, %cst_81 {dimension_numbers = #tpu.dot_dimension_numbers<[1], [0], [0], [1], [0, 0, 1, 1], [], []>} : vector<32x332xbf16>, vector<332x392xbf16>, vector<32x392xf32> -> vector<32x392xf32>
    %338 = arith.truncf %337 : vector<32x392xf32> to vector<32x392xbf16>
    %339 = vector.extract_strided_slice %338 {offsets = [0, 0], sizes = [32, 166], strides = [1, 1]} : vector<32x392xbf16> to vector<32x166xbf16>
    %340 = vector.extract_strided_slice %338 {offsets = [0, 196], sizes = [32, 166], strides = [1, 1]} : vector<32x392xbf16> to vector<32x166xbf16>
    %341 = tpu.concatenate %339, %340 in 1 : vector<32x166xbf16>, vector<32x166xbf16> -> vector<32x332xbf16>
    %342 = vector.extract_strided_slice %338 {offsets = [0, 1], sizes = [32, 166], strides = [1, 1]} : vector<32x392xbf16> to vector<32x166xbf16>
    %343 = vector.extract_strided_slice %338 {offsets = [0, 197], sizes = [32, 166], strides = [1, 1]} : vector<32x392xbf16> to vector<32x166xbf16>
    %344 = tpu.concatenate %342, %343 in 1 : vector<32x166xbf16>, vector<32x166xbf16> -> vector<32x332xbf16>
    %345 = vector.extract_strided_slice %338 {offsets = [0, 2], sizes = [32, 166], strides = [1, 1]} : vector<32x392xbf16> to vector<32x166xbf16>
    %346 = vector.extract_strided_slice %338 {offsets = [0, 198], sizes = [32, 166], strides = [1, 1]} : vector<32x392xbf16> to vector<32x166xbf16>
    %347 = tpu.concatenate %345, %346 in 1 : vector<32x166xbf16>, vector<32x166xbf16> -> vector<32x332xbf16>
    %348 = vector.extract_strided_slice %338 {offsets = [0, 14], sizes = [32, 166], strides = [1, 1]} : vector<32x392xbf16> to vector<32x166xbf16>
    %349 = vector.extract_strided_slice %338 {offsets = [0, 210], sizes = [32, 166], strides = [1, 1]} : vector<32x392xbf16> to vector<32x166xbf16>
    %350 = tpu.concatenate %348, %349 in 1 : vector<32x166xbf16>, vector<32x166xbf16> -> vector<32x332xbf16>
    %351 = vector.extract_strided_slice %338 {offsets = [0, 15], sizes = [32, 166], strides = [1, 1]} : vector<32x392xbf16> to vector<32x166xbf16>
    %352 = vector.extract_strided_slice %338 {offsets = [0, 211], sizes = [32, 166], strides = [1, 1]} : vector<32x392xbf16> to vector<32x166xbf16>
    %353 = tpu.concatenate %351, %352 in 1 : vector<32x166xbf16>, vector<32x166xbf16> -> vector<32x332xbf16>
    %354 = vector.extract_strided_slice %338 {offsets = [0, 16], sizes = [32, 166], strides = [1, 1]} : vector<32x392xbf16> to vector<32x166xbf16>
    %355 = vector.extract_strided_slice %338 {offsets = [0, 212], sizes = [32, 166], strides = [1, 1]} : vector<32x392xbf16> to vector<32x166xbf16>
    %356 = tpu.concatenate %354, %355 in 1 : vector<32x166xbf16>, vector<32x166xbf16> -> vector<32x332xbf16>
    %357 = vector.extract_strided_slice %338 {offsets = [0, 28], sizes = [32, 166], strides = [1, 1]} : vector<32x392xbf16> to vector<32x166xbf16>
    %358 = vector.extract_strided_slice %338 {offsets = [0, 224], sizes = [32, 166], strides = [1, 1]} : vector<32x392xbf16> to vector<32x166xbf16>
    %359 = tpu.concatenate %357, %358 in 1 : vector<32x166xbf16>, vector<32x166xbf16> -> vector<32x332xbf16>
    %360 = vector.extract_strided_slice %338 {offsets = [0, 29], sizes = [32, 166], strides = [1, 1]} : vector<32x392xbf16> to vector<32x166xbf16>
    %361 = vector.extract_strided_slice %338 {offsets = [0, 225], sizes = [32, 166], strides = [1, 1]} : vector<32x392xbf16> to vector<32x166xbf16>
    %362 = tpu.concatenate %360, %361 in 1 : vector<32x166xbf16>, vector<32x166xbf16> -> vector<32x332xbf16>
    %363 = vector.extract_strided_slice %338 {offsets = [0, 30], sizes = [32, 166], strides = [1, 1]} : vector<32x392xbf16> to vector<32x166xbf16>
    %364 = vector.extract_strided_slice %338 {offsets = [0, 226], sizes = [32, 166], strides = [1, 1]} : vector<32x392xbf16> to vector<32x166xbf16>
    %365 = tpu.concatenate %363, %364 in 1 : vector<32x166xbf16>, vector<32x166xbf16> -> vector<32x332xbf16>
    %366 = tpu.concatenate %341, %344, %347, %350, %353, %356, %359, %362, %365 in 0 : vector<32x332xbf16>, vector<32x332xbf16>, vector<32x332xbf16>, vector<32x332xbf16>, vector<32x332xbf16>, vector<32x332xbf16>, vector<32x332xbf16>, vector<32x332xbf16>, vector<32x332xbf16> -> vector<288x332xbf16>
    %c3 = arith.constant 3 : index
    %c0_82 = arith.constant 0 : index
    %c0_83 = arith.constant 0 : index
    %367 = vector.load %arg7[%c3, %c0_82, %c0_83] : memref<4x32x288xbf16, #tpu.memory_space<vmem>>, vector<1x32x288xbf16>
    %368 = vector.shape_cast %367 : vector<1x32x288xbf16> to vector<32x288xbf16>
    %cst_84 = arith.constant dense<0.000000e+00> : vector<32x332xf32>
    %369 = tpu.matmul %368, %366, %cst_84 {dimension_numbers = #tpu.dot_dimension_numbers<[1], [0], [0], [1], [0, 0, 1, 1], [], []>} : vector<32x288xbf16>, vector<288x332xbf16>, vector<32x332xf32> -> vector<32x332xf32>
    %c3_85 = arith.constant 3 : index
    %c0_86 = arith.constant 0 : index
    %c0_87 = arith.constant 0 : index
    %370 = vector.load %arg8[%c3_85, %c0_86, %c0_87] : memref<4x32x1xf32, #tpu.memory_space<vmem>>, vector<1x32x1xf32>
    %371 = vector.shape_cast %370 : vector<1x32x1xf32> to vector<32x1xf32>
    %372 = vector.broadcast %371 : vector<32x1xf32> to vector<32x332xf32>
    %373 = arith.addf %369, %372 : vector<32x332xf32>
    %374 = vector.extract_strided_slice %373 {offsets = [0, 0], sizes = [32, 166], strides = [1, 1]} : vector<32x332xf32> to vector<32x166xf32>
    %375 = vector.broadcast %0 : vector<1x166xf32> to vector<32x166xf32>
    %376 = arith.mulf %374, %375 : vector<32x166xf32>
    %cst_88 = arith.constant dense<0.000000e+00> : vector<32xf32>
    %377 = vector.multi_reduction <add>, %376, %cst_88 [1] : vector<32x166xf32> to vector<32xf32>
    %378 = vector.shape_cast %377 : vector<32xf32> to vector<32x1xf32>
    %cst_89 = arith.constant 0.0069444445 : f32
    %379 = vector.broadcast %cst_89 : f32 to vector<32x1xf32>
    %380 = arith.mulf %378, %379 : vector<32x1xf32>
    %381 = vector.broadcast %380 : vector<32x1xf32> to vector<32x166xf32>
    %382 = arith.subf %374, %381 : vector<32x166xf32>
    %383 = vector.broadcast %0 : vector<1x166xf32> to vector<32x166xf32>
    %384 = arith.mulf %382, %383 : vector<32x166xf32>
    %385 = arith.mulf %384, %384 : vector<32x166xf32>
    %cst_90 = arith.constant dense<0.000000e+00> : vector<32xf32>
    %386 = vector.multi_reduction <add>, %385, %cst_90 [1] : vector<32x166xf32> to vector<32xf32>
    %387 = vector.shape_cast %386 : vector<32xf32> to vector<32x1xf32>
    %cst_91 = arith.constant 0.0069444445 : f32
    %388 = vector.broadcast %cst_91 : f32 to vector<32x1xf32>
    %389 = arith.mulf %387, %388 : vector<32x1xf32>
    %cst_92 = arith.constant 9.99999974E-6 : f32
    %390 = vector.broadcast %cst_92 : f32 to vector<32x1xf32>
    %391 = arith.addf %389, %390 : vector<32x1xf32>
    %392 = math.rsqrt %391 : vector<32x1xf32>
    %393 = vector.broadcast %392 : vector<32x1xf32> to vector<32x166xf32>
    %394 = arith.mulf %384, %393 : vector<32x166xf32>
    %395 = vector.extract_strided_slice %373 {offsets = [0, 166], sizes = [32, 166], strides = [1, 1]} : vector<32x332xf32> to vector<32x166xf32>
    %396 = vector.broadcast %0 : vector<1x166xf32> to vector<32x166xf32>
    %397 = arith.mulf %395, %396 : vector<32x166xf32>
    %cst_93 = arith.constant dense<0.000000e+00> : vector<32xf32>
    %398 = vector.multi_reduction <add>, %397, %cst_93 [1] : vector<32x166xf32> to vector<32xf32>
    %399 = vector.shape_cast %398 : vector<32xf32> to vector<32x1xf32>
    %cst_94 = arith.constant 0.0069444445 : f32
    %400 = vector.broadcast %cst_94 : f32 to vector<32x1xf32>
    %401 = arith.mulf %399, %400 : vector<32x1xf32>
    %402 = vector.broadcast %401 : vector<32x1xf32> to vector<32x166xf32>
    %403 = arith.subf %395, %402 : vector<32x166xf32>
    %404 = vector.broadcast %0 : vector<1x166xf32> to vector<32x166xf32>
    %405 = arith.mulf %403, %404 : vector<32x166xf32>
    %406 = arith.mulf %405, %405 : vector<32x166xf32>
    %cst_95 = arith.constant dense<0.000000e+00> : vector<32xf32>
    %407 = vector.multi_reduction <add>, %406, %cst_95 [1] : vector<32x166xf32> to vector<32xf32>
    %408 = vector.shape_cast %407 : vector<32xf32> to vector<32x1xf32>
    %cst_96 = arith.constant 0.0069444445 : f32
    %409 = vector.broadcast %cst_96 : f32 to vector<32x1xf32>
    %410 = arith.mulf %408, %409 : vector<32x1xf32>
    %cst_97 = arith.constant 9.99999974E-6 : f32
    %411 = vector.broadcast %cst_97 : f32 to vector<32x1xf32>
    %412 = arith.addf %410, %411 : vector<32x1xf32>
    %413 = math.rsqrt %412 : vector<32x1xf32>
    %414 = vector.broadcast %413 : vector<32x1xf32> to vector<32x166xf32>
    %415 = arith.mulf %405, %414 : vector<32x166xf32>
    %416 = tpu.concatenate %394, %415 in 1 : vector<32x166xf32>, vector<32x166xf32> -> vector<32x332xf32>
    %417 = vector.extract_strided_slice %250 {offsets = [0, 15], sizes = [32, 166], strides = [1, 1]} : vector<32x392xf32> to vector<32x166xf32>
    %418 = vector.extract_strided_slice %250 {offsets = [0, 211], sizes = [32, 166], strides = [1, 1]} : vector<32x392xf32> to vector<32x166xf32>
    %419 = tpu.concatenate %417, %418 in 1 : vector<32x166xf32>, vector<32x166xf32> -> vector<32x332xf32>
    %420 = arith.addf %416, %419 : vector<32x332xf32>
    %cst_98 = arith.constant 0.000000e+00 : f32
    %421 = vector.broadcast %cst_98 : f32 to vector<32x332xf32>
    %422 = arith.cmpf oge, %420, %421 : vector<32x332xf32>
    %cst_99 = arith.constant 2.000000e-01 : f32
    %423 = vector.broadcast %cst_99 : f32 to vector<32x332xf32>
    %424 = arith.mulf %423, %420 : vector<32x332xf32>
    %425 = arith.select %422, %420, %424 : vector<32x332xi1>, vector<32x332xf32>
    %426 = arith.truncf %425 : vector<32x332xf32> to vector<32x332xbf16>
    %c0_100 = arith.constant 0 : index
    %c0_101 = arith.constant 0 : index
    %427 = vector.load %arg6[%c0_100, %c0_101] : memref<332x392xbf16, #tpu.memory_space<vmem>>, vector<332x392xbf16>
    %cst_102 = arith.constant dense<0.000000e+00> : vector<32x392xf32>
    %428 = tpu.matmul %426, %427, %cst_102 {dimension_numbers = #tpu.dot_dimension_numbers<[1], [0], [0], [1], [0, 0, 1, 1], [], []>} : vector<32x332xbf16>, vector<332x392xbf16>, vector<32x392xf32> -> vector<32x392xf32>
    %429 = arith.truncf %428 : vector<32x392xf32> to vector<32x392xbf16>
    %430 = vector.extract_strided_slice %429 {offsets = [0, 0], sizes = [32, 151], strides = [1, 1]} : vector<32x392xbf16> to vector<32x151xbf16>
    %431 = vector.extract_strided_slice %429 {offsets = [0, 196], sizes = [32, 151], strides = [1, 1]} : vector<32x392xbf16> to vector<32x151xbf16>
    %432 = tpu.concatenate %430, %431 in 1 : vector<32x151xbf16>, vector<32x151xbf16> -> vector<32x302xbf16>
    %433 = vector.extract_strided_slice %429 {offsets = [0, 1], sizes = [32, 151], strides = [1, 1]} : vector<32x392xbf16> to vector<32x151xbf16>
    %434 = vector.extract_strided_slice %429 {offsets = [0, 197], sizes = [32, 151], strides = [1, 1]} : vector<32x392xbf16> to vector<32x151xbf16>
    %435 = tpu.concatenate %433, %434 in 1 : vector<32x151xbf16>, vector<32x151xbf16> -> vector<32x302xbf16>
    %436 = vector.extract_strided_slice %429 {offsets = [0, 2], sizes = [32, 151], strides = [1, 1]} : vector<32x392xbf16> to vector<32x151xbf16>
    %437 = vector.extract_strided_slice %429 {offsets = [0, 198], sizes = [32, 151], strides = [1, 1]} : vector<32x392xbf16> to vector<32x151xbf16>
    %438 = tpu.concatenate %436, %437 in 1 : vector<32x151xbf16>, vector<32x151xbf16> -> vector<32x302xbf16>
    %439 = vector.extract_strided_slice %429 {offsets = [0, 3], sizes = [32, 151], strides = [1, 1]} : vector<32x392xbf16> to vector<32x151xbf16>
    %440 = vector.extract_strided_slice %429 {offsets = [0, 199], sizes = [32, 151], strides = [1, 1]} : vector<32x392xbf16> to vector<32x151xbf16>
    %441 = tpu.concatenate %439, %440 in 1 : vector<32x151xbf16>, vector<32x151xbf16> -> vector<32x302xbf16>
    %442 = vector.extract_strided_slice %429 {offsets = [0, 14], sizes = [32, 151], strides = [1, 1]} : vector<32x392xbf16> to vector<32x151xbf16>
    %443 = vector.extract_strided_slice %429 {offsets = [0, 210], sizes = [32, 151], strides = [1, 1]} : vector<32x392xbf16> to vector<32x151xbf16>
    %444 = tpu.concatenate %442, %443 in 1 : vector<32x151xbf16>, vector<32x151xbf16> -> vector<32x302xbf16>
    %445 = vector.extract_strided_slice %429 {offsets = [0, 15], sizes = [32, 151], strides = [1, 1]} : vector<32x392xbf16> to vector<32x151xbf16>
    %446 = vector.extract_strided_slice %429 {offsets = [0, 211], sizes = [32, 151], strides = [1, 1]} : vector<32x392xbf16> to vector<32x151xbf16>
    %447 = tpu.concatenate %445, %446 in 1 : vector<32x151xbf16>, vector<32x151xbf16> -> vector<32x302xbf16>
    %448 = vector.extract_strided_slice %429 {offsets = [0, 16], sizes = [32, 151], strides = [1, 1]} : vector<32x392xbf16> to vector<32x151xbf16>
    %449 = vector.extract_strided_slice %429 {offsets = [0, 212], sizes = [32, 151], strides = [1, 1]} : vector<32x392xbf16> to vector<32x151xbf16>
    %450 = tpu.concatenate %448, %449 in 1 : vector<32x151xbf16>, vector<32x151xbf16> -> vector<32x302xbf16>
    %451 = vector.extract_strided_slice %429 {offsets = [0, 17], sizes = [32, 151], strides = [1, 1]} : vector<32x392xbf16> to vector<32x151xbf16>
    %452 = vector.extract_strided_slice %429 {offsets = [0, 213], sizes = [32, 151], strides = [1, 1]} : vector<32x392xbf16> to vector<32x151xbf16>
    %453 = tpu.concatenate %451, %452 in 1 : vector<32x151xbf16>, vector<32x151xbf16> -> vector<32x302xbf16>
    %454 = vector.extract_strided_slice %429 {offsets = [0, 28], sizes = [32, 151], strides = [1, 1]} : vector<32x392xbf16> to vector<32x151xbf16>
    %455 = vector.extract_strided_slice %429 {offsets = [0, 224], sizes = [32, 151], strides = [1, 1]} : vector<32x392xbf16> to vector<32x151xbf16>
    %456 = tpu.concatenate %454, %455 in 1 : vector<32x151xbf16>, vector<32x151xbf16> -> vector<32x302xbf16>
    %457 = vector.extract_strided_slice %429 {offsets = [0, 29], sizes = [32, 151], strides = [1, 1]} : vector<32x392xbf16> to vector<32x151xbf16>
    %458 = vector.extract_strided_slice %429 {offsets = [0, 225], sizes = [32, 151], strides = [1, 1]} : vector<32x392xbf16> to vector<32x151xbf16>
    %459 = tpu.concatenate %457, %458 in 1 : vector<32x151xbf16>, vector<32x151xbf16> -> vector<32x302xbf16>
    %460 = vector.extract_strided_slice %429 {offsets = [0, 30], sizes = [32, 151], strides = [1, 1]} : vector<32x392xbf16> to vector<32x151xbf16>
    %461 = vector.extract_strided_slice %429 {offsets = [0, 226], sizes = [32, 151], strides = [1, 1]} : vector<32x392xbf16> to vector<32x151xbf16>
    %462 = tpu.concatenate %460, %461 in 1 : vector<32x151xbf16>, vector<32x151xbf16> -> vector<32x302xbf16>
    %463 = vector.extract_strided_slice %429 {offsets = [0, 31], sizes = [32, 151], strides = [1, 1]} : vector<32x392xbf16> to vector<32x151xbf16>
    %464 = vector.extract_strided_slice %429 {offsets = [0, 227], sizes = [32, 151], strides = [1, 1]} : vector<32x392xbf16> to vector<32x151xbf16>
    %465 = tpu.concatenate %463, %464 in 1 : vector<32x151xbf16>, vector<32x151xbf16> -> vector<32x302xbf16>
    %466 = vector.extract_strided_slice %429 {offsets = [0, 42], sizes = [32, 151], strides = [1, 1]} : vector<32x392xbf16> to vector<32x151xbf16>
    %467 = vector.extract_strided_slice %429 {offsets = [0, 238], sizes = [32, 151], strides = [1, 1]} : vector<32x392xbf16> to vector<32x151xbf16>
    %468 = tpu.concatenate %466, %467 in 1 : vector<32x151xbf16>, vector<32x151xbf16> -> vector<32x302xbf16>
    %469 = vector.extract_strided_slice %429 {offsets = [0, 43], sizes = [32, 151], strides = [1, 1]} : vector<32x392xbf16> to vector<32x151xbf16>
    %470 = vector.extract_strided_slice %429 {offsets = [0, 239], sizes = [32, 151], strides = [1, 1]} : vector<32x392xbf16> to vector<32x151xbf16>
    %471 = tpu.concatenate %469, %470 in 1 : vector<32x151xbf16>, vector<32x151xbf16> -> vector<32x302xbf16>
    %472 = vector.extract_strided_slice %429 {offsets = [0, 44], sizes = [32, 151], strides = [1, 1]} : vector<32x392xbf16> to vector<32x151xbf16>
    %473 = vector.extract_strided_slice %429 {offsets = [0, 240], sizes = [32, 151], strides = [1, 1]} : vector<32x392xbf16> to vector<32x151xbf16>
    %474 = tpu.concatenate %472, %473 in 1 : vector<32x151xbf16>, vector<32x151xbf16> -> vector<32x302xbf16>
    %475 = vector.extract_strided_slice %429 {offsets = [0, 45], sizes = [32, 151], strides = [1, 1]} : vector<32x392xbf16> to vector<32x151xbf16>
    %476 = vector.extract_strided_slice %429 {offsets = [0, 241], sizes = [32, 151], strides = [1, 1]} : vector<32x392xbf16> to vector<32x151xbf16>
    %477 = tpu.concatenate %475, %476 in 1 : vector<32x151xbf16>, vector<32x151xbf16> -> vector<32x302xbf16>
    %478 = tpu.concatenate %432, %435, %438, %441, %444, %447, %450, %453, %456, %459, %462, %465, %468, %471, %474, %477 in 0 : vector<32x302xbf16>, vector<32x302xbf16>, vector<32x302xbf16>, vector<32x302xbf16>, vector<32x302xbf16>, vector<32x302xbf16>, vector<32x302xbf16>, vector<32x302xbf16>, vector<32x302xbf16>, vector<32x302xbf16>, vector<32x302xbf16>, vector<32x302xbf16>, vector<32x302xbf16>, vector<32x302xbf16>, vector<32x302xbf16>, vector<32x302xbf16> -> vector<512x302xbf16>
    %c0_103 = arith.constant 0 : index
    %c0_104 = arith.constant 0 : index
    %479 = vector.load %arg9[%c0_103, %c0_104] : memref<8x512xbf16, #tpu.memory_space<vmem>>, vector<8x512xbf16>
    %cst_105 = arith.constant dense<0.000000e+00> : vector<8x302xf32>
    %480 = tpu.matmul %479, %478, %cst_105 {dimension_numbers = #tpu.dot_dimension_numbers<[1], [0], [0], [1], [0, 0, 1, 1], [], []>} : vector<8x512xbf16>, vector<512x302xbf16>, vector<8x302xf32> -> vector<8x302xf32>
    %c0_106 = arith.constant 0 : index
    %c0_107 = arith.constant 0 : index
    %481 = vector.load %arg10[%c0_106, %c0_107] : memref<8x1xf32, #tpu.memory_space<vmem>>, vector<8x1xf32>
    %482 = vector.broadcast %481 : vector<8x1xf32> to vector<8x302xf32>
    %483 = arith.addf %480, %482 : vector<8x302xf32>
    %484 = arith.truncf %483 : vector<8x302xf32> to vector<8x302xbf16>
    %c0_108 = arith.constant 0 : index
    %c0_109 = arith.constant 0 : index
    %485 = vector.load %arg11[%c0_108, %c0_109] : memref<302x256xbf16, #tpu.memory_space<vmem>>, vector<302x256xbf16>
    %cst_110 = arith.constant dense<0.000000e+00> : vector<8x256xf32>
    %486 = tpu.matmul %484, %485, %cst_110 {dimension_numbers = #tpu.dot_dimension_numbers<[1], [0], [0], [1], [0, 0, 1, 1], [], []>} : vector<8x302xbf16>, vector<302x256xbf16>, vector<8x256xf32> -> vector<8x256xf32>
    %487 = vector.extract_strided_slice %486 {offsets = [0, 0], sizes = [1, 256], strides = [1, 1]} : vector<8x256xf32> to vector<1x256xf32>
    %488 = arith.negf %487 : vector<1x256xf32>
    %489 = math.exp %488 : vector<1x256xf32>
    %cst_111 = arith.constant 1.000000e+00 : f32
    %490 = vector.broadcast %cst_111 : f32 to vector<1x256xf32>
    %491 = arith.addf %490, %489 : vector<1x256xf32>
    %492 = arith.divf %490, %491 : vector<1x256xf32>
    %c0_112 = arith.constant 0 : index
    %c0_113 = arith.constant 0 : index
    %c0_114 = arith.constant 0 : index
    %493 = vector.load %arg13[%c0_112, %c0_113, %c0_114] : memref<1x1x256xf32, #tpu.memory_space<vmem>>, vector<1x1x256xf32>
    %494 = vector.shape_cast %493 : vector<1x1x256xf32> to vector<1x256xf32>
    %495 = vector.shape_cast %492 : vector<1x256xf32> to vector<1x1x256xf32>
    tpu.vector_store %arg13[%c0_112, %c0_113, %c0_114], %495 {strides = array<i32>} : memref<1x1x256xf32, #tpu.memory_space<vmem>>, vector<1x1x256xf32>,
    return
  }
  func.func @transform_0(%arg0: i32) -> (i32, i32, i32) {
    %c0_i32 = arith.constant 0 : i32
    %c0_i32_0 = arith.constant 0 : i32
    %c0_i32_1 = arith.constant 0 : i32
    return %arg0, %c0_i32, %c0_i32_0 : i32, i32, i32
  }
  func.func @transform_1(%arg0: i32) -> (i32, i32) {
    %c0_i32 = arith.constant 0 : i32
    %c0_i32_0 = arith.constant 0 : i32
    %c0_i32_1 = arith.constant 0 : i32
    return %c0_i32, %c0_i32_0 : i32, i32
  }
  func.func @transform_2(%arg0: i32) -> (i32, i32) {
    %c0_i32 = arith.constant 0 : i32
    %c0_i32_0 = arith.constant 0 : i32
    %c0_i32_1 = arith.constant 0 : i32
    return %c0_i32, %c0_i32_0 : i32, i32
  }
  func.func @transform_3(%arg0: i32) -> (i32, i32) {
    %c0_i32 = arith.constant 0 : i32
    %c0_i32_0 = arith.constant 0 : i32
    %c0_i32_1 = arith.constant 0 : i32
    return %c0_i32, %c0_i32_0 : i32, i32
  }
  func.func @transform_4(%arg0: i32) -> (i32, i32) {
    %c0_i32 = arith.constant 0 : i32
    %c0_i32_0 = arith.constant 0 : i32
    %c0_i32_1 = arith.constant 0 : i32
    return %c0_i32, %c0_i32_0 : i32, i32
  }
  func.func @transform_5(%arg0: i32) -> (i32, i32) {
    %c0_i32 = arith.constant 0 : i32
    %c0_i32_0 = arith.constant 0 : i32
    %c0_i32_1 = arith.constant 0 : i32
    return %c0_i32, %c0_i32_0 : i32, i32
  }
  func.func @transform_6(%arg0: i32) -> (i32, i32, i32) {
    %c0_i32 = arith.constant 0 : i32
    %c0_i32_0 = arith.constant 0 : i32
    %c0_i32_1 = arith.constant 0 : i32
    %c0_i32_2 = arith.constant 0 : i32
    return %c0_i32, %c0_i32_0, %c0_i32_1 : i32, i32, i32
  }
  func.func @transform_7(%arg0: i32) -> (i32, i32, i32) {
    %c0_i32 = arith.constant 0 : i32
    %c0_i32_0 = arith.constant 0 : i32
    %c0_i32_1 = arith.constant 0 : i32
    %c0_i32_2 = arith.constant 0 : i32
    return %c0_i32, %c0_i32_0, %c0_i32_1 : i32, i32, i32
  }
  func.func @transform_8(%arg0: i32) -> (i32, i32) {
    %c0_i32 = arith.constant 0 : i32
    %c0_i32_0 = arith.constant 0 : i32
    %c0_i32_1 = arith.constant 0 : i32
    return %c0_i32, %c0_i32_0 : i32, i32
  }
  func.func @transform_9(%arg0: i32) -> (i32, i32) {
    %c0_i32 = arith.constant 0 : i32
    %c0_i32_0 = arith.constant 0 : i32
    %c0_i32_1 = arith.constant 0 : i32
    return %c0_i32, %c0_i32_0 : i32, i32
  }
  func.func @transform_10(%arg0: i32) -> (i32, i32) {
    %c0_i32 = arith.constant 0 : i32
    %c0_i32_0 = arith.constant 0 : i32
    %c0_i32_1 = arith.constant 0 : i32
    return %c0_i32, %c0_i32_0 : i32, i32
  }
  func.func @transform_11(%arg0: i32) -> (i32, i32) {
    %c0_i32 = arith.constant 0 : i32
    %c0_i32_0 = arith.constant 0 : i32
    %c0_i32_1 = arith.constant 0 : i32
    return %c0_i32, %c0_i32_0 : i32, i32
  }
  func.func @transform_12(%arg0: i32) -> (i32, i32, i32) {
    %c0_i32 = arith.constant 0 : i32
    %c0_i32_0 = arith.constant 0 : i32
    %c0_i32_1 = arith.constant 0 : i32
    return %arg0, %c0_i32, %c0_i32_0 : i32, i32, i32
  }
}

</mosaic_0001>

<bundles_post_ra>
// kernel: _lambda_.1
= control target key start
LH: loop header
LB: loop body
LE: loop exit
PB: predicated region body
PF: predicated region fallthrough
CT: control target
= control target key end

     0   :  { %v15980_v2 = vmov 0   ;;  %vm15978_vm0 = vcmask 564224   ;;  %vm908_vm1 = vcmask 1041408   ;;  %vm909_vm2 = vcmask 1042432   ;;  %s10411_s22 = smov 87   ;;  %s10412_s23 = smov 46   ;;  %s15942_s0 = inlined_call_operand.vmem [shape: bf16[1,197,1352], index: 0, kind: input, shape index: {}]   ;;  %s15943_s1 = inlined_call_operand.vmem [shape: bf16[16,197], index: 1, kind: input, shape index: {}]   ;;  %s15944_s2 = inlined_call_operand.vmem [shape: bf16[32,256], index: 2, kind: input, shape index: {}]   ;;  %s15945_s3 = inlined_call_operand.vmem [shape: f32[32,1], index: 3, kind: input, shape index: {}]   ;;  %s15946_s4 = inlined_call_operand.vmem [shape: bf16[310,392], index: 4, kind: input, shape index: {}]   ;;  %s15947_s6 = inlined_call_operand.vmem [shape: bf16[4,32,288], index: 6, kind: input, shape index: {}]   ;;  %s15948_s7 = inlined_call_operand.vmem [shape: f32[4,32,1], index: 7, kind: input, shape index: {}]   ;;  %s15949_s11 = inlined_call_operand.vmem [shape: f32[1,166], index: 11, kind: input, shape index: {}]   ;;  %s15950_s5 = inlined_call_operand.vmem [shape: bf16[332,392], index: 5, kind: input, shape index: {}]   ;;  %s15951_s8 = inlined_call_operand.vmem [shape: bf16[8,512], index: 8, kind: input, shape index: {}]   ;;  %s15952_s9 = inlined_call_operand.vmem [shape: f32[8,1], index: 9, kind: input, shape index: {}]   ;;  %s15953_s10 = inlined_call_operand.vmem [shape: bf16[302,256], index: 10, kind: input, shape index: {}]   ;;  %s15954_s12 = inlined_call_operand.vmem [shape: f32[1,1,256], index: 12, kind: output, shape index: {}]  }
   0x1   :  { %v9573_v0 = vld [vmem:[%s15942_s0 + $0x4] ss:$44 sps:$4 sm:$0xff]   ;;  %v9575_v1 = vld [vmem:[%s15942_s0 + $0xc] ss:$44 sps:$4 sm:$0xff]   ;;  %9571 = vset.pattern.permute.xlu1 %v15980_v2  ;;  %9572 = vset.pattern.permute.xlu0 %v15980_v2  ;;  %v9578_v4 = vld [vmem:[%s15942_s0 + $0x8] ss:$44 sps:$4 sm:$0xff]  }
   0x2   :  { %945 = vmatprep.subr.bf16.mxu0 %v9573_v0  ;;  %v9577_v3 = vld [vmem:[%s15942_s0] ss:$44 sps:$4 sm:$0xff]   ;;  %988 = vmatprep.subr.bf16.mxu1 %v9575_v1  ;;  %v9579_v5 = vld [vmem:[%s15942_s0 + $0x5c] ss:$44 sps:$4 sm:$0xff]   ;;  %v9581_v6 = vld [vmem:[%s15942_s0 + $0x64] ss:$44 sps:$4 sm:$0xff]  }
   0x3   :  { %946 = vmatpush1.bf16.msra.mxu0 %v9577_v3  ;;  %989 = vmatpush1.bf16.msra.mxu1 %v9578_v4  ;;  %v9583_v7 = vld [vmem:[%s15942_s0 + $0x58] ss:$44 sps:$4 sm:$0xff]   ;;  %v9584_v8 = vld [vmem:[%s15942_s0 + $0x60] ss:$44 sps:$4 sm:$0xff]   ;;  %v9587_v10 = vld [vmem:[%s15942_s0 + $0xbc] ss:$44 sps:$4 sm:$0xff]  }
   0x4   :  { %947 = vmatprep.subr.bf16.mxu0 %v9579_v5  ;;  %990 = vmatprep.subr.bf16.mxu1 %v9581_v6  ;;  %v9585_v9 = vld [vmem:[%s15942_s0 + $0xb4] ss:$44 sps:$4 sm:$0xff]   ;;  %v9589_v11 = vld [vmem:[%s15942_s0 + $0xb0] ss:$44 sps:$4 sm:$0xff]   ;;  %v9590_v12 = vld [vmem:[%s15942_s0 + $0xb8] ss:$44 sps:$4 sm:$0xff]  }
   0x5   :  { %v9591_v13 = vld [vmem:[%s15942_s0 + $0x10c] ss:$44 sps:$4 sm:$0xff]   ;;  %v9593_v14 = vld [vmem:[%s15942_s0 + $0x114] ss:$44 sps:$4 sm:$0xff]   ;;  %v9596_v16 = vld [vmem:[%s15942_s0 + $0x110] ss:$44 sps:$4 sm:$0xff]  }
   0x6   :  { %v9595_v15 = vld [vmem:[%s15942_s0 + $0x108] ss:$44 sps:$4 sm:$0xff]   ;;  %v9597_v17 = vld [vmem:[%s15942_s0 + $0x164] ss:$44 sps:$4 sm:$0xff]   ;;  %v9599_v18 = vld [vmem:[%s15942_s0 + $0x16c] ss:$44 sps:$4 sm:$0xff]  }
   0x7   :  { %948 = vmatpush1.bf16.msra.mxu0 %v9583_v7  ;;  %991 = vmatpush1.bf16.msra.mxu1 %v9584_v8  ;;  %v9601_v19 = vld [vmem:[%s15942_s0 + $0x160] ss:$44 sps:$4 sm:$0xff]   ;;  %v9602_v20 = vld [vmem:[%s15942_s0 + $0x168] ss:$44 sps:$4 sm:$0xff]   ;;  %v9605_v22 = vld [vmem:[%s15942_s0 + $0x1c4] ss:$44 sps:$4 sm:$0xff]  }
   0x8   :  { %949 = vmatprep.subr.bf16.mxu0 %v9585_v9  ;;  %992 = vmatprep.subr.bf16.mxu1 %v9587_v10  ;;  %v9603_v21 = vld [vmem:[%s15942_s0 + $0x1bc] ss:$44 sps:$4 sm:$0xff]   ;;  %v9607_v23 = vld [vmem:[%s15942_s0 + $0x1b8] ss:$44 sps:$4 sm:$0xff]   ;;  %v9608_v24 = vld [vmem:[%s15942_s0 + $0x1c0] ss:$44 sps:$4 sm:$0xff]  }
   0x9   :  { %v9609_v25 = vld [vmem:[%s15942_s0 + $0x214] ss:$44 sps:$4 sm:$0xff]   ;;  %v9611_v26 = vld [vmem:[%s15942_s0 + $0x21c] ss:$44 sps:$4 sm:$0xff]   ;;  %v9614_v28 = vld [vmem:[%s15942_s0 + $0x218] ss:$44 sps:$4 sm:$0xff]  }
   0xa   :  { %v9613_v27 = vld [vmem:[%s15942_s0 + $0x210] ss:$44 sps:$4 sm:$0xff]   ;;  %v9615_v29 = vld [vmem:[%s15942_s0 + $0x26c] ss:$44 sps:$4 sm:$0xff]   ;;  %v9617_v30 = vld [vmem:[%s15942_s0 + $0x274] ss:$44 sps:$4 sm:$0xff]  }
   0xb   :  { %950 = vmatpush1.bf16.msra.mxu0 %v9589_v11  ;;  %993 = vmatpush1.bf16.msra.mxu1 %v9590_v12  ;;  %v9619_v31 = vld [vmem:[%s15942_s0 + $0x268] ss:$44 sps:$4 sm:$0xff]   ;;  %v9620_v32 = vld [vmem:[%s15942_s0 + $0x270] ss:$44 sps:$4 sm:$0xff]   ;;  %v9623_v34 = vld [vmem:[%s15942_s0 + $0x2cc] ss:$44 sps:$4 sm:$0xff]  }
   0xc   :  { %951 = vmatprep.subr.bf16.mxu0 %v9591_v13  ;;  %994 = vmatprep.subr.bf16.mxu1 %v9593_v14  ;;  %v9621_v33 = vld [vmem:[%s15942_s0 + $0x2c4] ss:$44 sps:$4 sm:$0xff]   ;;  %v9625_v35 = vld [vmem:[%s15942_s0 + $0x2c0] ss:$44 sps:$4 sm:$0xff]   ;;  %v9626_v36 = vld [vmem:[%s15942_s0 + $0x2c8] ss:$44 sps:$4 sm:$0xff]  }
   0xd   :  { %v9627_v37 = vld [vmem:[%s15942_s0 + $0x31c] ss:$44 sps:$4 sm:$0xff]   ;;  %v9629_v38 = vld [vmem:[%s15942_s0 + $0x324] ss:$44 sps:$4 sm:$0xff]   ;;  %v9632_v41 = vld [vmem:[%s15942_s0 + $0x320] ss:$44 sps:$4 sm:$0xff]  }
   0xe   :  { %v10654_v39 = vld [vmem:[%s15943_s1 + $0x4] ss:$8 sps:$4 sm:$0xff]   ;;  %v9633_v42 = vld [vmem:[%s15942_s0 + $0x374] ss:$44 sps:$4 sm:$0xff]   ;;  %v9635_v43 = vld [vmem:[%s15942_s0 + $0x37c] ss:$44 sps:$4 sm:$0xff]  }
   0xf   :  { %952 = vmatpush1.bf16.msra.mxu0 %v9595_v15  ;;  %995 = vmatpush1.bf16.msra.mxu1 %v9596_v16  ;;  %v9631_v40 = vld [vmem:[%s15942_s0 + $0x318] ss:$44 sps:$4 sm:$0xff]   ;;  %v190_v45 = vld [vmem:[%s15942_s0 + $0x428] sm:$0x77]  ;;  %v10409_v46 = vmov 65535   ;;  %s15955_s24 = smov 86  }
  0x10   :  { %953 = vmatprep.subr.bf16.mxu0 %v9597_v17  ;;  %996 = vmatprep.subr.bf16.mxu1 %v9599_v18  ;;  %v189_v44 = vld [vmem:[%s15942_s0 + $0x420] sm:$0x77]  ;;  %v910_v47 = vsel %vm908_vm1, 4294967295, %v10409_v46  ;;  %v9637_v48 = vld [vmem:[%s15942_s0 + $0x370] ss:$44 sps:$4 sm:$0xff]   ;;  %v8789_v53 = vcombine.high %v190_v45, %v190_v45  ;;  %v8788_v58 = vcombine.low %v190_v45, %v190_v45  ;;  %s10414_s25 = smov 115  }
  0x11   :  { %8797 = vmatprep.mubr.msk.bf16.mxu0 %vm15978_vm0, %v10654_v39  ;;  %8798 = vmatprep.mubr.msk.bf16.mxu1 %vm15978_vm0, %v10654_v39  ;;  %v9638_v49 = vld [vmem:[%s15942_s0 + $0x378] ss:$44 sps:$4 sm:$0xff]   ;;  %v9641_v51 = vld [vmem:[%s15942_s0 + $0x3d4] ss:$44 sps:$4 sm:$0xff]   ;;  %v8787_v52 = vcombine.high %v189_v44, %v189_v44  ;;  %v10691_v54 = vsel %vm909_vm2, %v910_v47, 0  ;;  %v8786_v57 = vcombine.low %v189_v44, %v189_v44  ;;  %s10415_s26 = smov 45  }
  0x12   :  { %v9639_v50 = vld [vmem:[%s15942_s0 + $0x3cc] ss:$44 sps:$4 sm:$0xff]   ;;  %v9643_v55 = vld [vmem:[%s15942_s0 + $0x3c8] ss:$44 sps:$4 sm:$0xff]   ;;  %v9644_v56 = vld [vmem:[%s15942_s0 + $0x3d0] ss:$44 sps:$4 sm:$0xff]   ;;  %v922_v60 = vand.u32 %v8789_v53, %v10691_v54  ;;  %v919_v62 = vand.u32 %v8788_v58, %v10691_v54 }
  0x13   :  { %954 = vmatpush1.bf16.msra.mxu0 %v9601_v19  ;;  %997 = vmatpush1.bf16.msra.mxu1 %v9602_v20  ;;  %v916_v59 = vand.u32 %v8787_v52, %v10691_v54  ;;  %v913_v61 = vand.u32 %v8786_v57, %v10691_v54  ;;  %v9654_v63 = vld [vmem:[%s15942_s0 + $0x14] ss:$44 sps:$4 sm:$0xff]   ;;  %v9657_v0 = vld [vmem:[%s15942_s0 + $0x1c] ss:$44 sps:$4 sm:$0xff]   ;;  %v9655_v4 = vld [vmem:[%s15942_s0 + $0x18] ss:$44 sps:$4 sm:$0xff]  }
  0x14   :  { %955 = vmatprep.subr.bf16.mxu0 %v9603_v21  ;;  %998 = vmatprep.subr.bf16.mxu1 %v9605_v22  ;;  %v10712_v1 = vld [vmem:[%s15943_s1] ss:$8 sps:$4 sm:$0xff]   ;;  %v9652_v3 = vld [vmem:[%s15942_s0 + $0x10] ss:$44 sps:$4 sm:$0xff]   ;;  %v9660_v5 = vld [vmem:[%s15942_s0 + $0x6c] ss:$44 sps:$4 sm:$0xff]  }
  0x15   :  { %v9663_v6 = vld [vmem:[%s15942_s0 + $0x74] ss:$44 sps:$4 sm:$0xff]   ;;  %v9661_v8 = vld [vmem:[%s15942_s0 + $0x70] ss:$44 sps:$4 sm:$0xff]   ;;  %v9669_v10 = vld [vmem:[%s15942_s0 + $0xcc] ss:$44 sps:$4 sm:$0xff]  }
  0x16   :  { %v9658_v7 = vld [vmem:[%s15942_s0 + $0x68] ss:$44 sps:$4 sm:$0xff]   ;;  %v9666_v9 = vld [vmem:[%s15942_s0 + $0xc4] ss:$44 sps:$4 sm:$0xff]   ;;  %v9664_v11 = vld [vmem:[%s15942_s0 + $0xc0] ss:$44 sps:$4 sm:$0xff]  }
  0x17   :  { %956 = vmatpush1.bf16.msra.mxu0 %v9607_v23  ;;  %999 = vmatpush1.bf16.msra.mxu1 %v9608_v24  ;;  %v9667_v12 = vld [vmem:[%s15942_s0 + $0xc8] ss:$44 sps:$4 sm:$0xff]   ;;  %v9675_v14 = vld [vmem:[%s15942_s0 + $0x124] ss:$44 sps:$4 sm:$0xff]   ;;  %v9673_v16 = vld [vmem:[%s15942_s0 + $0x120] ss:$44 sps:$4 sm:$0xff]  }
  0x18   :  { %957 = vmatprep.subr.bf16.mxu0 %v9609_v25  ;;  %1000 = vmatprep.subr.bf16.mxu1 %v9611_v26  ;;  %v9672_v13 = vld [vmem:[%s15942_s0 + $0x11c] ss:$44 sps:$4 sm:$0xff]   ;;  %v9670_v15 = vld [vmem:[%s15942_s0 + $0x118] ss:$44 sps:$4 sm:$0xff]   ;;  %v9678_v17 = vld [vmem:[%s15942_s0 + $0x174] ss:$44 sps:$4 sm:$0xff]  }
  0x19   :  { %v9681_v18 = vld [vmem:[%s15942_s0 + $0x17c] ss:$44 sps:$4 sm:$0xff]   ;;  %v9679_v20 = vld [vmem:[%s15942_s0 + $0x178] ss:$44 sps:$4 sm:$0xff]   ;;  %v9687_v22 = vld [vmem:[%s15942_s0 + $0x1d4] ss:$44 sps:$4 sm:$0xff]  }
  0x1a   :  { %v9676_v19 = vld [vmem:[%s15942_s0 + $0x170] ss:$44 sps:$4 sm:$0xff]   ;;  %v9684_v21 = vld [vmem:[%s15942_s0 + $0x1cc] ss:$44 sps:$4 sm:$0xff]   ;;  %v9682_v23 = vld [vmem:[%s15942_s0 + $0x1c8] ss:$44 sps:$4 sm:$0xff]  }
  0x1b   :  { %958 = vmatpush1.bf16.msra.mxu0 %v9613_v27  ;;  %1001 = vmatpush1.bf16.msra.mxu1 %v9614_v28  ;;  %v9685_v24 = vld [vmem:[%s15942_s0 + $0x1d0] ss:$44 sps:$4 sm:$0xff]   ;;  %v9693_v26 = vld [vmem:[%s15942_s0 + $0x22c] ss:$44 sps:$4 sm:$0xff]   ;;  %v9691_v28 = vld [vmem:[%s15942_s0 + $0x228] ss:$44 sps:$4 sm:$0xff]  }
  0x1c   :  { %959 = vmatprep.subr.bf16.mxu0 %v9615_v29  ;;  %1002 = vmatprep.subr.bf16.mxu1 %v9617_v30  ;;  %v9690_v25 = vld [vmem:[%s15942_s0 + $0x224] ss:$44 sps:$4 sm:$0xff]   ;;  %v9688_v27 = vld [vmem:[%s15942_s0 + $0x220] ss:$44 sps:$4 sm:$0xff]   ;;  %v9696_v29 = vld [vmem:[%s15942_s0 + $0x27c] ss:$44 sps:$4 sm:$0xff]  }
  0x1d   :  { %v9699_v30 = vld [vmem:[%s15942_s0 + $0x284] ss:$44 sps:$4 sm:$0xff]   ;;  %v192_v45 = vld [vmem:[%s15942_s0 + $0x438] sm:$0x77]  ;;  %v9712_v46 = vld [vmem:[%s15942_s0 + $0x380] ss:$44 sps:$4 sm:$0xff]  }
  0x1e   :  { %v191_v44 = vld [vmem:[%s15942_s0 + $0x430] sm:$0x77]  ;;  %v9718_v52 = vld [vmem:[%s15942_s0 + $0x3d8] ss:$44 sps:$4 sm:$0xff]   ;;  %v9721_v53 = vld [vmem:[%s15942_s0 + $0x3e0] ss:$44 sps:$4 sm:$0xff]  }
  0x1f   :  { %960 = vmatpush1.bf16.msra.mxu0 %v9619_v31  ;;  %1003 = vmatpush1.bf16.msra.mxu1 %v9620_v32  ;;  %v9694_v31 = vld [vmem:[%s15942_s0 + $0x278] ss:$44 sps:$4 sm:$0xff]   ;;  %v9697_v32 = vld [vmem:[%s15942_s0 + $0x280] ss:$44 sps:$4 sm:$0xff]   ;;  %v9715_v47 = vld [vmem:[%s15942_s0 + $0x388] ss:$44 sps:$4 sm:$0xff]  }
  0x20   :  { %961 = vmatprep.subr.bf16.mxu0 %v9621_v33  ;;  %1004 = vmatprep.subr.bf16.mxu1 %v9623_v34  ;;  %v9702_v33 = vld [vmem:[%s15942_s0 + $0x2d4] ss:$44 sps:$4 sm:$0xff]   ;;  %v9705_v34 = vld [vmem:[%s15942_s0 + $0x2dc] ss:$44 sps:$4 sm:$0xff]   ;;  %s10416_s27 = smov 74   ;;  %s10417_s28 = smov 4  }
  0x21   :  { %s10418_s1 = smov 5   ;;  %s10419_s29 = smov 119  }
  0x22   :  { %s10420_s30 = smov 78   ;;  %s10421_s13 = smov 77  }
  0x23   :  { %962 = vmatpush1.bf16.msra.mxu0 %v9625_v35  ;;  %1005 = vmatpush1.bf16.msra.mxu1 %v9626_v36  ;;  %v9700_v35 = vld [vmem:[%s15942_s0 + $0x2d0] ss:$44 sps:$4 sm:$0xff]   ;;  %v9703_v36 = vld [vmem:[%s15942_s0 + $0x2d8] ss:$44 sps:$4 sm:$0xff]   ;;  %s10422_s14 = smov 118   ;;  %s10423_s15 = smov 106  }
  0x24   :  { %963 = vmatprep.subr.bf16.mxu0 %v9627_v37  ;;  %1006 = vmatprep.subr.bf16.mxu1 %v9629_v38  ;;  %v9708_v37 = vld [vmem:[%s15942_s0 + $0x32c] ss:$44 sps:$4 sm:$0xff]   ;;  %v9711_v38 = vld [vmem:[%s15942_s0 + $0x334] ss:$44 sps:$4 sm:$0xff]   ;;  %s10424_s16 = smov 65   ;;  %s10425_s17 = smov 37  }
  0x25   :  { %s10426_s18 = smov 36   ;;  %s10427_s19 = smov 123  }
  0x26   :  { %s10428_s20 = smov 124   ;;  %s10429_s21 = smov 105  }
  0x27   :  { %964 = vmatpush1.bf16.msra.mxu0 %v9631_v40  ;;  %1007 = vmatpush1.bf16.msra.mxu1 %v9632_v41  ;;  %v9706_v40 = vld [vmem:[%s15942_s0 + $0x328] ss:$44 sps:$4 sm:$0xff]   ;;  %v9709_v41 = vld [vmem:[%s15942_s0 + $0x330] ss:$44 sps:$4 sm:$0xff]  }
  0x28   :  { %965 = vmatprep.subr.bf16.mxu0 %v9633_v42  ;;  %1008 = vmatprep.subr.bf16.mxu1 %v9635_v43  ;;  %v9714_v42 = vld [vmem:[%s15942_s0 + $0x384] ss:$44 sps:$4 sm:$0xff]   ;;  %v9717_v43 = vld [vmem:[%s15942_s0 + $0x38c] ss:$44 sps:$4 sm:$0xff]  }
  0x2b   :  { %966 = vmatpush1.bf16.msra.mxu0 %v9637_v48  ;;  %1009 = vmatpush1.bf16.msra.mxu1 %v9638_v49  ;;  %v9720_v48 = vld [vmem:[%s15942_s0 + $0x3dc] ss:$44 sps:$4 sm:$0xff]   ;;  %v9723_v49 = vld [vmem:[%s15942_s0 + $0x3e4] ss:$44 sps:$4 sm:$0xff]  }
  0x2c   :  { %967 = vmatprep.subr.bf16.mxu0 %v9639_v50  ;;  %1010 = vmatprep.subr.bf16.mxu1 %v9641_v51  ;;  %v8791_v50 = vcombine.high %v191_v44, %v191_v44  ;;  %v8793_v51 = vcombine.high %v192_v45, %v192_v45 }
  0x2e   :  { %v928_v57 = vand.u32 %v8791_v50, %v10691_v54  ;;  %v934_v58 = vand.u32 %v8793_v51, %v10691_v54 }
  0x2f   :  { %968 = vmatpush1.bf16.msra.mxu0 %v9643_v55  ;;  %1011 = vmatpush1.bf16.msra.mxu1 %v9644_v56  ;;  %v8790_v55 = vcombine.low %v191_v44, %v191_v44  ;;  %v8792_v56 = vcombine.low %v192_v45, %v192_v45 }
  0x30   :  { %969 = vmatprep.subr.bf16.mxu0 %v916_v59  ;;  %1012 = vmatprep.subr.bf16.mxu1 %v922_v60 }
  0x31   :  { %v925_v59 = vand.u32 %v8790_v55, %v10691_v54  ;;  %v931_v60 = vand.u32 %v8792_v56, %v10691_v54 }
  0x33   :  { %970 = vmatpush1.bf16.msra.mxu0 %v913_v61  ;;  %1013 = vmatpush1.bf16.msra.mxu1 %v919_v62  ;;  %v9730_v61 = vld [vmem:[%s15942_s0 + $0x24] ss:$44 sps:$4 sm:$0xff]   ;;  %v9728_v62 = vld [vmem:[%s15942_s0 + $0x20] ss:$44 sps:$4 sm:$0xff]  }
  0x34   :  { %1031 = vmatprep.subr.bf16.mxu0 %v9654_v63  ;;  %1074 = vmatprep.subr.bf16.mxu1 %v9657_v0  ;;  %v9731_v63 = vld [vmem:[%s15942_s0 + $0x28] ss:$44 sps:$4 sm:$0xff]  }
  0x35   :  { %v9734_v0 = vld [vmem:[%s15942_s0 + $0x7c] ss:$44 sps:$4 sm:$0xff]  }
  0x36   :  { %978 = vmatmul.mubr.bf16.vlgmr.msra.gmra.mrb[0].mxu0 %v10712_v1  ;;  %1021 = vmatmul.mubr.bf16.vlgmr.msra.gmra.mrb[0].mxu1 %v10712_v1 }
  0x37   :  { %1032 = vmatpush1.bf16.msra.mxu0 %v9652_v3  ;;  %1075 = vmatpush1.bf16.msra.mxu1 %v9655_v4  ;;  %v9732_v3 = vld [vmem:[%s15942_s0 + $0x78] ss:$44 sps:$4 sm:$0xff]   ;;  %v9735_v4 = vld [vmem:[%s15942_s0 + $0x80] ss:$44 sps:$4 sm:$0xff]  }
  0x38   :  { %1033 = vmatprep.subr.bf16.mxu0 %v9660_v5  ;;  %1076 = vmatprep.subr.bf16.mxu1 %v9663_v6  ;;  %v9738_v5 = vld [vmem:[%s15942_s0 + $0xd4] ss:$44 sps:$4 sm:$0xff]   ;;  %v9736_v6 = vld [vmem:[%s15942_s0 + $0xd0] ss:$44 sps:$4 sm:$0xff]  }
  0x39   :  { %8799 = vmatprep.mubr.msk.bf16.mxu0 %vm15978_vm0, %v10654_v39  ;;  %8800 = vmatprep.mubr.msk.bf16.mxu1 %vm15978_vm0, %v10654_v39 }
  0x3b   :  { %1034 = vmatpush1.bf16.msra.mxu0 %v9658_v7  ;;  %1077 = vmatpush1.bf16.msra.mxu1 %v9661_v8  ;;  %v9739_v7 = vld [vmem:[%s15942_s0 + $0xd8] ss:$44 sps:$4 sm:$0xff]  }
  0x3c   :  { %1035 = vmatprep.subr.bf16.mxu0 %v9666_v9  ;;  %1078 = vmatprep.subr.bf16.mxu1 %v9669_v10  ;;  %v9742_v8 = vld [vmem:[%s15942_s0 + $0x12c] ss:$44 sps:$4 sm:$0xff]   ;;  %v9743_v9 = vld [vmem:[%s15942_s0 + $0x130] ss:$44 sps:$4 sm:$0xff]  }
  0x3d   :  { %v9746_v10 = vld [vmem:[%s15942_s0 + $0x184] ss:$44 sps:$4 sm:$0xff]  }
  0x3f   :  { %1036 = vmatpush1.bf16.msra.mxu0 %v9664_v11  ;;  %1079 = vmatpush1.bf16.msra.mxu1 %v9667_v12  ;;  %v9744_v11 = vld [vmem:[%s15942_s0 + $0x180] ss:$44 sps:$4 sm:$0xff]   ;;  %v9747_v12 = vld [vmem:[%s15942_s0 + $0x188] ss:$44 sps:$4 sm:$0xff]  }
  0x40   :  { %1037 = vmatprep.subr.bf16.mxu0 %v9672_v13  ;;  %1080 = vmatprep.subr.bf16.mxu1 %v9675_v14  ;;  %v9750_v13 = vld [vmem:[%s15942_s0 + $0x1dc] ss:$44 sps:$4 sm:$0xff]   ;;  %v9748_v14 = vld [vmem:[%s15942_s0 + $0x1d8] ss:$44 sps:$4 sm:$0xff]  }
  0x43   :  { %1038 = vmatpush1.bf16.msra.mxu0 %v9670_v15  ;;  %1081 = vmatpush1.bf16.msra.mxu1 %v9673_v16  ;;  %v9751_v15 = vld [vmem:[%s15942_s0 + $0x1e0] ss:$44 sps:$4 sm:$0xff]  }
  0x44   :  { %1039 = vmatprep.subr.bf16.mxu0 %v9678_v17  ;;  %1082 = vmatprep.subr.bf16.mxu1 %v9681_v18  ;;  %v9754_v16 = vld [vmem:[%s15942_s0 + $0x234] ss:$44 sps:$4 sm:$0xff]   ;;  %v9752_v17 = vld [vmem:[%s15942_s0 + $0x230] ss:$44 sps:$4 sm:$0xff]   ;;  %v9755_v18 = vld [vmem:[%s15942_s0 + $0x238] ss:$44 sps:$4 sm:$0xff]  }
  0x47   :  { %1040 = vmatpush1.bf16.msra.mxu0 %v9676_v19  ;;  %1083 = vmatpush1.bf16.msra.mxu1 %v9679_v20  ;;  %v9758_v19 = vld [vmem:[%s15942_s0 + $0x28c] ss:$44 sps:$4 sm:$0xff]   ;;  %v9756_v20 = vld [vmem:[%s15942_s0 + $0x288] ss:$44 sps:$4 sm:$0xff]  }
  0x48   :  { %1041 = vmatprep.subr.bf16.mxu0 %v9684_v21  ;;  %1084 = vmatprep.subr.bf16.mxu1 %v9687_v22  ;;  %v9759_v21 = vld [vmem:[%s15942_s0 + $0x290] ss:$44 sps:$4 sm:$0xff]  }
  0x49   :  { %v9762_v22 = vld [vmem:[%s15942_s0 + $0x2e4] ss:$44 sps:$4 sm:$0xff]  }
  0x4b   :  { %1042 = vmatpush1.bf16.msra.mxu0 %v9682_v23  ;;  %1085 = vmatpush1.bf16.msra.mxu1 %v9685_v24  ;;  %v9760_v23 = vld [vmem:[%s15942_s0 + $0x2e0] ss:$44 sps:$4 sm:$0xff]   ;;  %v9763_v24 = vld [vmem:[%s15942_s0 + $0x2e8] ss:$44 sps:$4 sm:$0xff]  }
  0x4c   :  { %1043 = vmatprep.subr.bf16.mxu0 %v9690_v25  ;;  %1086 = vmatprep.subr.bf16.mxu1 %v9693_v26  ;;  %v9766_v25 = vld [vmem:[%s15942_s0 + $0x33c] ss:$44 sps:$4 sm:$0xff]   ;;  %v9764_v26 = vld [vmem:[%s15942_s0 + $0x338] ss:$44 sps:$4 sm:$0xff]  }
  0x4f   :  { %1044 = vmatpush1.bf16.msra.mxu0 %v9688_v27  ;;  %1087 = vmatpush1.bf16.msra.mxu1 %v9691_v28  ;;  %v9767_v27 = vld [vmem:[%s15942_s0 + $0x340] ss:$44 sps:$4 sm:$0xff]  }
  0x50   :  { %1045 = vmatprep.subr.bf16.mxu0 %v9696_v29  ;;  %1088 = vmatprep.subr.bf16.mxu1 %v9699_v30  ;;  %v9770_v28 = vld [vmem:[%s15942_s0 + $0x394] ss:$44 sps:$4 sm:$0xff]   ;;  %v9768_v30 = vld [vmem:[%s15942_s0 + $0x390] ss:$44 sps:$4 sm:$0xff]  }
  0x51   :  { %v193_v29 = vld [vmem:[%s15942_s0 + $0x440] sm:$0x77] }
  0x53   :  { %1046 = vmatpush1.bf16.msra.mxu0 %v9694_v31  ;;  %1089 = vmatpush1.bf16.msra.mxu1 %v9697_v32  ;;  %v9771_v31 = vld [vmem:[%s15942_s0 + $0x398] ss:$44 sps:$4 sm:$0xff]  }
  0x54   :  { %1047 = vmatprep.subr.bf16.mxu0 %v9702_v33  ;;  %1090 = vmatprep.subr.bf16.mxu1 %v9705_v34  ;;  %v9774_v32 = vld [vmem:[%s15942_s0 + $0x3ec] ss:$44 sps:$4 sm:$0xff]   ;;  %v8795_v33 = vcombine.high %v193_v29, %v193_v29  ;;  %v9772_v34 = vld [vmem:[%s15942_s0 + $0x3e8] ss:$44 sps:$4 sm:$0xff]  }
  0x57   :  { %1048 = vmatpush1.bf16.msra.mxu0 %v9700_v35  ;;  %1091 = vmatpush1.bf16.msra.mxu1 %v9703_v36  ;;  %v9775_v35 = vld [vmem:[%s15942_s0 + $0x3f0] ss:$44 sps:$4 sm:$0xff]   ;;  %v8794_v36 = vcombine.low %v193_v29, %v193_v29 }
  0x58   :  { %1049 = vmatprep.subr.bf16.mxu0 %v9708_v37  ;;  %1092 = vmatprep.subr.bf16.mxu1 %v9711_v38  ;;  %v9778_v37 = vld [vmem:[%s15942_s0 + $0x448] ss:$0 sps:$4 sm:$0x77]   ;;  %v940_v38 = vand.u32 %v8795_v33, %v10691_v54 }
  0x5b   :  { %1050 = vmatpush1.bf16.msra.mxu0 %v9706_v40  ;;  %1093 = vmatpush1.bf16.msra.mxu1 %v9709_v41  ;;  %v937_v40 = vand.u32 %v8794_v36, %v10691_v54  ;;  %v943_v41 = vand.u32 %v9778_v37, %v10691_v54 }
  0x5c   :  { %1051 = vmatprep.subr.bf16.mxu0 %v9714_v42  ;;  %1094 = vmatprep.subr.bf16.mxu1 %v9717_v43 }
  0x5f   :  { %1052 = vmatpush1.bf16.msra.mxu0 %v9712_v46  ;;  %1095 = vmatpush1.bf16.msra.mxu1 %v9715_v47 }
  0x60   :  { %1053 = vmatprep.subr.bf16.mxu0 %v9720_v48  ;;  %1096 = vmatprep.subr.bf16.mxu1 %v9723_v49 }
  0x63   :  { %1054 = vmatpush1.bf16.msra.mxu0 %v9718_v52  ;;  %1097 = vmatpush1.bf16.msra.mxu1 %v9721_v53 }
  0x64   :  { %1055 = vmatprep.subr.bf16.mxu0 %v928_v57  ;;  %1098 = vmatprep.subr.bf16.mxu1 %v934_v58 }
  0x67   :  { %1056 = vmatpush1.bf16.msra.mxu0 %v925_v59  ;;  %1099 = vmatpush1.bf16.msra.mxu1 %v931_v60 }
  0x68   :  { %1117 = vmatprep.subr.bf16.mxu0 %v9730_v61  ;;  %1160 = vmatprep.subr.bf16.mxu1 %v15980_v2 }
  0x6a   :  { %1064 = vmatmul.mubr.bf16.vlgmr.msra.gmra.mrb[4].mxu0 %v10712_v1  ;;  %1107 = vmatmul.mubr.bf16.vlgmr.msra.gmra.mrb[4].mxu1 %v10712_v1 }
  0x6b   :  { %1118 = vmatpush1.bf16.msra.mxu0 %v9728_v62  ;;  %1161 = vmatpush1.bf16.msra.mxu1 %v9731_v63 }
  0x6c   :  { %1119 = vmatprep.subr.bf16.mxu0 %v9734_v0  ;;  %1162 = vmatprep.subr.bf16.mxu1 %v15980_v2 }
  0x6d   :  { %8801 = vmatprep.mubr.msk.bf16.mxu0 %vm15978_vm0, %v10654_v39  ;;  %8802 = vmatprep.mubr.msk.bf16.mxu1 %vm15978_vm0, %v10654_v39  ;;  %v9740_v39 = vld [vmem:[%s15942_s0 + $0x128] ss:$44 sps:$4 sm:$0xff]   ;;  %s10410_s0 = smov 127  }
  0x6f   :  { %1120 = vmatpush1.bf16.msra.mxu0 %v9732_v3  ;;  %1163 = vmatpush1.bf16.msra.mxu1 %v9735_v4 }
  0x70   :  { %1121 = vmatprep.subr.bf16.mxu0 %v9738_v5  ;;  %1164 = vmatprep.subr.bf16.mxu1 %v15980_v2 }
  0x73   :  { %1122 = vmatpush1.bf16.msra.mxu0 %v9736_v6  ;;  %1165 = vmatpush1.bf16.msra.mxu1 %v9739_v7 }
  0x74   :  { %1123 = vmatprep.subr.bf16.mxu0 %v9742_v8  ;;  %1166 = vmatprep.subr.bf16.mxu1 %v15980_v2 }
  0x77   :  { %1124 = vmatpush1.bf16.msra.mxu0 %v9740_v39  ;;  %1167 = vmatpush1.bf16.msra.mxu1 %v9743_v9 }
  0x78   :  { %1125 = vmatprep.subr.bf16.mxu0 %v9746_v10  ;;  %1168 = vmatprep.subr.bf16.mxu1 %v15980_v2 }
  0x7b   :  { %1126 = vmatpush1.bf16.msra.mxu0 %v9744_v11  ;;  %1169 = vmatpush1.bf16.msra.mxu1 %v9747_v12 }
  0x7c   :  { %1127 = vmatprep.subr.bf16.mxu0 %v9750_v13  ;;  %1170 = vmatprep.subr.bf16.mxu1 %v15980_v2 }
  0x7f   :  { %1128 = vmatpush1.bf16.msra.mxu0 %v9748_v14  ;;  %1171 = vmatpush1.bf16.msra.mxu1 %v9751_v15 }
  0x80   :  { %1129 = vmatprep.subr.bf16.mxu0 %v9754_v16  ;;  %1172 = vmatprep.subr.bf16.mxu1 %v15980_v2 }
  0x83   :  { %1130 = vmatpush1.bf16.msra.mxu0 %v9752_v17  ;;  %1173 = vmatpush1.bf16.msra.mxu1 %v9755_v18 }
  0x84   :  { %1131 = vmatprep.subr.bf16.mxu0 %v9758_v19  ;;  %1174 = vmatprep.subr.bf16.mxu1 %v15980_v2 }
  0x87   :  { %1132 = vmatpush1.bf16.msra.mxu0 %v9756_v20  ;;  %1175 = vmatpush1.bf16.msra.mxu1 %v9759_v21 }
  0x88   :  { %1133 = vmatprep.subr.bf16.mxu0 %v9762_v22  ;;  %1176 = vmatprep.subr.bf16.mxu1 %v15980_v2 }
  0x8b   :  { %1134 = vmatpush1.bf16.msra.mxu0 %v9760_v23  ;;  %1177 = vmatpush1.bf16.msra.mxu1 %v9763_v24 }
  0x8c   :  { %1135 = vmatprep.subr.bf16.mxu0 %v9766_v25  ;;  %1178 = vmatprep.subr.bf16.mxu1 %v15980_v2 }
  0x8f   :  { %1136 = vmatpush1.bf16.msra.mxu0 %v9764_v26  ;;  %1179 = vmatpush1.bf16.msra.mxu1 %v9767_v27 }
  0x90   :  { %1137 = vmatprep.subr.bf16.mxu0 %v9770_v28  ;;  %1180 = vmatprep.subr.bf16.mxu1 %v15980_v2 }
  0x93   :  { %1138 = vmatpush1.bf16.msra.mxu0 %v9768_v30  ;;  %1181 = vmatpush1.bf16.msra.mxu1 %v9771_v31 }
  0x94   :  { %1139 = vmatprep.subr.bf16.mxu0 %v9774_v32  ;;  %1182 = vmatprep.subr.bf16.mxu1 %v15980_v2 }
  0x97   :  { %1140 = vmatpush1.bf16.msra.mxu0 %v9772_v34  ;;  %1183 = vmatpush1.bf16.msra.mxu1 %v9775_v35 }
  0x98   :  { %1141 = vmatprep.subr.bf16.mxu0 %v940_v38  ;;  %1184 = vmatprep.subr.bf16.mxu1 %v15980_v2 }
  0x9b   :  { %1142 = vmatpush1.bf16.msra.mxu0 %v937_v40  ;;  %1185 = vmatpush1.bf16.msra.mxu1 %v943_v41 }
  0x9e   :  { %1150 = vmatmul.mubr.bf16.vlgmr.msra.gmra.mrb[8].mxu0 %v10712_v1  ;;  %1193 = vmatmul.mubr.bf16.vlgmr.msra.gmra.mrb[8].mxu1 %v10712_v1 }
 0x109   :  { %v979_v42 = vpop.f32.mrb[0].mxu0  ;;  %v1022_v43 = vpop.f32.mrb[0].mxu1 }
 0x10a   :  { %vm1201_vm3 = vcmp.ge.f32.partialorder %v979_v42, 0.0  ;;  %v1223_v44 = vmul.f32 0.2, %v979_v42  ;;  %v1225_v45 = vmul.f32 0.2, %v1022_v43  ;;  %vm1203_vm4 = vcmp.ge.f32.partialorder %v1022_v43, 0.0 }
 0x10b   :  { %v981_v46 = vpop.f32.mrb[1].mxu0  ;;  %v1024_v47 = vpop.f32.mrb[1].mxu1 }
 0x10c   :  { %v1245_v48 = vsel %vm1201_vm3, %v979_v42, %v1223_v44  ;;  %v1224_v49 = vmul.f32 0.2, %v981_v46  ;;  %v983_v54 = vpop.f32.mrb[2].mxu0  ;;  %v1026_v50 = vpop.f32.mrb[2].mxu1  ;;  %vm1204_vm5 = vcmp.ge.f32.partialorder %v1024_v47, 0.0  ;;  %v1247_v53 = vsel %vm1203_vm4, %v1022_v43, %v1225_v45 }
 0x10d   :  { %v1226_v51 = vmul.f32 0.2, %v1024_v47  ;;  %vm1212_vm6 = vcmp.ge.f32.partialorder %v983_v54, 0.0  ;;  %v1234_v52 = vmul.f32 0.2, %v983_v54  ;;  %vm1202_vm7 = vcmp.ge.f32.partialorder %v981_v46, 0.0 }
 0x10e   :  { %vm1214_vm8 = vcmp.ge.f32.partialorder %v1026_v50, 0.0  ;;  %v1236_v1 = vmul.f32 0.2, %v1026_v50  ;;  %v985_v55 = vpop.f32.mrb[3].mxu0  ;;  %v1028_v56 = vpop.f32.mrb[3].mxu1  ;;  %v1246_v63 = vsel %vm1202_vm7, %v981_v46, %v1224_v49 }
 0x10f   :  { %v1248_v57 = vsel %vm1204_vm5, %v1024_v47, %v1226_v51  ;;  %v1256_v58 = vsel %vm1212_vm6, %v983_v54, %v1234_v52  ;;  %vm1213_vm9 = vcmp.ge.f32.partialorder %v985_v55, 0.0  ;;  %v1235_v59 = vmul.f32 0.2, %v985_v55 }
 0x110   :  { %v11006_v60 = vpack.c.bf16 %v1256_v58, %v1245_v48  ;;  %v1258_v61 = vsel %vm1214_vm8, %v1026_v50, %v1236_v1  ;;  %vm1215_vm10 = vcmp.ge.f32.partialorder %v1028_v56, 0.0  ;;  %v1237_v62 = vmul.f32 0.2, %v1028_v56 }
 0x111   :  { %v11008_v0 = vpack.c.bf16 %v1258_v61, %v1247_v53  ;;  %v1257_v3 = vsel %vm1213_vm9, %v985_v55, %v1235_v59 }
 0x112   :  { %v11010_v4 = vpack.c.bf16 %v1257_v3, %v1246_v63  ;;  %v1259_v5 = vsel %vm1215_vm10, %v1028_v56, %v1237_v62  ;;  %1314 = vrot.lane.b32.xlu1 %v11006_v60, %s10410_s0 }
 0x113   :  { %v11014_v6 = vpack.c.bf16 %v1259_v5, %v1248_v57  ;;  %1296 = vrot.lane.b32.xlu0 %v11008_v0, %s10411_s22 }
 0x116   :  { %1351 = vrot.lane.b32.xlu1 %v11008_v0, %s10412_s23 }
 0x117   :  { %1334 = vrot.lane.b32.xlu0 %v11008_v0, %s15955_s24 }
 0x11a   :  { %1439 = vrot.lane.b32.xlu1 %v11006_v60, %s10414_s25 }
 0x11b   :  { %1397 = vrot.lane.b32.xlu0 %v11008_v0, %s10415_s26 }
 0x11e   :  { %1294 = vrot.lane.b32.xlu1 %v11010_v4, %s10411_s22  ;;  %s10430_s22 = smov 114  }
 0x11f   :  { %1459 = vrot.lane.b32.xlu0 %v11008_v0, %s10416_s27 }
 0x122   :  { %1332 = vrot.lane.b32.xlu1 %v11010_v4, %s15955_s24  ;;  %s16164_s24 = smov 112  }
 0x123   :  { %1316 = vrot.lane.b32.xlu0 %v11010_v4, %s10410_s0 }
 0x126   :  { %1399 = vrot.lane.b32.xlu1 %v11014_v6, %s10415_s26  ;;  %s10433_s26 = smov 24  }
 0x127   :  { %1353 = vrot.lane.b32.xlu0 %v11014_v6, %s10412_s23  ;;  %s10431_s23 = smov 64  }
 0x12a   :  { %1418 = vrot.lane.b32.xlu1 %v11014_v6, %s10417_s28 }
 0x12b   :  { %1375 = vrot.lane.b32.xlu0 %v11014_v6, %s10418_s1 }
 0x12e   :  { %1457 = vrot.lane.b32.xlu1 %v11010_v4, %s10416_s27  ;;  %s10434_s27 = smov 33  }
 0x12f   :  { %1441 = vrot.lane.b32.xlu0 %v11010_v4, %s10414_s25  ;;  %s10432_s25 = smov 73  }
 0x13d   :  { %v1065_v7 = vpop.f32.mrb[4].mxu0  ;;  %v1108_v8 = vpop.f32.mrb[4].mxu1 }
 0x13e   :  { %vm1205_vm11 = vcmp.ge.f32.partialorder %v1065_v7, 0.0  ;;  %v1227_v39 = vmul.f32 0.2, %v1065_v7  ;;  %v1229_v9 = vmul.f32 0.2, %v1108_v8  ;;  %vm1207_vm12 = vcmp.ge.f32.partialorder %v1108_v8, 0.0 }
 0x13f   :  { %v1067_v10 = vpop.f32.mrb[5].mxu0  ;;  %v1110_v11 = vpop.f32.mrb[5].mxu1 }
 0x140   :  { %v1249_v12 = vsel %vm1205_vm11, %v1065_v7, %v1227_v39  ;;  %v1228_v13 = vmul.f32 0.2, %v1067_v10  ;;  %v1069_v14 = vpop.f32.mrb[6].mxu0  ;;  %v1112_v15 = vpop.f32.mrb[6].mxu1  ;;  %vm1208_vm13 = vcmp.ge.f32.partialorder %v1110_v11, 0.0  ;;  %v1251_v18 = vsel %vm1207_vm12, %v1108_v8, %v1229_v9 }
 0x141   :  { %v1230_v16 = vmul.f32 0.2, %v1110_v11  ;;  %vm1216_vm14 = vcmp.ge.f32.partialorder %v1069_v14, 0.0  ;;  %v1238_v17 = vmul.f32 0.2, %v1069_v14  ;;  %vm1206_vm15 = vcmp.ge.f32.partialorder %v1067_v10, 0.0 }
 0x142   :  { %vm1218_vm1 = vcmp.ge.f32.partialorder %v1112_v15, 0.0  ;;  %v1240_v19 = vmul.f32 0.2, %v1112_v15  ;;  %v1071_v20 = vpop.f32.mrb[7].mxu0  ;;  %v1114_v21 = vpop.f32.mrb[7].mxu1  ;;  %v1250_v28 = vsel %vm1206_vm15, %v1067_v10, %v1228_v13  ;;  %vm1306_vm11 = vcmask 637952  }
 0x143   :  { %v1252_v22 = vsel %vm1208_vm13, %v1110_v11, %v1230_v16  ;;  %v1260_v23 = vsel %vm1216_vm14, %v1069_v14, %v1238_v17  ;;  %vm1217_vm3 = vcmp.ge.f32.partialorder %v1071_v20, 0.0  ;;  %v1239_v24 = vmul.f32 0.2, %v1071_v20  ;;  %v9781_v39 = vld [vmem:[%s15944_s2 + $0x4] ss:$8 sps:$4 sm:$0xff]  }
 0x144   :  { %v11036_v25 = vpack.c.bf16 %v1260_v23, %v1249_v12  ;;  %v1262_v26 = vsel %vm1218_vm1, %v1112_v15, %v1240_v19  ;;  %vm1219_vm4 = vcmp.ge.f32.partialorder %v1114_v21, 0.0  ;;  %v1241_v27 = vmul.f32 0.2, %v1114_v21  ;;  %1660 = vmatprep.mubr.bf16.mxu0 %v9781_v39  ;;  %1713 = vmatprep.mubr.bf16.mxu1 %v9781_v39  ;;  %v1584_v17 = vld [vmem:[%s15945_s3] sm:$0xff]  ;;  %v1586_v19 = vld [vmem:[%s15945_s3 + $0x10] sm:$0xff] }
 0x145   :  { %v11038_v29 = vpack.c.bf16 %v1262_v26, %v1251_v18  ;;  %v1261_v30 = vsel %vm1217_vm3, %v1071_v20, %v1239_v24  ;;  %v1585_v18 = vld [vmem:[%s15945_s3 + $0x8] sm:$0xff]  ;;  %vm1284_vm12 = vcmask 973824   ;;  %vm1287_vm13 = vcmask 220160  }
 0x146   :  { %v11040_v31 = vpack.c.bf16 %v1261_v30, %v1250_v28  ;;  %v1263_v32 = vsel %vm1219_vm4, %v1114_v21, %v1241_v27  ;;  %vm1325_vm14 = vcmask 965632   ;;  %vm1298_vm15 = vcmask 711680  }
 0x147   :  { %v11042_v33 = vpack.c.bf16 %v1263_v32, %v1252_v22  ;;  %1282 = vrot.lane.b32.xlu0 %v11038_v29, %s10419_s29  ;;  %1302 = vrot.lane.b32.xlu1 %v11038_v29, %s10420_s30  ;;  %v1587_v22 = vld [vmem:[%s15945_s3 + $0x18] sm:$0xff]  ;;  %vm1343_vm1 = vcmask 629760   ;;  %vm1318_vm3 = vcmask 1039360   ;;  %vm15959_vm4 = vcmask 703488   ;;  %s16202_s3 = smov 113  }
 0x14b   :  { %1339 = vrot.lane.b32.xlu0 %v11038_v29, %s10421_s13  ;;  %1323 = vrot.lane.b32.xlu1 %v11038_v29, %s10422_s14 }
 0x14f   :  { %1420 = vrot.lane.b32.xlu1 %v11036_v25, %s10417_s28  ;;  %1377 = vrot.lane.b32.xlu0 %v11036_v25, %s10418_s1 }
 0x153   :  { %1448 = vrot.lane.b32.xlu1 %v11038_v29, %s10423_s15  ;;  %1464 = vrot.lane.b32.xlu0 %v11038_v29, %s10424_s16 }
 0x157   :  { %1304 = vrot.lane.b32.xlu1 %v11042_v33, %s10420_s30  ;;  %1280 = vrot.lane.b32.xlu0 %v11040_v31, %s10419_s29  ;;  %s15967_s30 = smov 111  }
 0x15b   :  { %1341 = vrot.lane.b32.xlu1 %v11042_v33, %s10421_s13  ;;  %1321 = vrot.lane.b32.xlu0 %v11040_v31, %s10422_s14  ;;  %s10446_s13 = smov 83   ;;  %s16038_s14 = smov 113  }
 0x15f   :  { %1379 = vrot.lane.b32.xlu1 %v11040_v31, %s10418_s1  ;;  %1360 = vrot.lane.b32.xlu0 %v11042_v33, %s10425_s17  ;;  %s10436_s1 = smov 32  }
 0x163   :  { %1404 = vrot.lane.b32.xlu1 %v11042_v33, %s10426_s18  ;;  %1422 = vrot.lane.b32.xlu0 %v11040_v31, %s10417_s28  ;;  %s10435_s28 = smov 120  }
 0x167   :  { %1466 = vrot.lane.b32.xlu1 %v11042_v33, %s10424_s16  ;;  %1446 = vrot.lane.b32.xlu0 %v11040_v31, %s10423_s15  ;;  %s10438_s15 = smov 23   ;;  %s10439_s16 = smov 110  }
 0x171   :  { %v1151_v34 = vpop.f32.mrb[8].mxu0  ;;  %v1194_v35 = vpop.f32.mrb[8].mxu1 }
 0x172   :  { %v1231_v36 = vmul.f32 0.2, %v1151_v34  ;;  %vm1211_vm5 = vcmp.ge.f32.partialorder %v1194_v35, 0.0  ;;  %v1233_v37 = vmul.f32 0.2, %v1194_v35  ;;  %vm1209_vm6 = vcmp.ge.f32.partialorder %v1151_v34, 0.0 }
 0x173   :  { %v1153_v38 = vpop.f32.mrb[9].mxu0  ;;  %v1196_v40 = vpop.f32.mrb[9].mxu1 }
 0x174   :  { %v1255_v41 = vsel %vm1211_vm5, %v1194_v35, %v1233_v37  ;;  %v1232_v42 = vmul.f32 0.2, %v1153_v38  ;;  %v1155_v43 = vpop.f32.mrb[10].mxu0  ;;  %v1197_v44 = vpop.f32.mrb[10].mxu1  ;;  %v1253_v47 = vsel %vm1209_vm6, %v1151_v34, %v1231_v36  ;;  %vm1210_vm9 = vcmp.ge.f32.partialorder %v1153_v38, 0.0 }
 0x175   :  { %vm1220_vm7 = vcmp.ge.f32.partialorder %v1155_v43, 0.0  ;;  %v1242_v45 = vmul.f32 0.2, %v1155_v43  ;;  %vm1222_vm8 = vcmp.ge.f32.partialorder %v1197_v44, 0.0  ;;  %v1244_v46 = vmul.f32 0.2, %v1197_v44 }
 0x176   :  { %v1157_v48 = vpop.f32.mrb[11].mxu0  ;;  %v1199_v49 = vpop.f32.mrb[11].mxu1  ;;  %v1254_v1 = vsel %vm1210_vm9, %v1153_v38, %v1232_v42  ;;  %vm1366_vm5 = vcmask 302080   ;;  %vm15957_vm6 = vcmask 375808   ;;  %vm1381_vm9 = vcmask 39936  }
 0x177   :  { %v1264_v54 = vsel %vm1220_vm7, %v1155_v43, %v1242_v45  ;;  %v1266_v50 = vsel %vm1222_vm8, %v1197_v44, %v1244_v46  ;;  %vm1221_vm10 = vcmp.ge.f32.partialorder %v1157_v48, 0.0  ;;  %v1243_v51 = vmul.f32 0.2, %v1157_v48 }
 0x178   :  { %v1275_v52 = vpack.c.bf16 %v1264_v54, %v1253_v47  ;;  %v1277_v53 = vpack.c.bf16 %v1266_v50, %v1255_v41  ;;  %vm1410_vm7 = vcmask 293888   ;;  %vm1390_vm8 = vcmask 1014784  }
 0x179   :  { %v1265_v55 = vsel %vm1221_vm10, %v1157_v48, %v1243_v51  ;;  %vm1401_vm10 = vcmask 367616  }
 0x17a   :  { %v11070_v56 = vpack.c.bf16 %v1265_v55, %v1254_v1  ;;  %1406 = vrot.lane.b32.xlu0 %v1275_v52, %s10426_s18  ;;  %1362 = vrot.lane.b32.xlu1 %v1275_v52, %s10425_s17 }
 0x17e   :  { %1430 = vrot.lane.b32.xlu0 %v1277_v53, %s10427_s19  ;;  %1388 = vrot.lane.b32.xlu1 %v1277_v53, %s10428_s20 }
 0x182   :  { %1484 = vrot.lane.b32.xlu1 %v11038_v29, %s10429_s21  ;;  %1386 = vrot.lane.b32.xlu0 %v11070_v56, %s10428_s20  ;;  %s15973_s20 = smov 99  }
 0x184   :  { %v11084_v58 = vpop.permute.xlu1 %1314 }
 0x185   :  { %v11082_v57 = vpop.permute.xlu0 %1296 }
 0x186   :  { %1475 = vrot.lane.b32.xlu1 %v11006_v60, %s10430_s22  ;;  %1482 = vrot.lane.b32.xlu0 %v11040_v31, %s10429_s21  ;;  %s16087_s21 = smov 68  }
 0x188   :  { %v11090_v61 = vpop.permute.xlu1 %1351 }
 0x189   :  { %v11088_v59 = vpop.permute.xlu0 %1334 }
 0x18a   :  { %1428 = vrot.lane.b32.xlu1 %v11070_v56, %s10427_s19  ;;  %1477 = vrot.lane.b32.xlu0 %v11010_v4, %s10430_s22  ;;  %s16028_s19 = smov 69  }
 0x18c   :  { %v11098_v63 = vpop.permute.xlu1 %1439 }
 0x18d   :  { %v11096_v62 = vpop.permute.xlu0 %1397 }
 0x18e   :  { %1502 = vrot.lane.b32.xlu1 %v11042_v33, %s10431_s23  ;;  %1500 = vrot.lane.b32.xlu0 %v11038_v29, %s10431_s23  ;;  %s15971_s23 = smov 68  }
 0x190   :  { %v11104_v5 = vpop.permute.xlu1 %1294 }
 0x191   :  { %v11102_v3 = vpop.permute.xlu0 %1459  ;;  %v1299_v34 = vsel %vm1298_vm15, %v11104_v5, %v11082_v57  ;;  %vm1424_vm15 = vcmask 31744  }
 0x192   :  { %1493 = vrot.lane.b32.xlu1 %v11010_v4, %s10432_s25  ;;  %1495 = vrot.lane.b32.xlu0 %v11008_v0, %s10432_s25  ;;  %s15969_s25 = smov 90  }
 0x194   :  { %v11113_v8 = vpop.permute.xlu1 %1332 }
 0x195   :  { %v11111_v7 = vpop.permute.xlu0 %1316  ;;  %v1337_v40 = vsel %vm15959_vm4, %v11113_v8, %v11088_v59  ;;  %vm16008_vm4 = vcmask 670720  }
 0x196   :  { %1518 = vrot.lane.b32.xlu1 %v1275_v52, %s10433_s26  ;;  %1513 = vrot.lane.b32.xlu0 %v11014_v6, %s10434_s27 }
 0x198   :  { %v11121_v9 = vpop.permute.xlu1 %1399 }
 0x199   :  { %v1402_v5 = vsel %vm1401_vm10, %v11096_v62, %v11121_v9  ;;  %vm1486_vm10 = vcmask 859136  }
 0x19a   :  { %1531 = vrot.lane.b32.xlu1 %v11040_v31, %s10435_s28  ;;  %1511 = vrot.lane.b32.xlu0 %v11008_v0, %s10434_s27  ;;  %s16040_s27 = smov 97  }
 0x19e   :  { %1549 = vrot.lane.b32.xlu1 %v11014_v6, %s10436_s1  ;;  %1538 = vrot.lane.b32.xlu0 %v1277_v53, %s15967_s30  ;;  %v11119_v6 = vpop.permute.xlu0 %1353 }
 0x19f   :  { %v1356_v49 = vsel %vm15957_vm6, %v11090_v61, %v11119_v6  ;;  %vm16005_vm6 = vcmask 572416  }
 0x1a2   :  { %1536 = vrot.lane.b32.xlu1 %v11070_v56, %s15967_s30  ;;  %1529 = vrot.lane.b32.xlu0 %v11036_v25, %s10435_s28  ;;  %v11128_v10 = vpop.permute.xlu0 %1375  ;;  %s10444_s28 = smov 126   ;;  %s16042_s30 = smov 52  }
 0x1a6   :  { %1547 = vrot.lane.b32.xlu1 %v11008_v0, %s10436_s1  ;;  %1554 = vrot.lane.b32.xlu0 %v1275_v52, %s10438_s15  ;;  %v11130_v0 = vpop.permute.xlu1 %1418  ;;  %v11135_v11 = vpop.permute.xlu0 %1441  ;;  %s10445_s1 = smov 84  }
 0x1aa   :  { %1571 = vrot.lane.b32.xlu1 %v1277_v53, %s10439_s16  ;;  %1569 = vrot.lane.b32.xlu0 %v11070_v56, %s10439_s16  ;;  %v11137_v12 = vpop.permute.xlu1 %1457  ;;  %s16032_s16 = smov 112  }
 0x1ae   :  { %1520 = vrot.lane.b32.xlu1 %v11070_v56, %s10433_s26  ;;  %1565 = vrot.lane.b32.xlu0 %v11036_v25, %s10419_s29  ;;  %s16034_s26 = smov 100   ;;  %s16030_s29 = smov 70  }
 0x1b2   :  { %1556 = vrot.lane.b32.xlu1 %v11070_v56, %s10438_s15  ;;  %1364 = vrot.lane.b32.xlu0 %v11070_v56, %s10425_s17  ;;  %s16036_s15 = smov 82   ;;  %s16203_s17 = smov 82  }
 0x1b6   :  { %1408 = vrot.lane.b32.xlu0 %v11070_v56, %s10426_s18  ;;  %1590 = vperm.xlu1 %9571, %v1584_v17   ;;  %s16166_s18 = smov 69  }
 0x1b9   :  { %v1283_v13 = vpop.permute.xlu0 %1282  ;;  %v1303_v14 = vpop.permute.xlu1 %1302 }
 0x1ba   :  { %1595 = vperm.xlu0 %9572, %v1585_v18   ;;  %1600 = vperm.xlu1 %9571, %v1586_v19  }
 0x1bd   :  { %v1340_v15 = vpop.permute.xlu0 %1339  ;;  %v11141_v16 = vpop.permute.xlu1 %1323 }
 0x1be   :  { %1605 = vperm.xlu1 %9571, %v1587_v22  }
 0x1c1   :  { %v11152_v20 = vpop.permute.xlu1 %1420  ;;  %v11154_v21 = vpop.permute.xlu0 %1377 }
 0x1c5   :  { %v11159_v23 = vpop.permute.xlu1 %1448  ;;  %v11161_v24 = vpop.permute.xlu0 %1464 }
 0x1c6   :  { %9123 = vmatprep.subr.bf16.mxu1 %v11159_v23 }
 0x1c7   :  { %9124 = vmatpush3.bf16.msra.mxu1 %v1283_v13 }
 0x1c9   :  { %v1305_v25 = vpop.permute.xlu1 %1304  ;;  %v11164_v26 = vpop.permute.xlu0 %1280 }
 0x1ca   :  { %v1307_v27 = vsel %vm1306_vm11, %v1303_v14, %v1305_v25  ;;  %v1285_v28 = vsel %vm1284_vm12, %v11164_v26, %v1283_v13  ;;  %vm1450_vm11 = vcmask 867328   ;;  %v1425_v14 = vsel %vm1424_vm15, %v11130_v0, %v11152_v20 }
 0x1cb   :  { %v1290_v29 = vsel %vm1287_vm13, %v11010_v4, %v1285_v28  ;;  %v1311_v32 = vsel %vm1287_vm13, %v11082_v57, %v1307_v27  ;;  %v1382_v57 = vsel %vm1381_vm9, %v11128_v10, %v11154_v21 }
 0x1cc   :  { %1628 = vmatprep.subr.bf16.mxu0 %v1290_v29 }
 0x1cd   :  { %v11170_v30 = vpop.permute.xlu1 %1341  ;;  %1629 = vmatpush1.bf16.msra.mxu0 %v11006_v60  ;;  %v1322_v31 = vpop.permute.xlu0 %1321  ;;  %v1319_v60 = vsel %vm1318_vm3, %v11084_v58, %v11111_v7 }
 0x1ce   :  { %v1326_v33 = vsel %vm1325_vm14, %v1322_v31, %v11141_v16  ;;  %1630 = vmatprep.subr.bf16.mxu0 %v1311_v32  ;;  %v1344_v36 = vsel %vm1343_vm1, %v1340_v15, %v11170_v30  ;;  %vm1432_vm14 = vcmask 1006592   ;;  %vm1468_vm1 = vcmask 531456  }
 0x1cf   :  { %v1330_v4 = vsel %vm1287_vm13, %v11111_v7, %v1326_v33  ;;  %v1348_v38 = vsel %vm1287_vm13, %v11088_v59, %v1344_v36 }
 0x1d1   :  { %v1380_v35 = vpop.permute.xlu1 %1379  ;;  %1631 = vmatpush1.bf16.msra.mxu0 %v1299_v34  ;;  %v1361_v42 = vpop.permute.xlu0 %1360 }
 0x1d2   :  { %1632 = vmatprep.subr.bf16.mxu0 %v1330_v4  ;;  %v1383_v53 = vsel %vm1381_vm9, %v11154_v21, %v1380_v35  ;;  %vm1461_vm9 = vcmask 605184  }
 0x1d5   :  { %v1405_v37 = vpop.permute.xlu1 %1404  ;;  %1633 = vmatpush1.bf16.msra.mxu0 %v1319_v60  ;;  %v1423_v43 = vpop.permute.xlu0 %1422 }
 0x1d6   :  { %1634 = vmatprep.subr.bf16.mxu0 %v1348_v38  ;;  %v1426_v39 = vsel %vm1424_vm15, %v11152_v20, %v1423_v43  ;;  %v1462_v20 = vsel %vm1461_vm9, %v11137_v12, %v11102_v3  ;;  %vm1497_vm15 = vcmask 596992   ;;  %vm1533_vm9 = vcmask 982016  }
 0x1d9   :  { %v1467_v41 = vpop.permute.xlu1 %1466  ;;  %1635 = vmatpush1.bf16.msra.mxu0 %v1337_v40  ;;  %v1447_v44 = vpop.permute.xlu0 %1446 }
 0x1da   :  { %9125 = vmatprep.subr.bf16.mxu1 %v1467_v41 }
 0x1db   :  { %9126 = vmatpush3.bf16.msra.mxu1 %v1305_v25 }
 0x1ec   :  { %v11189_v45 = vpop.permute.xlu0 %1406  ;;  %v11191_v46 = vpop.permute.xlu1 %1362 }
 0x1ed   :  { %v1367_v47 = vsel %vm1366_vm5, %v1361_v42, %v11191_v46  ;;  %v1411_v1 = vsel %vm1410_vm7, %v1405_v37, %v11189_v45 }
 0x1ee   :  { %v1372_v48 = vsel %vm1287_vm13, %v11119_v6, %v1367_v47  ;;  %v1416_v61 = vsel %vm1287_vm13, %v11121_v9, %v1411_v1  ;;  %v1451_v6 = vsel %vm1450_vm11, %v1447_v44, %v11159_v23  ;;  %vm1504_vm11 = vcmask 523264   ;;  %v9790_v44 = vld [vmem:[%s15946_s4 + $0xc] ss:$16 sps:$4 sm:$0xff]   ;;  %v9788_v1 = vld [vmem:[%s15946_s4 + $0x8] ss:$16 sps:$4 sm:$0xff]  }
 0x1ef   :  { %1636 = vmatprep.subr.bf16.mxu0 %v1372_v48  ;;  %v1455_v9 = vsel %vm1287_vm13, %v11135_v11, %v1451_v6  ;;  %v9806_v6 = vld [vmem:[%s15946_s4 + $0x68] ss:$16 sps:$4 sm:$0xff]  }
 0x1f0   :  { %v11200_v54 = vpop.permute.xlu0 %1430  ;;  %1637 = vmatpush1.bf16.msra.mxu0 %v1356_v49  ;;  %v11202_v50 = vpop.permute.xlu1 %1388 }
 0x1f4   :  { %v1485_v51 = vpop.permute.xlu1 %1484  ;;  %v1387_v52 = vpop.permute.xlu0 %1386 }
 0x1f5   :  { %v1391_v55 = vsel %vm1390_vm8, %v1387_v52, %v11202_v50  ;;  %9127 = vmatprep.subr.bf16.mxu1 %v1485_v51  ;;  %vm1443_vm8 = vcmask 941056   ;;  %v9779_v52 = vld [vmem:[%s15944_s2] ss:$8 sps:$4 sm:$0xff]  }
 0x1f6   :  { %9128 = vmatpush3.bf16.msra.mxu1 %v11141_v16  ;;  %v1395_v56 = vsel %vm1287_vm13, %v1383_v53, %v1391_v55  ;;  %v1469_v16 = vsel %vm1468_vm1, %v11161_v24, %v1467_v41  ;;  %v1444_v17 = vsel %vm1443_vm8, %v11098_v63, %v11135_v11  ;;  %vm1515_vm1 = vcmask 269312   ;;  %v9782_v53 = vld [vmem:[%s15944_s2 + $0x14] ss:$8 sps:$4 sm:$0xff]  }
 0x1f7   :  { %1638 = vmatprep.subr.bf16.mxu0 %v1395_v56  ;;  %v1473_v19 = vsel %vm1287_vm13, %v11102_v3, %v1469_v16  ;;  %vm15958_vm8 = vcmask 908288   ;;  %v9826_v16 = vld [vmem:[%s15946_s4 + $0xcc] ss:$16 sps:$4 sm:$0xff]  }
 0x1f8   :  { %v1476_v58 = vpop.permute.xlu1 %1475  ;;  %1639 = vmatpush1.bf16.msra.mxu0 %v1382_v57  ;;  %v1483_v59 = vpop.permute.xlu0 %1482 }
 0x1f9   :  { %1640 = vmatprep.subr.bf16.mxu0 %v1416_v61  ;;  %v1487_v21 = vsel %vm1486_vm10, %v1483_v59, %v1485_v51  ;;  %vm15964_vm10 = vcmask 261120   ;;  %v9802_v59 = vld [vmem:[%s15946_s4 + $0x4c] ss:$16 sps:$4 sm:$0xff]  }
 0x1fc   :  { %v1429_v7 = vpop.permute.xlu1 %1428  ;;  %1641 = vmatpush1.bf16.msra.mxu0 %v1402_v5  ;;  %v1478_v8 = vpop.permute.xlu0 %1477 }
 0x1fd   :  { %v1433_v10 = vsel %vm1432_vm14, %v1429_v7, %v11200_v54  ;;  %v1491_v24 = vsel %vm1287_vm13, %v1478_v8, %v1487_v21  ;;  %vm1479_vm14 = vcmask 932864   ;;  %v9800_v7 = vld [vmem:[%s15946_s4 + $0x48] ss:$16 sps:$4 sm:$0xff]   ;;  %v9811_v21 = vld [vmem:[%s15946_s4 + $0x84] ss:$16 sps:$4 sm:$0xff]  }
 0x1fe   :  { %v1437_v13 = vsel %vm1287_vm13, %v1426_v39, %v1433_v10  ;;  %v1480_v11 = vsel %vm1479_vm14, %v1476_v58, %v1478_v8  ;;  %v9794_v58 = vld [vmem:[%s15946_s4 + $0x28] ss:$16 sps:$4 sm:$0xff]   ;;  %v9808_v8 = vld [vmem:[%s15946_s4 + $0x6c] ss:$16 sps:$4 sm:$0xff]  }
 0x1ff   :  { %1642 = vmatprep.subr.bf16.mxu0 %v1437_v13  ;;  %v9814_v10 = vld [vmem:[%s15946_s4 + $0x8c] ss:$16 sps:$4 sm:$0xff]   ;;  %v9793_v13 = vld [vmem:[%s15946_s4 + $0x24] ss:$16 sps:$4 sm:$0xff]  }
 0x200   :  { %v1503_v15 = vpop.permute.xlu1 %1502  ;;  %1643 = vmatpush1.bf16.msra.mxu0 %v1425_v14  ;;  %v1501_v62 = vpop.permute.xlu0 %1500  ;;  %v9812_v14 = vld [vmem:[%s15946_s4 + $0x88] ss:$16 sps:$4 sm:$0xff]  }
 0x201   :  { %1644 = vmatprep.subr.bf16.mxu0 %v1455_v9  ;;  %9129 = vmatprep.subr.bf16.mxu1 %v1503_v15  ;;  %v1505_v63 = vsel %vm1504_vm11, %v1501_v62, %v1503_v15  ;;  %vm1573_vm11 = vcmask 900096   ;;  %v9820_v15 = vld [vmem:[%s15946_s4 + $0xac] ss:$16 sps:$4 sm:$0xff]   ;;  %v9799_v62 = vld [vmem:[%s15946_s4 + $0x44] ss:$16 sps:$4 sm:$0xff]  }
 0x202   :  { %9130 = vmatpush3.bf16.msra.mxu1 %v11170_v30  ;;  %v9818_v9 = vld [vmem:[%s15946_s4 + $0xa8] ss:$16 sps:$4 sm:$0xff]  }
 0x204   :  { %v1494_v18 = vpop.permute.xlu1 %1493  ;;  %1645 = vmatpush1.bf16.msra.mxu0 %v1444_v17  ;;  %v1496_v0 = vpop.permute.xlu0 %1495  ;;  %v9797_v17 = vld [vmem:[%s15946_s4 + $0x40] ss:$16 sps:$4 sm:$0xff]  }
 0x205   :  { %1646 = vmatprep.subr.bf16.mxu0 %v1473_v19  ;;  %v1509_v28 = vsel %vm1287_vm13, %v1496_v0, %v1505_v63  ;;  %v1498_v3 = vsel %vm1497_vm15, %v1494_v18, %v1496_v0  ;;  %vm1522_vm15 = vcmask 195584   ;;  %v9805_v18 = vld [vmem:[%s15946_s4 + $0x64] ss:$16 sps:$4 sm:$0xff]   ;;  %v9824_v0 = vld [vmem:[%s15946_s4 + $0xc8] ss:$16 sps:$4 sm:$0xff]  }
 0x206   :  { %v9832_v19 = vld [vmem:[%s15946_s4 + $0xec] ss:$16 sps:$4 sm:$0xff]   ;;  %v9817_v63 = vld [vmem:[%s15946_s4 + $0xa4] ss:$16 sps:$4 sm:$0xff]  }
 0x208   :  { %v1519_v22 = vpop.permute.xlu1 %1518  ;;  %1647 = vmatpush1.bf16.msra.mxu0 %v1462_v20  ;;  %v1514_v23 = vpop.permute.xlu0 %1513  ;;  %v9803_v20 = vld [vmem:[%s15946_s4 + $0x60] ss:$16 sps:$4 sm:$0xff]  }
 0x209   :  { %1648 = vmatprep.subr.bf16.mxu0 %v1491_v24  ;;  %v1527_v30 = vsel %vm1287_vm13, %v1514_v23, %v1519_v22  ;;  %v9809_v24 = vld [vmem:[%s15946_s4 + $0x80] ss:$16 sps:$4 sm:$0xff]  }
 0x20c   :  { %v1532_v25 = vpop.permute.xlu1 %1531  ;;  %1649 = vmatpush1.bf16.msra.mxu0 %v1480_v11  ;;  %v1512_v27 = vpop.permute.xlu0 %1511  ;;  %v9836_v11 = vld [vmem:[%s15946_s4 + $0x108] ss:$16 sps:$4 sm:$0xff]  }
 0x20d   :  { %1650 = vmatprep.subr.bf16.mxu0 %v1509_v28  ;;  %v1516_v31 = vsel %vm1515_vm1, %v1512_v27, %v1514_v23  ;;  %v9838_v23 = vld [vmem:[%s15946_s4 + $0x10c] ss:$16 sps:$4 sm:$0xff]   ;;  %v9815_v27 = vld [vmem:[%s15946_s4 + $0xa0] ss:$16 sps:$4 sm:$0xff]   ;;  %v9823_v28 = vld [vmem:[%s15946_s4 + $0xc4] ss:$16 sps:$4 sm:$0xff]  }
 0x210   :  { %v1550_v12 = vpop.permute.xlu1 %1549  ;;  %1651 = vmatpush1.bf16.msra.mxu0 %v1498_v3  ;;  %v1539_v29 = vpop.permute.xlu0 %1538  ;;  %v9842_v3 = vld [vmem:[%s15946_s4 + $0x128] ss:$16 sps:$4 sm:$0xff]  }
 0x211   :  { %1652 = vmatprep.subr.bf16.mxu0 %v1527_v30  ;;  %v9829_v30 = vld [vmem:[%s15946_s4 + $0xe4] ss:$16 sps:$4 sm:$0xff]  }
 0x214   :  { %v1537_v32 = vpop.permute.xlu1 %1536  ;;  %1653 = vmatpush1.bf16.msra.mxu0 %v1516_v31  ;;  %v1530_v33 = vpop.permute.xlu0 %1529  ;;  %v9848_v31 = vld [vmem:[%s15946_s4 + $0x148] ss:$16 sps:$4 sm:$0xff]  }
 0x215   :  { %v1541_v34 = vsel %vm15958_vm8, %v1537_v32, %v1539_v29  ;;  %v1534_v4 = vsel %vm1533_vm9, %v1530_v33, %v1532_v25  ;;  %v9856_v32 = vld [vmem:[%s15946_s4 + $0x16c] ss:$16 sps:$4 sm:$0xff]   ;;  %v9827_v33 = vld [vmem:[%s15946_s4 + $0xe0] ss:$16 sps:$4 sm:$0xff]   ;;  %vm16011_vm8 = vcmask 924672  }
 0x216   :  { %v1545_v35 = vsel %vm1287_vm13, %v1532_v25, %v1541_v34  ;;  %v9844_v25 = vld [vmem:[%s15946_s4 + $0x12c] ss:$16 sps:$4 sm:$0xff]   ;;  %v9835_v34 = vld [vmem:[%s15946_s4 + $0x104] ss:$16 sps:$4 sm:$0xff]  }
 0x217   :  { %1654 = vmatprep.subr.bf16.mxu0 %v1545_v35  ;;  %v9854_v35 = vld [vmem:[%s15946_s4 + $0x168] ss:$16 sps:$4 sm:$0xff]  }
 0x218   :  { %v1548_v36 = vpop.permute.xlu1 %1547  ;;  %1655 = vmatpush1.bf16.msra.mxu0 %v1534_v4  ;;  %v1555_v60 = vpop.permute.xlu0 %1554  ;;  %v9862_v4 = vld [vmem:[%s15946_s4 + $0x18c] ss:$16 sps:$4 sm:$0xff]  }
 0x219   :  { %v1563_v37 = vsel %vm1287_vm13, %v1550_v12, %v1555_v60  ;;  %v1552_v38 = vsel %vm15964_vm10, %v1548_v36, %v1550_v12  ;;  %v9850_v12 = vld [vmem:[%s15946_s4 + $0x14c] ss:$16 sps:$4 sm:$0xff]   ;;  %v9833_v36 = vld [vmem:[%s15946_s4 + $0x100] ss:$16 sps:$4 sm:$0xff]  }
 0x21a   :  { %1656 = vmatprep.subr.bf16.mxu0 %v1563_v37  ;;  %v9860_v37 = vld [vmem:[%s15946_s4 + $0x188] ss:$16 sps:$4 sm:$0xff]  }
 0x21c   :  { %v1572_v40 = vpop.permute.xlu1 %1571  ;;  %1657 = vmatpush1.bf16.msra.mxu0 %v1552_v38  ;;  %v1570_v41 = vpop.permute.xlu0 %1569  ;;  %v9839_v38 = vld [vmem:[%s15946_s4 + $0x120] ss:$16 sps:$4 sm:$0xff]  }
 0x21d   :  { %v1574_v42 = vsel %vm1573_vm11, %v1570_v41, %v1572_v40  ;;  %v9845_v41 = vld [vmem:[%s15946_s4 + $0x140] ss:$16 sps:$4 sm:$0xff]  }
 0x21e   :  { %v1578_v43 = vsel %vm1287_vm13, %v11164_v26, %v1574_v42  ;;  %v9853_v42 = vld [vmem:[%s15946_s4 + $0x164] ss:$16 sps:$4 sm:$0xff]  }
 0x21f   :  { %1658 = vmatprep.subr.bf16.mxu0 %v1578_v43  ;;  %v9851_v43 = vld [vmem:[%s15946_s4 + $0x160] ss:$16 sps:$4 sm:$0xff]  }
 0x220   :  { %v1521_v47 = vpop.permute.xlu1 %1520  ;;  %v1566_v48 = vpop.permute.xlu0 %1565 }
 0x221   :  { %v1567_v49 = vsel %vm1284_vm12, %v1566_v48, %v11164_v26  ;;  %v1523_v51 = vsel %vm1522_vm15, %v1519_v22, %v1521_v47  ;;  %v9796_v26 = vld [vmem:[%s15946_s4 + $0x2c] ss:$16 sps:$4 sm:$0xff]   ;;  %vm15961_vm12 = vcmask 187392   ;;  %v9830_v22 = vld [vmem:[%s15946_s4 + $0xe8] ss:$16 sps:$4 sm:$0xff]  }
 0x222   :  { %1659 = vmatpush1.bf16.msra.mxu0 %v1567_v49  ;;  %9131 = vmatprep.subr.bf16.mxu1 %v1523_v51  ;;  %v9857_v47 = vld [vmem:[%s15946_s4 + $0x180] ss:$16 sps:$4 sm:$0xff]   ;;  %v9865_v48 = vld [vmem:[%s15946_s4 + $0x1a4] ss:$16 sps:$4 sm:$0xff]   ;;  %v9868_v49 = vld [vmem:[%s15946_s4 + $0x1ac] ss:$16 sps:$4 sm:$0xff]  }
 0x223   :  { %2365 = vmatprep.subr.bf16.mxu0 %v9790_v44  ;;  %v9859_v44 = vld [vmem:[%s15946_s4 + $0x184] ss:$16 sps:$4 sm:$0xff]   ;;  %v9863_v51 = vld [vmem:[%s15946_s4 + $0x1a0] ss:$16 sps:$4 sm:$0xff]  }
 0x224   :  { %v1365_v55 = vpop.permute.xlu0 %1364  ;;  %v1557_v57 = vpop.permute.xlu1 %1556 }
 0x225   :  { %v1368_v56 = vsel %vm1366_vm5, %v11191_v46, %v1365_v55  ;;  %1661 = vmatmul.mubr.bf16.vlgmr.msra.gmra.mrb[12].mxu0 %v9779_v52  ;;  %v9784_v46 = vld [vmem:[%s15944_s2 + $0x10] ss:$8 sps:$4 sm:$0xff]   ;;  %v1559_v5 = vsel %vm15961_vm12, %v1555_v60, %v1557_v57  ;;  %v9841_v60 = vld [vmem:[%s15946_s4 + $0x124] ss:$16 sps:$4 sm:$0xff]   ;;  %v9880_v57 = vld [vmem:[%s15946_s4 + $0x1ec] ss:$16 sps:$4 sm:$0xff]  }
 0x226   :  { %9132 = vmatpush3.bf16.msra.mxu1 %v1368_v56  ;;  %1670 = vmatprep.mubr.bf16.mxu0 %v9782_v53  ;;  %v9869_v55 = vld [vmem:[%s15946_s4 + $0x1c0] ss:$16 sps:$4 sm:$0xff]   ;;  %v9877_v56 = vld [vmem:[%s15946_s4 + $0x1e4] ss:$16 sps:$4 sm:$0xff]   ;;  %s10443_s2 = smov 96   ;;  %vm15963_vm12 = vcmask 818176  }
 0x227   :  { %9133 = vmatprep.subr.bf16.mxu1 %v1539_v29  ;;  %2366 = vmatpush1.bf16.msra.mxu0 %v9788_v1  ;;  %v9821_v29 = vld [vmem:[%s15946_s4 + $0xc0] ss:$16 sps:$4 sm:$0xff]   ;;  %v9874_v1 = vld [vmem:[%s15946_s4 + $0x1cc] ss:$16 sps:$4 sm:$0xff]  }
 0x228   :  { %2367 = vmatprep.subr.bf16.mxu0 %v9796_v26  ;;  %v1409_v61 = vpop.permute.xlu0 %1408  ;;  %v9872_v26 = vld [vmem:[%s15946_s4 + $0x1c8] ss:$16 sps:$4 sm:$0xff]  }
 0x229   :  { %v1412_v39 = vsel %vm1410_vm7, %v11189_v45, %v1409_v61  ;;  %v9785_v45 = vld [vmem:[%s15946_s4] ss:$16 sps:$4 sm:$0xff]   ;;  %v9886_v61 = vld [vmem:[%s15946_s4 + $0x20c] ss:$16 sps:$4 sm:$0xff]  }
 0x22a   :  { %9134 = vmatpush3.bf16.msra.mxu1 %v11202_v50  ;;  %v9787_v50 = vld [vmem:[%s15946_s4 + $0x4] ss:$16 sps:$4 sm:$0xff]  }
 0x22b   :  { %9135 = vmatprep.subr.bf16.mxu1 %v1559_v5  ;;  %2368 = vmatpush1.bf16.msra.mxu0 %v9794_v58  ;;  %v9875_v58 = vld [vmem:[%s15946_s4 + $0x1e0] ss:$16 sps:$4 sm:$0xff]  }
 0x22c   :  { %2369 = vmatprep.subr.bf16.mxu0 %v9802_v59  ;;  %v9878_v59 = vld [vmem:[%s15946_s4 + $0x1e8] ss:$16 sps:$4 sm:$0xff]  }
 0x22d   :  { %1671 = vmatmul.mubr.bf16.gmra.mrb[16].mxu0 %v9784_v46 }
 0x22e   :  { %9136 = vmatpush3.bf16.msra.mxu1 %v1412_v39 }
 0x22f   :  { %9137 = vmatprep.subr.bf16.mxu1 %v1572_v40  ;;  %2370 = vmatpush1.bf16.msra.mxu0 %v9800_v7  ;;  %v9847_v40 = vld [vmem:[%s15946_s4 + $0x144] ss:$16 sps:$4 sm:$0xff]  }
 0x230   :  { %2371 = vmatprep.subr.bf16.mxu0 %v9808_v8 }
 0x232   :  { %9138 = vmatpush3.bf16.msra.mxu1 %v11200_v54  ;;  %v9791_v54 = vld [vmem:[%s15946_s4 + $0x20] ss:$16 sps:$4 sm:$0xff]  }
 0x233   :  { %2259 = vmatprep.subr.bf16.mxu1 %v9787_v50  ;;  %2372 = vmatpush1.bf16.msra.mxu0 %v9806_v6 }
 0x234   :  { %2373 = vmatprep.subr.bf16.mxu0 %v9814_v10 }
 0x235   :  { %1714 = vmatmul.mubr.bf16.vlgmr.msra.gmra.mrb[12].mxu1 %v9779_v52  ;;  %v9866_v52 = vld [vmem:[%s15946_s4 + $0x1a8] ss:$16 sps:$4 sm:$0xff]   ;;  %v11458_v5 = vpop.permute.xlu1 %1590 }
 0x236   :  { %1721 = vmatprep.mubr.bf16.mxu1 %v9782_v53  ;;  %2260 = vmatpush1.bf16.msra.mxu1 %v9785_v45  ;;  %v9871_v53 = vld [vmem:[%s15946_s4 + $0x1c4] ss:$16 sps:$4 sm:$0xff]  }
 0x237   :  { %2261 = vmatprep.subr.bf16.mxu1 %v9793_v13  ;;  %2374 = vmatpush1.bf16.msra.mxu0 %v9812_v14 }
 0x238   :  { %2375 = vmatprep.subr.bf16.mxu0 %v9820_v15 }
 0x239   :  { %v11460_v8 = vpop.permute.xlu0 %1595  ;;  %v11465_v15 = vpop.permute.xlu1 %1600 }
 0x23a   :  { %2262 = vmatpush1.bf16.msra.mxu1 %v9791_v54 }
 0x23b   :  { %2263 = vmatprep.subr.bf16.mxu1 %v9799_v62  ;;  %2376 = vmatpush1.bf16.msra.mxu0 %v9818_v9 }
 0x23c   :  { %2377 = vmatprep.subr.bf16.mxu0 %v9826_v16 }
 0x23d   :  { %1722 = vmatmul.mubr.bf16.gmra.mrb[16].mxu1 %v9784_v46  ;;  %v9883_v46 = vld [vmem:[%s15946_s4 + $0x204] ss:$16 sps:$4 sm:$0xff]  }
 0x23e   :  { %2264 = vmatpush1.bf16.msra.mxu1 %v9797_v17 }
 0x23f   :  { %2265 = vmatprep.subr.bf16.mxu1 %v9805_v18  ;;  %2378 = vmatpush1.bf16.msra.mxu0 %v9824_v0 }
 0x240   :  { %2379 = vmatprep.subr.bf16.mxu0 %v9832_v19 }
 0x242   :  { %2266 = vmatpush1.bf16.msra.mxu1 %v9803_v20 }
 0x243   :  { %2267 = vmatprep.subr.bf16.mxu1 %v9811_v21  ;;  %2380 = vmatpush1.bf16.msra.mxu0 %v9830_v22 }
 0x244   :  { %2381 = vmatprep.subr.bf16.mxu0 %v9838_v23 }
 0x246   :  { %2268 = vmatpush1.bf16.msra.mxu1 %v9809_v24 }
 0x247   :  { %2269 = vmatprep.subr.bf16.mxu1 %v9817_v63  ;;  %2382 = vmatpush1.bf16.msra.mxu0 %v9836_v11  ;;  %v9881_v63 = vld [vmem:[%s15946_s4 + $0x200] ss:$16 sps:$4 sm:$0xff]   ;;  %v9884_v11 = vld [vmem:[%s15946_s4 + $0x208] ss:$16 sps:$4 sm:$0xff]  }
 0x248   :  { %2383 = vmatprep.subr.bf16.mxu0 %v9844_v25  ;;  %v11475_v25 = vpop.permute.xlu1 %1605 }
 0x24a   :  { %2270 = vmatpush1.bf16.msra.mxu1 %v9815_v27 }
 0x24b   :  { %2271 = vmatprep.subr.bf16.mxu1 %v9823_v28  ;;  %2384 = vmatpush1.bf16.msra.mxu0 %v9842_v3  ;;  %v9889_v3 = vld [vmem:[%s15946_s4 + $0x224] ss:$16 sps:$4 sm:$0xff]  }
 0x24c   :  { %2385 = vmatprep.subr.bf16.mxu0 %v9850_v12  ;;  %v9892_v12 = vld [vmem:[%s15946_s4 + $0x22c] ss:$16 sps:$4 sm:$0xff]  }
 0x24e   :  { %2272 = vmatpush1.bf16.msra.mxu1 %v9821_v29 }
 0x24f   :  { %2273 = vmatprep.subr.bf16.mxu1 %v9829_v30  ;;  %2386 = vmatpush1.bf16.msra.mxu0 %v9848_v31 }
 0x250   :  { %2387 = vmatprep.subr.bf16.mxu0 %v9856_v32  ;;  %v9887_v32 = vld [vmem:[%s15946_s4 + $0x220] ss:$16 sps:$4 sm:$0xff]  }
 0x252   :  { %2274 = vmatpush1.bf16.msra.mxu1 %v9827_v33  ;;  %v9890_v33 = vld [vmem:[%s15946_s4 + $0x228] ss:$16 sps:$4 sm:$0xff]  }
 0x253   :  { %2275 = vmatprep.subr.bf16.mxu1 %v9835_v34  ;;  %2388 = vmatpush1.bf16.msra.mxu0 %v9854_v35 }
 0x254   :  { %2389 = vmatprep.subr.bf16.mxu0 %v9862_v4  ;;  %v9895_v4 = vld [vmem:[%s15946_s4 + $0x244] ss:$16 sps:$4 sm:$0xff]  }
 0x256   :  { %2276 = vmatpush1.bf16.msra.mxu1 %v9833_v36  ;;  %v9898_v36 = vld [vmem:[%s15946_s4 + $0x24c] ss:$16 sps:$4 sm:$0xff]  }
 0x257   :  { %2277 = vmatprep.subr.bf16.mxu1 %v9841_v60  ;;  %2390 = vmatpush1.bf16.msra.mxu0 %v9860_v37  ;;  %v1848_v37 = vld [vmem:[%s15946_s4 + $0x260] sm:$0x77] }
 0x258   :  { %2391 = vmatprep.subr.bf16.mxu0 %v9868_v49 }
 0x25a   :  { %2278 = vmatpush1.bf16.msra.mxu1 %v9839_v38 }
 0x25b   :  { %2279 = vmatprep.subr.bf16.mxu1 %v9847_v40  ;;  %2392 = vmatpush1.bf16.msra.mxu0 %v9866_v52  ;;  %v1849_v40 = vld [vmem:[%s15946_s4 + $0x268] sm:$0x77]  ;;  %v9893_v52 = vld [vmem:[%s15946_s4 + $0x240] ss:$16 sps:$4 sm:$0xff]  }
 0x25c   :  { %2393 = vmatprep.subr.bf16.mxu0 %v9874_v1  ;;  %v8884_v1 = vcombine.high %v1848_v37, %v1848_v37 }
 0x25e   :  { %2280 = vmatpush1.bf16.msra.mxu1 %v9845_v41 }
 0x25f   :  { %2281 = vmatprep.subr.bf16.mxu1 %v9853_v42  ;;  %2394 = vmatpush1.bf16.msra.mxu0 %v9872_v26 }
 0x260   :  { %2395 = vmatprep.subr.bf16.mxu0 %v9880_v57  ;;  %v8883_v57 = vcombine.low %v1848_v37, %v1848_v37 }
 0x262   :  { %2282 = vmatpush1.bf16.msra.mxu1 %v9851_v43 }
 0x263   :  { %2283 = vmatprep.subr.bf16.mxu1 %v9859_v44  ;;  %2396 = vmatpush1.bf16.msra.mxu0 %v9878_v59 }
 0x264   :  { %2418 = vmatprep.subr.bf16.mxu0 %v9886_v61 }
 0x266   :  { %2284 = vmatpush1.bf16.msra.mxu1 %v9857_v47 }
 0x267   :  { %2285 = vmatprep.subr.bf16.mxu1 %v9865_v48 }
 0x26a   :  { %2286 = vmatpush1.bf16.msra.mxu1 %v9863_v51 }
 0x26b   :  { %2287 = vmatprep.subr.bf16.mxu1 %v9871_v53  ;;  %v9896_v53 = vld [vmem:[%s15946_s4 + $0x248] ss:$16 sps:$4 sm:$0xff]   ;;  %s10440_s4 = smov 98  }
 0x26e   :  { %2288 = vmatpush1.bf16.msra.mxu1 %v9869_v55  ;;  %v8886_v55 = vcombine.high %v1849_v40, %v1849_v40 }
 0x26f   :  { %2289 = vmatprep.subr.bf16.mxu1 %v9877_v56 }
 0x272   :  { %2290 = vmatpush1.bf16.msra.mxu1 %v9875_v58  ;;  %v8885_v58 = vcombine.low %v1849_v40, %v1849_v40 }
 0x273   :  { %2312 = vmatprep.subr.bf16.mxu1 %v9883_v46 }
 0x2f8   :  { %v1662_v7 = vpop.f32.mrb[12].mxu0 }
 0x2f9   :  { %v1663_v39 = vadd.f32 %v1662_v7, %v11458_v5  ;;  %v1664_v50 = vpop.f32.mrb[13].mxu0 }
 0x2fa   :  { %v1665_v6 = vadd.f32 %v1664_v50, %v11458_v5  ;;  %v1666_v10 = vpop.f32.mrb[14].mxu0  ;;  %v2248_v50 = vsel %vm909_vm2, %v8883_v57, 0  ;;  %v15979_v57 = vlaneseq }
 0x2fb   :  { %v1742_v45 = vmul.f32 0.2, %v1663_v39  ;;  %v1667_v13 = vadd.f32 %v1666_v10, %v11460_v8  ;;  %v1668_v14 = vpop.f32.mrb[15].mxu0  ;;  %vm1730_vm13 = vcmp.ge.f32.partialorder %v1663_v39, 0.0 }
 0x2fc   :  { %v1743_v54 = vmul.f32 0.2, %v1665_v6  ;;  %v1669_v62 = vadd.f32 %v1668_v14, %v11460_v8  ;;  %vm1731_vm5 = vcmp.ge.f32.partialorder %v1665_v6, 0.0 }
 0x2fd   :  { %vm1733_vm7 = vcmp.ge.f32.partialorder %v1667_v13, 0.0  ;;  %v1745_v9 = vmul.f32 0.2, %v1667_v13  ;;  %v1754_v17 = vsel %vm1730_vm13, %v1663_v39, %v1742_v45 }
 0x2fe   :  { %vm1734_vm1 = vcmp.ge.f32.partialorder %v1669_v62, 0.0  ;;  %v1746_v16 = vmul.f32 0.2, %v1669_v62  ;;  %v1755_v20 = vsel %vm1731_vm5, %v1665_v6, %v1743_v54  ;;  %v2254_v6 = vsel %vm909_vm2, %v8885_v58, 0 }
 0x2ff   :  { %v1757_v18 = vsel %vm1733_vm7, %v1667_v13, %v1745_v9 }
 0x300   :  { %v1766_v0 = vpack.c.bf16 %v1757_v18, %v1754_v17  ;;  %v1672_v19 = vpop.f32.mrb[16].mxu0  ;;  %v1758_v21 = vsel %vm1734_vm1, %v1669_v62, %v1746_v16  ;;  %vm15960_vm1 = vcmask 441344  }
 0x301   :  { %v1673_v22 = vadd.f32 %v1672_v19, %v11465_v15  ;;  %v1674_v23 = vpop.f32.mrb[17].mxu0  ;;  %v1767_v24 = vpack.c.bf16 %v1758_v21, %v1755_v20 }
 0x302   :  { %v1675_v27 = vadd.f32 %v1674_v23, %v11465_v15  ;;  %v1676_v28 = vpop.f32.mrb[18].mxu0 }
 0x303   :  { %v1748_v29 = vmul.f32 0.2, %v1673_v22  ;;  %v1677_v30 = vadd.f32 %v1676_v28, %v11475_v25  ;;  %v1678_v31 = vpop.f32.mrb[19].mxu0  ;;  %2291 = vmatprep.mubr.bf16.mxu1 %v1767_v24  ;;  %2397 = vmatprep.mubr.bf16.mxu0 %v1767_v24  ;;  %vm1736_vm9 = vcmp.ge.f32.partialorder %v1673_v22, 0.0 }
 0x304   :  { %v1749_v34 = vmul.f32 0.2, %v1675_v27  ;;  %v1679_v35 = vadd.f32 %v1678_v31, %v11475_v25  ;;  %2292 = vmatmul.mubr.bf16.vlgmr.msra.gmra.mrb[20].mxu1 %v1766_v0  ;;  %2398 = vmatmul.mubr.bf16.vlgmr.msra.gmra.mrb[20].mxu0 %v1766_v0  ;;  %vm1737_vm11 = vcmp.ge.f32.partialorder %v1675_v27, 0.0 }
 0x305   :  { %vm1739_vm15 = vcmp.ge.f32.partialorder %v1677_v30, 0.0  ;;  %v1751_v60 = vmul.f32 0.2, %v1677_v30  ;;  %2313 = vmatpush1.bf16.msra.mxu1 %v9881_v63  ;;  %2419 = vmatpush1.bf16.msra.mxu0 %v9884_v11  ;;  %v1760_v41 = vsel %vm1736_vm9, %v1673_v22, %v1748_v29 }
 0x306   :  { %vm1740_vm13 = vcmp.ge.f32.partialorder %v1679_v35, 0.0  ;;  %v1752_v38 = vmul.f32 0.2, %v1679_v35  ;;  %2314 = vmatprep.subr.bf16.mxu1 %v9889_v3  ;;  %2420 = vmatprep.subr.bf16.mxu0 %v9892_v12  ;;  %v1761_v44 = vsel %vm1737_vm11, %v1675_v27, %v1749_v34  ;;  %vm2491_vm11 = vcmask 801792  }
 0x307   :  { %v1763_v42 = vsel %vm1739_vm15, %v1677_v30, %v1751_v60  ;;  %vm2496_vm15 = vcmask 310272  }
 0x308   :  { %v9139_v43 = vpop.f32.mrb[12].mxu1  ;;  %v1764_v47 = vsel %vm1740_vm13, %v1679_v35, %v1752_v38  ;;  %v1769_v48 = vpack.c.bf16 %v1763_v42, %v1760_v41  ;;  %vm2527_vm13 = vcmask 793600  }
 0x309   :  { %v9140_v49 = vpop.f32.mrb[13].mxu1  ;;  %2315 = vmatpush1.bf16.msra.mxu1 %v9887_v32  ;;  %2421 = vmatpush1.bf16.msra.mxu0 %v9890_v33  ;;  %v1770_v51 = vpack.c.bf16 %v1764_v47, %v1761_v44  ;;  %v9905_v44 = vld [vmem:[%s15947_s6 + $0x4] ss:$12 sps:$4 sm:$0xff]  }
 0x30a   :  { %v9141_v26 = vadd.f32 %v9140_v49, %v9139_v43  ;;  %v9142_v56 = vpop.f32.mrb[14].mxu1  ;;  %2316 = vmatprep.subr.bf16.mxu1 %v9895_v4  ;;  %2422 = vmatprep.subr.bf16.mxu0 %v9898_v36 }
 0x30b   :  { %v9143_v59 = vpop.f32.mrb[15].mxu1  ;;  %2301 = vmatprep.mubr.bf16.mxu1 %v1770_v51  ;;  %2407 = vmatprep.mubr.bf16.mxu0 %v1770_v51 }
 0x30c   :  { %v1716_v46 = vadd.f32 %v9141_v26, %v11458_v5  ;;  %v9144_v61 = vadd.f32 %v9143_v59, %v9142_v56  ;;  %2302 = vmatmul.mubr.bf16.gmra.mrb[24].mxu1 %v1769_v48  ;;  %2408 = vmatmul.mubr.bf16.gmra.mrb[24].mxu0 %v1769_v48 }
 0x30d   :  { %2317 = vmatpush1.bf16.msra.mxu1 %v9893_v52  ;;  %2423 = vmatpush1.bf16.msra.mxu0 %v9896_v53 }
 0x30e   :  { %v1744_v7 = vmul.f32 0.2, %v1716_v46  ;;  %v1719_v39 = vadd.f32 %v9144_v61, %v11460_v8  ;;  %8887 = vmatprep.subr.msk.bf16.mxu1 %vm909_vm2, %v8884_v1  ;;  %8890 = vmatprep.subr.msk.bf16.mxu0 %vm909_vm2, %v8886_v55  ;;  %vm1732_vm5 = vcmp.ge.f32.partialorder %v1716_v46, 0.0 }
 0x30f   :  { %2344 = vmatprep.mubr.bf16.mxu1 %v15980_v2  ;;  %2450 = vmatprep.mubr.bf16.mxu0 %v15980_v2 }
 0x310   :  { %vm1735_vm7 = vcmp.ge.f32.partialorder %v1719_v39, 0.0  ;;  %v1747_v5 = vmul.f32 0.2, %v1719_v39  ;;  %v9145_v10 = vpop.f32.mrb[16].mxu1  ;;  %v1756_v8 = vsel %vm1732_vm5, %v1716_v46, %v1744_v7  ;;  %v11750_v46 = vshrl.u32 %v15979_v57, 7 }
 0x311   :  { %v9146_v45 = vpop.f32.mrb[17].mxu1  ;;  %2319 = vmatpush1.bf16.msra.mxu1 %v2248_v50  ;;  %2425 = vmatpush1.bf16.msra.mxu0 %v2254_v6  ;;  %v2801_v50 = vld [vmem:[%s15948_s7 + $0x8] sm:$0xff]  ;;  %v42_v6 = vld [vmem:[%s15949_s11] sm:$0x3]  ;;  %s15965_s11 = smov 38   ;;  %vm2561_vm5 = vcmask 785408  }
 0x312   :  { %v1759_v13 = vsel %vm1735_vm7, %v1719_v39, %v1747_v5  ;;  %v9147_v14 = vadd.f32 %v9146_v45, %v9145_v10  ;;  %v9148_v54 = vpop.f32.mrb[18].mxu1  ;;  %16065 = vst [vmem:[#allocation14_spill] sm:$0xff] %v11750_v46  ;;  %v3072_v39 = vsub.s32 1, %v11750_v46  ;;  %v3068_v5 = vsub.s32 0, %v11750_v46  ;;  %v12483_v46 = vld [vmem:[%s15950_s5 + $0x1ac] ss:$16 sps:$4 sm:$0xff]  }
 0x313   :  { %v1768_v62 = vpack.c.bf16 %v1759_v13, %v1756_v8  ;;  %v9149_v9 = vpop.f32.mrb[19].mxu1  ;;  %v2800_v8 = vld [vmem:[%s15948_s7] sm:$0xff]  ;;  %vm2548_vm7 = vcmask 1031168   ;;  %16077 = vst [vmem:[#allocation26_spill] sm:$0xff] %v12483_v46 }
 0x314   :  { %v1724_v16 = vadd.f32 %v9147_v14, %v11465_v15  ;;  %v9150_v17 = vadd.f32 %v9149_v9, %v9148_v54  ;;  %v11776_v13 = vrot.slane %v42_v6, %v3072_v39  ;;  %v11778_v14 = vrot.slane %v42_v6, %v3068_v5  ;;  %v2803_v9 = vld [vmem:[%s15948_s7 + $0x18] sm:$0xff] }
 0x315   :  { %8888 = vmatmul.mubr.msk.bf16.vlgmr.msra.gmra.mrb[20].mxu1 %vm15960_vm1, %v1768_v62  ;;  %8891 = vmatmul.mubr.msk.bf16.vlgmr.msra.gmra.mrb[20].mxu0 %vm15960_vm1, %v1768_v62 }
 0x316   :  { %v1750_v18 = vmul.f32 0.2, %v1724_v16  ;;  %v1727_v0 = vadd.f32 %v9150_v17, %v11475_v25  ;;  %2354 = vmatprep.mubr.bf16.mxu1 %v15980_v2  ;;  %2460 = vmatprep.mubr.bf16.mxu0 %v15980_v2  ;;  %vm1738_vm2 = vcmp.ge.f32.partialorder %v1724_v16, 0.0  ;;  %16066 = vst [vmem:[#allocation15_spill] sm:$0xff] %v11776_v13  ;;  %16067 = vst [vmem:[#allocation16_spill] sm:$0xff] %v11778_v14 }
 0x318   :  { %vm1741_vm9 = vcmp.ge.f32.partialorder %v1727_v0, 0.0  ;;  %v1753_v19 = vmul.f32 0.2, %v1727_v0  ;;  %v1762_v20 = vsel %vm1738_vm2, %v1724_v16, %v1750_v18  ;;  %v2802_v18 = vld [vmem:[%s15948_s7 + $0x10] sm:$0xff]  ;;  %vm2594_vm2 = vcmask 687104  }
 0x31a   :  { %v1765_v21 = vsel %vm1741_vm9, %v1727_v0, %v1753_v19  ;;  %vm16012_vm9 = vcmask 678912  }
 0x31b   :  { %v1771_v22 = vpack.c.bf16 %v1765_v21, %v1762_v20 }
 0x31d   :  { %8889 = vmatmul.mubr.msk.bf16.gmra.mrb[24].mxu1 %vm15960_vm1, %v1771_v22  ;;  %8892 = vmatmul.mubr.msk.bf16.gmra.mrb[24].mxu0 %vm15960_vm1, %v1771_v22  ;;  %vm15962_vm1 = vcmask 916480  }
 0x31e   :  { %2893 = vmatprep.mubr.bf16.mxu1 %v9905_v44  ;;  %2999 = vmatprep.mubr.bf16.mxu0 %v9905_v44 }
 0x3e8   :  { %v11527_v15 = vpop.f32.mrb[20].mxu1  ;;  %v11529_v23 = vpop.f32.mrb[20].mxu0 }
 0x3e9   :  { %16053 = vst [vmem:[#allocation2_spill] sm:$0xff] %v11527_v15  ;;  %16054 = vst [vmem:[#allocation3_spill] sm:$0xff] %v11529_v23  ;;  %v11531_v24 = vpop.f32.mrb[21].mxu1  ;;  %v2454_v63 = vpop.f32.mrb[21].mxu0 }
 0x3ea   :  { %16055 = vst [vmem:[#allocation4_spill] sm:$0xff] %v11531_v24  ;;  %v11533_v11 = vpop.f32.mrb[22].mxu1  ;;  %v11535_v25 = vpop.f32.mrb[22].mxu0 }
 0x3eb   :  { %16056 = vst [vmem:[#allocation5_spill] sm:$0xff] %v11533_v11  ;;  %16057 = vst [vmem:[#allocation6_spill] sm:$0xff] %v11535_v25  ;;  %v11539_v27 = vpack.c.bf16 %v11533_v11, %v11527_v15  ;;  %v11543_v28 = vpack.c.bf16 %v11535_v25, %v11529_v23  ;;  %v11545_v3 = vpop.f32.mrb[23].mxu1  ;;  %v2458_v12 = vpop.f32.mrb[23].mxu0 }
 0x3ec   :  { %16058 = vst [vmem:[#allocation7_spill] sm:$0xff] %v11545_v3  ;;  %v11549_v29 = vpack.c.bf16 %v11545_v3, %v11531_v24  ;;  %v11551_v30 = vpack.c.bf16 %v2458_v12, %v2454_v63 }
 0x3ed   :  { %2485 = vrot.lane.b32.xlu1 %v11543_v28, %s10440_s4  ;;  %2675 = vrot.lane.b32.xlu0 %v11539_v27, %s16034_s26 }
 0x3f0   :  { %v11557_v31 = vpop.f32.mrb[24].mxu1  ;;  %v11559_v32 = vpop.f32.mrb[24].mxu0 }
 0x3f1   :  { %16059 = vst [vmem:[#allocation8_spill] sm:$0xff] %v11557_v31  ;;  %16060 = vst [vmem:[#allocation9_spill] sm:$0xff] %v11559_v32  ;;  %2521 = vrot.lane.b32.xlu1 %v11543_v28, %s16040_s27  ;;  %v2464_v33 = vpop.f32.mrb[25].mxu0  ;;  %2483 = vrot.lane.b32.xlu0 %v11549_v29, %s10440_s4  ;;  %v11565_v34 = vpop.f32.mrb[25].mxu1 }
 0x3f2   :  { %16061 = vst [vmem:[#allocation10_spill] sm:$0xff] %v11565_v34  ;;  %v11567_v35 = vpop.f32.mrb[26].mxu1  ;;  %v11569_v4 = vpop.f32.mrb[26].mxu0 }
 0x3f3   :  { %16062 = vst [vmem:[#allocation11_spill] sm:$0xff] %v11567_v35  ;;  %16063 = vst [vmem:[#allocation12_spill] sm:$0xff] %v11569_v4  ;;  %v11573_v36 = vpack.c.bf16 %v11567_v35, %v11557_v31  ;;  %v11577_v60 = vpack.c.bf16 %v11569_v4, %v11559_v32  ;;  %v11579_v37 = vpop.f32.mrb[27].mxu1  ;;  %v2468_v38 = vpop.f32.mrb[27].mxu0 }
 0x3f4   :  { %16064 = vst [vmem:[#allocation13_spill] sm:$0xff] %v11579_v37  ;;  %v11583_v40 = vpack.c.bf16 %v11579_v37, %v11565_v34  ;;  %v11585_v41 = vpack.c.bf16 %v2468_v38, %v2464_v33  ;;  %v12495_v37 = vld [vmem:[%s15950_s5 + $0x1cc] ss:$16 sps:$4 sm:$0xff]  }
 0x3f5   :  { %2507 = vrot.lane.b32.xlu1 %v11539_v27, %s10410_s0  ;;  %2519 = vrot.lane.b32.xlu0 %v11549_v29, %s16040_s27  ;;  %16079 = vst [vmem:[#allocation28_spill] sm:$0xff] %v12495_v37 }
 0x3f9   :  { %2555 = vrot.lane.b32.xlu1 %v11543_v28, %s10443_s2  ;;  %2509 = vrot.lane.b32.xlu0 %v11549_v29, %s10410_s0 }
 0x3fd   :  { %2540 = vrot.lane.b32.xlu1 %v11539_v27, %s10444_s28  ;;  %2553 = vrot.lane.b32.xlu0 %v11549_v29, %s10443_s2 }
 0x401   :  { %2588 = vrot.lane.b32.xlu1 %v11543_v28, %s10445_s1  ;;  %2542 = vrot.lane.b32.xlu0 %v11549_v29, %s10444_s28 }
 0x405   :  { %2574 = vrot.lane.b32.xlu1 %v11539_v27, %s10430_s22  ;;  %2586 = vrot.lane.b32.xlu0 %v11549_v29, %s10445_s1 }
 0x409   :  { %2622 = vrot.lane.b32.xlu1 %v11543_v28, %s10446_s13  ;;  %2576 = vrot.lane.b32.xlu0 %v11549_v29, %s10430_s22 }
 0x40d   :  { %2607 = vrot.lane.b32.xlu1 %v11539_v27, %s16038_s14  ;;  %2620 = vrot.lane.b32.xlu0 %v11549_v29, %s10446_s13 }
 0x411   :  { %2656 = vrot.lane.b32.xlu1 %v11543_v28, %s16036_s15  ;;  %2609 = vrot.lane.b32.xlu0 %v11549_v29, %s16038_s14 }
 0x415   :  { %2641 = vrot.lane.b32.xlu1 %v11539_v27, %s16032_s16  ;;  %2654 = vrot.lane.b32.xlu0 %v11549_v29, %s16036_s15 }
 0x419   :  { %2692 = vrot.lane.b32.xlu1 %v11543_v28, %s16030_s29  ;;  %2643 = vrot.lane.b32.xlu0 %v11549_v29, %s16032_s16 }
 0x41d   :  { %2732 = vrot.lane.b32.xlu1 %v11543_v28, %s16028_s19  ;;  %2690 = vrot.lane.b32.xlu0 %v11549_v29, %s16030_s29 }
 0x421   :  { %2694 = vrot.lane.b32.xlu1 %v11551_v30, %s16030_s29  ;;  %2677 = vrot.lane.b32.xlu0 %v11549_v29, %s16034_s26 }
 0x425   :  { %2489 = vrot.lane.b32.xlu1 %v11577_v60, %s10440_s4  ;;  %2730 = vrot.lane.b32.xlu0 %v11549_v29, %s16028_s19 }
 0x429   :  { %2525 = vrot.lane.b32.xlu1 %v11577_v60, %s16040_s27  ;;  %2698 = vrot.lane.b32.xlu0 %v11577_v60, %s16030_s29 }
 0x42d   :  { %2511 = vrot.lane.b32.xlu1 %v11573_v36, %s10410_s0  ;;  %2487 = vrot.lane.b32.xlu0 %v11583_v40, %s10440_s4 }
 0x431   :  { %2559 = vrot.lane.b32.xlu1 %v11577_v60, %s10443_s2  ;;  %2719 = vrot.lane.b32.xlu0 %v11549_v29, %s15973_s20 }
 0x435   :  { %2544 = vrot.lane.b32.xlu1 %v11573_v36, %s10444_s28  ;;  %2523 = vrot.lane.b32.xlu0 %v11583_v40, %s16040_s27 }
 0x439   :  { %2592 = vrot.lane.b32.xlu1 %v11577_v60, %s10445_s1  ;;  %2513 = vrot.lane.b32.xlu0 %v11583_v40, %s10410_s0 }
 0x43d   :  { %2578 = vrot.lane.b32.xlu1 %v11573_v36, %s10430_s22  ;;  %2557 = vrot.lane.b32.xlu0 %v11583_v40, %s10443_s2 }
 0x441   :  { %2626 = vrot.lane.b32.xlu1 %v11577_v60, %s10446_s13  ;;  %2546 = vrot.lane.b32.xlu0 %v11583_v40, %s10444_s28 }
 0x445   :  { %2611 = vrot.lane.b32.xlu1 %v11573_v36, %s16038_s14  ;;  %2590 = vrot.lane.b32.xlu0 %v11583_v40, %s10445_s1 }
 0x449   :  { %2660 = vrot.lane.b32.xlu1 %v11577_v60, %s16036_s15  ;;  %2580 = vrot.lane.b32.xlu0 %v11583_v40, %s10430_s22 }
 0x44d   :  { %2645 = vrot.lane.b32.xlu1 %v11573_v36, %s16032_s16  ;;  %2624 = vrot.lane.b32.xlu0 %v11583_v40, %s10446_s13 }
 0x451   :  { %2679 = vrot.lane.b32.xlu1 %v11573_v36, %s16034_s26  ;;  %2613 = vrot.lane.b32.xlu0 %v11583_v40, %s16038_s14 }
 0x455   :  { %2734 = vrot.lane.b32.xlu1 %v11551_v30, %s16028_s19  ;;  %2658 = vrot.lane.b32.xlu0 %v11583_v40, %s16036_s15 }
 0x459   :  { %2696 = vrot.lane.b32.xlu1 %v11583_v40, %s16030_s29  ;;  %2647 = vrot.lane.b32.xlu0 %v11583_v40, %s16032_s16 }
 0x45d   :  { %2681 = vrot.lane.b32.xlu1 %v11583_v40, %s16034_s26  ;;  %2717 = vrot.lane.b32.xlu0 %v11539_v27, %s15973_s20 }
 0x45f   :  { %v2486_v42 = vpop.permute.xlu1 %2485  ;;  %v11695_v43 = vpop.permute.xlu0 %2675 }
 0x461   :  { %2736 = vrot.lane.b32.xlu1 %v11583_v40, %s16028_s19  ;;  %2700 = vrot.lane.b32.xlu0 %v11585_v41, %s16030_s29 }
 0x463   :  { %v11704_v47 = vpop.permute.xlu1 %2521  ;;  %v11706_v48 = vpop.permute.xlu0 %2483 }
 0x464   :  { %v2492_v49 = vsel %vm2491_vm11, %v11706_v48, %v2486_v42 }
 0x465   :  { %2723 = vrot.lane.b32.xlu1 %v11583_v40, %s15973_s20  ;;  %2738 = vrot.lane.b32.xlu0 %v11577_v60, %s16028_s19  ;;  %v2499_v51 = vsel %vm2496_vm15, %v11549_v29, %v2492_v49 }
 0x466   :  { %2861 = vmatprep.subr.bf16.mxu1 %v2499_v51 }
 0x467   :  { %v11716_v52 = vpop.permute.xlu1 %2507  ;;  %2862 = vmatpush1.bf16.msra.mxu1 %v11539_v27  ;;  %v11719_v53 = vpop.permute.xlu0 %2519 }
 0x468   :  { %v2528_v44 = vsel %vm2527_vm13, %v11719_v53, %v11704_v47 }
 0x469   :  { %2721 = vrot.lane.b32.xlu1 %v11573_v36, %s15973_s20  ;;  %2740 = vrot.lane.b32.xlu0 %v11585_v41, %s16028_s19  ;;  %s16086_s20 = smov 99  }
 0x46b   :  { %v11725_v1 = vpop.permute.xlu1 %2555  ;;  %v11727_v55 = vpop.permute.xlu0 %2509 }
 0x46c   :  { %v2534_v39 = vsel %vm2496_vm15, %v11727_v55, %v2528_v44 }
 0x46d   :  { %2767 = vrot.lane.b32.xlu1 %v11543_v28, %s15971_s23  ;;  %2765 = vrot.lane.b32.xlu0 %v11549_v29, %s15971_s23 }
 0x46f   :  { %v11733_v26 = vpop.permute.xlu1 %2540  ;;  %v11735_v56 = vpop.permute.xlu0 %2553 }
 0x471   :  { %2757 = vrot.lane.b32.xlu1 %v11539_v27, %s10440_s4  ;;  %2769 = vrot.lane.b32.xlu0 %v11551_v30, %s15971_s23 }
 0x473   :  { %v11741_v58 = vpop.permute.xlu1 %2588  ;;  %v11743_v59 = vpop.permute.xlu0 %2542 }
 0x475   :  { %2773 = vrot.lane.b32.xlu1 %v11577_v60, %s15971_s23  ;;  %2771 = vrot.lane.b32.xlu0 %v11583_v40, %s15971_s23 }
 0x477   :  { %v11752_v61 = vpop.permute.xlu1 %2574  ;;  %v11754_v7 = vpop.permute.xlu0 %2586 }
 0x479   :  { %2759 = vrot.lane.b32.xlu1 %v11573_v36, %s10440_s4  ;;  %2775 = vrot.lane.b32.xlu0 %v11585_v41, %s15971_s23  ;;  %s16130_s23 = smov 90  }
 0x47b   :  { %v11768_v10 = vpop.permute.xlu1 %2622  ;;  %v11770_v45 = vpop.permute.xlu0 %2576 }
 0x47c   :  { %9151 = vmatprep.subr.bf16.mxu0 %v11768_v10 }
 0x47d   :  { %9152 = vmatpush3.bf16.msra.mxu0 %v2486_v42  ;;  %2811 = vperm.xlu1 %9571, %v2801_v50   ;;  %v2515_v50 = vsel %vm1318_vm3, %v11716_v52, %v11727_v55 }
 0x47e   :  { %2806 = vperm.xlu0 %9572, %v2800_v8  }
 0x47f   :  { %v11780_v54 = vpop.permute.xlu1 %2607  ;;  %v11782_v62 = vpop.permute.xlu0 %2620 }
 0x481   :  { %3166 = vrot.lane.b32.xlu1 %v11776_v13, %s15965_s11 }
 0x482   :  { %3164 = vrot.lane.b32.xlu0 %v11778_v14, %s15965_s11  ;;  %s16165_s11 = smov 70  }
 0x483   :  { %v11791_v16 = vpop.permute.xlu1 %2656  ;;  %v11793_v17 = vpop.permute.xlu0 %2609 }
 0x485   :  { %2821 = vperm.xlu1 %9571, %v2803_v9  }
 0x486   :  { %2816 = vperm.xlu0 %9572, %v2802_v18   ;;  %v2562_v18 = vsel %vm2561_vm5, %v11735_v56, %v11725_v1 }
 0x487   :  { %v11798_v0 = vpop.permute.xlu1 %2641  ;;  %v11800_v19 = vpop.permute.xlu0 %2654  ;;  %v2568_v52 = vsel %vm2496_vm15, %v11743_v59, %v2562_v18 }
 0x48b   :  { %v11802_v20 = vpop.permute.xlu1 %2692  ;;  %v11804_v21 = vpop.permute.xlu0 %2643 }
 0x48f   :  { %v11806_v22 = vpop.permute.xlu1 %2732  ;;  %v11808_v63 = vpop.permute.xlu0 %2690 }
 0x493   :  { %v11810_v27 = vpop.permute.xlu1 %2694  ;;  %v11812_v28 = vpop.permute.xlu0 %2677 }
 0x497   :  { %v2490_v12 = vpop.permute.xlu1 %2489  ;;  %v11814_v29 = vpop.permute.xlu0 %2730 }
 0x49b   :  { %v11816_v30 = vpop.permute.xlu1 %2525  ;;  %v11818_v33 = vpop.permute.xlu0 %2698 }
 0x49f   :  { %v2512_v60 = vpop.permute.xlu1 %2511  ;;  %v11820_v38 = vpop.permute.xlu0 %2487 }
 0x4a0   :  { %v2493_v41 = vsel %vm2491_vm11, %v11820_v38, %v2490_v12 }
 0x4a1   :  { %v2503_v42 = vsel %vm2496_vm15, %v11583_v40, %v2493_v41 }
 0x4a2   :  { %2863 = vmatprep.subr.bf16.mxu1 %v2503_v42  ;;  %v2549_v42 = vsel %vm2548_vm7, %v11733_v26, %v11743_v59 }
 0x4a3   :  { %v11829_v49 = vpop.permute.xlu1 %2559  ;;  %2864 = vmatpush1.bf16.msra.mxu1 %v11573_v36  ;;  %v11832_v51 = vpop.permute.xlu0 %2719 }
 0x4a4   :  { %2865 = vmatprep.subr.bf16.mxu1 %v2534_v39 }
 0x4a7   :  { %v2545_v40 = vpop.permute.xlu1 %2544  ;;  %2866 = vmatpush1.bf16.msra.mxu1 %v2515_v50  ;;  %v2524_v6 = vpop.permute.xlu0 %2523 }
 0x4a8   :  { %v2529_v53 = vsel %vm2527_vm13, %v2524_v6, %v11816_v30  ;;  %v2595_v6 = vsel %vm2594_vm2, %v11754_v7, %v11741_v58 }
 0x4a9   :  { %v2601_v26 = vsel %vm2496_vm15, %v11770_v45, %v2595_v6 }
 0x4ab   :  { %v11841_v5 = vpop.permute.xlu1 %2592  ;;  %v2514_v36 = vpop.permute.xlu0 %2513 }
 0x4ac   :  { %v2538_v8 = vsel %vm2496_vm15, %v2514_v36, %v2529_v53  ;;  %v2516_v9 = vsel %vm1318_vm3, %v2512_v60, %v2514_v36 }
 0x4ad   :  { %2867 = vmatprep.subr.bf16.mxu1 %v2538_v8 }
 0x4ae   :  { %2868 = vmatpush1.bf16.msra.mxu1 %v2516_v9 }
 0x4af   :  { %v2579_v55 = vpop.permute.xlu1 %2578  ;;  %2869 = vmatprep.subr.bf16.mxu1 %v2568_v52  ;;  %v2558_v41 = vpop.permute.xlu0 %2557 }
 0x4b0   :  { %v2563_v60 = vsel %vm2561_vm5, %v2558_v41, %v11829_v49 }
 0x4b2   :  { %2870 = vmatpush1.bf16.msra.mxu1 %v2549_v42  ;;  %v2663_v42 = vsel %vm16008_vm4, %v11800_v19, %v11791_v16 }
 0x4b3   :  { %v2627_v44 = vpop.permute.xlu1 %2626  ;;  %v2547_v56 = vpop.permute.xlu0 %2546 }
 0x4b4   :  { %9153 = vmatprep.subr.bf16.mxu0 %v2627_v44  ;;  %v2572_v39 = vsel %vm2496_vm15, %v2547_v56, %v2563_v60  ;;  %v2550_v50 = vsel %vm2548_vm7, %v2545_v40, %v2547_v56  ;;  %v2582_v40 = vsel %vm1479_vm14, %v11752_v61, %v11770_v45  ;;  %v2704_v61 = vsel %vm16005_vm6, %v11802_v20, %v11810_v27 }
 0x4b5   :  { %2871 = vmatprep.subr.bf16.mxu1 %v2572_v39  ;;  %9154 = vmatpush3.bf16.msra.mxu0 %v2490_v12  ;;  %v2650_v60 = vsel %vm15962_vm1, %v11798_v0, %v11804_v21 }
 0x4b6   :  { %2872 = vmatpush1.bf16.msra.mxu1 %v2550_v50  ;;  %9155 = vmatprep.subr.bf16.mxu0 %v11791_v16  ;;  %v2703_v50 = vsel %vm16005_vm6, %v11808_v63, %v11802_v20 }
 0x4b7   :  { %v2612_v59 = vpop.permute.xlu1 %2611  ;;  %2873 = vmatprep.subr.bf16.mxu1 %v2601_v26  ;;  %v2591_v53 = vpop.permute.xlu0 %2590  ;;  %v2711_v6 = vsel %vm2496_vm15, %v11812_v28, %v2703_v50 }
 0x4b8   :  { %v2596_v7 = vsel %vm2594_vm2, %v2591_v53, %v11841_v5 }
 0x4b9   :  { %9156 = vmatpush3.bf16.msra.mxu0 %v11704_v47  ;;  %v2629_v47 = vsel %vm16012_vm9, %v11782_v62, %v11768_v10  ;;  %v2616_v10 = vsel %vm16011_vm8, %v11780_v54, %v11793_v17 }
 0x4ba   :  { %2874 = vmatpush1.bf16.msra.mxu1 %v2582_v40  ;;  %v2635_v45 = vsel %vm2496_vm15, %v11793_v17, %v2629_v47 }
 0x4bb   :  { %v2661_v12 = vpop.permute.xlu1 %2660  ;;  %v2581_v36 = vpop.permute.xlu0 %2580 }
 0x4bc   :  { %9157 = vmatprep.subr.bf16.mxu0 %v2661_v12  ;;  %v2605_v8 = vsel %vm2496_vm15, %v2581_v36, %v2596_v7  ;;  %v2583_v9 = vsel %vm1479_vm14, %v2579_v55, %v2581_v36  ;;  %v2743_v7 = vsel %vm15978_vm0, %v11814_v29, %v11806_v22 }
 0x4bd   :  { %2875 = vmatprep.subr.bf16.mxu1 %v2605_v8  ;;  %9158 = vmatpush3.bf16.msra.mxu0 %v11816_v30 }
 0x4be   :  { %2876 = vmatpush1.bf16.msra.mxu1 %v2583_v9  ;;  %9159 = vmatprep.subr.bf16.mxu0 %v2704_v61 }
 0x4bf   :  { %v2646_v18 = vpop.permute.xlu1 %2645  ;;  %2877 = vmatprep.subr.bf16.mxu1 %v2635_v45  ;;  %v2625_v52 = vpop.permute.xlu0 %2624  ;;  %v9903_v45 = vld [vmem:[%s15947_s6] ss:$12 sps:$4 sm:$0xff]  }
 0x4c0   :  { %v2630_v62 = vsel %vm16012_vm9, %v2625_v52, %v2627_v44 }
 0x4c1   :  { %9160 = vmatpush3.bf16.msra.mxu0 %v11725_v1  ;;  %v2669_v1 = vsel %vm2496_vm15, %v11804_v21, %v2663_v42 }
 0x4c2   :  { %2878 = vmatpush1.bf16.msra.mxu1 %v2616_v10 }
 0x4c3   :  { %v2680_v27 = vpop.permute.xlu1 %2679  ;;  %v2614_v30 = vpop.permute.xlu0 %2613 }
 0x4c4   :  { %v2639_v55 = vsel %vm2496_vm15, %v2614_v30, %v2630_v62  ;;  %v2617_v41 = vsel %vm16011_vm8, %v2612_v59, %v2614_v30  ;;  %v2684_v59 = vsel %vm15963_vm12, %v11695_v43, %v11812_v28  ;;  %v2751_v43 = vsel %vm2496_vm15, %v11832_v51, %v2743_v7 }
 0x4c5   :  { %2879 = vmatprep.subr.bf16.mxu1 %v2639_v55  ;;  %v9908_v55 = vld [vmem:[%s15947_s6 + $0x18] ss:$12 sps:$4 sm:$0xff]  }
 0x4c6   :  { %2880 = vmatpush1.bf16.msra.mxu1 %v2617_v41 }
 0x4c7   :  { %v2735_v54 = vpop.permute.xlu1 %2734  ;;  %2881 = vmatprep.subr.bf16.mxu1 %v2669_v1  ;;  %v2659_v17 = vpop.permute.xlu0 %2658  ;;  %v9909_v1 = vld [vmem:[%s15947_s6 + $0x8] ss:$12 sps:$4 sm:$0xff]  }
 0x4c8   :  { %v2664_v44 = vsel %vm16008_vm4, %v2659_v17, %v2661_v12  ;;  %v2744_v28 = vsel %vm15978_vm0, %v11806_v22, %v2735_v54 }
 0x4ca   :  { %2882 = vmatpush1.bf16.msra.mxu1 %v2650_v60 }
 0x4cb   :  { %v2697_v56 = vpop.permute.xlu1 %2696  ;;  %v2648_v39 = vpop.permute.xlu0 %2647 }
 0x4cc   :  { %v2673_v16 = vsel %vm2496_vm15, %v2648_v39, %v2664_v44  ;;  %v2651_v19 = vsel %vm15962_vm1, %v2646_v18, %v2648_v39  ;;  %v2705_v26 = vsel %vm16005_vm6, %v2697_v56, %v11818_v33  ;;  %vm15977_vm1 = vcmask 809984   ;;  %v9910_v39 = vld [vmem:[%s15947_s6 + $0x20] ss:$12 sps:$4 sm:$0xff]  }
 0x4cd   :  { %2883 = vmatprep.subr.bf16.mxu1 %v2673_v16 }
 0x4ce   :  { %2884 = vmatpush1.bf16.msra.mxu1 %v2651_v19 }
 0x4cf   :  { %v2682_v0 = vpop.permute.xlu1 %2681  ;;  %2885 = vmatprep.subr.bf16.mxu1 %v2711_v6  ;;  %v2718_v21 = vpop.permute.xlu0 %2717 }
 0x4d0   :  { %v2715_v53 = vsel %vm2496_vm15, %v2682_v0, %v2705_v26  ;;  %v2685_v12 = vsel %vm15963_vm12, %v2680_v27, %v2682_v0  ;;  %v2726_v29 = vsel %vm15977_vm1, %v2718_v21, %v11832_v51  ;;  %vm15975_vm12 = vcmask 556032  }
 0x4d2   :  { %2886 = vmatpush1.bf16.msra.mxu1 %v2684_v59 }
 0x4d3   :  { %v2737_v20 = vpop.permute.xlu1 %2736  ;;  %2887 = vmatprep.subr.bf16.mxu1 %v2715_v53  ;;  %v2701_v63 = vpop.permute.xlu0 %2700 }
 0x4d4   :  { %v2706_v40 = vsel %vm16005_vm6, %v11818_v33, %v2701_v63 }
 0x4d5   :  { %9161 = vmatprep.subr.bf16.mxu0 %v2706_v40 }
 0x4d6   :  { %2888 = vmatpush1.bf16.msra.mxu1 %v2685_v12  ;;  %9162 = vmatpush3.bf16.msra.mxu0 %v11829_v49 }
 0x4d7   :  { %v2724_v36 = vpop.permute.xlu1 %2723  ;;  %2889 = vmatprep.subr.bf16.mxu1 %v2751_v43  ;;  %9163 = vmatprep.subr.bf16.mxu0 %v2744_v28  ;;  %v2739_v33 = vpop.permute.xlu0 %2738 }
 0x4d8   :  { %v2745_v8 = vsel %vm15978_vm0, %v2737_v20, %v2739_v33 }
 0x4d9   :  { %v2755_v9 = vsel %vm2496_vm15, %v2724_v36, %v2745_v8 }
 0x4da   :  { %2890 = vmatpush1.bf16.msra.mxu1 %v2726_v29  ;;  %9164 = vmatpush3.bf16.msra.mxu0 %v11741_v58  ;;  %v9906_v58 = vld [vmem:[%s15947_s6 + $0x1c] ss:$12 sps:$4 sm:$0xff]  }
 0x4db   :  { %v2722_v49 = vpop.permute.xlu1 %2721  ;;  %2891 = vmatprep.subr.bf16.mxu1 %v2755_v9  ;;  %v2741_v47 = vpop.permute.xlu0 %2740 }
 0x4dc   :  { %v2727_v61 = vsel %vm15977_vm1, %v2722_v49, %v2724_v36  ;;  %v2746_v22 = vsel %vm15978_vm0, %v2739_v33, %v2741_v47  ;;  %vm3878_vm0 = vcmask 621568  }
 0x4dd   :  { %9165 = vmatprep.subr.bf16.mxu0 %v2746_v22 }
 0x4de   :  { %2892 = vmatpush1.bf16.msra.mxu1 %v2727_v61  ;;  %9166 = vmatpush3.bf16.msra.mxu0 %v11841_v5 }
 0x4df   :  { %v2768_v51 = vpop.permute.xlu1 %2767  ;;  %v2766_v18 = vpop.permute.xlu0 %2765 }
 0x4e0   :  { %v2778_v52 = vsel %vm15975_vm12, %v2766_v18, %v2768_v51 }
 0x4e1   :  { %2894 = vmatmul.mubr.bf16.vlgmr.msra.gmra.mrb[28].mxu1 %v9903_v45  ;;  %3000 = vmatmul.mubr.bf16.vlgmr.msra.gmra.mrb[28].mxu0 %v9903_v45  ;;  %v2786_v10 = vsel %vm2496_vm15, %v11706_v48, %v2778_v52 }
 0x4e2   :  { %2914 = vmatprep.subr.bf16.mxu1 %v2786_v10  ;;  %2903 = vmatprep.mubr.bf16.mxu1 %v9906_v58 }
 0x4e3   :  { %v2758_v62 = vpop.permute.xlu1 %2757  ;;  %v2770_v27 = vpop.permute.xlu0 %2769  ;;  %3007 = vmatprep.mubr.bf16.mxu0 %v9906_v58 }
 0x4e4   :  { %v2761_v5 = vsel %vm2491_vm11, %v2758_v62, %v11706_v48  ;;  %v2779_v30 = vsel %vm15975_vm12, %v2768_v51, %v2770_v27 }
 0x4e5   :  { %2915 = vmatpush1.bf16.msra.mxu1 %v2761_v5  ;;  %9323 = vmatprep.subr.bf16.mxu0 %v2779_v30 }
 0x4e6   :  { %9324 = vmatpush3.bf16.msra.mxu0 %v2779_v30 }
 0x4e7   :  { %v2774_v41 = vpop.permute.xlu1 %2773  ;;  %v2772_v42 = vpop.permute.xlu0 %2771 }
 0x4e8   :  { %v2780_v54 = vsel %vm15975_vm12, %v2772_v42, %v2774_v41 }
 0x4e9   :  { %2904 = vmatmul.mubr.bf16.gmra.mrb[32].mxu1 %v9908_v55  ;;  %3008 = vmatmul.mubr.bf16.gmra.mrb[32].mxu0 %v9908_v55  ;;  %v2790_v48 = vsel %vm2496_vm15, %v11820_v38, %v2780_v54 }
 0x4ea   :  { %2916 = vmatprep.subr.bf16.mxu1 %v2790_v48  ;;  %2946 = vmatprep.mubr.bf16.mxu1 %v15980_v2 }
 0x4eb   :  { %v2760_v17 = vpop.permute.xlu1 %2759  ;;  %v2776_v60 = vpop.permute.xlu0 %2775  ;;  %9327 = vmatprep.mubr.msk.bf16.mxu0 %vm15964_vm10, %v9909_v1 }
 0x4ec   :  { %v2762_v44 = vsel %vm2491_vm11, %v2760_v17, %v11820_v38  ;;  %v2781_v56 = vsel %vm15975_vm12, %v2774_v41, %v2776_v60  ;;  %vm3885_vm12 = vcmask 1045504  }
 0x4ed   :  { %2917 = vmatpush1.bf16.msra.mxu1 %v2762_v44  ;;  %9325 = vmatprep.subr.bf16.mxu0 %v2781_v56 }
 0x4ee   :  { %9326 = vmatpush3.bf16.msra.mxu0 %v2781_v56 }
 0x4f1   :  { %8899 = vmatmul.mubr.msk.bf16.vlgmr.msra.gmra.mrb[28].mxu1 %vm15964_vm10, %v9909_v1  ;;  %9328 = vmatmul.mubr.msk.bf16.vlgmr.msra.gmra.mrb[36].mxu0 %vm15964_vm10, %v9910_v39 }
 0x4f2   :  { %2956 = vmatprep.mubr.bf16.mxu1 %v15980_v2 }
 0x4f9   :  { %8900 = vmatmul.mubr.msk.bf16.gmra.mrb[32].mxu1 %vm15964_vm10, %v9910_v39  ;;  %vm15976_vm10 = vcmask 736256  }
 0x4fa   :  { %3983 = vmatprep.mubr.bf16.mxu1 %v15980_v2 }
 0x4fc   :  { %v11962_v0 = vpop.permute.xlu1 %2811 }
 0x4fd   :  { %v2807_v19 = vpop.permute.xlu0 %2806 }
 0x500   :  { %v3167_v20 = vpop.permute.xlu1 %3166 }
 0x501   :  { %v11964_v59 = vpop.permute.xlu0 %3164 }
 0x502   :  { %16068 = vst [vmem:[#allocation17_spill] sm:$0xff] %v11964_v59  ;;  %v11975_v47 = vsel %vm2496_vm15, %v11964_v59, %v3167_v20 }
 0x503   :  { %16069 = vst [vmem:[#allocation18_spill] sm:$0xff] %v11975_v47 }
 0x504   :  { %v11968_v36 = vpop.permute.xlu1 %2821 }
 0x505   :  { %v11966_v28 = vpop.permute.xlu0 %2816 }
 0x5b4   :  { %v9167_v38 = vpop.f32.mrb[28].mxu0 }
 0x5b5   :  { %v9168_v16 = vpop.f32.mrb[29].mxu0 }
 0x5b6   :  { %v9169_v50 = vadd.f32 %v9168_v16, %v9167_v38  ;;  %v9170_v6 = vpop.f32.mrb[30].mxu0 }
 0x5b7   :  { %v9171_v21 = vpop.f32.mrb[31].mxu0 }
 0x5b8   :  { %v9172_v26 = vadd.f32 %v9171_v21, %v9170_v6  ;;  %v3002_v9 = vadd.f32 %v9169_v50, %v2807_v19 }
 0x5ba   :  { %v3005_v10 = vadd.f32 %v9172_v26, %v11962_v0 }
 0x5bc   :  { %v9173_v53 = vpop.f32.mrb[32].mxu0 }
 0x5bd   :  { %v9174_v63 = vpop.f32.mrb[33].mxu0 }
 0x5be   :  { %v9175_v40 = vadd.f32 %v9174_v63, %v9173_v53  ;;  %v9176_v7 = vpop.f32.mrb[34].mxu0 }
 0x5bf   :  { %v9177_v12 = vpop.f32.mrb[35].mxu0 }
 0x5c0   :  { %v9178_v43 = vadd.f32 %v9177_v12, %v9176_v7  ;;  %v3010_v33 = vadd.f32 %v9175_v40, %v11966_v28 }
 0x5c2   :  { %v3013_v45 = vadd.f32 %v9178_v43, %v11968_v36 }
 0x5c4   :  { %v2948_v8 = vpop.f32.mrb[28].mxu1  ;;  %v9329_v29 = vpop.f32.mrb[36].mxu0 }
 0x5c5   :  { %v11971_v49 = vadd.f32 %v9329_v29, %v3010_v33  ;;  %v2950_v61 = vpop.f32.mrb[29].mxu1  ;;  %v3050_v22 = vpop.f32.mrb[37].mxu0  ;;  %v12028_v26 = vadd.f32 %v2948_v8, %v2807_v19 }
 0x5c6   :  { %v11978_v58 = vadd.f32 %v2950_v61, %v2807_v19  ;;  %v11980_v51 = vadd.f32 %v3050_v22, %v3002_v9  ;;  %v11982_v18 = vpop.f32.mrb[30].mxu1  ;;  %v9330_v52 = vpop.f32.mrb[38].mxu0 }
 0x5c7   :  { %v11985_v62 = vadd.f32 %v9330_v52, %v3013_v45  ;;  %v2954_v27 = vpop.f32.mrb[31].mxu1  ;;  %v3053_v5 = vpop.f32.mrb[39].mxu0  ;;  %v3176_v39 = vmul.f32 %v11975_v47, %v11971_v49  ;;  %v3076_v43 = vmul.f32 %v12028_v26, %v11778_v14 }
 0x5c8   :  { %v3172_v30 = vmul.f32 %v11975_v47, %v11980_v51  ;;  %v11990_v55 = vadd.f32 %v2954_v27, %v11962_v0  ;;  %v11992_v41 = vadd.f32 %v3053_v5, %v3005_v10  ;;  %v3171_v42 = vmul.f32 %v11978_v58, %v11964_v59 }
 0x5c9   :  { %v3178_v50 = vmul.f32 %v11975_v47, %v11985_v62  ;;  %v3077_v21 = vmul.f32 %v11978_v58, %v11776_v13 }
 0x5ca   :  { %3187 = vrot.lane.b32.xlu0 %v3171_v42, %s15969_s25  ;;  %3189 = vrot.lane.b32.xlu1 %v3172_v30, %s15969_s25  ;;  %v3174_v1 = vmul.f32 %v11975_v47, %v11992_v41  ;;  %v3173_v48 = vmul.f32 %v11990_v55, %v11964_v59 }
 0x5cb   :  { %v3084_v12 = vsel %vm2496_vm15, %v3077_v21, 0.0 }
 0x5cc   :  { %v12000_v54 = vpop.f32.mrb[32].mxu1  ;;  %v3085_v61 = vadd.f32 %v3084_v12, %v3076_v43 }
 0x5cd   :  { %v2960_v17 = vpop.f32.mrb[33].mxu1 }
 0x5ce   :  { %v12005_v60 = vadd.f32 %v2960_v17, %v11966_v28  ;;  %v12007_v44 = vpop.f32.mrb[34].mxu1  ;;  %3191 = vrot.lane.b32.xlu0 %v3173_v48, %s15969_s25  ;;  %3193 = vrot.lane.b32.xlu1 %v3174_v1, %s15969_s25 }
 0x5cf   :  { %v2964_v56 = vpop.f32.mrb[35].mxu1 }
 0x5d0   :  { %v12014_v38 = vadd.f32 %v2964_v56, %v11968_v36  ;;  %v3175_v16 = vmul.f32 %v12005_v60, %v11964_v59 }
 0x5d2   :  { %3195 = vrot.lane.b32.xlu0 %v3175_v16, %s15969_s25  ;;  %3197 = vrot.lane.b32.xlu1 %v3176_v39, %s15969_s25  ;;  %v3177_v6 = vmul.f32 %v12014_v38, %v11964_v59 }
 0x5d6   :  { %3199 = vrot.lane.b32.xlu0 %v3177_v6, %s15969_s25  ;;  %3201 = vrot.lane.b32.xlu1 %v3178_v50, %s15969_s25 }
 0x63c   :  { %v3190_v53 = vpop.permute.xlu1 %3189  ;;  %v3188_v20 = vpop.permute.xlu0 %3187 }
 0x63d   :  { %v3216_v63 = vsel %vm2496_vm15, %v3190_v53, 0.0  ;;  %v3204_v40 = vsel %vm15976_vm10, %v3188_v20, %v3190_v53 }
 0x63e   :  { %v3217_v7 = vadd.f32 %v3216_v63, %v3204_v40 }
 0x640   :  { %v3194_v33 = vpop.permute.xlu1 %3193  ;;  %3218 = vadd.xlane.f32.xlu0 %v3217_v7  ;;  %v3192_v29 = vpop.permute.xlu0 %3191 }
 0x641   :  { %v3220_v9 = vsel %vm2496_vm15, %v3194_v33, 0.0  ;;  %v3205_v19 = vsel %vm15976_vm10, %v3192_v29, %v3194_v33  ;;  %v3081_v33 = vmul.f32 %v12005_v60, %v11776_v13  ;;  %v12073_v29 = vadd.f32 %v12000_v54, %v11966_v28 }
 0x642   :  { %v3221_v8 = vadd.f32 %v3220_v9, %v3205_v19  ;;  %v3083_v19 = vmul.f32 %v12014_v38, %v11776_v13 }
 0x643   :  { %v3092_v9 = vsel %vm2496_vm15, %v3081_v33, 0.0 }
 0x644   :  { %v3198_v22 = vpop.permute.xlu1 %3197  ;;  %3086 = vadd.xlane.f32.xlu0 %v3085_v61  ;;  %3222 = vadd.xlane.f32.xlu1 %v3221_v8  ;;  %v3196_v45 = vpop.permute.xlu0 %3195  ;;  %v3080_v8 = vmul.f32 %v12073_v29, %v11778_v14  ;;  %v12082_v61 = vadd.f32 %v12007_v44, %v11968_v36 }
 0x645   :  { %v3224_v52 = vsel %vm2496_vm15, %v3198_v22, 0.0  ;;  %v3206_v10 = vsel %vm15976_vm10, %v3196_v45, %v3198_v22  ;;  %v3096_v45 = vsel %vm2496_vm15, %v3083_v19, 0.0 }
 0x646   :  { %v3225_v27 = vadd.f32 %v3224_v52, %v3206_v10  ;;  %v3093_v22 = vadd.f32 %v3092_v9, %v3080_v8  ;;  %v3082_v52 = vmul.f32 %v12082_v61, %v11778_v14  ;;  %v3079_v10 = vmul.f32 %v11990_v55, %v11776_v13 }
 0x648   :  { %v3202_v5 = vpop.permute.xlu1 %3201  ;;  %3226 = vadd.xlane.f32.xlu0 %v3225_v27  ;;  %v3200_v30 = vpop.permute.xlu0 %3199  ;;  %v3097_v28 = vadd.f32 %v3096_v45, %v3082_v52  ;;  %v12091_v27 = vadd.f32 %v11982_v18, %v11962_v0  ;;  %v3088_v36 = vsel %vm2496_vm15, %v3079_v10, 0.0 }
 0x649   :  { %v3228_v42 = vsel %vm2496_vm15, %v3202_v5, 0.0  ;;  %v3207_v1 = vsel %vm15976_vm10, %v3200_v30, %v3202_v5 }
 0x64a   :  { %v3229_v48 = vadd.f32 %v3228_v42, %v3207_v1  ;;  %v3078_v44 = vmul.f32 %v12091_v27, %v11778_v14 }
 0x64c   :  { %3230 = vadd.xlane.f32.xlu0 %v3229_v48  ;;  %v3089_v30 = vadd.f32 %v3088_v36, %v3078_v44 }
 0x6cd   :  { %v3219_v17 = vpop.xlane.xlu0 %3218 }
 0x6ce   :  { %v3232_v56 = vmul.f32 0.0069444445, %v3219_v17 }
 0x6d0   :  { %v3236_v39 = vsub.f32 %v11978_v58, %v3232_v56  ;;  %v3237_v16 = vsub.f32 %v11980_v51, %v3232_v56 }
 0x6d1   :  { %v3223_v50 = vpop.xlane.xlu1 %3222  ;;  %v3087_v54 = vpop.xlane.xlu0 %3086 }
 0x6d2   :  { %v12044_v6 = vmul.f32 %v3236_v39, %v11964_v59  ;;  %v12047_v21 = vmul.f32 %v3237_v16, %v11975_v47  ;;  %v3233_v53 = vmul.f32 0.0069444445, %v3223_v50 }
 0x6d4   :  { %v3238_v20 = vsub.f32 %v11990_v55, %v3233_v53  ;;  %v3239_v63 = vsub.f32 %v11992_v41, %v3233_v53  ;;  %v3253_v40 = vmul.f32 %v12047_v21, %v12047_v21  ;;  %v3252_v7 = vmul.f32 %v12044_v6, %v12044_v6 }
 0x6d5   :  { %v3227_v5 = vpop.xlane.xlu0 %3226 }
 0x6d6   :  { %v12056_v51 = vmul.f32 %v3238_v20, %v11964_v59  ;;  %3270 = vrot.lane.b32.xlu0 %v3253_v40, %s15969_s25  ;;  %3268 = vrot.lane.b32.xlu1 %v3252_v7, %s15969_s25  ;;  %v12063_v43 = vmul.f32 %v3239_v63, %v11975_v47  ;;  %v3234_v42 = vmul.f32 0.0069444445, %v3227_v5 }
 0x6d8   :  { %v3254_v12 = vmul.f32 %v12056_v51, %v12056_v51  ;;  %v3255_v41 = vmul.f32 %v12063_v43, %v12063_v43  ;;  %v3241_v1 = vsub.f32 %v11971_v49, %v3234_v42  ;;  %v3240_v17 = vsub.f32 %v12005_v60, %v3234_v42  ;;  %v9913_v42 = vld [vmem:[%s15950_s5 + $0x200] ss:$16 sps:$4 sm:$0xff]  }
 0x6d9   :  { %v3231_v48 = vpop.xlane.xlu0 %3230 }
 0x6da   :  { %3272 = vrot.lane.b32.xlu1 %v3254_v12, %s15969_s25  ;;  %v12099_v56 = vmul.f32 %v3241_v1, %v11975_v47  ;;  %v3235_v39 = vmul.f32 0.0069444445, %v3231_v48  ;;  %v12102_v0 = vmul.f32 %v3240_v17, %v11964_v59  ;;  %v9914_v1 = vld [vmem:[%s15950_s5 + $0x224] ss:$16 sps:$4 sm:$0xff]   ;;  %v9916_v48 = vld [vmem:[%s15950_s5 + $0x220] ss:$16 sps:$4 sm:$0xff]  }
 0x6db   :  { %v9917_v17 = vld [vmem:[%s15950_s5 + $0x244] ss:$16 sps:$4 sm:$0xff]  }
 0x6dc   :  { %v3242_v18 = vsub.f32 %v12014_v38, %v3235_v39  ;;  %v3257_v16 = vmul.f32 %v12099_v56, %v12099_v56  ;;  %v3243_v50 = vsub.f32 %v11985_v62, %v3235_v39  ;;  %v3256_v53 = vmul.f32 %v12102_v0, %v12102_v0  ;;  %v9919_v39 = vld [vmem:[%s15950_s5 + $0x240] ss:$16 sps:$4 sm:$0xff]  }
 0x6dd   :  { %v3100_v62 = vmul.f32 0.0069444445, %v3087_v54 }
 0x6de   :  { %3274 = vrot.lane.b32.xlu1 %v3255_v41, %s15969_s25  ;;  %v12110_v49 = vmul.f32 %v3242_v18, %v11964_v59  ;;  %v12116_v20 = vmul.f32 %v3243_v50, %v11975_v47  ;;  %v9920_v18 = vld [vmem:[%s15950_s5 + $0x264] ss:$16 sps:$4 sm:$0xff]  }
 0x6df   :  { %v3105_v7 = vsub.f32 %v11978_v58, %v3100_v62  ;;  %v3104_v19 = vsub.f32 %v12028_v26, %v3100_v62  ;;  %v9923_v50 = vld [vmem:[%s15950_s5 + $0x284] ss:$16 sps:$4 sm:$0x3f]   ;;  %v9928_v62 = vld [vmem:[%s15950_s5] ss:$16 sps:$4 sm:$0xff]  }
 0x6e0   :  { %v3258_v63 = vmul.f32 %v12110_v49, %v12110_v49  ;;  %v3259_v40 = vmul.f32 %v12116_v20, %v12116_v20 }
 0x6e1   :  { %v12132_v52 = vmul.f32 %v3104_v19, %v11778_v14  ;;  %v9944_v19 = vld [vmem:[%s15950_s5 + $0x64] ss:$16 sps:$4 sm:$0xff]  }
 0x6e3   :  { %v3120_v26 = vmul.f32 %v12132_v52, %v12132_v52 }
 0x6f5   :  { %3094 = vadd.xlane.f32.xlu0 %v3093_v22  ;;  %v12129_v22 = vmul.f32 %v3105_v7, %v11776_v13  ;;  %v9929_v7 = vld [vmem:[%s15950_s5 + $0xc] ss:$16 sps:$4 sm:$0xff]  }
 0x6f7   :  { %v3121_v58 = vmul.f32 %v12129_v22, %v12129_v22 }
 0x6f9   :  { %3098 = vadd.xlane.f32.xlu0 %v3097_v28  ;;  %v3128_v44 = vsel %vm2496_vm15, %v3121_v58, 0.0 }
 0x6fa   :  { %v3129_v5 = vadd.f32 %v3128_v44, %v3120_v26 }
 0x702   :  { %3090 = vadd.xlane.f32.xlu1 %v3089_v30  ;;  %v9911_v30 = vld [vmem:[%s15950_s5 + $0x204] ss:$16 sps:$4 sm:$0xff]  }
 0x703   :  { %3951 = vmatprep.subr.bf16.mxu1 %v9911_v30 }
 0x704   :  { %3952 = vmatpush1.bf16.msra.mxu1 %v9913_v42 }
 0x705   :  { %3953 = vmatprep.subr.bf16.mxu1 %v9914_v1 }
 0x708   :  { %3954 = vmatpush1.bf16.msra.mxu1 %v9916_v48 }
 0x709   :  { %3955 = vmatprep.subr.bf16.mxu1 %v9917_v17 }
 0x70c   :  { %3956 = vmatpush1.bf16.msra.mxu1 %v9919_v39 }
 0x70d   :  { %3957 = vmatprep.subr.bf16.mxu1 %v9920_v18 }
 0x70f   :  { %3278 = vrot.lane.b32.xlu0 %v3257_v16, %s15969_s25  ;;  %v9922_v16 = vld [vmem:[%s15950_s5 + $0x260] ss:$16 sps:$4 sm:$0xff]  }
 0x710   :  { %3958 = vmatpush1.bf16.msra.mxu1 %v9922_v16 }
 0x711   :  { %8987 = vmatprep.subr.msk.bf16.mxu1 %vm3885_vm12, %v9923_v50 }
 0x713   :  { %3276 = vrot.lane.b32.xlu1 %v3256_v53, %s15969_s25  ;;  %v9925_v53 = vld [vmem:[%s15950_s5 + $0x280] ss:$16 sps:$4 sm:$0x3f]  }
 0x717   :  { %3280 = vrot.lane.b32.xlu1 %v3258_v63, %s15969_s25  ;;  %v12173_v63 = vsel %vm3885_vm12, %v9925_v53, 0 }
 0x718   :  { %16070 = vst [vmem:[#allocation19_spill] sm:$0xff] %v12173_v63  ;;  %3960 = vmatpush1.bf16.msra.mxu1 %v12173_v63 }
 0x719   :  { %4004 = vmatprep.subr.bf16.mxu1 %v9929_v7 }
 0x71b   :  { %3282 = vrot.lane.b32.xlu1 %v3259_v40, %s15969_s25  ;;  %v9926_v40 = vld [vmem:[%s15950_s5 + $0x4] ss:$16 sps:$4 sm:$0xff]   ;;  %s10459_s25 = smov 67  }
 0x71c   :  { %3898 = vmatprep.subr.bf16.mxu0 %v9926_v40 }
 0x71d   :  { %3899 = vmatpush1.bf16.msra.mxu0 %v9928_v62 }
 0x748   :  { %v3269_v12 = vpop.permute.xlu1 %3268  ;;  %v3271_v41 = vpop.permute.xlu0 %3270 }
 0x749   :  { %v3284_v33 = vsel %vm15976_vm10, %v3269_v12, %v3271_v41  ;;  %v3296_v9 = vsel %vm2496_vm15, %v3271_v41, 0.0  ;;  %v9932_v12 = vld [vmem:[%s15950_s5 + $0x24] ss:$16 sps:$4 sm:$0xff]   ;;  %v9934_v41 = vld [vmem:[%s15950_s5 + $0x20] ss:$16 sps:$4 sm:$0xff]  }
 0x74a   :  { %v3297_v8 = vadd.f32 %v3296_v9, %v3284_v33  ;;  %3900 = vmatprep.subr.bf16.mxu0 %v9932_v12  ;;  %v9938_v33 = vld [vmem:[%s15950_s5 + $0x44] ss:$16 sps:$4 sm:$0xff]   ;;  %v9940_v9 = vld [vmem:[%s15950_s5 + $0x40] ss:$16 sps:$4 sm:$0xff]  }
 0x74b   :  { %3901 = vmatpush1.bf16.msra.mxu0 %v9934_v41 }
 0x74c   :  { %v3273_v45 = vpop.permute.xlu1 %3272  ;;  %3298 = vadd.xlane.f32.xlu0 %v3297_v8  ;;  %3902 = vmatprep.subr.bf16.mxu0 %v9938_v33 }
 0x74f   :  { %3903 = vmatpush1.bf16.msra.mxu0 %v9940_v9 }
 0x750   :  { %v3275_v28 = vpop.permute.xlu1 %3274  ;;  %3904 = vmatprep.subr.bf16.mxu0 %v9944_v19 }
 0x751   :  { %v3285_v54 = vsel %vm15976_vm10, %v3273_v45, %v3275_v28  ;;  %v3300_v10 = vsel %vm2496_vm15, %v3275_v28, 0.0  ;;  %v9946_v45 = vld [vmem:[%s15950_s5 + $0x60] ss:$16 sps:$4 sm:$0xff]  }
 0x752   :  { %v3301_v36 = vadd.f32 %v3300_v10, %v3285_v54  ;;  %v9950_v10 = vld [vmem:[%s15950_s5 + $0x84] ss:$16 sps:$4 sm:$0xff]  }
 0x753   :  { %3905 = vmatpush1.bf16.msra.mxu0 %v9946_v45  ;;  %v9956_v45 = vld [vmem:[%s15950_s5 + $0xa4] ss:$16 sps:$4 sm:$0xff]  }
 0x754   :  { %3302 = vadd.xlane.f32.xlu1 %v3301_v36  ;;  %v9952_v36 = vld [vmem:[%s15950_s5 + $0x80] ss:$16 sps:$4 sm:$0xff]   ;;  %3906 = vmatprep.subr.bf16.mxu0 %v9950_v10 }
 0x757   :  { %3907 = vmatpush1.bf16.msra.mxu0 %v9952_v36 }
 0x758   :  { %3130 = vadd.xlane.f32.xlu1 %v3129_v5  ;;  %3908 = vmatprep.subr.bf16.mxu0 %v9956_v45  ;;  %v10016_v45 = vld [vmem:[%s15950_s5 + $0x1e4] ss:$16 sps:$4 sm:$0xff]  }
 0x782   :  { %v3095_v8 = vpop.xlane.xlu0 %3094 }
 0x783   :  { %v3102_v58 = vmul.f32 0.0069444445, %v3095_v8 }
 0x785   :  { %v3108_v28 = vsub.f32 %v12073_v29, %v3102_v58  ;;  %v3109_v54 = vsub.f32 %v12005_v60, %v3102_v58 }
 0x786   :  { %v3099_v5 = vpop.xlane.xlu0 %3098 }
 0x787   :  { %v12212_v26 = vmul.f32 %v3108_v28, %v11778_v14  ;;  %v12215_v44 = vmul.f32 %v3109_v54, %v11776_v13  ;;  %v3103_v39 = vmul.f32 0.0069444445, %v3099_v5  ;;  %v9958_v54 = vld [vmem:[%s15950_s5 + $0xa0] ss:$16 sps:$4 sm:$0xff]  }
 0x788   :  { %3909 = vmatpush1.bf16.msra.mxu0 %v9958_v54 }
 0x789   :  { %v3124_v29 = vmul.f32 %v12212_v26, %v12212_v26  ;;  %v3125_v60 = vmul.f32 %v12215_v44, %v12215_v44  ;;  %v3111_v7 = vsub.f32 %v12014_v38, %v3103_v39  ;;  %v3110_v33 = vsub.f32 %v12082_v61, %v3103_v39  ;;  %v9974_v39 = vld [vmem:[%s15950_s5 + $0x104] ss:$16 sps:$4 sm:$0xff]  }
 0x78a   :  { %v3279_v17 = vpop.permute.xlu0 %3278 }
 0x78b   :  { %v3136_v30 = vsel %vm2496_vm15, %v3125_v60, 0.0  ;;  %v3304_v50 = vsel %vm2496_vm15, %v3279_v17, 0.0  ;;  %v12245_v61 = vmul.f32 %v3110_v33, %v11778_v14  ;;  %v9964_v60 = vld [vmem:[%s15950_s5 + $0xc0] ss:$16 sps:$4 sm:$0xff]  }
 0x78c   :  { %v3137_v42 = vadd.f32 %v3136_v30, %v3124_v29  ;;  %v9962_v29 = vld [vmem:[%s15950_s5 + $0xc4] ss:$16 sps:$4 sm:$0xff]   ;;  %v10000_v33 = vld [vmem:[%s15950_s5 + $0x180] ss:$16 sps:$4 sm:$0xff]  }
 0x78d   :  { %v3126_v30 = vmul.f32 %v12245_v61, %v12245_v61  ;;  %3910 = vmatprep.subr.bf16.mxu0 %v9962_v29 }
 0x78e   :  { %3138 = vadd.xlane.f32.xlu1 %v3137_v42  ;;  %3911 = vmatpush1.bf16.msra.mxu0 %v9964_v60 }
 0x78f   :  { %v3091_v1 = vpop.xlane.xlu1 %3090 }
 0x790   :  { %v3101_v48 = vmul.f32 0.0069444445, %v3091_v1  ;;  %v9968_v1 = vld [vmem:[%s15950_s5 + $0xe4] ss:$16 sps:$4 sm:$0xff]  }
 0x791   :  { %3912 = vmatprep.subr.bf16.mxu0 %v9968_v1 }
 0x792   :  { %v3107_v18 = vsub.f32 %v11990_v55, %v3101_v48  ;;  %v3106_v40 = vsub.f32 %v12091_v27, %v3101_v48  ;;  %v12235_v55 = vmul.f32 %v3111_v7, %v11776_v13  ;;  %v9994_v7 = vld [vmem:[%s15950_s5 + $0x160] ss:$16 sps:$4 sm:$0xff]  }
 0x793   :  { %v3277_v16 = vpop.permute.xlu1 %3276 }
 0x794   :  { %v3286_v53 = vsel %vm15976_vm10, %v3277_v16, %v3279_v17  ;;  %v12228_v12 = vmul.f32 %v3107_v18, %v11776_v13  ;;  %v12232_v9 = vmul.f32 %v3106_v40, %v11778_v14  ;;  %v3127_v36 = vmul.f32 %v12235_v55, %v12235_v55  ;;  %v9970_v17 = vld [vmem:[%s15950_s5 + $0xe0] ss:$16 sps:$4 sm:$0xff]   ;;  %v9980_v16 = vld [vmem:[%s15950_s5 + $0x124] ss:$16 sps:$4 sm:$0xff]  }
 0x795   :  { %v3305_v62 = vadd.f32 %v3304_v50, %v3286_v53  ;;  %3913 = vmatpush1.bf16.msra.mxu0 %v9970_v17  ;;  %v9976_v18 = vld [vmem:[%s15950_s5 + $0x100] ss:$16 sps:$4 sm:$0xff]   ;;  %v9986_v53 = vld [vmem:[%s15950_s5 + $0x144] ss:$16 sps:$4 sm:$0xff]  }
 0x796   :  { %v3123_v19 = vmul.f32 %v12228_v12, %v12228_v12  ;;  %v3122_v28 = vmul.f32 %v12232_v9, %v12232_v9  ;;  %v3140_v42 = vsel %vm2496_vm15, %v3127_v36, 0.0  ;;  %3914 = vmatprep.subr.bf16.mxu0 %v9974_v39  ;;  %v9982_v50 = vld [vmem:[%s15950_s5 + $0x120] ss:$16 sps:$4 sm:$0xff]  }
 0x797   :  { %v3281_v41 = vpop.permute.xlu1 %3280  ;;  %3306 = vadd.xlane.f32.xlu0 %v3305_v62  ;;  %v3141_v48 = vadd.f32 %v3140_v42, %v3126_v30  ;;  %v9988_v40 = vld [vmem:[%s15950_s5 + $0x140] ss:$16 sps:$4 sm:$0xff]   ;;  %v9992_v62 = vld [vmem:[%s15950_s5 + $0x164] ss:$16 sps:$4 sm:$0xff]  }
 0x798   :  { %v3132_v10 = vsel %vm2496_vm15, %v3123_v19, 0.0  ;;  %v10004_v19 = vld [vmem:[%s15950_s5 + $0x1a4] ss:$16 sps:$4 sm:$0xff]  }
 0x799   :  { %v3133_v5 = vadd.f32 %v3132_v10, %v3122_v28  ;;  %3915 = vmatpush1.bf16.msra.mxu0 %v9976_v18 }
 0x79a   :  { %3916 = vmatprep.subr.bf16.mxu0 %v9980_v16  ;;  %v12329_v16 = vld [vmem:[%s15950_s5 + $0x8] ss:$16 sps:$4 sm:$0xff]  }
 0x79b   :  { %v3283_v27 = vpop.permute.xlu1 %3282 }
 0x79c   :  { %v3287_v8 = vsel %vm15976_vm10, %v3281_v41, %v3283_v27  ;;  %v3308_v38 = vsel %vm2496_vm15, %v3283_v27, 0.0  ;;  %v9998_v41 = vld [vmem:[%s15950_s5 + $0x184] ss:$16 sps:$4 sm:$0xff]   ;;  %v10006_v27 = vld [vmem:[%s15950_s5 + $0x1a0] ss:$16 sps:$4 sm:$0xff]  }
 0x79d   :  { %v3309_v58 = vadd.f32 %v3308_v38, %v3287_v8  ;;  %3917 = vmatpush1.bf16.msra.mxu0 %v9982_v50  ;;  %v10010_v8 = vld [vmem:[%s15950_s5 + $0x1c4] ss:$16 sps:$4 sm:$0xff]   ;;  %v10012_v38 = vld [vmem:[%s15950_s5 + $0x1c0] ss:$16 sps:$4 sm:$0xff]  }
 0x79e   :  { %3918 = vmatprep.subr.bf16.mxu0 %v9986_v53  ;;  %v12351_v53 = vld [vmem:[%s15950_s5 + $0x4c] ss:$16 sps:$4 sm:$0xff]  }
 0x79f   :  { %3310 = vadd.xlane.f32.xlu0 %v3309_v58  ;;  %v10018_v58 = vld [vmem:[%s15950_s5 + $0x1e0] ss:$16 sps:$4 sm:$0xff]  }
 0x7a1   :  { %3919 = vmatpush1.bf16.msra.mxu0 %v9988_v40  ;;  %v12357_v40 = vld [vmem:[%s15950_s5 + $0x48] ss:$16 sps:$4 sm:$0xff]  }
 0x7a2   :  { %3920 = vmatprep.subr.bf16.mxu0 %v9992_v62  ;;  %v12363_v62 = vld [vmem:[%s15950_s5 + $0x6c] ss:$16 sps:$4 sm:$0xff]  }
 0x7a3   :  { %3134 = vadd.xlane.f32.xlu0 %v3133_v5 }
 0x7a5   :  { %3921 = vmatpush1.bf16.msra.mxu0 %v9994_v7  ;;  %v12369_v7 = vld [vmem:[%s15950_s5 + $0x68] ss:$16 sps:$4 sm:$0xff]  }
 0x7a6   :  { %3922 = vmatprep.subr.bf16.mxu0 %v9998_v41  ;;  %v12375_v41 = vld [vmem:[%s15950_s5 + $0x8c] ss:$16 sps:$4 sm:$0xff]  }
 0x7a7   :  { %3142 = vadd.xlane.f32.xlu0 %v3141_v48 }
 0x7a9   :  { %3923 = vmatpush1.bf16.msra.mxu0 %v10000_v33  ;;  %v12381_v33 = vld [vmem:[%s15950_s5 + $0x88] ss:$16 sps:$4 sm:$0xff]  }
 0x7aa   :  { %3924 = vmatprep.subr.bf16.mxu0 %v10004_v19  ;;  %v12387_v19 = vld [vmem:[%s15950_s5 + $0xac] ss:$16 sps:$4 sm:$0xff]  }
 0x7ad   :  { %3925 = vmatpush1.bf16.msra.mxu0 %v10006_v27  ;;  %v12393_v27 = vld [vmem:[%s15950_s5 + $0xa8] ss:$16 sps:$4 sm:$0xff]  }
 0x7ae   :  { %3926 = vmatprep.subr.bf16.mxu0 %v10010_v8  ;;  %v12399_v8 = vld [vmem:[%s15950_s5 + $0xcc] ss:$16 sps:$4 sm:$0xff]  }
 0x7b1   :  { %3927 = vmatpush1.bf16.msra.mxu0 %v10012_v38  ;;  %v12405_v38 = vld [vmem:[%s15950_s5 + $0xc8] ss:$16 sps:$4 sm:$0xff]  }
 0x7b2   :  { %3928 = vmatprep.subr.bf16.mxu0 %v10016_v45  ;;  %v12411_v45 = vld [vmem:[%s15950_s5 + $0xec] ss:$16 sps:$4 sm:$0xff]  }
 0x7b5   :  { %3929 = vmatpush1.bf16.msra.mxu0 %v10018_v58  ;;  %v12417_v58 = vld [vmem:[%s15950_s5 + $0xe8] ss:$16 sps:$4 sm:$0xff]  }
 0x7d9   :  { %v3299_v28 = vpop.xlane.xlu0 %3298 }
 0x7da   :  { %v3312_v54 = vmul.f32 0.0069444445, %v3299_v28  ;;  %v12423_v28 = vld [vmem:[%s15950_s5 + $0x10c] ss:$16 sps:$4 sm:$0xff]  }
 0x7dc   :  { %v3316_v10 = vadd.f32 1e-05, %v3312_v54  ;;  %v12429_v54 = vld [vmem:[%s15950_s5 + $0x108] ss:$16 sps:$4 sm:$0xff]  }
 0x7de   :  { %10122 = vrsqrt.f32 %v3316_v10  ;;  %v12435_v10 = vld [vmem:[%s15950_s5 + $0x12c] ss:$16 sps:$4 sm:$0xff]  }
 0x7e1   :  { %v3303_v36 = vpop.xlane.xlu1 %3302 }
 0x7e2   :  { %v3313_v29 = vmul.f32 0.0069444445, %v3303_v36  ;;  %v12441_v36 = vld [vmem:[%s15950_s5 + $0x128] ss:$16 sps:$4 sm:$0xff]  }
 0x7e4   :  { %v3317_v60 = vadd.f32 1e-05, %v3313_v29  ;;  %v12447_v29 = vld [vmem:[%s15950_s5 + $0x14c] ss:$16 sps:$4 sm:$0xff]  }
 0x7e5   :  { %16071 = vst [vmem:[#allocation20_spill] sm:$0xff] %v12447_v29 }
 0x7e6   :  { %10124 = vrsqrt.f32 %v3317_v60  ;;  %v12453_v60 = vld [vmem:[%s15950_s5 + $0x148] ss:$16 sps:$4 sm:$0xff]  }
 0x7e7   :  { %16072 = vst [vmem:[#allocation21_spill] sm:$0xff] %v12453_v60 }
 0x7e8   :  { %v12318_v5 = vpop.eup %10122 }
 0x7e9   :  { %v3325_v30 = vmul.f32 %v12318_v5, %v12047_v21  ;;  %v12336_v21 = vld [vmem:[%s15950_s5 + $0x2c] ss:$16 sps:$4 sm:$0xff]  }
 0x7eb   :  { %v3350_v1 = vmul.f32 0.2, %v3325_v30  ;;  %vm3338_vm10 = vcmp.ge.f32.partialorder %v3325_v30, 0.0 }
 0x7ed   :  { %v3362_v39 = vsel %vm3338_vm10, %v3325_v30, %v3350_v1  ;;  %v12459_v30 = vld [vmem:[%s15950_s5 + $0x16c] ss:$16 sps:$4 sm:$0xff]   ;;  %v12465_v1 = vld [vmem:[%s15950_s5 + $0x168] ss:$16 sps:$4 sm:$0xff]  }
 0x7ee   :  { %16073 = vst [vmem:[#allocation22_spill] sm:$0xff] %v12459_v30  ;;  %16074 = vst [vmem:[#allocation23_spill] sm:$0xff] %v12465_v1 }
 0x7f0   :  { %v12322_v42 = vpop.eup %10124 }
 0x7f1   :  { %v3327_v48 = vmul.f32 %v12322_v42, %v12063_v43  ;;  %v12344_v43 = vld [vmem:[%s15950_s5 + $0x28] ss:$16 sps:$4 sm:$0xff]  }
 0x7f3   :  { %vm3341_vm1 = vcmp.ge.f32.partialorder %v3327_v48, 0.0  ;;  %v3353_v17 = vmul.f32 0.2, %v3327_v48 }
 0x7f5   :  { %v3365_v18 = vsel %vm3341_vm1, %v3327_v48, %v3353_v17  ;;  %v3131_v48 = vpop.xlane.xlu1 %3130  ;;  %v12471_v17 = vld [vmem:[%s15950_s5 + $0x18c] ss:$16 sps:$4 sm:$0xff]  }
 0x7f6   :  { %v12331_v50 = vpack.c.bf16 %v3365_v18, %v3362_v39  ;;  %16075 = vst [vmem:[#allocation24_spill] sm:$0xff] %v12471_v17  ;;  %v3144_v18 = vmul.f32 0.0069444445, %v3131_v48  ;;  %v12489_v48 = vld [vmem:[%s15950_s5 + $0x1a8] ss:$16 sps:$4 sm:$0xff]  }
 0x7f7   :  { %16078 = vst [vmem:[#allocation27_spill] sm:$0xff] %v12489_v48 }
 0x7f8   :  { %8988 = vmatmul.mubr.msk.bf16.vlgmr.msra.gmra.mrb[36].mxu1 %vm3878_vm0, %v12331_v50  ;;  %v3148_v35 = vadd.f32 1e-05, %v3144_v18  ;;  %v12501_v18 = vld [vmem:[%s15950_s5 + $0x1c8] ss:$16 sps:$4 sm:$0xff]  }
 0x7f9   :  { %4005 = vmatpush1.bf16.msra.mxu1 %v12329_v16  ;;  %3993 = vmatprep.mubr.bf16.mxu1 %v15980_v2  ;;  %v12477_v2 = vld [vmem:[%s15950_s5 + $0x188] ss:$16 sps:$4 sm:$0xff]   ;;  %16080 = vst [vmem:[#allocation29_spill] sm:$0xff] %v12501_v18 }
 0x7fa   :  { %4006 = vmatprep.subr.bf16.mxu1 %v12336_v21  ;;  %16076 = vst [vmem:[#allocation25_spill] sm:$0xff] %v12477_v2 }
 0x7fd   :  { %4007 = vmatpush1.bf16.msra.mxu1 %v12344_v43 }
 0x7fe   :  { %4008 = vmatprep.subr.bf16.mxu1 %v12351_v53 }
 0x801   :  { %4009 = vmatpush1.bf16.msra.mxu1 %v12357_v40 }
 0x802   :  { %4010 = vmatprep.subr.bf16.mxu1 %v12363_v62 }
 0x805   :  { %4011 = vmatpush1.bf16.msra.mxu1 %v12369_v7 }
 0x806   :  { %4012 = vmatprep.subr.bf16.mxu1 %v12375_v41 }
 0x809   :  { %4013 = vmatpush1.bf16.msra.mxu1 %v12381_v33 }
 0x80a   :  { %4014 = vmatprep.subr.bf16.mxu1 %v12387_v19 }
 0x80d   :  { %4015 = vmatpush1.bf16.msra.mxu1 %v12393_v27 }
 0x80e   :  { %4016 = vmatprep.subr.bf16.mxu1 %v12399_v8 }
 0x811   :  { %4017 = vmatpush1.bf16.msra.mxu1 %v12405_v38 }
 0x812   :  { %4018 = vmatprep.subr.bf16.mxu1 %v12411_v45 }
 0x815   :  { %4019 = vmatpush1.bf16.msra.mxu1 %v12417_v58 }
 0x816   :  { %4020 = vmatprep.subr.bf16.mxu1 %v12423_v28 }
 0x819   :  { %4021 = vmatpush1.bf16.msra.mxu1 %v12429_v54 }
 0x81a   :  { %4022 = vmatprep.subr.bf16.mxu1 %v12435_v10 }
 0x81b   :  { %v3139_v63 = vpop.xlane.xlu1 %3138 }
 0x81d   :  { %4023 = vmatpush1.bf16.msra.mxu1 %v12441_v36 }
 0x81e   :  { %4024 = vmatprep.subr.bf16.mxu1 %v12447_v29 }
 0x821   :  { %4025 = vmatpush1.bf16.msra.mxu1 %v12453_v60 }
 0x822   :  { %4026 = vmatprep.subr.bf16.mxu1 %v12459_v30 }
 0x824   :  { %v3307_v39 = vpop.xlane.xlu0 %3306 }
 0x825   :  { %v3314_v57 = vmul.f32 0.0069444445, %v3307_v39  ;;  %4027 = vmatpush1.bf16.msra.mxu1 %v12465_v1  ;;  %v3146_v39 = vmul.f32 0.0069444445, %v3139_v63  ;;  %v12507_v63 = vld [vmem:[%s15950_s5 + $0x1ec] ss:$16 sps:$4 sm:$0xff]  }
 0x826   :  { %4028 = vmatprep.subr.bf16.mxu1 %v12471_v17  ;;  %16081 = vst [vmem:[#allocation30_spill] sm:$0xff] %v12507_v63 }
 0x827   :  { %v3318_v31 = vadd.f32 1e-05, %v3314_v57  ;;  %v3150_v32 = vadd.f32 1e-05, %v3146_v39  ;;  %v12519_v39 = vld [vmem:[%s15950_s5 + $0x20c] ss:$16 sps:$4 sm:$0xff]  }
 0x828   :  { %16083 = vst [vmem:[#allocation32_spill] sm:$0xff] %v12519_v39 }
 0x829   :  { %4029 = vmatpush1.bf16.msra.mxu1 %v12477_v2  ;;  %10126 = vrsqrt.f32 %v3318_v31 }
 0x82a   :  { %4030 = vmatprep.subr.bf16.mxu1 %v12483_v46  ;;  %10128 = vrsqrt.f32 %v3148_v35 }
 0x82c   :  { %v3311_v4 = vpop.xlane.xlu0 %3310 }
 0x82d   :  { %v3315_v57 = vmul.f32 0.0069444445, %v3311_v4  ;;  %4031 = vmatpush1.bf16.msra.mxu1 %v12489_v48  ;;  %v12513_v4 = vld [vmem:[%s15950_s5 + $0x1e8] ss:$16 sps:$4 sm:$0xff]  }
 0x82e   :  { %4032 = vmatprep.subr.bf16.mxu1 %v12495_v37  ;;  %16082 = vst [vmem:[#allocation31_spill] sm:$0xff] %v12513_v4 }
 0x82f   :  { %v3319_v11 = vadd.f32 1e-05, %v3315_v57 }
 0x830   :  { %v3135_v31 = vpop.xlane.xlu0 %3134 }
 0x831   :  { %10130 = vrsqrt.f32 %v3319_v11  ;;  %v3145_v35 = vmul.f32 0.0069444445, %v3135_v31  ;;  %4033 = vmatpush1.bf16.msra.mxu1 %v12501_v18 }
 0x832   :  { %10132 = vrsqrt.f32 %v3150_v32  ;;  %4034 = vmatprep.subr.bf16.mxu1 %v12507_v63 }
 0x833   :  { %v3149_v34 = vadd.f32 1e-05, %v3145_v35  ;;  %v10127_v15 = vpop.eup %10126 }
 0x834   :  { %v3143_v57 = vpop.xlane.xlu0 %3142  ;;  %v10129_v31 = vpop.eup %10128  ;;  %v3329_v32 = vmul.f32 %v10127_v15, %v12099_v56  ;;  %v3328_v56 = vmul.f32 %v10127_v15, %v12102_v0 }
 0x835   :  { %10134 = vrsqrt.f32 %v3149_v34  ;;  %v3147_v11 = vmul.f32 0.0069444445, %v3143_v57  ;;  %4035 = vmatpush1.bf16.msra.mxu1 %v12513_v4  ;;  %v3157_v3 = vmul.f32 %v10129_v31, %v12129_v22  ;;  %v3156_v24 = vmul.f32 %v10129_v31, %v12132_v52 }
 0x836   :  { %4057 = vmatprep.subr.bf16.mxu1 %v12519_v39  ;;  %v3356_v13 = vmul.f32 0.2, %v3329_v32  ;;  %v3324_v34 = vmul.f32 %v12318_v5, %v12044_v6  ;;  %vm3344_vm10 = vcmp.ge.f32.partialorder %v3329_v32, 0.0  ;;  %v3326_v22 = vmul.f32 %v12322_v42, %v12056_v51 }
 0x837   :  { %v3151_v25 = vadd.f32 1e-05, %v3147_v11  ;;  %vm3336_vm6 = vcmp.ge.f32.partialorder %v3156_v24, 0.0 }
 0x838   :  { %v3332_v11 = vsel %vm2496_vm15, %v3157_v3, %v3324_v34  ;;  %v3368_v31 = vsel %vm3344_vm10, %v3329_v32, %v3356_v13  ;;  %v3348_v3 = vmul.f32 0.2, %v3156_v24 }
 0x839   :  { %10136 = vrsqrt.f32 %v3151_v25  ;;  %vm3337_vm4 = vcmp.ge.f32.partialorder %v3332_v11, 0.0  ;;  %v3349_v47 = vmul.f32 0.2, %v3332_v11 }
 0x83b   :  { %v10131_v23 = vpop.eup %10130 }
 0x83c   :  { %v10133_v14 = vpop.eup %10132  ;;  %v3331_v35 = vmul.f32 %v10131_v23, %v12116_v20 }
 0x83d   :  { %v3161_v52 = vmul.f32 %v10133_v14, %v12215_v44 }
 0x83e   :  { %vm3347_vm1 = vcmp.ge.f32.partialorder %v3331_v35, 0.0  ;;  %v3359_v57 = vmul.f32 0.2, %v3331_v35 }
 0x83f   :  { %v10135_v25 = vpop.eup %10134  ;;  %v3334_v51 = vsel %vm2496_vm15, %v3161_v52, %v3328_v56 }
 0x840   :  { %v3371_v20 = vsel %vm3347_vm1, %v3331_v35, %v3359_v57  ;;  %v3159_v59 = vmul.f32 %v10135_v25, %v12228_v12  ;;  %v3158_v6 = vmul.f32 %v10135_v25, %v12232_v9  ;;  %v3330_v9 = vmul.f32 %v10131_v23, %v12110_v49  ;;  %v10024_v23 = vld [vmem:[%s15950_s5 + $0x208] ss:$16 sps:$4 sm:$0xff]  }
 0x841   :  { %v12536_v5 = vpack.c.bf16 %v3371_v20, %v3368_v31  ;;  %v3361_v35 = vsel %vm3337_vm4, %v3332_v11, %v3349_v47  ;;  %v3355_v57 = vmul.f32 0.2, %v3334_v51  ;;  %vm3343_vm1 = vcmp.ge.f32.partialorder %v3334_v51, 0.0  ;;  %v10028_v20 = vld [vmem:[%s15950_s5 + $0x24c] ss:$16 sps:$4 sm:$0xff]  }
 0x842   :  { %v3333_v15 = vsel %vm2496_vm15, %v3159_v59, %v3326_v22  ;;  %vm3339_vm8 = vcmp.ge.f32.partialorder %v3158_v6, 0.0  ;;  %v3351_v0 = vmul.f32 0.2, %v3158_v6  ;;  %v3360_v59 = vsel %vm3336_vm6, %v3156_v24, %v3348_v3 }
 0x843   :  { %v10137_v42 = vpop.eup %10136  ;;  %8989 = vmatmul.mubr.msk.bf16.gmra.mrb[40].mxu1 %vm3878_vm0, %v12536_v5  ;;  %vm3340_vm10 = vcmp.ge.f32.partialorder %v3333_v15, 0.0  ;;  %v3352_v13 = vmul.f32 0.2, %v3333_v15  ;;  %v3160_v22 = vmul.f32 %v10133_v14, %v12212_v26  ;;  %v3367_v49 = vsel %vm3343_vm1, %v3334_v51, %v3355_v57  ;;  %v10027_v26 = vld [vmem:[%s15950_s5 + $0x228] ss:$16 sps:$4 sm:$0xff]  }
 0x844   :  { %v3363_v44 = vsel %vm3339_vm8, %v3158_v6, %v3351_v0  ;;  %v3163_v12 = vmul.f32 %v10137_v42, %v12235_v55  ;;  %v3162_v32 = vmul.f32 %v10137_v42, %v12245_v61  ;;  %v10025_v55 = vld [vmem:[%s15950_s5 + $0x22c] ss:$16 sps:$4 sm:$0xff]   ;;  %v10033_v51 = vld [vmem:[%s15950_s5 + $0x268] ss:$16 sps:$4 sm:$0xff]   ;;  %v16084_v42 = vmov 0  }
 0x845   :  { %v3364_v34 = vsel %vm3340_vm10, %v3333_v15, %v3352_v13  ;;  %v3372_v52 = vpack.c.bf16 %v3363_v44, %v3360_v59  ;;  %v3354_v14 = vmul.f32 0.2, %v3160_v22  ;;  %vm3342_vm6 = vcmp.ge.f32.partialorder %v3160_v22, 0.0  ;;  %v10030_v15 = vld [vmem:[%s15950_s5 + $0x248] ss:$16 sps:$4 sm:$0xff]  }
 0x846   :  { %v3373_v25 = vpack.c.bf16 %v3364_v34, %v3361_v35  ;;  %v3335_v56 = vsel %vm2496_vm15, %v3163_v12, %v3330_v9  ;;  %v3357_v47 = vmul.f32 0.2, %v3162_v32  ;;  %vm3345_vm4 = vcmp.ge.f32.partialorder %v3162_v32, 0.0  ;;  %v10031_v0 = vld [vmem:[%s15950_s5 + $0x26c] ss:$16 sps:$4 sm:$0xff]  }
 0x847   :  { %vm3346_vm9 = vcmp.ge.f32.partialorder %v3335_v56, 0.0  ;;  %v3358_v31 = vmul.f32 0.2, %v3335_v56  ;;  %v3366_v6 = vsel %vm3342_vm6, %v3160_v22, %v3354_v14  ;;  %v10034_v13 = vld [vmem:[%s15950_s5 + $0x28c] ss:$16 sps:$4 sm:$0x3f]  }
 0x848   :  { %3930 = vmatprep.mubr.bf16.mxu0 %v3373_v25  ;;  %4036 = vmatprep.mubr.bf16.mxu1 %v3373_v25  ;;  %v3369_v11 = vsel %vm3345_vm4, %v3162_v32, %v3357_v47  ;;  %v10036_v44 = vld [vmem:[%s15950_s5 + $0x288] ss:$16 sps:$4 sm:$0x3f]   ;;  %vm16088_vm8 = vcmask 678912   ;;  %vm16091_vm1 = vcmask 670720   ;;  %vm16093_vm6 = vcmask 916480  }
 0x849   :  { %3931 = vmatmul.mubr.bf16.vlgmr.msra.gmra.mrb[40].mxu0 %v3372_v52  ;;  %v3370_v24 = vsel %vm3346_vm9, %v3335_v56, %v3358_v31  ;;  %v3375_v3 = vpack.c.bf16 %v3369_v11, %v3366_v6  ;;  %v12578_v12 = vsel %vm3885_vm12, %v10036_v44, 0  ;;  %vm16089_vm9 = vcmask 924672   ;;  %vm16090_vm10 = vmmov %vm16088_vm8 }
 0x84a   :  { %v3376_v61 = vpack.c.bf16 %v3370_v24, %v3367_v49  ;;  %16085 = vst [vmem:[#allocation33_spill] sm:$0xff] %v12578_v12  ;;  %vm16092_vm4 = vmmov %vm16089_vm9 }
 0x84b   :  { %4037 = vmatmul.mubr.bf16.vlgmr.msra.gmra.mrb[44].mxu1 %v3372_v52 }
 0x84c   :  { %4058 = vmatpush1.bf16.msra.mxu1 %v10024_v23  ;;  %3940 = vmatprep.mubr.bf16.mxu0 %v3376_v61 }
 0x84d   :  { %4046 = vmatprep.mubr.bf16.mxu1 %v3376_v61  ;;  %4059 = vmatprep.subr.bf16.mxu1 %v10025_v55 }
 0x850   :  { %4060 = vmatpush1.bf16.msra.mxu1 %v10027_v26 }
 0x851   :  { %3941 = vmatmul.mubr.bf16.gmra.mrb[44].mxu0 %v3375_v3  ;;  %4061 = vmatprep.subr.bf16.mxu1 %v10028_v20 }
 0x853   :  { %4047 = vmatmul.mubr.bf16.gmra.mrb[48].mxu1 %v3375_v3 }
 0x854   :  { %4062 = vmatpush1.bf16.msra.mxu1 %v10030_v15  ;;  %4089 = vmatprep.mubr.bf16.mxu1 %v16084_v42 }
 0x855   :  { %4063 = vmatprep.subr.bf16.mxu1 %v10031_v0 }
 0x858   :  { %4064 = vmatpush1.bf16.msra.mxu1 %v10033_v51 }
 0x859   :  { %8990 = vmatprep.subr.msk.bf16.mxu1 %vm3885_vm12, %v10034_v13 }
 0x85c   :  { %4066 = vmatpush1.bf16.msra.mxu1 %v12578_v12 }
 0x85f   :  { %8991 = vmatmul.mubr.msk.bf16.vlgmr.msra.gmra.mrb[44].mxu1 %vm3878_vm0, %v12331_v50 }
 0x860   :  { %4099 = vmatprep.mubr.bf16.mxu1 %v16084_v42 }
 0x867   :  { %8992 = vmatmul.mubr.msk.bf16.gmra.mrb[48].mxu1 %vm3878_vm0, %v12536_v5 }
 0x8cb   :  { %v3985_v9 = vpop.f32.mrb[36].mxu1 }
 0x8cc   :  { %v3987_v32 = vpop.f32.mrb[37].mxu1 }
 0x8cd   :  { %v3989_v35 = vpop.f32.mrb[38].mxu1 }
 0x8ce   :  { %v3991_v34 = vpop.f32.mrb[39].mxu1 }
 0x916   :  { %v3995_v59 = vpop.f32.mrb[40].mxu1 }
 0x917   :  { %v3997_v57 = vpop.f32.mrb[41].mxu1 }
 0x918   :  { %v3999_v25 = vpop.f32.mrb[42].mxu1 }
 0x919   :  { %v4001_v56 = vpop.f32.mrb[43].mxu1 }
 0x91c   :  { %v3932_v22 = vpop.f32.mrb[40].mxu0 }
 0x91d   :  { %v3986_v52 = vadd.f32 %v3985_v9, %v3932_v22  ;;  %v3934_v31 = vpop.f32.mrb[41].mxu0 }
 0x91e   :  { %v3988_v23 = vadd.f32 %v3987_v32, %v3934_v31  ;;  %v3936_v47 = vpop.f32.mrb[42].mxu0  ;;  %v10039_v31 = vld [vmem:[%s15947_s6 + $0x34] ss:$12 sps:$4 sm:$0xff]  }
 0x91f   :  { %v3990_v49 = vadd.f32 %v3989_v35, %v3936_v47  ;;  %v3938_v50 = vpop.f32.mrb[43].mxu0  ;;  %4624 = vmatprep.mubr.bf16.mxu1 %v10039_v31  ;;  %4518 = vmatprep.mubr.bf16.mxu0 %v10039_v31 }
 0x920   :  { %v3992_v24 = vadd.f32 %v3991_v34, %v3938_v50 }
 0x921   :  { %v12586_v55 = vpack.c.bf16 %v3990_v49, %v3986_v52 }
 0x922   :  { %v12588_v61 = vpack.c.bf16 %v3992_v24, %v3988_v23 }
 0x923   :  { %4144 = vrot.lane.b32.xlu1 %v12586_v55, %s10410_s0 }
 0x924   :  { %4156 = vrot.lane.b32.xlu0 %v12588_v61, %s16040_s27  ;;  %v3942_v5 = vpop.f32.mrb[44].mxu0 }
 0x925   :  { %v3996_v14 = vadd.f32 %v3995_v59, %v3942_v5  ;;  %v3944_v26 = vpop.f32.mrb[45].mxu0 }
 0x926   :  { %v3998_v11 = vadd.f32 %v3997_v57, %v3944_v26  ;;  %v3946_v20 = vpop.f32.mrb[46].mxu0 }
 0x927   :  { %v4000_v6 = vadd.f32 %v3999_v25, %v3946_v20  ;;  %4176 = vrot.lane.b32.xlu1 %v12586_v55, %s10444_s28  ;;  %v3948_v3 = vpop.f32.mrb[47].mxu0 }
 0x928   :  { %v4002_v15 = vadd.f32 %v4001_v56, %v3948_v3  ;;  %4146 = vrot.lane.b32.xlu0 %v12588_v61, %s10410_s0 }
 0x929   :  { %v12598_v0 = vpack.c.bf16 %v4000_v6, %v3996_v14 }
 0x92a   :  { %v12600_v51 = vpack.c.bf16 %v4002_v15, %v3998_v11 }
 0x92b   :  { %4208 = vrot.lane.b32.xlu1 %v12586_v55, %s10430_s22 }
 0x92c   :  { %4188 = vrot.lane.b32.xlu0 %v12588_v61, %s10443_s2 }
 0x92f   :  { %4240 = vrot.lane.b32.xlu1 %v12586_v55, %s16038_s14 }
 0x930   :  { %4178 = vrot.lane.b32.xlu0 %v12588_v61, %s10444_s28 }
 0x932   :  { %v4091_v13 = vpop.f32.mrb[44].mxu1 }
 0x933   :  { %v4093_v44 = vpop.f32.mrb[45].mxu1  ;;  %4122 = vrot.lane.b32.xlu1 %v12588_v61, %s10440_s4 }
 0x934   :  { %v4095_v9 = vpop.f32.mrb[46].mxu1  ;;  %4220 = vrot.lane.b32.xlu0 %v12588_v61, %s10445_s1 }
 0x935   :  { %v12614_v32 = vpack.c.bf16 %v4095_v9, %v4091_v13  ;;  %v4097_v35 = vpop.f32.mrb[47].mxu1  ;;  %v9001_v13 = vld [vmem:[%s15948_s7 + $0x20] sm:$0xff] }
 0x936   :  { %v12616_v34 = vpack.c.bf16 %v4097_v35, %v4093_v44 }
 0x937   :  { %4148 = vrot.lane.b32.xlu1 %v12598_v0, %s10410_s0 }
 0x938   :  { %4210 = vrot.lane.b32.xlu0 %v12588_v61, %s10430_s22 }
 0x93a   :  { %v4101_v59 = vpop.f32.mrb[48].mxu1 }
 0x93b   :  { %v4103_v57 = vpop.f32.mrb[49].mxu1  ;;  %4180 = vrot.lane.b32.xlu1 %v12598_v0, %s10444_s28 }
 0x93c   :  { %v4105_v25 = vpop.f32.mrb[50].mxu1  ;;  %4252 = vrot.lane.b32.xlu0 %v12588_v61, %s10446_s13 }
 0x93d   :  { %v12626_v56 = vpack.c.bf16 %v4105_v25, %v4101_v59  ;;  %v4107_v22 = vpop.f32.mrb[51].mxu1  ;;  %v9004_v25 = vld [vmem:[%s15948_s7 + $0x38] sm:$0xff] }
 0x93e   :  { %v12628_v52 = vpack.c.bf16 %v4107_v22, %v4103_v57 }
 0x93f   :  { %4212 = vrot.lane.b32.xlu1 %v12598_v0, %s10430_s22 }
 0x940   :  { %4242 = vrot.lane.b32.xlu0 %v12588_v61, %s16038_s14 }
 0x943   :  { %4126 = vrot.lane.b32.xlu1 %v12600_v51, %s10440_s4 }
 0x944   :  { %4160 = vrot.lane.b32.xlu0 %v12600_v51, %s16040_s27 }
 0x947   :  { %4244 = vrot.lane.b32.xlu1 %v12598_v0, %s16038_s14 }
 0x948   :  { %4150 = vrot.lane.b32.xlu0 %v12600_v51, %s10410_s0 }
 0x94b   :  { %4272 = vrot.lane.b32.xlu1 %v12586_v55, %s16032_s16 }
 0x94c   :  { %4192 = vrot.lane.b32.xlu0 %v12600_v51, %s10443_s2 }
 0x94f   :  { %4276 = vrot.lane.b32.xlu1 %v12598_v0, %s16032_s16 }
 0x950   :  { %4182 = vrot.lane.b32.xlu0 %v12600_v51, %s10444_s28 }
 0x953   :  { %4158 = vrot.lane.b32.xlu1 %v12614_v32, %s16040_s27 }
 0x954   :  { %4224 = vrot.lane.b32.xlu0 %v12600_v51, %s10445_s1 }
 0x957   :  { %4190 = vrot.lane.b32.xlu1 %v12614_v32, %s10443_s2 }
 0x958   :  { %4214 = vrot.lane.b32.xlu0 %v12600_v51, %s10430_s22 }
 0x95b   :  { %4222 = vrot.lane.b32.xlu1 %v12614_v32, %s10445_s1 }
 0x95c   :  { %4124 = vrot.lane.b32.xlu0 %v12614_v32, %s10440_s4 }
 0x95f   :  { %4254 = vrot.lane.b32.xlu1 %v12614_v32, %s10446_s13 }
 0x960   :  { %4256 = vrot.lane.b32.xlu0 %v12600_v51, %s10446_s13 }
 0x963   :  { %4286 = vrot.lane.b32.xlu1 %v12614_v32, %s16036_s15 }
 0x964   :  { %4246 = vrot.lane.b32.xlu0 %v12600_v51, %s16038_s14 }
 0x967   :  { %4128 = vrot.lane.b32.xlu1 %v12626_v56, %s10440_s4 }
 0x968   :  { %4284 = vrot.lane.b32.xlu0 %v12588_v61, %s16036_s15 }
 0x96b   :  { %4320 = vrot.lane.b32.xlu1 %v12614_v32, %s16030_s29 }
 0x96c   :  { %4274 = vrot.lane.b32.xlu0 %v12588_v61, %s16032_s16 }
 0x96f   :  { %4162 = vrot.lane.b32.xlu1 %v12626_v56, %s16040_s27 }
 0x970   :  { %4288 = vrot.lane.b32.xlu0 %v12600_v51, %s16036_s15 }
 0x973   :  { %4322 = vrot.lane.b32.xlu1 %v12616_v34, %s16030_s29 }
 0x974   :  { %4278 = vrot.lane.b32.xlu0 %v12600_v51, %s16032_s16  ;;  %s16204_s16 = smov 100  }
 0x977   :  { %4194 = vrot.lane.b32.xlu1 %v12626_v56, %s10443_s2 }
 0x978   :  { %4318 = vrot.lane.b32.xlu0 %v12588_v61, %s16030_s29 }
 0x97b   :  { %4324 = vrot.lane.b32.xlu1 %v12600_v51, %s16030_s29 }
 0x97c   :  { %4306 = vrot.lane.b32.xlu0 %v12588_v61, %s16034_s26 }
 0x97f   :  { %4226 = vrot.lane.b32.xlu1 %v12626_v56, %s10445_s1 }
 0x980   :  { %4304 = vrot.lane.b32.xlu0 %v12586_v55, %s16034_s26 }
 0x983   :  { %4310 = vrot.lane.b32.xlu1 %v12600_v51, %s16034_s26 }
 0x984   :  { %4356 = vrot.lane.b32.xlu0 %v12588_v61, %s16028_s19 }
 0x987   :  { %4258 = vrot.lane.b32.xlu1 %v12626_v56, %s10446_s13 }
 0x988   :  { %4346 = vrot.lane.b32.xlu0 %v12588_v61, %s16086_s20 }
 0x98b   :  { %4308 = vrot.lane.b32.xlu1 %v12598_v0, %s16034_s26 }
 0x98c   :  { %4344 = vrot.lane.b32.xlu0 %v12586_v55, %s16086_s20 }
 0x98f   :  { %4290 = vrot.lane.b32.xlu1 %v12626_v56, %s16036_s15 }
 0x990   :  { %4326 = vrot.lane.b32.xlu0 %v12626_v56, %s16030_s29 }
 0x993   :  { %4358 = vrot.lane.b32.xlu1 %v12614_v32, %s16028_s19 }
 0x994   :  { %4328 = vrot.lane.b32.xlu0 %v12628_v52, %s16030_s29  ;;  %s10462_s29 = smov 54  }
 0x995   :  { %v12721_v23 = vpop.permute.xlu1 %4144 }
 0x996   :  { %v12723_v47 = vpop.permute.xlu0 %4156 }
 0x997   :  { %4360 = vrot.lane.b32.xlu1 %v12616_v34, %s16028_s19 }
 0x998   :  { %4364 = vrot.lane.b32.xlu0 %v12626_v56, %s16028_s19 }
 0x999   :  { %v12729_v49 = vpop.permute.xlu1 %4176 }
 0x99a   :  { %v12731_v50 = vpop.permute.xlu0 %4146 }
 0x99b   :  { %4362 = vrot.lane.b32.xlu1 %v12600_v51, %s16028_s19 }
 0x99c   :  { %4366 = vrot.lane.b32.xlu0 %v12628_v52, %s16028_s19  ;;  %s16249_s19 = smov 86  }
 0x99d   :  { %v12737_v24 = vpop.permute.xlu1 %4208 }
 0x99e   :  { %v12739_v5 = vpop.permute.xlu0 %4188 }
 0x99f   :  { %4350 = vrot.lane.b32.xlu1 %v12600_v51, %s16086_s20 }
 0x9a0   :  { %4390 = vrot.lane.b32.xlu0 %v12588_v61, %s16087_s21 }
 0x9a1   :  { %v12745_v14 = vpop.permute.xlu1 %4240 }
 0x9a2   :  { %v12747_v26 = vpop.permute.xlu0 %4178 }
 0x9a3   :  { %4348 = vrot.lane.b32.xlu1 %v12598_v0, %s16086_s20 }
 0x9a4   :  { %4394 = vrot.lane.b32.xlu0 %v12616_v34, %s16087_s21  ;;  %v9002_v34 = vld [vmem:[%s15948_s7 + $0x28] sm:$0xff] }
 0x9a5   :  { %v12753_v11 = vpop.permute.xlu1 %4122 }
 0x9a6   :  { %v12755_v20 = vpop.permute.xlu0 %4220 }
 0x9a7   :  { %4392 = vrot.lane.b32.xlu1 %v12614_v32, %s16087_s21  ;;  %v9003_v32 = vld [vmem:[%s15948_s7 + $0x30] sm:$0xff] }
 0x9a8   :  { %4396 = vrot.lane.b32.xlu0 %v12600_v51, %s16087_s21 }
 0x9a9   :  { %v4149_v6 = vpop.permute.xlu1 %4148 }
 0x9aa   :  { %v12761_v3 = vpop.permute.xlu0 %4210 }
 0x9ab   :  { %4382 = vrot.lane.b32.xlu1 %v12586_v55, %s10440_s4 }
 0x9ac   :  { %4400 = vrot.lane.b32.xlu0 %v12628_v52, %s16087_s21 }
 0x9ad   :  { %v12767_v15 = vpop.permute.xlu1 %4180 }
 0x9ae   :  { %v12772_v44 = vpop.permute.xlu0 %4252 }
 0x9af   :  { %4398 = vrot.lane.b32.xlu1 %v12626_v56, %s16087_s21 }
 0x9b0   :  { %4432 = vperm.xlu0 %9572, %v9001_v13  }
 0x9b1   :  { %v12776_v9 = vpop.permute.xlu1 %4212 }
 0x9b2   :  { %v12781_v35 = vpop.permute.xlu0 %4242 }
 0x9b3   :  { %4384 = vrot.lane.b32.xlu1 %v12598_v0, %s10440_s4 }
 0x9b4   :  { %4442 = vperm.xlu0 %9572, %v9003_v32  }
 0x9b5   :  { %v12788_v59 = vpop.permute.xlu1 %4126 }
 0x9b6   :  { %v4161_v57 = vpop.permute.xlu0 %4160 }
 0x9b7   :  { %4437 = vperm.xlu1 %9571, %v9002_v34  }
 0x9b9   :  { %v12793_v56 = vpop.permute.xlu1 %4244 }
 0x9ba   :  { %v4151_v22 = vpop.permute.xlu0 %4150 }
 0x9bb   :  { %4447 = vperm.xlu1 %9571, %v9004_v25  }
 0x9bd   :  { %v12795_v52 = vpop.permute.xlu1 %4272 }
 0x9be   :  { %v4193_v31 = vpop.permute.xlu0 %4192 }
 0x9c1   :  { %v12797_v13 = vpop.permute.xlu1 %4276 }
 0x9c2   :  { %v4183_v32 = vpop.permute.xlu0 %4182 }
 0x9c5   :  { %v12799_v12 = vpop.permute.xlu1 %4158 }
 0x9c6   :  { %v4225_v39 = vpop.permute.xlu0 %4224  ;;  %v4164_v30 = vsel %vm2527_vm13, %v12723_v47, %v12799_v12  ;;  %v4152_v47 = vsel %vm1318_vm3, %v12721_v23, %v12731_v50 }
 0x9c9   :  { %v12801_v4 = vpop.permute.xlu1 %4190 }
 0x9ca   :  { %v4215_v34 = vpop.permute.xlu0 %4214 }
 0x9cd   :  { %v12803_v63 = vpop.permute.xlu1 %4222 }
 0x9ce   :  { %v4125_v18 = vpop.permute.xlu0 %4124 }
 0x9cf   :  { %v4130_v37 = vsel %vm2491_vm11, %v12753_v11, %v4125_v18 }
 0x9d0   :  { %v4136_v25 = vsel %vm2496_vm15, %v12588_v61, %v4130_v37 }
 0x9d1   :  { %v4255_v48 = vpop.permute.xlu1 %4254  ;;  %4486 = vmatprep.subr.bf16.mxu0 %v4136_v25 }
 0x9d2   :  { %4487 = vmatpush1.bf16.msra.mxu0 %v12586_v55  ;;  %9183 = vmatprep.subr.bf16.mxu1 %v4255_v48  ;;  %v4257_v46 = vpop.permute.xlu0 %4256 }
 0x9d3   :  { %9184 = vmatpush3.bf16.msra.mxu1 %v4125_v18  ;;  %v4170_v18 = vsel %vm2496_vm15, %v12731_v50, %v4164_v30  ;;  %v4153_v30 = vsel %vm1318_vm3, %v4149_v6, %v4151_v22 }
 0x9d5   :  { %v12810_v2 = vpop.permute.xlu1 %4286 }
 0x9d6   :  { %v12812_v17 = vpop.permute.xlu0 %4246 }
 0x9d9   :  { %v4129_v1 = vpop.permute.xlu1 %4128 }
 0x9da   :  { %v4131_v60 = vsel %vm2491_vm11, %v12788_v59, %v4129_v1  ;;  %v4285_v37 = vpop.permute.xlu0 %4284 }
 0x9db   :  { %v4140_v61 = vsel %vm2496_vm15, %v12600_v51, %v4131_v60  ;;  %v4196_v60 = vsel %vm2561_vm5, %v12739_v5, %v12801_v4  ;;  %v4184_v5 = vsel %vm2548_vm7, %v12729_v49, %v12747_v26 }
 0x9dc   :  { %4488 = vmatprep.subr.bf16.mxu0 %v4140_v61  ;;  %v4202_v23 = vsel %vm2496_vm15, %v12747_v26, %v4196_v60  ;;  %v4185_v60 = vsel %vm2548_vm7, %v12767_v15, %v4183_v32 }
 0x9dd   :  { %v12821_v55 = vpop.permute.xlu1 %4320  ;;  %4489 = vmatpush1.bf16.msra.mxu0 %v12598_v0 }
 0x9de   :  { %4490 = vmatprep.subr.bf16.mxu0 %v4170_v18  ;;  %v4275_v25 = vpop.permute.xlu0 %4274 }
 0x9e1   :  { %v12829_v29 = vpop.permute.xlu1 %4162  ;;  %4491 = vmatpush1.bf16.msra.mxu0 %v4152_v47 }
 0x9e2   :  { %v4165_v51 = vsel %vm2527_vm13, %v4161_v57, %v12829_v29  ;;  %v4289_v0 = vpop.permute.xlu0 %4288  ;;  %v4228_v57 = vsel %vm2594_vm2, %v12755_v20, %v12803_v63  ;;  %v4216_v20 = vsel %vm1479_vm14, %v12737_v24, %v12761_v3 }
 0x9e3   :  { %v4174_v61 = vsel %vm2496_vm15, %v4151_v22, %v4165_v51  ;;  %v4234_v49 = vsel %vm2496_vm15, %v12761_v3, %v4228_v57 }
 0x9e4   :  { %4492 = vmatprep.subr.bf16.mxu0 %v4174_v61 }
 0x9e5   :  { %v4323_v18 = vpop.permute.xlu1 %4322  ;;  %4493 = vmatpush1.bf16.msra.mxu0 %v4153_v30 }
 0x9e6   :  { %4494 = vmatprep.subr.bf16.mxu0 %v4202_v23  ;;  %v4279_v50 = vpop.permute.xlu0 %4278 }
 0x9e9   :  { %v12843_v47 = vpop.permute.xlu1 %4194  ;;  %4495 = vmatpush1.bf16.msra.mxu0 %v4184_v5  ;;  %v4217_v5 = vsel %vm1479_vm14, %v12776_v9, %v4215_v34 }
 0x9ea   :  { %v4197_v6 = vsel %vm2561_vm5, %v4193_v31, %v12843_v47  ;;  %v4319_v22 = vpop.permute.xlu0 %4318  ;;  %v4260_v31 = vsel %vm16088_vm8, %v12772_v44, %v4255_v48  ;;  %v4248_v48 = vsel %vm16089_vm9, %v12745_v14, %v12781_v35  ;;  %v4249_v14 = vsel %vm16092_vm4, %v12793_v56, %v12812_v17  ;;  %vm16094_vm8 = vmmov %vm16091_vm1 }
 0x9eb   :  { %v4206_v51 = vsel %vm2496_vm15, %v4183_v32, %v4197_v6  ;;  %v4266_v24 = vsel %vm2496_vm15, %v12781_v35, %v4260_v31  ;;  %vm16095_vm9 = vcmask 572416  }
 0x9ec   :  { %4496 = vmatprep.subr.bf16.mxu0 %v4206_v51  ;;  %v4331_v56 = vsel %vm16095_vm9, %v12821_v55, %v4323_v18  ;;  %vm16098_vm4 = vmmov %vm16095_vm9 }
 0x9ed   :  { %v4325_v61 = vpop.permute.xlu1 %4324  ;;  %4497 = vmatpush1.bf16.msra.mxu0 %v4185_v60 }
 0x9ee   :  { %4498 = vmatprep.subr.bf16.mxu0 %v4234_v49  ;;  %v4307_v26 = vpop.permute.xlu0 %4306 }
 0x9f1   :  { %v12858_v30 = vpop.permute.xlu1 %4226  ;;  %4499 = vmatpush1.bf16.msra.mxu0 %v4216_v20 }
 0x9f2   :  { %v4229_v15 = vsel %vm2594_vm2, %v4225_v39, %v12858_v30  ;;  %v4305_v32 = vpop.permute.xlu0 %4304 }
 0x9f3   :  { %v4238_v23 = vsel %vm2496_vm15, %v4215_v34, %v4229_v15  ;;  %v4292_v34 = vsel %vm16091_vm1, %v4285_v37, %v12810_v2  ;;  %vm16097_vm1 = vmmov %vm16093_vm6 }
 0x9f4   :  { %4500 = vmatprep.subr.bf16.mxu0 %v4238_v23 }
 0x9f5   :  { %v4311_v57 = vpop.permute.xlu1 %4310  ;;  %4501 = vmatpush1.bf16.msra.mxu0 %v4217_v5 }
 0x9f6   :  { %4502 = vmatprep.subr.bf16.mxu0 %v4266_v24  ;;  %v4357_v3 = vpop.permute.xlu0 %4356 }
 0x9f9   :  { %v4259_v44 = vpop.permute.xlu1 %4258  ;;  %4503 = vmatpush1.bf16.msra.mxu0 %v4248_v48 }
 0x9fa   :  { %v4261_v39 = vsel %vm16090_vm10, %v4257_v46, %v4259_v44  ;;  %9185 = vmatprep.subr.bf16.mxu1 %v4259_v44  ;;  %v4347_v6 = vpop.permute.xlu0 %4346  ;;  %v4298_v46 = vsel %vm2496_vm15, %v4275_v25, %v4292_v34  ;;  %vm16096_vm10 = vmmov %vm16095_vm9  ;;  %vm16101_vm9 = vcmask 564224  }
 0x9fb   :  { %9186 = vmatpush3.bf16.msra.mxu1 %v4129_v1  ;;  %v4270_v9 = vsel %vm2496_vm15, %v12812_v17, %v4261_v39  ;;  %v4280_v1 = vsel %vm16093_vm6, %v12795_v52, %v4275_v25  ;;  %v4330_v49 = vsel %vm16096_vm10, %v4319_v22, %v12821_v55  ;;  %vm16099_vm6 = vmmov %vm16098_vm4 }
 0x9fc   :  { %4504 = vmatprep.subr.bf16.mxu0 %v4270_v9  ;;  %9187 = vmatprep.subr.bf16.mxu1 %v12810_v2  ;;  %v4338_v25 = vsel %vm2496_vm15, %v4307_v26, %v4330_v49  ;;  %vm16102_vm10 = vmmov %vm16101_vm9  ;;  %v10044_v49 = vld [vmem:[%s15947_s6 + $0x50] ss:$12 sps:$4 sm:$0xff]  }
 0x9fd   :  { %v4309_v35 = vpop.permute.xlu1 %4308  ;;  %4505 = vmatpush1.bf16.msra.mxu0 %v4249_v14 }
 0x9fe   :  { %4506 = vmatprep.subr.bf16.mxu0 %v4298_v46  ;;  %v4345_v51 = vpop.permute.xlu0 %4344  ;;  %v10043_v46 = vld [vmem:[%s15947_s6 + $0x38] ss:$12 sps:$4 sm:$0xff]  }
 0x9ff   :  { %9188 = vmatpush3.bf16.msra.mxu1 %v12799_v12  ;;  %v4281_v12 = vsel %vm16097_vm1, %v12797_v13, %v4279_v50 }
 0xa01   :  { %v4291_v60 = vpop.permute.xlu1 %4290  ;;  %4507 = vmatpush1.bf16.msra.mxu0 %v4280_v1 }
 0xa02   :  { %v4293_v37 = vsel %vm16094_vm8, %v4289_v0, %v4291_v60  ;;  %9189 = vmatprep.subr.bf16.mxu1 %v4291_v60  ;;  %v4327_v2 = vpop.permute.xlu0 %4326  ;;  %vm16100_vm8 = vcmask 818176  }
 0xa03   :  { %9190 = vmatpush3.bf16.msra.mxu1 %v12829_v29  ;;  %v4302_v17 = vsel %vm2496_vm15, %v4279_v50, %v4293_v37  ;;  %v4332_v0 = vsel %vm16098_vm4, %v4325_v61, %v4327_v2  ;;  %v4312_v20 = vsel %vm16100_vm8, %v4305_v32, %v4307_v26  ;;  %vm16103_vm1 = vmmov %vm16100_vm8 }
 0xa04   :  { %4508 = vmatprep.subr.bf16.mxu0 %v4302_v17  ;;  %9191 = vmatprep.subr.bf16.mxu1 %v4331_v56  ;;  %v4342_v22 = vsel %vm2496_vm15, %v4311_v57, %v4332_v0  ;;  %v4313_v61 = vsel %vm16103_vm1, %v4309_v35, %v4311_v57  ;;  %vm16104_vm4 = vmmov %vm16101_vm9  ;;  %v10196_v0 = vld [vmem:[%s15950_s5] ss:$16 sps:$4 sm:$0xff]  }
 0xa05   :  { %v4359_v52 = vpop.permute.xlu1 %4358  ;;  %4509 = vmatpush1.bf16.msra.mxu0 %v4281_v12  ;;  %vm16106_vm8 = vmmov %vm16104_vm4  ;;  %v10194_v12 = vld [vmem:[%s15950_s5 + $0x4] ss:$16 sps:$4 sm:$0xff]  }
 0xa06   :  { %4510 = vmatprep.subr.bf16.mxu0 %v4338_v25  ;;  %v4329_v29 = vpop.permute.xlu0 %4328  ;;  %v4368_v13 = vsel %vm16101_vm9, %v4357_v3, %v4359_v52  ;;  %v10037_v3 = vld [vmem:[%s15947_s6 + $0x30] ss:$12 sps:$4 sm:$0xff]  }
 0xa07   :  { %9192 = vmatpush3.bf16.msra.mxu1 %v12801_v4  ;;  %v4333_v18 = vsel %vm16099_vm6, %v4327_v2, %v4329_v29  ;;  %v4376_v26 = vsel %vm2496_vm15, %v4347_v6, %v4368_v13  ;;  %vm16105_vm6 = vcmask 809984   ;;  %v10195_v25 = vld [vmem:[%s15950_s5 + $0xc] ss:$16 sps:$4 sm:$0xff]   ;;  %v10197_v29 = vld [vmem:[%s15950_s5 + $0x24] ss:$16 sps:$4 sm:$0xff]  }
 0xa08   :  { %9193 = vmatprep.subr.bf16.mxu1 %v4333_v18  ;;  %v4352_v23 = vsel %vm16105_vm6, %v4345_v51, %v4347_v6  ;;  %vm16107_vm9 = vmmov %vm16105_vm6  ;;  %v10199_v18 = vld [vmem:[%s15950_s5 + $0x44] ss:$16 sps:$4 sm:$0xff]  }
 0xa09   :  { %v4361_v55 = vpop.permute.xlu1 %4360  ;;  %4511 = vmatpush1.bf16.msra.mxu0 %v4312_v20  ;;  %v16116_v20 = vld [vmem:[#allocation20_spill] sm:$0xff] }
 0xa0a   :  { %4512 = vmatprep.subr.bf16.mxu0 %v4342_v22  ;;  %v4365_v50 = vpop.permute.xlu0 %4364  ;;  %v4369_v31 = vsel %vm16102_vm10, %v4359_v52, %v4361_v55  ;;  %vm16108_vm10 = vcmask 556032   ;;  %v16117_v55 = vld [vmem:[#allocation21_spill] sm:$0xff]  ;;  %v16118_v22 = vld [vmem:[#allocation22_spill] sm:$0xff] }
 0xa0b   :  { %9194 = vmatpush3.bf16.msra.mxu1 %v12843_v47  ;;  %vm16109_vm1 = vmmov %vm16108_vm10  ;;  %v10219_v13 = vld [vmem:[%s15950_s5 + $0x184] ss:$16 sps:$4 sm:$0xff]  }
 0xa0c   :  { %9195 = vmatprep.subr.bf16.mxu1 %v4369_v31  ;;  %vm16111_vm6 = vmmov %vm16109_vm1  ;;  %v16120_v31 = vld [vmem:[#allocation24_spill] sm:$0xff] }
 0xa0d   :  { %v4363_v4 = vpop.permute.xlu1 %4362  ;;  %4513 = vmatpush1.bf16.msra.mxu0 %v4313_v61  ;;  %v10220_v61 = vld [vmem:[%s15950_s5 + $0x180] ss:$16 sps:$4 sm:$0xff]  }
 0xa0e   :  { %4514 = vmatprep.subr.bf16.mxu0 %v4376_v26  ;;  %v4367_v15 = vpop.permute.xlu0 %4366  ;;  %v4370_v5 = vsel %vm16106_vm8, %v4363_v4, %v4365_v50  ;;  %vm16112_vm8 = vmmov %vm16109_vm1  ;;  %v10221_v4 = vld [vmem:[%s15950_s5 + $0x1a4] ss:$16 sps:$4 sm:$0xff]   ;;  %v16121_v26 = vld [vmem:[#allocation25_spill] sm:$0xff] }
 0xa0f   :  { %9196 = vmatpush3.bf16.msra.mxu1 %v12803_v63  ;;  %v4371_v32 = vsel %vm16104_vm4, %v4365_v50, %v4367_v15  ;;  %v10040_v63 = vld [vmem:[%s15947_s6 + $0x4c] ss:$12 sps:$4 sm:$0xff]   ;;  %vm16110_vm4 = vcmask 261120   ;;  %v16122_v15 = vld [vmem:[#allocation26_spill] sm:$0xff] }
 0xa10   :  { %9197 = vmatprep.subr.bf16.mxu1 %v4371_v32  ;;  %v16119_v50 = vld [vmem:[#allocation23_spill] sm:$0xff]  ;;  %v10222_v32 = vld [vmem:[%s15950_s5 + $0x1a0] ss:$16 sps:$4 sm:$0xff]  }
 0xa11   :  { %v4351_v24 = vpop.permute.xlu1 %4350  ;;  %4515 = vmatpush1.bf16.msra.mxu0 %v4352_v23  ;;  %v10223_v23 = vld [vmem:[%s15950_s5 + $0x1c4] ss:$16 sps:$4 sm:$0xff]  }
 0xa12   :  { %v4391_v47 = vpop.permute.xlu0 %4390  ;;  %v4380_v57 = vsel %vm2496_vm15, %v4351_v24, %v4370_v5  ;;  %v16123_v5 = vld [vmem:[#allocation27_spill] sm:$0xff] }
 0xa13   :  { %4516 = vmatprep.subr.bf16.mxu0 %v4380_v57  ;;  %9198 = vmatpush3.bf16.msra.mxu1 %v12858_v30  ;;  %v10042_v30 = vld [vmem:[%s15947_s6 + $0x48] ss:$12 sps:$4 sm:$0xff]  }
 0xa14   :  { %v10225_v57 = vld [vmem:[%s15950_s5 + $0x1e4] ss:$16 sps:$4 sm:$0xff]  }
 0xa15   :  { %v4349_v48 = vpop.permute.xlu1 %4348 }
 0xa16   :  { %v4353_v44 = vsel %vm16107_vm9, %v4349_v48, %v4351_v24  ;;  %4625 = vmatmul.mubr.bf16.vlgmr.msra.gmra.mrb[52].mxu1 %v10037_v3  ;;  %v4395_v39 = vpop.permute.xlu0 %4394  ;;  %vm16113_vm9 = vmmov %vm16110_vm4  ;;  %v16124_v24 = vld [vmem:[#allocation28_spill] sm:$0xff] }
 0xa17   :  { %4517 = vmatpush1.bf16.msra.mxu0 %v4353_v44  ;;  %4632 = vmatprep.mubr.bf16.mxu1 %v10040_v63  ;;  %v10226_v48 = vld [vmem:[%s15950_s5 + $0x1e0] ss:$16 sps:$4 sm:$0xff]   ;;  %v10227_v44 = vld [vmem:[%s15950_s5 + $0x204] ss:$16 sps:$4 sm:$0xff]  }
 0xa19   :  { %v4393_v6 = vpop.permute.xlu1 %4392 }
 0xa1a   :  { %v4402_v9 = vsel %vm16108_vm10, %v4391_v47, %v4393_v6  ;;  %4519 = vmatmul.mubr.bf16.vlgmr.msra.gmra.mrb[48].mxu0 %v10037_v3  ;;  %v4403_v34 = vsel %vm16109_vm1, %v4393_v6, %v4395_v39  ;;  %v4397_v14 = vpop.permute.xlu0 %4396  ;;  %vm16114_vm10 = vmmov %vm16110_vm4  ;;  %v10224_v47 = vld [vmem:[%s15950_s5 + $0x1c0] ss:$16 sps:$4 sm:$0xff]   ;;  %v16125_v3 = vld [vmem:[#allocation29_spill] sm:$0xff] }
 0xa1b   :  { %9331 = vmatprep.subr.bf16.mxu1 %v4403_v34  ;;  %v4410_v35 = vsel %vm2496_vm15, %v12753_v11, %v4402_v9  ;;  %4528 = vmatprep.mubr.bf16.mxu0 %v10040_v63  ;;  %vm16115_vm1 = vmmov %vm16110_vm4  ;;  %v16126_v63 = vld [vmem:[#allocation30_spill] sm:$0xff]  ;;  %v16127_v39 = vld [vmem:[#allocation31_spill] sm:$0xff] }
 0xa1c   :  { %4539 = vmatprep.subr.bf16.mxu0 %v4410_v35  ;;  %9332 = vmatpush3.bf16.msra.mxu1 %v4403_v34  ;;  %v16128_v6 = vld [vmem:[#allocation32_spill] sm:$0xff] }
 0xa1d   :  { %v4383_v51 = vpop.permute.xlu1 %4382 }
 0xa1e   :  { %v4386_v1 = vsel %vm2491_vm11, %v4383_v51, %v12753_v11  ;;  %4633 = vmatmul.mubr.bf16.gmra.mrb[56].mxu1 %v10042_v30  ;;  %v4401_v60 = vpop.permute.xlu0 %4400 }
 0xa1f   :  { %4540 = vmatpush1.bf16.msra.mxu0 %v4386_v1  ;;  %9335 = vmatprep.mubr.msk.bf16.mxu1 %vm16110_vm4, %v10043_v46  ;;  %vm16134_vm4 = vcmask 736256  }
 0xa21   :  { %v4399_v37 = vpop.permute.xlu1 %4398 }
 0xa22   :  { %v4404_v2 = vsel %vm16111_vm6, %v4397_v14, %v4399_v37  ;;  %4529 = vmatmul.mubr.bf16.gmra.mrb[52].mxu0 %v10042_v30  ;;  %v4405_v17 = vsel %vm16112_vm8, %v4399_v37, %v4401_v60  ;;  %vm16135_vm6 = vmmov %vm16134_vm4 }
 0xa23   :  { %9333 = vmatprep.subr.bf16.mxu1 %v4405_v17  ;;  %v4414_v56 = vsel %vm2496_vm15, %v12788_v59, %v4404_v2  ;;  %4571 = vmatprep.mubr.bf16.mxu0 %v16084_v42  ;;  %vm16136_vm8 = vmmov %vm16134_vm4 }
 0xa24   :  { %4541 = vmatprep.subr.bf16.mxu0 %v4414_v56  ;;  %9334 = vmatpush3.bf16.msra.mxu1 %v4405_v17 }
 0xa25   :  { %v4385_v11 = vpop.permute.xlu1 %4384  ;;  %5076 = vmatprep.subr.bf16.mxu1 %v10194_v12 }
 0xa26   :  { %v4387_v52 = vsel %vm2491_vm11, %v4385_v11, %v12788_v59  ;;  %v10198_v59 = vld [vmem:[%s15950_s5 + $0x20] ss:$16 sps:$4 sm:$0xff]  }
 0xa27   :  { %4542 = vmatpush1.bf16.msra.mxu0 %v4387_v52  ;;  %9336 = vmatmul.mubr.msk.bf16.vlgmr.msra.gmra.mrb[60].mxu1 %vm16113_vm9, %v10044_v49  ;;  %vm16137_vm9 = vmmov %vm16134_vm4 }
 0xa28   :  { %5182 = vmatprep.subr.bf16.mxu0 %v10195_v25  ;;  %5077 = vmatpush1.bf16.msra.mxu1 %v10196_v0 }
 0xa29   :  { %5078 = vmatprep.subr.bf16.mxu1 %v10197_v29 }
 0xa2a   :  { %9011 = vmatmul.mubr.msk.bf16.vlgmr.msra.gmra.mrb[48].mxu0 %vm16114_vm10, %v10043_v46  ;;  %vm16147_vm10 = vmmov %vm16134_vm4 }
 0xa2b   :  { %4581 = vmatprep.mubr.bf16.mxu0 %v16084_v42  ;;  %5183 = vmatpush1.bf16.msra.mxu0 %v12329_v16  ;;  %v10200_v16 = vld [vmem:[%s15950_s5 + $0x40] ss:$16 sps:$4 sm:$0xff]  }
 0xa2c   :  { %5184 = vmatprep.subr.bf16.mxu0 %v12336_v21  ;;  %5079 = vmatpush1.bf16.msra.mxu1 %v10198_v59  ;;  %v10201_v21 = vld [vmem:[%s15950_s5 + $0x64] ss:$16 sps:$4 sm:$0xff]  }
 0xa2d   :  { %5080 = vmatprep.subr.bf16.mxu1 %v10199_v18 }
 0xa2f   :  { %5185 = vmatpush1.bf16.msra.mxu0 %v12344_v43  ;;  %v10202_v43 = vld [vmem:[%s15950_s5 + $0x60] ss:$16 sps:$4 sm:$0xff]   ;;  %v4433_v1 = vpop.permute.xlu0 %4432 }
 0xa30   :  { %5186 = vmatprep.subr.bf16.mxu0 %v12351_v53  ;;  %5081 = vmatpush1.bf16.msra.mxu1 %v10200_v16  ;;  %v10203_v53 = vld [vmem:[%s15950_s5 + $0x84] ss:$16 sps:$4 sm:$0xff]  }
 0xa31   :  { %5082 = vmatprep.subr.bf16.mxu1 %v10201_v21 }
 0xa32   :  { %9012 = vmatmul.mubr.msk.bf16.gmra.mrb[52].mxu0 %vm16115_vm1, %v10044_v49  ;;  %vm16148_vm1 = vmmov %vm16134_vm4 }
 0xa33   :  { %5187 = vmatpush1.bf16.msra.mxu0 %v12357_v40  ;;  %v10204_v40 = vld [vmem:[%s15950_s5 + $0x80] ss:$16 sps:$4 sm:$0xff]   ;;  %v4443_v11 = vpop.permute.xlu0 %4442 }
 0xa34   :  { %5188 = vmatprep.subr.bf16.mxu0 %v12363_v62  ;;  %5083 = vmatpush1.bf16.msra.mxu1 %v10202_v43  ;;  %v10205_v62 = vld [vmem:[%s15950_s5 + $0xa4] ss:$16 sps:$4 sm:$0xff]  }
 0xa35   :  { %5084 = vmatprep.subr.bf16.mxu1 %v10203_v53 }
 0xa36   :  { %v4438_v17 = vpop.permute.xlu1 %4437 }
 0xa37   :  { %5189 = vmatpush1.bf16.msra.mxu0 %v12369_v7  ;;  %v10206_v7 = vld [vmem:[%s15950_s5 + $0xa0] ss:$16 sps:$4 sm:$0xff]  }
 0xa38   :  { %5190 = vmatprep.subr.bf16.mxu0 %v12375_v41  ;;  %5085 = vmatpush1.bf16.msra.mxu1 %v10204_v40  ;;  %v10207_v41 = vld [vmem:[%s15950_s5 + $0xc4] ss:$16 sps:$4 sm:$0xff]  }
 0xa39   :  { %5086 = vmatprep.subr.bf16.mxu1 %v10205_v62 }
 0xa3a   :  { %v4448_v52 = vpop.permute.xlu1 %4447 }
 0xa3b   :  { %5191 = vmatpush1.bf16.msra.mxu0 %v12381_v33  ;;  %v10208_v33 = vld [vmem:[%s15950_s5 + $0xc0] ss:$16 sps:$4 sm:$0xff]  }
 0xa3c   :  { %5192 = vmatprep.subr.bf16.mxu0 %v12387_v19  ;;  %5087 = vmatpush1.bf16.msra.mxu1 %v10206_v7  ;;  %v10209_v19 = vld [vmem:[%s15950_s5 + $0xe4] ss:$16 sps:$4 sm:$0xff]  }
 0xa3d   :  { %5088 = vmatprep.subr.bf16.mxu1 %v10207_v41  ;;  %v16129_v7 = vld [vmem:[#allocation18_spill] sm:$0xff] }
 0xa3f   :  { %5193 = vmatpush1.bf16.msra.mxu0 %v12393_v27  ;;  %v10210_v27 = vld [vmem:[%s15950_s5 + $0xe0] ss:$16 sps:$4 sm:$0xff]  }
 0xa40   :  { %5194 = vmatprep.subr.bf16.mxu0 %v12399_v8  ;;  %5089 = vmatpush1.bf16.msra.mxu1 %v10208_v33  ;;  %v10211_v8 = vld [vmem:[%s15950_s5 + $0x104] ss:$16 sps:$4 sm:$0xff]  }
 0xa41   :  { %5090 = vmatprep.subr.bf16.mxu1 %v10209_v19 }
 0xa43   :  { %5195 = vmatpush1.bf16.msra.mxu0 %v12405_v38  ;;  %v10212_v38 = vld [vmem:[%s15950_s5 + $0x100] ss:$16 sps:$4 sm:$0xff]  }
 0xa44   :  { %5196 = vmatprep.subr.bf16.mxu0 %v12411_v45  ;;  %5091 = vmatpush1.bf16.msra.mxu1 %v10210_v27  ;;  %v10213_v45 = vld [vmem:[%s15950_s5 + $0x124] ss:$16 sps:$4 sm:$0xff]  }
 0xa45   :  { %5092 = vmatprep.subr.bf16.mxu1 %v10211_v8 }
 0xa47   :  { %5197 = vmatpush1.bf16.msra.mxu0 %v12417_v58  ;;  %v10214_v58 = vld [vmem:[%s15950_s5 + $0x120] ss:$16 sps:$4 sm:$0xff]  }
 0xa48   :  { %5198 = vmatprep.subr.bf16.mxu0 %v12423_v28  ;;  %5093 = vmatpush1.bf16.msra.mxu1 %v10212_v38  ;;  %v10215_v28 = vld [vmem:[%s15950_s5 + $0x144] ss:$16 sps:$4 sm:$0xff]  }
 0xa49   :  { %5094 = vmatprep.subr.bf16.mxu1 %v10213_v45 }
 0xa4b   :  { %5199 = vmatpush1.bf16.msra.mxu0 %v12429_v54  ;;  %v10216_v54 = vld [vmem:[%s15950_s5 + $0x140] ss:$16 sps:$4 sm:$0xff]  }
 0xa4c   :  { %5200 = vmatprep.subr.bf16.mxu0 %v12435_v10  ;;  %5095 = vmatpush1.bf16.msra.mxu1 %v10214_v58  ;;  %v10217_v10 = vld [vmem:[%s15950_s5 + $0x164] ss:$16 sps:$4 sm:$0xff]   ;;  %v16131_v58 = vld [vmem:[#allocation17_spill] sm:$0xff] }
 0xa4d   :  { %5096 = vmatprep.subr.bf16.mxu1 %v10215_v28 }
 0xa4f   :  { %5201 = vmatpush1.bf16.msra.mxu0 %v12441_v36  ;;  %v10218_v36 = vld [vmem:[%s15950_s5 + $0x160] ss:$16 sps:$4 sm:$0xff]  }
 0xa50   :  { %5202 = vmatprep.subr.bf16.mxu0 %v16116_v20  ;;  %5097 = vmatpush1.bf16.msra.mxu1 %v10216_v54 }
 0xa51   :  { %5098 = vmatprep.subr.bf16.mxu1 %v10217_v10 }
 0xa53   :  { %5203 = vmatpush1.bf16.msra.mxu0 %v16117_v55 }
 0xa54   :  { %5204 = vmatprep.subr.bf16.mxu0 %v16118_v22  ;;  %5099 = vmatpush1.bf16.msra.mxu1 %v10218_v36 }
 0xa55   :  { %5100 = vmatprep.subr.bf16.mxu1 %v10219_v13 }
 0xa57   :  { %5205 = vmatpush1.bf16.msra.mxu0 %v16119_v50 }
 0xa58   :  { %5206 = vmatprep.subr.bf16.mxu0 %v16120_v31  ;;  %5101 = vmatpush1.bf16.msra.mxu1 %v10220_v61  ;;  %v16132_v31 = vld [vmem:[#allocation15_spill] sm:$0xff] }
 0xa59   :  { %5102 = vmatprep.subr.bf16.mxu1 %v10221_v4 }
 0xa5b   :  { %5207 = vmatpush1.bf16.msra.mxu0 %v16121_v26 }
 0xa5c   :  { %5208 = vmatprep.subr.bf16.mxu0 %v16122_v15  ;;  %5103 = vmatpush1.bf16.msra.mxu1 %v10222_v32  ;;  %v16133_v15 = vld [vmem:[#allocation16_spill] sm:$0xff] }
 0xa5d   :  { %5104 = vmatprep.subr.bf16.mxu1 %v10223_v23 }
 0xa5f   :  { %5209 = vmatpush1.bf16.msra.mxu0 %v16123_v5 }
 0xa60   :  { %5210 = vmatprep.subr.bf16.mxu0 %v16124_v24  ;;  %5105 = vmatpush1.bf16.msra.mxu1 %v10224_v47 }
 0xa61   :  { %5106 = vmatprep.subr.bf16.mxu1 %v10225_v57 }
 0xa63   :  { %5211 = vmatpush1.bf16.msra.mxu0 %v16125_v3 }
 0xa64   :  { %5212 = vmatprep.subr.bf16.mxu0 %v16126_v63  ;;  %5107 = vmatpush1.bf16.msra.mxu1 %v10226_v48 }
 0xa65   :  { %5129 = vmatprep.subr.bf16.mxu1 %v10227_v44 }
 0xa67   :  { %5213 = vmatpush1.bf16.msra.mxu0 %v16127_v39 }
 0xa68   :  { %5235 = vmatprep.subr.bf16.mxu0 %v16128_v6 }
 0xae9   :  { %v9199_v9 = vpop.f32.mrb[52].mxu1 }
 0xaea   :  { %v9200_v34 = vpop.f32.mrb[53].mxu1 }
 0xaeb   :  { %v9201_v30 = vadd.f32 %v9200_v34, %v9199_v9  ;;  %v9202_v14 = vpop.f32.mrb[54].mxu1 }
 0xaec   :  { %v9203_v35 = vpop.f32.mrb[55].mxu1 }
 0xaed   :  { %v9204_v46 = vadd.f32 %v9203_v35, %v9202_v14  ;;  %v4627_v0 = vadd.f32 %v9201_v30, %v4433_v1 }
 0xaef   :  { %v4630_v43 = vadd.f32 %v9204_v46, %v4438_v17 }
 0xaf1   :  { %v9205_v51 = vpop.f32.mrb[56].mxu1 }
 0xaf2   :  { %v9206_v60 = vpop.f32.mrb[57].mxu1 }
 0xaf3   :  { %v9207_v37 = vadd.f32 %v9206_v60, %v9205_v51  ;;  %v9208_v2 = vpop.f32.mrb[58].mxu1 }
 0xaf4   :  { %v9209_v56 = vpop.f32.mrb[59].mxu1 }
 0xaf5   :  { %v9210_v49 = vadd.f32 %v9209_v56, %v9208_v2  ;;  %v4635_v12 = vadd.f32 %v9207_v37, %v4443_v11 }
 0xaf7   :  { %v4638_v18 = vadd.f32 %v9210_v49, %v4448_v52 }
 0xafa   :  { %v9337_v25 = vpop.f32.mrb[60].mxu1 }
 0xafb   :  { %v13079_v29 = vadd.f32 %v9337_v25, %v4635_v12  ;;  %v4675_v59 = vpop.f32.mrb[61].mxu1 }
 0xafc   :  { %v13081_v16 = vadd.f32 %v4675_v59, %v4627_v0  ;;  %v9338_v21 = vpop.f32.mrb[62].mxu1 }
 0xafd   :  { %v13083_v53 = vadd.f32 %v9338_v21, %v4638_v18  ;;  %v4573_v40 = vpop.f32.mrb[48].mxu0  ;;  %v4678_v62 = vpop.f32.mrb[63].mxu1  ;;  %v4783_v55 = vmul.f32 %v13079_v29, %v16129_v7 }
 0xafe   :  { %v4779_v41 = vmul.f32 %v13081_v16, %v16129_v7  ;;  %v13087_v33 = vadd.f32 %v4678_v62, %v4630_v43  ;;  %v4575_v19 = vpop.f32.mrb[49].mxu0  ;;  %v9371_v47 = vadd.f32 %v4573_v40, %v4433_v1 }
 0xaff   :  { %v13089_v27 = vadd.f32 %v4575_v19, %v4433_v1  ;;  %v4577_v8 = vpop.f32.mrb[50].mxu0  ;;  %v4785_v50 = vmul.f32 %v13083_v53, %v16129_v7 }
 0xb00   :  { %v4579_v38 = vpop.f32.mrb[51].mxu0  ;;  %4796 = vrot.lane.b32.xlu1 %v4779_v41, %s16130_s23  ;;  %v4781_v20 = vmul.f32 %v13087_v33, %v16129_v7  ;;  %v9373_v4 = vadd.f32 %v4577_v8, %v4438_v17  ;;  %v4690_v63 = vmul.f32 %v9371_v47, %v16133_v15 }
 0xb01   :  { %v13092_v45 = vadd.f32 %v4579_v38, %v4438_v17  ;;  %v4778_v28 = vmul.f32 %v13089_v27, %v16131_v58  ;;  %v4691_v24 = vmul.f32 %v13089_v27, %v16132_v31 }
 0xb02   :  { %v4692_v32 = vmul.f32 %v9373_v4, %v16133_v15 }
 0xb03   :  { %4794 = vrot.lane.b32.xlu0 %v4778_v28, %s16130_s23  ;;  %v4780_v10 = vmul.f32 %v13092_v45, %v16131_v58  ;;  %v4693_v61 = vmul.f32 %v13092_v45, %v16132_v31  ;;  %v4698_v57 = vsel %vm2496_vm15, %v4691_v24, 0.0 }
 0xb04   :  { %4800 = vrot.lane.b32.xlu1 %v4781_v20, %s16130_s23  ;;  %v4699_v44 = vadd.f32 %v4698_v57, %v4690_v63 }
 0xb05   :  { %v4583_v54 = vpop.f32.mrb[52].mxu0  ;;  %v4702_v26 = vsel %vm2496_vm15, %v4693_v61, 0.0 }
 0xb06   :  { %v4585_v22 = vpop.f32.mrb[53].mxu0  ;;  %v4703_v23 = vadd.f32 %v4702_v26, %v4692_v32  ;;  %v13121_v48 = vadd.f32 %v4583_v54, %v4443_v11 }
 0xb07   :  { %v4587_v36 = vpop.f32.mrb[54].mxu0  ;;  %4798 = vrot.lane.b32.xlu0 %v4780_v10, %s16130_s23  ;;  %v13113_v5 = vadd.f32 %v4585_v22, %v4443_v11 }
 0xb08   :  { %v4589_v13 = vpop.f32.mrb[55].mxu0  ;;  %4804 = vrot.lane.b32.xlu1 %v4783_v55, %s16130_s23  ;;  %v4694_v6 = vmul.f32 %v13121_v48, %v16133_v15  ;;  %v13136_v46 = vadd.f32 %v4587_v36, %v4448_v52 }
 0xb09   :  { %v4695_v3 = vmul.f32 %v13113_v5, %v16132_v31  ;;  %v13126_v34 = vadd.f32 %v4589_v13, %v4448_v52  ;;  %v4782_v30 = vmul.f32 %v13113_v5, %v16131_v58 }
 0xb0a   :  { %v4696_v1 = vmul.f32 %v13136_v46, %v16133_v15 }
 0xb0b   :  { %v4706_v39 = vsel %vm2496_vm15, %v4695_v3, 0.0  ;;  %v4784_v14 = vmul.f32 %v13126_v34, %v16131_v58  ;;  %v4697_v35 = vmul.f32 %v13126_v34, %v16132_v31 }
 0xb0c   :  { %4808 = vrot.lane.b32.xlu1 %v4785_v50, %s16130_s23  ;;  %v4707_v9 = vadd.f32 %v4706_v39, %v4694_v6 }
 0xb0d   :  { %v4710_v51 = vsel %vm2496_vm15, %v4697_v35, 0.0 }
 0xb0e   :  { %v4711_v60 = vadd.f32 %v4710_v51, %v4696_v1 }
 0xb26   :  { %4704 = vadd.xlane.f32.xlu0 %v4703_v23 }
 0xb30   :  { %4700 = vadd.xlane.f32.xlu1 %v4699_v44 }
 0xb34   :  { %4708 = vadd.xlane.f32.xlu1 %v4707_v9 }
 0xb3c   :  { %4802 = vrot.lane.b32.xlu0 %v4782_v30, %s16130_s23 }
 0xb40   :  { %4806 = vrot.lane.b32.xlu0 %v4784_v14, %s16130_s23 }
 0xb5f   :  { %4712 = vadd.xlane.f32.xlu0 %v4711_v60 }
 0xb72   :  { %v4797_v37 = vpop.permute.xlu1 %4796 }
 0xb73   :  { %v4822_v17 = vsel %vm2496_vm15, %v4797_v37, 0.0 }
 0xb75   :  { %v4795_v2 = vpop.permute.xlu0 %4794 }
 0xb76   :  { %v4810_v56 = vsel %vm16134_vm4, %v4795_v2, %v4797_v37  ;;  %v4801_v11 = vpop.permute.xlu1 %4800  ;;  %vm16149_vm4 = vmmov %vm16148_vm1 }
 0xb77   :  { %v4823_v49 = vadd.f32 %v4822_v17, %v4810_v56  ;;  %v4826_v52 = vsel %vm2496_vm15, %v4801_v11, 0.0 }
 0xb79   :  { %4824 = vadd.xlane.f32.xlu0 %v4823_v49  ;;  %v4799_v12 = vpop.permute.xlu0 %4798 }
 0xb7a   :  { %v4811_v25 = vsel %vm16135_vm6, %v4799_v12, %v4801_v11  ;;  %v4805_v59 = vpop.permute.xlu1 %4804  ;;  %vm16152_vm6 = vmmov %vm16148_vm1 }
 0xb7b   :  { %v4827_v0 = vadd.f32 %v4826_v52, %v4811_v25  ;;  %v4830_v41 = vsel %vm2496_vm15, %v4805_v59, 0.0 }
 0xb7d   :  { %4828 = vadd.xlane.f32.xlu1 %v4827_v0 }
 0xb7e   :  { %v4809_v28 = vpop.permute.xlu1 %4808 }
 0xb7f   :  { %v4834_v22 = vsel %vm2496_vm15, %v4809_v28, 0.0 }
 0xbb3   :  { %v4705_v18 = vpop.xlane.xlu0 %4704 }
 0xbb4   :  { %v4715_v21 = vmul.f32 0.0069444445, %v4705_v18 }
 0xbb6   :  { %v4720_v43 = vsub.f32 %v9373_v4, %v4715_v21  ;;  %v4721_v40 = vsub.f32 %v13092_v45, %v4715_v21 }
 0xbb7   :  { %v4803_v62 = vpop.permute.xlu0 %4802 }
 0xbb8   :  { %v13148_v19 = vmul.f32 %v4720_v43, %v16133_v15  ;;  %v13151_v8 = vmul.f32 %v4721_v40, %v16132_v31  ;;  %v4812_v38 = vsel %vm16136_vm8, %v4803_v62, %v4805_v59  ;;  %vm16154_vm8 = vcmask 678912  }
 0xbb9   :  { %v4831_v20 = vadd.f32 %v4830_v41, %v4812_v38 }
 0xbba   :  { %v4736_v54 = vmul.f32 %v13148_v19, %v13148_v19  ;;  %v4737_v10 = vmul.f32 %v13151_v8, %v13151_v8 }
 0xbbb   :  { %4832 = vadd.xlane.f32.xlu0 %v4831_v20  ;;  %v4807_v55 = vpop.permute.xlu0 %4806 }
 0xbbc   :  { %v4813_v36 = vsel %vm16137_vm9, %v4807_v55, %v4809_v28  ;;  %v4746_v13 = vsel %vm2496_vm15, %v4737_v10, 0.0  ;;  %vm16155_vm9 = vcmask 924672  }
 0xbbd   :  { %v4835_v50 = vadd.f32 %v4834_v22, %v4813_v36  ;;  %v4701_v61 = vpop.xlane.xlu1 %4700  ;;  %v4747_v4 = vadd.f32 %v4746_v13, %v4736_v54 }
 0xbbe   :  { %v4714_v26 = vmul.f32 0.0069444445, %v4701_v61 }
 0xbbf   :  { %4748 = vadd.xlane.f32.xlu1 %v4747_v4  ;;  %4836 = vadd.xlane.f32.xlu0 %v4835_v50 }
 0xbc0   :  { %v4718_v32 = vsub.f32 %v9371_v47, %v4714_v26  ;;  %v4719_v23 = vsub.f32 %v13089_v27, %v4714_v26 }
 0xbc1   :  { %v4709_v47 = vpop.xlane.xlu1 %4708 }
 0xbc2   :  { %v13163_v24 = vmul.f32 %v4718_v32, %v16133_v15  ;;  %v13166_v57 = vmul.f32 %v4719_v23, %v16132_v31  ;;  %v4716_v54 = vmul.f32 0.0069444445, %v4709_v47  ;;  %v16142_v47 = vld [vmem:[#allocation2_spill] sm:$0xff] }
 0xbc4   :  { %v4734_v3 = vmul.f32 %v13163_v24, %v13163_v24  ;;  %v4735_v63 = vmul.f32 %v13166_v57, %v13166_v57  ;;  %v4723_v22 = vsub.f32 %v13113_v5, %v4716_v54  ;;  %v4722_v13 = vsub.f32 %v13121_v48, %v4716_v54 }
 0xbc6   :  { %v4742_v44 = vsel %vm2496_vm15, %v4735_v63, 0.0  ;;  %v13240_v61 = vmul.f32 %v4723_v22, %v16132_v31  ;;  %v16138_v63 = vld [vmem:[#allocation4_spill] sm:$0xff] }
 0xbc7   :  { %v4743_v39 = vadd.f32 %v4742_v44, %v4734_v3  ;;  %v16139_v44 = vld [vmem:[#allocation3_spill] sm:$0xff]  ;;  %v16153_v22 = vld [vmem:[#allocation8_spill] sm:$0xff] }
 0xbc8   :  { %v4739_v48 = vmul.f32 %v13240_v61, %v13240_v61 }
 0xbc9   :  { %4744 = vadd.xlane.f32.xlu0 %v4743_v39  ;;  %v16140_v39 = vld [vmem:[#allocation7_spill] sm:$0xff] }
 0xbca   :  { %v4750_v23 = vsel %vm2496_vm15, %v4739_v48, 0.0 }
 0xbec   :  { %v4713_v6 = vpop.xlane.xlu0 %4712 }
 0xbed   :  { %v4717_v20 = vmul.f32 0.0069444445, %v4713_v6  ;;  %v16141_v6 = vld [vmem:[#allocation6_spill] sm:$0xff] }
 0xbef   :  { %v4725_v10 = vsub.f32 %v13126_v34, %v4717_v20  ;;  %v4724_v55 = vsub.f32 %v13136_v46, %v4717_v20 }
 0xbf1   :  { %v13233_v36 = vmul.f32 %v4725_v10, %v16132_v31  ;;  %v13237_v50 = vmul.f32 %v4724_v55, %v16133_v15 }
 0xbf3   :  { %v4741_v4 = vmul.f32 %v13233_v36, %v13233_v36 }
 0xbf5   :  { %v4754_v46 = vsel %vm2496_vm15, %v4741_v4, 0.0 }
 0xc06   :  { %v4825_v9 = vpop.xlane.xlu0 %4824 }
 0xc07   :  { %v4838_v30 = vmul.f32 0.0069444445, %v4825_v9  ;;  %v16143_v9 = vld [vmem:[#allocation10_spill] sm:$0xff] }
 0xc09   :  { %v4842_v14 = vsub.f32 %v13089_v27, %v4838_v30  ;;  %v4843_v35 = vsub.f32 %v13081_v16, %v4838_v30  ;;  %v16144_v30 = vld [vmem:[#allocation5_spill] sm:$0xff] }
 0xc0a   :  { %v4829_v51 = vpop.xlane.xlu1 %4828 }
 0xc0b   :  { %v13176_v1 = vmul.f32 %v4842_v14, %v16131_v58  ;;  %v13179_v60 = vmul.f32 %v4843_v35, %v16129_v7  ;;  %v4839_v37 = vmul.f32 0.0069444445, %v4829_v51  ;;  %v16145_v14 = vld [vmem:[#allocation9_spill] sm:$0xff]  ;;  %v16146_v51 = vld [vmem:[#allocation12_spill] sm:$0xff] }
 0xc0d   :  { %v4844_v2 = vsub.f32 %v13092_v45, %v4839_v37  ;;  %v4845_v17 = vsub.f32 %v13087_v33, %v4839_v37  ;;  %v4859_v56 = vmul.f32 %v13179_v60, %v13179_v60  ;;  %v4858_v27 = vmul.f32 %v13176_v1, %v13176_v1 }
 0xc0f   :  { %v13188_v16 = vmul.f32 %v4844_v2, %v16131_v58  ;;  %4876 = vrot.lane.b32.xlu0 %v4859_v56, %s16130_s23  ;;  %4874 = vrot.lane.b32.xlu1 %v4858_v27, %s16130_s23  ;;  %v13193_v49 = vmul.f32 %v4845_v17, %v16129_v7 }
 0xc11   :  { %v4860_v45 = vmul.f32 %v13188_v16, %v13188_v16  ;;  %v4861_v33 = vmul.f32 %v13193_v49, %v13193_v49 }
 0xc13   :  { %4878 = vrot.lane.b32.xlu1 %v4860_v45, %s16130_s23 }
 0xc17   :  { %4880 = vrot.lane.b32.xlu1 %v4861_v33, %s16130_s23 }
 0xc48   :  { %v4833_v11 = vpop.xlane.xlu0 %4832 }
 0xc49   :  { %v4840_v12 = vmul.f32 0.0069444445, %v4833_v11 }
 0xc4b   :  { %v4846_v52 = vsub.f32 %v13113_v5, %v4840_v12  ;;  %v4847_v25 = vsub.f32 %v13079_v29, %v4840_v12  ;;  %v4740_v5 = vmul.f32 %v13237_v50, %v13237_v50 }
 0xc4c   :  { %v4837_v0 = vpop.xlane.xlu0 %4836  ;;  %v4749_v35 = vpop.xlane.xlu1 %4748 }
 0xc4d   :  { %v13204_v59 = vmul.f32 %v4846_v52, %v16131_v58  ;;  %v13207_v18 = vmul.f32 %v4847_v25, %v16129_v7  ;;  %v4841_v21 = vmul.f32 0.0069444445, %v4837_v0  ;;  %v4755_v26 = vadd.f32 %v4754_v46, %v4740_v5 }
 0xc4f   :  { %v4848_v43 = vsub.f32 %v13126_v34, %v4841_v21  ;;  %v4849_v40 = vsub.f32 %v13083_v53, %v4841_v21  ;;  %v4863_v62 = vmul.f32 %v13207_v18, %v13207_v18  ;;  %v4862_v41 = vmul.f32 %v13204_v59, %v13204_v59 }
 0xc50   :  { %v13245_v34 = vmul.f32 %v4722_v13, %v16133_v15 }
 0xc51   :  { %v13216_v29 = vmul.f32 %v4848_v43, %v16131_v58  ;;  %v13219_v38 = vmul.f32 %v4849_v40, %v16129_v7  ;;  %4884 = vrot.lane.b32.xlu1 %v4863_v62, %s16130_s23  ;;  %4882 = vrot.lane.b32.xlu0 %v4862_v41, %s16130_s23  ;;  %v16150_v41 = vld [vmem:[#allocation13_spill] sm:$0xff] }
 0xc52   :  { %v4738_v32 = vmul.f32 %v13245_v34, %v13245_v34 }
 0xc53   :  { %v4865_v28 = vmul.f32 %v13219_v38, %v13219_v38  ;;  %v4864_v53 = vmul.f32 %v13216_v29, %v13216_v29 }
 0xc54   :  { %v4751_v3 = vadd.f32 %v4750_v23, %v4738_v32  ;;  %v4759_v32 = vmul.f32 0.0069444445, %v4749_v35 }
 0xc55   :  { %4888 = vrot.lane.b32.xlu1 %v4865_v28, %s16130_s23  ;;  %4886 = vrot.lane.b32.xlu0 %v4864_v53, %s16130_s23  ;;  %v16151_v28 = vld [vmem:[#allocation11_spill] sm:$0xff] }
 0xc56   :  { %v4745_v2 = vpop.xlane.xlu0 %4744 }
 0xc74   :  { %4756 = vadd.xlane.f32.xlu0 %v4755_v26 }
 0xc79   :  { %4752 = vadd.xlane.f32.xlu1 %v4751_v3  ;;  %v4758_v3 = vmul.f32 0.0069444445, %v4745_v2 }
 0xc81   :  { %v4875_v37 = vpop.permute.xlu1 %4874  ;;  %v4877_v56 = vpop.permute.xlu0 %4876 }
 0xc82   :  { %v4890_v27 = vsel %vm16147_vm10, %v4875_v37, %v4877_v56  ;;  %v4902_v45 = vsel %vm2496_vm15, %v4877_v56, 0.0  ;;  %vm16156_vm10 = vmmov %vm16155_vm9 }
 0xc83   :  { %v4903_v11 = vadd.f32 %v4902_v45, %v4890_v27 }
 0xc85   :  { %v4879_v17 = vpop.permute.xlu1 %4878 }
 0xc89   :  { %v4881_v33 = vpop.permute.xlu1 %4880 }
 0xc8a   :  { %4983 = vrot.lane.b32.xlu1 %v16138_v63, %s10446_s13  ;;  %4985 = vrot.lane.b32.xlu0 %v16139_v44, %s10446_s13  ;;  %v4891_v12 = vsel %vm16148_vm1, %v4879_v17, %v4881_v33  ;;  %v4906_v52 = vsel %vm2496_vm15, %v4881_v33, 0.0  ;;  %v4763_v44 = vadd.f32 1e-05, %v4759_v32  ;;  %vm16157_vm1 = vmmov %vm16154_vm8 }
 0xc8b   :  { %v4907_v25 = vadd.f32 %v4906_v52, %v4891_v12 }
 0xc8c   :  { %10138 = vrsqrt.f32 %v4763_v44 }
 0xc8e   :  { %4987 = vrot.lane.b32.xlu1 %v16140_v39, %s10446_s13  ;;  %4952 = vrot.lane.b32.xlu0 %v16138_v63, %s16038_s14 }
 0xc92   :  { %4989 = vrot.lane.b32.xlu1 %v16141_v6, %s10446_s13  ;;  %4950 = vrot.lane.b32.xlu0 %v16142_v47, %s16038_s14 }
 0xc96   :  { %4956 = vrot.lane.b32.xlu1 %v16140_v39, %s16038_s14  ;;  %4991 = vrot.lane.b32.xlu0 %v16143_v9, %s10446_s13  ;;  %v4762_v39 = vadd.f32 1e-05, %v4758_v3  ;;  %v10139_v56 = vpop.eup %10138 }
 0xc97   :  { %v4772_v12 = vmul.f32 %v10139_v56, %v13148_v19 }
 0xc98   :  { %10140 = vrsqrt.f32 %v4762_v39 }
 0xc9a   :  { %4954 = vrot.lane.b32.xlu1 %v16144_v30, %s16038_s14 }
 0xc9e   :  { %4993 = vrot.lane.b32.xlu1 %v16145_v14, %s10446_s13 }
 0xca2   :  { %4997 = vrot.lane.b32.xlu1 %v16146_v51, %s10446_s13  ;;  %v10141_v27 = vpop.eup %10140 }
 0xcb5   :  { %4904 = vadd.xlane.f32.xlu0 %v4903_v11  ;;  %v4771_v11 = vmul.f32 %v10141_v27, %v13166_v57 }
 0xcb9   :  { %4908 = vadd.xlane.f32.xlu0 %v4907_v25 }
 0xcc3   :  { %v4885_v0 = vpop.permute.xlu1 %4884  ;;  %v4883_v43 = vpop.permute.xlu0 %4882 }
 0xcc4   :  { %v4910_v21 = vsel %vm2496_vm15, %v4885_v0, 0.0  ;;  %v4892_v40 = vsel %vm16149_vm4, %v4883_v43, %v4885_v0  ;;  %v4770_v0 = vmul.f32 %v10141_v27, %v13163_v24  ;;  %v10235_v27 = vld [vmem:[%s15950_s5 + $0x24c] ss:$16 sps:$4 sm:$0xff]  }
 0xcc5   :  { %v4911_v62 = vadd.f32 %v4910_v21, %v4892_v40 }
 0xcc7   :  { %4912 = vadd.xlane.f32.xlu1 %v4911_v62  ;;  %v4889_v53 = vpop.permute.xlu1 %4888  ;;  %v4887_v20 = vpop.permute.xlu0 %4886 }
 0xcc8   :  { %v4914_v54 = vsel %vm2496_vm15, %v4889_v53, 0.0  ;;  %v4893_v10 = vsel %vm16152_vm6, %v4887_v20, %v4889_v53  ;;  %v4773_v53 = vmul.f32 %v10139_v56, %v13151_v8  ;;  %v10233_v56 = vld [vmem:[%s15950_s5 + $0x228] ss:$16 sps:$4 sm:$0xff]  }
 0xcc9   :  { %v4915_v55 = vadd.f32 %v4914_v54, %v4893_v10 }
 0xccf   :  { %4995 = vrot.lane.b32.xlu0 %v16150_v41, %s10446_s13 }
 0xcd8   :  { %4964 = vrot.lane.b32.xlu1 %v16150_v41, %s16038_s14 }
 0xcdc   :  { %4962 = vrot.lane.b32.xlu1 %v16151_v28, %s16038_s14 }
 0xcee   :  { %4916 = vadd.xlane.f32.xlu0 %v4915_v55 }
 0xd01   :  { %v13295_v13 = vpop.xlane.xlu0 %4756 }
 0xd04   :  { %4960 = vrot.lane.b32.xlu0 %v16143_v9, %s16038_s14 }
 0xd05   :  { %v4986_v4 = vpop.permute.xlu0 %4985 }
 0xd06   :  { %v13297_v5 = vpop.xlane.xlu1 %4752 }
 0xd08   :  { %4958 = vrot.lane.b32.xlu0 %v16153_v22, %s16038_s14 }
 0xd09   :  { %v4953_v46 = vpop.permute.xlu0 %4952 }
 0xd0a   :  { %v4984_v48 = vpop.permute.xlu1 %4983 }
 0xd0b   :  { %v5000_v45 = vsel %vm16154_vm8, %v4984_v48, %v4986_v4 }
 0xd0c   :  { %v5012_v43 = vsel %vm2496_vm15, %v4953_v46, %v5000_v45  ;;  %v10236_v45 = vld [vmem:[%s15950_s5 + $0x240] ss:$16 sps:$4 sm:$0xff]  }
 0xd0d   :  { %v4951_v26 = vpop.permute.xlu0 %4950 }
 0xd0e   :  { %v4988_v23 = vpop.permute.xlu1 %4987  ;;  %v4967_v21 = vsel %vm16156_vm10, %v4951_v26, %v4953_v46 }
 0xd0f   :  { %v5016_v20 = vadd.f32 %v4967_v21, %v4770_v0  ;;  %v10241_v0 = vld [vmem:[%s15950_s5 + $0x268] ss:$16 sps:$4 sm:$0xff]   ;;  %v10242_v21 = vld [vmem:[%s15950_s5 + $0x284] ss:$16 sps:$4 sm:$0x3f]  }
 0xd11   :  { %v13299_v63 = vpop.permute.xlu0 %4991  ;;  %v5040_v8 = vmul.f32 0.2, %v5016_v20  ;;  %vm5028_vm10 = vcmp.ge.f32.partialorder %v5016_v20, 0.0 }
 0xd12   :  { %v4990_v6 = vpop.permute.xlu1 %4989 }
 0xd13   :  { %v5001_v19 = vsel %vm16157_vm1, %v4988_v23, %v4990_v6  ;;  %v5052_v39 = vsel %vm5028_vm10, %v5016_v20, %v5040_v8 }
 0xd16   :  { %v4957_v37 = vpop.permute.xlu1 %4956 }
 0xd17   :  { %v5013_v24 = vsel %vm2496_vm15, %v4957_v37, %v5001_v19 }
 0xd1a   :  { %v4955_v35 = vpop.permute.xlu1 %4954 }
 0xd1b   :  { %v4968_v33 = vsel %vm16155_vm9, %v4955_v35, %v4957_v37  ;;  %v10231_v37 = vld [vmem:[%s15950_s5 + $0x22c] ss:$16 sps:$4 sm:$0xff]   ;;  %v10234_v35 = vld [vmem:[%s15950_s5 + $0x244] ss:$16 sps:$4 sm:$0xff]  }
 0xd1c   :  { %v5019_v40 = vadd.f32 %v4968_v33, %v4772_v12  ;;  %v10237_v33 = vld [vmem:[%s15950_s5 + $0x248] ss:$16 sps:$4 sm:$0xff]   ;;  %v10239_v12 = vld [vmem:[%s15950_s5 + $0x26c] ss:$16 sps:$4 sm:$0xff]  }
 0xd1e   :  { %v5043_v54 = vmul.f32 0.2, %v5019_v40  ;;  %vm5031_vm4 = vcmp.ge.f32.partialorder %v5019_v40, 0.0 }
 0xd20   :  { %v5055_v26 = vsel %vm5031_vm4, %v5019_v40, %v5043_v54  ;;  %vm16160_vm4 = vcmask 678912  }
 0xd42   :  { %v4905_v47 = vpop.xlane.xlu0 %4904 }
 0xd43   :  { %v4918_v9 = vmul.f32 0.0069444445, %v4905_v47  ;;  %v5064_v47 = vpack.c.bf16 %v5055_v26, %v5052_v39 }
 0xd45   :  { %v4922_v30 = vadd.f32 1e-05, %v4918_v9  ;;  %v10228_v9 = vld [vmem:[%s15950_s5 + $0x200] ss:$16 sps:$4 sm:$0xff]  }
 0xd46   :  { %v4909_v14 = vpop.xlane.xlu0 %4908 }
 0xd47   :  { %10142 = vrsqrt.f32 %v4922_v30  ;;  %v4919_v51 = vmul.f32 0.0069444445, %v4909_v14  ;;  %v10229_v30 = vld [vmem:[%s15950_s5 + $0x208] ss:$16 sps:$4 sm:$0xff]   ;;  %v13325_v14 = vpop.permute.xlu1 %4993 }
 0xd49   :  { %v4923_v17 = vadd.f32 1e-05, %v4919_v51  ;;  %v10230_v51 = vld [vmem:[%s15950_s5 + $0x224] ss:$16 sps:$4 sm:$0xff]  }
 0xd4a   :  { %v4996_v19 = vpop.permute.xlu0 %4995 }
 0xd4b   :  { %10144 = vrsqrt.f32 %v4923_v17  ;;  %v10232_v17 = vld [vmem:[%s15950_s5 + $0x220] ss:$16 sps:$4 sm:$0xff]  }
 0xd51   :  { %v10143_v2 = vpop.eup %10142 }
 0xd52   :  { %v4930_v52 = vmul.f32 %v10143_v2, %v13176_v1  ;;  %v4931_v25 = vmul.f32 %v10143_v2, %v13179_v60  ;;  %v13345_v2 = vpop.permute.xlu1 %4997 }
 0xd54   :  { %v5018_v62 = vadd.f32 %v4986_v4, %v4931_v25  ;;  %v4938_v41 = vsel %vm2496_vm15, %v4771_v11, %v4930_v52  ;;  %v10238_v11 = vld [vmem:[%s15950_s5 + $0x264] ss:$16 sps:$4 sm:$0xff]   ;;  %v10240_v25 = vld [vmem:[%s15950_s5 + $0x260] ss:$16 sps:$4 sm:$0xff]  }
 0xd55   :  { %v10145_v28 = vpop.eup %10144  ;;  %v5017_v57 = vadd.f32 %v5012_v43, %v4938_v41  ;;  %v10243_v43 = vld [vmem:[%s15950_s5 + $0x28c] ss:$16 sps:$4 sm:$0x3f]  }
 0xd56   :  { %v4932_v1 = vmul.f32 %v10145_v28, %v13188_v16  ;;  %v4933_v60 = vmul.f32 %v10145_v28, %v13193_v49  ;;  %v5042_v10 = vmul.f32 0.2, %v5018_v62  ;;  %vm5030_vm6 = vcmp.ge.f32.partialorder %v5018_v62, 0.0  ;;  %v4913_v52 = vpop.xlane.xlu1 %4912  ;;  %v16158_v41 = vld [vmem:[#allocation19_spill] sm:$0xff]  ;;  %v16159_v28 = vld [vmem:[#allocation33_spill] sm:$0xff] }
 0xd57   :  { %v5041_v46 = vmul.f32 0.2, %v5017_v57  ;;  %vm5029_vm9 = vcmp.ge.f32.partialorder %v5017_v57, 0.0  ;;  %v4920_v40 = vmul.f32 0.0069444445, %v4913_v52 }
 0xd58   :  { %v5021_v55 = vadd.f32 %v4990_v6, %v4933_v60  ;;  %v4939_v22 = vsel %vm2496_vm15, %v4773_v53, %v4932_v1  ;;  %v5054_v49 = vsel %vm5030_vm6, %v5018_v62, %v5042_v10  ;;  %v4760_v62 = vmul.f32 0.0069444445, %v13297_v5 }
 0xd59   :  { %v5020_v4 = vadd.f32 %v5013_v24, %v4939_v22  ;;  %v5053_v23 = vsel %vm5029_vm9, %v5017_v57, %v5041_v46  ;;  %v4761_v53 = vmul.f32 0.0069444445, %v13295_v13  ;;  %v4924_v57 = vadd.f32 1e-05, %v4920_v40  ;;  %vm16163_vm9 = vmmov %vm16160_vm4 }
 0xd5a   :  { %vm5033_vm8 = vcmp.ge.f32.partialorder %v5021_v55, 0.0  ;;  %v5045_v48 = vmul.f32 0.2, %v5021_v55  ;;  %v4764_v20 = vadd.f32 1e-05, %v4760_v62  ;;  %v4965_v10 = vpop.permute.xlu1 %4964  ;;  %vm16161_vm6 = vcmask 924672  }
 0xd5b   :  { %vm5032_vm1 = vcmp.ge.f32.partialorder %v5020_v4, 0.0  ;;  %v5044_v16 = vmul.f32 0.2, %v5020_v4  ;;  %v4765_v1 = vadd.f32 1e-05, %v4761_v53  ;;  %10146 = vrsqrt.f32 %v4924_v57 }
 0xd5c   :  { %v5057_v32 = vsel %vm5033_vm8, %v5021_v55, %v5045_v48  ;;  %10148 = vrsqrt.f32 %v4764_v20  ;;  %v5002_v48 = vsel %vm16160_vm4, %v13299_v63, %v13325_v14  ;;  %vm16162_vm8 = vmmov %vm16161_vm6 }
 0xd5d   :  { %v5056_v3 = vsel %vm5032_vm1, %v5020_v4, %v5044_v16  ;;  %v13317_v44 = vpack.c.bf16 %v5057_v32, %v5054_v49  ;;  %10150 = vrsqrt.f32 %v4765_v1 }
 0xd5e   :  { %v5065_v6 = vpack.c.bf16 %v5056_v3, %v5053_v23  ;;  %v4963_v46 = vpop.permute.xlu1 %4962 }
 0xd5f   :  { %v4970_v23 = vsel %vm16162_vm8, %v4963_v46, %v4965_v10 }
 0xd60   :  { %5108 = vmatprep.mubr.bf16.mxu1 %v5065_v6  ;;  %5214 = vmatprep.mubr.bf16.mxu0 %v5065_v6 }
 0xd61   :  { %5109 = vmatmul.mubr.bf16.vlgmr.msra.gmra.mrb[64].mxu1 %v5064_v47  ;;  %5215 = vmatmul.mubr.bf16.vlgmr.msra.gmra.mrb[56].mxu0 %v5064_v47 }
 0xd62   :  { %5130 = vmatpush1.bf16.msra.mxu1 %v10228_v9  ;;  %5236 = vmatpush1.bf16.msra.mxu0 %v10229_v30 }
 0xd63   :  { %5131 = vmatprep.subr.bf16.mxu1 %v10230_v51  ;;  %5237 = vmatprep.subr.bf16.mxu0 %v10231_v37 }
 0xd65   :  { %v10147_v5 = vpop.eup %10146 }
 0xd66   :  { %5132 = vmatpush1.bf16.msra.mxu1 %v10232_v17  ;;  %5238 = vmatpush1.bf16.msra.mxu0 %v10233_v56  ;;  %v10149_v4 = vpop.eup %10148  ;;  %v4934_v8 = vmul.f32 %v10147_v5, %v13204_v59  ;;  %v4935_v52 = vmul.f32 %v10147_v5, %v13207_v18 }
 0xd67   :  { %5133 = vmatprep.subr.bf16.mxu1 %v10234_v35  ;;  %5239 = vmatprep.subr.bf16.mxu0 %v10235_v27  ;;  %v10151_v13 = vpop.eup %10150  ;;  %v4775_v26 = vmul.f32 %v10149_v4, %v13240_v61  ;;  %v4774_v32 = vmul.f32 %v10149_v4, %v13245_v34  ;;  %v5003_v61 = vsel %vm16163_vm9, %v4996_v19, %v13345_v2 }
 0xd68   :  { %v4776_v3 = vmul.f32 %v10151_v13, %v13237_v50  ;;  %v4777_v9 = vmul.f32 %v10151_v13, %v13233_v36  ;;  %v5015_v51 = vsel %vm2496_vm15, %v4965_v10, %v5003_v61 }
 0xd69   :  { %v4940_v39 = vsel %vm2496_vm15, %v4775_v26, %v4934_v8 }
 0xd6a   :  { %5134 = vmatpush1.bf16.msra.mxu1 %v10236_v45  ;;  %5240 = vmatpush1.bf16.msra.mxu0 %v10237_v33  ;;  %v5025_v63 = vadd.f32 %v4970_v23, %v4776_v3  ;;  %v10047_v3 = vld [vmem:[%s15947_s6 + $0x64] ss:$12 sps:$4 sm:$0xff]  }
 0xd6b   :  { %5135 = vmatprep.subr.bf16.mxu1 %v10238_v11  ;;  %5241 = vmatprep.subr.bf16.mxu0 %v10239_v12 }
 0xd6c   :  { %v5049_v56 = vmul.f32 0.2, %v5025_v63 }
 0xd6e   :  { %5136 = vmatpush1.bf16.msra.mxu1 %v10240_v25  ;;  %5242 = vmatpush1.bf16.msra.mxu0 %v10241_v0  ;;  %v5024_v0 = vadd.f32 %v13325_v14, %v4935_v52 }
 0xd6f   :  { %9015 = vmatprep.subr.msk.bf16.mxu1 %vm3885_vm12, %v10242_v21  ;;  %9018 = vmatprep.subr.msk.bf16.mxu0 %vm3885_vm12, %v10243_v43 }
 0xd70   :  { %v5048_v18 = vmul.f32 0.2, %v5024_v0  ;;  %vm5036_vm9 = vcmp.ge.f32.partialorder %v5024_v0, 0.0 }
 0xd72   :  { %5138 = vmatpush1.bf16.msra.mxu1 %v16158_v41  ;;  %5244 = vmatpush1.bf16.msra.mxu0 %v16159_v28  ;;  %v5060_v43 = vsel %vm5036_vm9, %v5024_v0, %v5048_v18  ;;  %vm16172_vm9 = vcmask 670720  }
 0xd7b   :  { %v4917_v60 = vpop.xlane.xlu0 %4916 }
 0xd7c   :  { %v4921_v24 = vmul.f32 0.0069444445, %v4917_v60 }
 0xd7e   :  { %v4925_v54 = vadd.f32 1e-05, %v4921_v24 }
 0xd7f   :  { %v4961_v55 = vpop.permute.xlu0 %4960 }
 0xd80   :  { %10152 = vrsqrt.f32 %v4925_v54  ;;  %v5014_v49 = vsel %vm2496_vm15, %v4961_v55, %v5002_v48 }
 0xd81   :  { %v5023_v47 = vadd.f32 %v5014_v49, %v4940_v39 }
 0xd83   :  { %v4959_v22 = vpop.permute.xlu0 %4958  ;;  %v5047_v17 = vmul.f32 0.2, %v5023_v47  ;;  %vm5035_vm1 = vcmp.ge.f32.partialorder %v5023_v47, 0.0 }
 0xd84   :  { %v4969_v16 = vsel %vm16161_vm6, %v4959_v22, %v4961_v55  ;;  %vm5037_vm6 = vcmp.ge.f32.partialorder %v5025_v63, 0.0 }
 0xd85   :  { %v5022_v59 = vadd.f32 %v4969_v16, %v4774_v32  ;;  %v5059_v27 = vsel %vm5035_vm1, %v5023_v47, %v5047_v17  ;;  %v5061_v33 = vsel %vm5037_vm6, %v5025_v63, %v5049_v56  ;;  %vm16168_vm1 = vcmask 572416  }
 0xd87   :  { %v5046_v34 = vmul.f32 0.2, %v5022_v59  ;;  %vm5034_vm10 = vcmp.ge.f32.partialorder %v5022_v59, 0.0 }
 0xd89   :  { %v5058_v36 = vsel %vm5034_vm10, %v5022_v59, %v5046_v34  ;;  %vm16167_vm10 = vcmask 678912  }
 0xd8a   :  { %v10153_v6 = vpop.eup %10152  ;;  %v5067_v11 = vpack.c.bf16 %v5061_v33, %v5058_v36  ;;  %vm16170_vm6 = vmmov %vm16167_vm10 }
 0xd8b   :  { %v4936_v30 = vmul.f32 %v10153_v6, %v13216_v29  ;;  %v4937_v12 = vmul.f32 %v10153_v6, %v13219_v38 }
 0xd8d   :  { %v4941_v37 = vsel %vm2496_vm15, %v4777_v9, %v4936_v30  ;;  %v5027_v25 = vadd.f32 %v13345_v2, %v4937_v12  ;;  %v9031_v12 = vld [vmem:[%s15948_s7 + $0x50] sm:$0xff] }
 0xd8e   :  { %v5026_v50 = vadd.f32 %v5015_v51, %v4941_v37 }
 0xd8f   :  { %v5051_v21 = vmul.f32 0.2, %v5027_v25  ;;  %vm5039_vm8 = vcmp.ge.f32.partialorder %v5027_v25, 0.0 }
 0xd90   :  { %vm5038_vm4 = vcmp.ge.f32.partialorder %v5026_v50, 0.0  ;;  %v5050_v35 = vmul.f32 0.2, %v5026_v50 }
 0xd91   :  { %v5063_v38 = vsel %vm5039_vm8, %v5027_v25, %v5051_v21 }
 0xd92   :  { %v5062_v45 = vsel %vm5038_vm4, %v5026_v50, %v5050_v35  ;;  %v5069_v40 = vpack.c.bf16 %v5063_v38, %v5060_v43  ;;  %v9030_v35 = vld [vmem:[%s15948_s7 + $0x48] sm:$0xff]  ;;  %vm16169_vm4 = vcmask 924672  }
 0xd93   :  { %v5068_v29 = vpack.c.bf16 %v5062_v45, %v5059_v27  ;;  %v9029_v45 = vld [vmem:[%s15948_s7 + $0x40] sm:$0xff]  ;;  %vm16171_vm8 = vmmov %vm16169_vm4 }
 0xd95   :  { %5118 = vmatprep.mubr.bf16.mxu1 %v5068_v29  ;;  %5224 = vmatprep.mubr.bf16.mxu0 %v5068_v29  ;;  %v9032_v29 = vld [vmem:[%s15948_s7 + $0x58] sm:$0xff] }
 0xd96   :  { %5119 = vmatmul.mubr.bf16.gmra.mrb[68].mxu1 %v5067_v11  ;;  %5225 = vmatmul.mubr.bf16.gmra.mrb[60].mxu0 %v5067_v11 }
 0xd97   :  { %5161 = vmatprep.mubr.bf16.mxu1 %v16084_v42  ;;  %5267 = vmatprep.mubr.bf16.mxu0 %v16084_v42 }
 0xd9e   :  { %9016 = vmatmul.mubr.msk.bf16.vlgmr.msra.gmra.mrb[64].mxu1 %vm3878_vm0, %v13317_v44  ;;  %9019 = vmatmul.mubr.msk.bf16.vlgmr.msra.gmra.mrb[56].mxu0 %vm3878_vm0, %v13317_v44 }
 0xd9f   :  { %5171 = vmatprep.mubr.bf16.mxu1 %v16084_v42  ;;  %5277 = vmatprep.mubr.bf16.mxu0 %v16084_v42 }
 0xda6   :  { %9017 = vmatmul.mubr.msk.bf16.gmra.mrb[68].mxu1 %vm3878_vm0, %v5069_v40  ;;  %9020 = vmatmul.mubr.msk.bf16.gmra.mrb[60].mxu0 %vm3878_vm0, %v5069_v40 }
 0xda7   :  { %5696 = vmatprep.mubr.bf16.mxu1 %v10047_v3  ;;  %5802 = vmatprep.mubr.bf16.mxu0 %v10047_v3 }
 0xe71   :  { %v13408_v14 = vpop.f32.mrb[64].mxu1  ;;  %v13410_v2 = vpop.f32.mrb[56].mxu0 }
 0xe72   :  { %v13412_v62 = vpop.f32.mrb[65].mxu1  ;;  %v5271_v44 = vpop.f32.mrb[57].mxu0 }
 0xe73   :  { %v13414_v53 = vpop.f32.mrb[66].mxu1  ;;  %v13416_v57 = vpop.f32.mrb[58].mxu0 }
 0xe74   :  { %v13420_v20 = vpack.c.bf16 %v13414_v53, %v13408_v14  ;;  %v13424_v19 = vpack.c.bf16 %v13416_v57, %v13410_v2  ;;  %v13426_v1 = vpop.f32.mrb[67].mxu1  ;;  %v5275_v60 = vpop.f32.mrb[59].mxu0 }
 0xe75   :  { %v13430_v24 = vpack.c.bf16 %v13426_v1, %v13412_v62  ;;  %v13432_v54 = vpack.c.bf16 %v5275_v60, %v5271_v44 }
 0xe76   :  { %5302 = vrot.lane.b32.xlu1 %v13424_v19, %s10440_s4  ;;  %5482 = vrot.lane.b32.xlu0 %v13420_v20, %s16034_s26 }
 0xe79   :  { %v13438_v10 = vpop.f32.mrb[68].mxu1  ;;  %v13440_v55 = vpop.f32.mrb[60].mxu0 }
 0xe7a   :  { %5336 = vrot.lane.b32.xlu1 %v13424_v19, %s16040_s27  ;;  %v5281_v5 = vpop.f32.mrb[61].mxu0  ;;  %5300 = vrot.lane.b32.xlu0 %v13430_v24, %s10440_s4  ;;  %v13446_v22 = vpop.f32.mrb[69].mxu1 }
 0xe7b   :  { %v13448_v4 = vpop.f32.mrb[70].mxu1  ;;  %v13450_v46 = vpop.f32.mrb[62].mxu0 }
 0xe7c   :  { %v13454_v8 = vpack.c.bf16 %v13448_v4, %v13438_v10  ;;  %v13458_v13 = vpack.c.bf16 %v13450_v46, %v13440_v55  ;;  %v13460_v48 = vpop.f32.mrb[71].mxu1  ;;  %v5285_v16 = vpop.f32.mrb[63].mxu0 }
 0xe7d   :  { %v13464_v26 = vpack.c.bf16 %v13460_v48, %v13446_v22  ;;  %v13466_v49 = vpack.c.bf16 %v5285_v16, %v5281_v5 }
 0xe7e   :  { %5322 = vrot.lane.b32.xlu1 %v13420_v20, %s10410_s0  ;;  %5334 = vrot.lane.b32.xlu0 %v13430_v24, %s16040_s27 }
 0xe82   :  { %5368 = vrot.lane.b32.xlu1 %v13424_v19, %s10443_s2  ;;  %5324 = vrot.lane.b32.xlu0 %v13430_v24, %s10410_s0 }
 0xe86   :  { %5354 = vrot.lane.b32.xlu1 %v13420_v20, %s10444_s28  ;;  %5366 = vrot.lane.b32.xlu0 %v13430_v24, %s10443_s2 }
 0xe8a   :  { %5400 = vrot.lane.b32.xlu1 %v13424_v19, %s10445_s1  ;;  %5356 = vrot.lane.b32.xlu0 %v13430_v24, %s10444_s28 }
 0xe8e   :  { %5386 = vrot.lane.b32.xlu1 %v13420_v20, %s10430_s22  ;;  %5398 = vrot.lane.b32.xlu0 %v13430_v24, %s10445_s1 }
 0xe92   :  { %5432 = vrot.lane.b32.xlu1 %v13424_v19, %s10446_s13  ;;  %5388 = vrot.lane.b32.xlu0 %v13430_v24, %s10430_s22 }
 0xe96   :  { %5418 = vrot.lane.b32.xlu1 %v13420_v20, %s16038_s14  ;;  %5430 = vrot.lane.b32.xlu0 %v13430_v24, %s10446_s13 }
 0xe9a   :  { %5464 = vrot.lane.b32.xlu1 %v13424_v19, %s16036_s15  ;;  %5420 = vrot.lane.b32.xlu0 %v13430_v24, %s16038_s14 }
 0xe9e   :  { %5450 = vrot.lane.b32.xlu1 %v13420_v20, %s16164_s24  ;;  %5462 = vrot.lane.b32.xlu0 %v13430_v24, %s16036_s15 }
 0xea2   :  { %5498 = vrot.lane.b32.xlu1 %v13424_v19, %s16165_s11  ;;  %5452 = vrot.lane.b32.xlu0 %v13430_v24, %s16164_s24 }
 0xea6   :  { %5536 = vrot.lane.b32.xlu1 %v13424_v19, %s16166_s18  ;;  %5496 = vrot.lane.b32.xlu0 %v13430_v24, %s16165_s11 }
 0xeaa   :  { %5500 = vrot.lane.b32.xlu1 %v13432_v54, %s16165_s11  ;;  %5484 = vrot.lane.b32.xlu0 %v13430_v24, %s16034_s26 }
 0xeae   :  { %5306 = vrot.lane.b32.xlu1 %v13458_v13, %s10440_s4  ;;  %5534 = vrot.lane.b32.xlu0 %v13430_v24, %s16166_s18 }
 0xeb2   :  { %5340 = vrot.lane.b32.xlu1 %v13458_v13, %s16040_s27  ;;  %5504 = vrot.lane.b32.xlu0 %v13458_v13, %s16165_s11 }
 0xeb6   :  { %5326 = vrot.lane.b32.xlu1 %v13454_v8, %s10410_s0  ;;  %5304 = vrot.lane.b32.xlu0 %v13464_v26, %s10440_s4 }
 0xeba   :  { %5372 = vrot.lane.b32.xlu1 %v13458_v13, %s10443_s2  ;;  %5524 = vrot.lane.b32.xlu0 %v13430_v24, %s16086_s20 }
 0xebe   :  { %5358 = vrot.lane.b32.xlu1 %v13454_v8, %s10444_s28  ;;  %5338 = vrot.lane.b32.xlu0 %v13464_v26, %s16040_s27 }
 0xec2   :  { %5404 = vrot.lane.b32.xlu1 %v13458_v13, %s10445_s1  ;;  %5328 = vrot.lane.b32.xlu0 %v13464_v26, %s10410_s0 }
 0xec6   :  { %5390 = vrot.lane.b32.xlu1 %v13454_v8, %s10430_s22  ;;  %5370 = vrot.lane.b32.xlu0 %v13464_v26, %s10443_s2 }
 0xeca   :  { %5436 = vrot.lane.b32.xlu1 %v13458_v13, %s10446_s13  ;;  %5360 = vrot.lane.b32.xlu0 %v13464_v26, %s10444_s28 }
 0xece   :  { %5422 = vrot.lane.b32.xlu1 %v13454_v8, %s16038_s14  ;;  %5402 = vrot.lane.b32.xlu0 %v13464_v26, %s10445_s1 }
 0xed2   :  { %5468 = vrot.lane.b32.xlu1 %v13458_v13, %s16036_s15  ;;  %5392 = vrot.lane.b32.xlu0 %v13464_v26, %s10430_s22 }
 0xed6   :  { %5454 = vrot.lane.b32.xlu1 %v13454_v8, %s16164_s24  ;;  %5434 = vrot.lane.b32.xlu0 %v13464_v26, %s10446_s13 }
 0xeda   :  { %5486 = vrot.lane.b32.xlu1 %v13454_v8, %s16034_s26  ;;  %5424 = vrot.lane.b32.xlu0 %v13464_v26, %s16038_s14  ;;  %s10457_s14 = smov 80  }
 0xede   :  { %5538 = vrot.lane.b32.xlu1 %v13432_v54, %s16166_s18  ;;  %5466 = vrot.lane.b32.xlu0 %v13464_v26, %s16036_s15  ;;  %s10458_s15 = smov 125  }
 0xee2   :  { %5502 = vrot.lane.b32.xlu1 %v13464_v26, %s16165_s11  ;;  %5456 = vrot.lane.b32.xlu0 %v13464_v26, %s16164_s24 }
 0xee6   :  { %5488 = vrot.lane.b32.xlu1 %v13464_v26, %s16034_s26  ;;  %5522 = vrot.lane.b32.xlu0 %v13420_v20, %s16086_s20  ;;  %s10466_s26 = smov 40  }
 0xee8   :  { %v5303_v32 = vpop.permute.xlu1 %5302  ;;  %v13576_v23 = vpop.permute.xlu0 %5482 }
 0xeea   :  { %5540 = vrot.lane.b32.xlu1 %v13464_v26, %s16166_s18  ;;  %5506 = vrot.lane.b32.xlu0 %v13466_v49, %s16165_s11 }
 0xeec   :  { %v13585_v39 = vpop.permute.xlu1 %5336  ;;  %v13587_v59 = vpop.permute.xlu0 %5300 }
 0xeed   :  { %v5308_v6 = vsel %vm2491_vm11, %v13587_v59, %v5303_v32 }
 0xeee   :  { %5528 = vrot.lane.b32.xlu1 %v13464_v26, %s16086_s20  ;;  %5542 = vrot.lane.b32.xlu0 %v13458_v13, %s16166_s18  ;;  %v5314_v47 = vsel %vm2496_vm15, %v13430_v24, %v5308_v6 }
 0xeef   :  { %5664 = vmatprep.subr.bf16.mxu1 %v5314_v47 }
 0xef0   :  { %v5323_v9 = vpop.permute.xlu1 %5322  ;;  %5665 = vmatpush1.bf16.msra.mxu1 %v13420_v20  ;;  %v5335_v63 = vpop.permute.xlu0 %5334 }
 0xef2   :  { %5526 = vrot.lane.b32.xlu1 %v13454_v8, %s16086_s20  ;;  %5544 = vrot.lane.b32.xlu0 %v13466_v49, %s16166_s18 }
 0xef4   :  { %v13602_v30 = vpop.permute.xlu1 %5368  ;;  %v5325_v61 = vpop.permute.xlu0 %5324 }
 0xef6   :  { %5570 = vrot.lane.b32.xlu1 %v13424_v19, %s16087_s21  ;;  %5568 = vrot.lane.b32.xlu0 %v13430_v24, %s16087_s21 }
 0xef8   :  { %v13608_v51 = vpop.permute.xlu1 %5354  ;;  %v5367_v34 = vpop.permute.xlu0 %5366 }
 0xefa   :  { %5560 = vrot.lane.b32.xlu1 %v13420_v20, %s10440_s4  ;;  %5572 = vrot.lane.b32.xlu0 %v13432_v54, %s16087_s21 }
 0xefc   :  { %v13614_v37 = vpop.permute.xlu1 %5400  ;;  %v13616_v17 = vpop.permute.xlu0 %5356 }
 0xefe   :  { %5576 = vrot.lane.b32.xlu1 %v13458_v13, %s16087_s21  ;;  %5574 = vrot.lane.b32.xlu0 %v13464_v26, %s16087_s21 }
 0xf00   :  { %v13622_v50 = vpop.permute.xlu1 %5386  ;;  %v13624_v56 = vpop.permute.xlu0 %5398 }
 0xf02   :  { %5562 = vrot.lane.b32.xlu1 %v13454_v8, %s10440_s4  ;;  %5578 = vrot.lane.b32.xlu0 %v13466_v49, %s16087_s21 }
 0xf04   :  { %v13633_v36 = vpop.permute.xlu1 %5432  ;;  %v13635_v27 = vpop.permute.xlu0 %5388 }
 0xf05   :  { %9215 = vmatprep.subr.bf16.mxu0 %v13633_v36 }
 0xf06   :  { %9216 = vmatpush3.bf16.msra.mxu0 %v5303_v32  ;;  %5615 = vperm.xlu1 %9571, %v9030_v35   ;;  %v5342_v32 = vsel %vm2527_vm13, %v5335_v63, %v13585_v39  ;;  %v5330_v35 = vsel %vm1318_vm3, %v5323_v9, %v5325_v61 }
 0xf07   :  { %5610 = vperm.xlu0 %9572, %v9029_v45   ;;  %v5348_v47 = vsel %vm2496_vm15, %v5325_v61, %v5342_v32 }
 0xf08   :  { %v13644_v33 = vpop.permute.xlu1 %5418  ;;  %v13646_v11 = vpop.permute.xlu0 %5430 }
 0xf0a   :  { %5625 = vperm.xlu1 %9571, %v9032_v29  }
 0xf0b   :  { %5620 = vperm.xlu0 %9572, %v9031_v12  }
 0xf0c   :  { %v13651_v52 = vpop.permute.xlu1 %5464  ;;  %v13653_v25 = vpop.permute.xlu0 %5420 }
 0xf10   :  { %v13655_v0 = vpop.permute.xlu1 %5450  ;;  %v13657_v21 = vpop.permute.xlu0 %5462 }
 0xf14   :  { %v13659_v18 = vpop.permute.xlu1 %5498  ;;  %v13661_v38 = vpop.permute.xlu0 %5452 }
 0xf18   :  { %v13663_v43 = vpop.permute.xlu1 %5536  ;;  %v13665_v40 = vpop.permute.xlu0 %5496 }
 0xf1c   :  { %v13667_v44 = vpop.permute.xlu1 %5500  ;;  %v13669_v20 = vpop.permute.xlu0 %5484 }
 0xf20   :  { %v5307_v19 = vpop.permute.xlu1 %5306  ;;  %v13671_v60 = vpop.permute.xlu0 %5534 }
 0xf24   :  { %v5341_v24 = vpop.permute.xlu1 %5340  ;;  %v13673_v54 = vpop.permute.xlu0 %5504 }
 0xf28   :  { %v5327_v5 = vpop.permute.xlu1 %5326  ;;  %v13675_v13 = vpop.permute.xlu0 %5304 }
 0xf29   :  { %v5309_v16 = vsel %vm2491_vm11, %v13675_v13, %v5307_v19 }
 0xf2a   :  { %v5318_v49 = vsel %vm2496_vm15, %v13464_v26, %v5309_v16 }
 0xf2b   :  { %5666 = vmatprep.subr.bf16.mxu1 %v5318_v49 }
 0xf2c   :  { %v13683_v3 = vpop.permute.xlu1 %5372  ;;  %5667 = vmatpush1.bf16.msra.mxu1 %v13454_v8  ;;  %v13686_v6 = vpop.permute.xlu0 %5524  ;;  %v5374_v8 = vsel %vm2561_vm5, %v5367_v34, %v13602_v30 }
 0xf2d   :  { %5668 = vmatprep.subr.bf16.mxu1 %v5348_v47  ;;  %v5380_v9 = vsel %vm2496_vm15, %v13616_v17, %v5374_v8  ;;  %v5362_v47 = vsel %vm2548_vm7, %v13608_v51, %v13616_v17 }
 0xf30   :  { %v5359_v45 = vpop.permute.xlu1 %5358  ;;  %5669 = vmatpush1.bf16.msra.mxu1 %v5330_v35  ;;  %v5339_v29 = vpop.permute.xlu0 %5338 }
 0xf31   :  { %v5343_v26 = vsel %vm2527_vm13, %v5339_v29, %v5341_v24 }
 0xf34   :  { %v13691_v12 = vpop.permute.xlu1 %5404  ;;  %v5329_v63 = vpop.permute.xlu0 %5328 }
 0xf35   :  { %v5352_v16 = vsel %vm2496_vm15, %v5329_v63, %v5343_v26  ;;  %v5331_v49 = vsel %vm1318_vm3, %v5327_v5, %v5329_v63  ;;  %v5406_v63 = vsel %vm2594_vm2, %v13624_v56, %v13614_v37 }
 0xf36   :  { %5670 = vmatprep.subr.bf16.mxu1 %v5352_v16  ;;  %v5412_v51 = vsel %vm2496_vm15, %v13635_v27, %v5406_v63 }
 0xf37   :  { %5671 = vmatpush1.bf16.msra.mxu1 %v5331_v49 }
 0xf38   :  { %v5391_v61 = vpop.permute.xlu1 %5390  ;;  %5672 = vmatprep.subr.bf16.mxu1 %v5380_v9  ;;  %v5371_v32 = vpop.permute.xlu0 %5370 }
 0xf39   :  { %v5375_v35 = vsel %vm2561_vm5, %v5371_v32, %v13683_v3  ;;  %v5438_v32 = vsel %vm16167_vm10, %v13646_v11, %v13633_v36  ;;  %v5426_v36 = vsel %vm16169_vm4, %v13644_v33, %v13653_v25  ;;  %vm16173_vm10 = vcmask 916480  }
 0xf3a   :  { %vm16175_vm4 = vmmov %vm16173_vm10 }
 0xf3b   :  { %5673 = vmatpush1.bf16.msra.mxu1 %v5362_v47 }
 0xf3c   :  { %v5437_v5 = vpop.permute.xlu1 %5436  ;;  %v5361_v29 = vpop.permute.xlu0 %5360 }
 0xf3d   :  { %9217 = vmatprep.subr.bf16.mxu0 %v5437_v5  ;;  %v5384_v34 = vsel %vm2496_vm15, %v5361_v29, %v5375_v35  ;;  %v5363_v26 = vsel %vm2548_vm7, %v5359_v45, %v5361_v29  ;;  %v5394_v45 = vsel %vm1479_vm14, %v13622_v50, %v13635_v27  ;;  %v5444_v50 = vsel %vm2496_vm15, %v13653_v25, %v5438_v32 }
 0xf3e   :  { %5674 = vmatprep.subr.bf16.mxu1 %v5384_v34  ;;  %9218 = vmatpush3.bf16.msra.mxu0 %v5307_v19  ;;  %v5470_v29 = vsel %vm16172_vm9, %v13657_v21, %v13651_v52  ;;  %v5458_v25 = vsel %vm16173_vm10, %v13655_v0, %v13661_v38 }
 0xf3f   :  { %5675 = vmatpush1.bf16.msra.mxu1 %v5363_v26  ;;  %9219 = vmatprep.subr.bf16.mxu0 %v13651_v52 }
 0xf40   :  { %v5423_v17 = vpop.permute.xlu1 %5422  ;;  %5676 = vmatprep.subr.bf16.mxu1 %v5412_v51  ;;  %v5403_v16 = vpop.permute.xlu0 %5402 }
 0xf41   :  { %v5407_v56 = vsel %vm2594_vm2, %v5403_v16, %v13691_v12 }
 0xf42   :  { %9220 = vmatpush3.bf16.msra.mxu0 %v13585_v39  ;;  %v5509_v39 = vsel %vm16168_vm1, %v13659_v18, %v13667_v44  ;;  %vm16174_vm1 = vmmov %vm16172_vm9  ;;  %vm16178_vm9 = vcmask 818176  }
 0xf43   :  { %5677 = vmatpush1.bf16.msra.mxu1 %v5394_v45  ;;  %v5490_v45 = vsel %vm16178_vm9, %v13576_v23, %v13669_v20 }
 0xf44   :  { %v5469_v19 = vpop.permute.xlu1 %5468  ;;  %v5393_v49 = vpop.permute.xlu0 %5392 }
 0xf45   :  { %9221 = vmatprep.subr.bf16.mxu0 %v5469_v19  ;;  %v5416_v8 = vsel %vm2496_vm15, %v5393_v49, %v5407_v56  ;;  %v5395_v9 = vsel %vm1479_vm14, %v5391_v61, %v5393_v49 }
 0xf46   :  { %5678 = vmatprep.subr.bf16.mxu1 %v5416_v8  ;;  %9222 = vmatpush3.bf16.msra.mxu0 %v5341_v24 }
 0xf47   :  { %5679 = vmatpush1.bf16.msra.mxu1 %v5395_v9  ;;  %9223 = vmatprep.subr.bf16.mxu0 %v5509_v39 }
 0xf48   :  { %v5455_v27 = vpop.permute.xlu1 %5454  ;;  %5680 = vmatprep.subr.bf16.mxu1 %v5444_v50  ;;  %v5435_v47 = vpop.permute.xlu0 %5434 }
 0xf49   :  { %v5439_v11 = vsel %vm16170_vm6, %v5435_v47, %v5437_v5  ;;  %vm16176_vm6 = vcmask 572416   ;;  %v10045_v47 = vld [vmem:[%s15947_s6 + $0x60] ss:$12 sps:$4 sm:$0xff]  }
 0xf4a   :  { %9224 = vmatpush3.bf16.msra.mxu0 %v13602_v30  ;;  %v5476_v30 = vsel %vm2496_vm15, %v13661_v38, %v5470_v29  ;;  %v5508_v21 = vsel %vm16176_vm6, %v13665_v40, %v13659_v18  ;;  %vm16179_vm10 = vmmov %vm16176_vm6  ;;  %v10050_v29 = vld [vmem:[%s15947_s6 + $0x78] ss:$12 sps:$4 sm:$0xff]  }
 0xf4b   :  { %5681 = vmatpush1.bf16.msra.mxu1 %v5426_v36 }
 0xf4c   :  { %v5487_v24 = vpop.permute.xlu1 %5486  ;;  %v5425_v61 = vpop.permute.xlu0 %5424 }
 0xf4d   :  { %v5448_v44 = vsel %vm2496_vm15, %v5425_v61, %v5439_v11  ;;  %v5427_v35 = vsel %vm16171_vm8, %v5423_v17, %v5425_v61  ;;  %v5516_v17 = vsel %vm2496_vm15, %v13669_v20, %v5508_v21  ;;  %vm16177_vm8 = vmmov %vm16176_vm6  ;;  %v10244_v21 = vld [vmem:[%s15950_s5 + $0xc] ss:$16 sps:$4 sm:$0xff]  }
 0xf4e   :  { %5682 = vmatprep.subr.bf16.mxu1 %v5448_v44 }
 0xf4f   :  { %5683 = vmatpush1.bf16.msra.mxu1 %v5427_v35 }
 0xf50   :  { %v5539_v34 = vpop.permute.xlu1 %5538  ;;  %5684 = vmatprep.subr.bf16.mxu1 %v5476_v30  ;;  %v5467_v33 = vpop.permute.xlu0 %5466 }
 0xf51   :  { %v5471_v5 = vsel %vm16174_vm1, %v5467_v33, %v5469_v19  ;;  %vm16180_vm1 = vcmask 564224   ;;  %v10051_v33 = vld [vmem:[%s15947_s6 + $0x68] ss:$12 sps:$4 sm:$0xff]  }
 0xf52   :  { %v5546_v49 = vsel %vm16180_vm1, %v13671_v60, %v13663_v43  ;;  %vm16182_vm6 = vmmov %vm16180_vm1 }
 0xf53   :  { %5685 = vmatpush1.bf16.msra.mxu1 %v5458_v25  ;;  %v5554_v23 = vsel %vm2496_vm15, %v13686_v6, %v5546_v49  ;;  %v5547_v20 = vsel %vm16182_vm6, %v13663_v43, %v5539_v34  ;;  %v10255_v49 = vld [vmem:[%s15950_s5 + $0x48] ss:$16 sps:$4 sm:$0xff]  }
 0xf54   :  { %v5503_v26 = vpop.permute.xlu1 %5502  ;;  %v5457_v63 = vpop.permute.xlu0 %5456 }
 0xf55   :  { %v5480_v51 = vsel %vm2496_vm15, %v5457_v63, %v5471_v5  ;;  %v5459_v52 = vsel %vm16175_vm4, %v5455_v27, %v5457_v63  ;;  %v5510_v38 = vsel %vm16177_vm8, %v5503_v26, %v13673_v54  ;;  %vm16181_vm4 = vmmov %vm16178_vm9  ;;  %vm16184_vm9 = vcmask 809984  }
 0xf56   :  { %5686 = vmatprep.subr.bf16.mxu1 %v5480_v51  ;;  %vm16183_vm8 = vmmov %vm16180_vm1 }
 0xf57   :  { %5687 = vmatpush1.bf16.msra.mxu1 %v5459_v52  ;;  %v10052_v52 = vld [vmem:[%s15947_s6 + $0x80] ss:$12 sps:$4 sm:$0xff]  }
 0xf58   :  { %v5489_v16 = vpop.permute.xlu1 %5488  ;;  %5688 = vmatprep.subr.bf16.mxu1 %v5516_v17  ;;  %v5523_v0 = vpop.permute.xlu0 %5522  ;;  %v10245_v17 = vld [vmem:[%s15950_s5 + $0x4] ss:$16 sps:$4 sm:$0xff]  }
 0xf59   :  { %v5520_v56 = vsel %vm2496_vm15, %v5489_v16, %v5510_v38  ;;  %v5491_v8 = vsel %vm16181_vm4, %v5487_v24, %v5489_v16  ;;  %v5530_v60 = vsel %vm16184_vm9, %v5523_v0, %v13686_v6  ;;  %v10048_v6 = vld [vmem:[%s15947_s6 + $0x7c] ss:$12 sps:$4 sm:$0xff]   ;;  %vm16186_vm4 = vcmask 556032   ;;  %v10248_v0 = vld [vmem:[%s15950_s5 + $0x24] ss:$16 sps:$4 sm:$0xff]  }
 0xf5a   :  { %vm16187_vm6 = vmmov %vm16186_vm4  ;;  %v10247_v16 = vld [vmem:[%s15950_s5 + $0x8] ss:$16 sps:$4 sm:$0xff]   ;;  %v10249_v38 = vld [vmem:[%s15950_s5 + $0x2c] ss:$16 sps:$4 sm:$0xff]  }
 0xf5b   :  { %5689 = vmatpush1.bf16.msra.mxu1 %v5490_v45  ;;  %v10250_v45 = vld [vmem:[%s15950_s5 + $0x20] ss:$16 sps:$4 sm:$0xff]  }
 0xf5c   :  { %v5541_v19 = vpop.permute.xlu1 %5540  ;;  %5690 = vmatprep.subr.bf16.mxu1 %v5520_v56  ;;  %v5507_v18 = vpop.permute.xlu0 %5506  ;;  %v10251_v56 = vld [vmem:[%s15950_s5 + $0x28] ss:$16 sps:$4 sm:$0xff]  }
 0xf5d   :  { %v5511_v40 = vsel %vm16179_vm10, %v13673_v54, %v5507_v18  ;;  %vm16185_vm10 = vmmov %vm16184_vm9  ;;  %vm16189_vm9 = vcmask 261120   ;;  %v10253_v18 = vld [vmem:[%s15950_s5 + $0x4c] ss:$16 sps:$4 sm:$0xff]  }
 0xf5e   :  { %9225 = vmatprep.subr.bf16.mxu0 %v5511_v40  ;;  %v10254_v40 = vld [vmem:[%s15950_s5 + $0x40] ss:$16 sps:$4 sm:$0xff]  }
 0xf5f   :  { %5691 = vmatpush1.bf16.msra.mxu1 %v5491_v8  ;;  %9226 = vmatpush3.bf16.msra.mxu0 %v13683_v3  ;;  %v10256_v8 = vld [vmem:[%s15950_s5 + $0x64] ss:$16 sps:$4 sm:$0xff]  }
 0xf60   :  { %v5529_v9 = vpop.permute.xlu1 %5528  ;;  %5692 = vmatprep.subr.bf16.mxu1 %v5554_v23  ;;  %9227 = vmatprep.subr.bf16.mxu0 %v5547_v20  ;;  %v5543_v54 = vpop.permute.xlu0 %5542  ;;  %v10257_v23 = vld [vmem:[%s15950_s5 + $0x6c] ss:$16 sps:$4 sm:$0xff]   ;;  %v10258_v20 = vld [vmem:[%s15950_s5 + $0x60] ss:$16 sps:$4 sm:$0xff]  }
 0xf61   :  { %v5548_v32 = vsel %vm16183_vm8, %v5541_v19, %v5543_v54  ;;  %vm16188_vm8 = vmmov %vm16186_vm4  ;;  %v10252_v19 = vld [vmem:[%s15950_s5 + $0x44] ss:$16 sps:$4 sm:$0xff]  }
 0xf62   :  { %v5558_v39 = vsel %vm2496_vm15, %v5529_v9, %v5548_v32  ;;  %v10261_v32 = vld [vmem:[%s15950_s5 + $0x8c] ss:$16 sps:$4 sm:$0xff]  }
 0xf63   :  { %5693 = vmatpush1.bf16.msra.mxu1 %v5530_v60  ;;  %9228 = vmatpush3.bf16.msra.mxu0 %v13614_v37  ;;  %v10262_v60 = vld [vmem:[%s15950_s5 + $0x80] ss:$16 sps:$4 sm:$0xff]  }
 0xf64   :  { %v5527_v3 = vpop.permute.xlu1 %5526  ;;  %5694 = vmatprep.subr.bf16.mxu1 %v5558_v39  ;;  %v5545_v50 = vpop.permute.xlu0 %5544  ;;  %v10263_v39 = vld [vmem:[%s15950_s5 + $0x88] ss:$16 sps:$4 sm:$0xff]  }
 0xf65   :  { %v5531_v27 = vsel %vm16185_vm10, %v5527_v3, %v5529_v9  ;;  %v5549_v43 = vsel %vm16180_vm1, %v5543_v54, %v5545_v50  ;;  %vm16190_vm10 = vmmov %vm16186_vm4  ;;  %v10259_v9 = vld [vmem:[%s15950_s5 + $0x68] ss:$16 sps:$4 sm:$0xff]   ;;  %v10260_v54 = vld [vmem:[%s15950_s5 + $0x84] ss:$16 sps:$4 sm:$0xff]  }
 0xf66   :  { %9229 = vmatprep.subr.bf16.mxu0 %v5549_v43  ;;  %vm16191_vm1 = vmmov %vm16189_vm9  ;;  %v10264_v3 = vld [vmem:[%s15950_s5 + $0xa4] ss:$16 sps:$4 sm:$0xff]   ;;  %v10265_v50 = vld [vmem:[%s15950_s5 + $0xac] ss:$16 sps:$4 sm:$0xff]  }
 0xf67   :  { %5695 = vmatpush1.bf16.msra.mxu1 %v5531_v27  ;;  %9230 = vmatpush3.bf16.msra.mxu0 %v13691_v12  ;;  %v10266_v27 = vld [vmem:[%s15950_s5 + $0xa0] ss:$16 sps:$4 sm:$0xff]   ;;  %v10267_v43 = vld [vmem:[%s15950_s5 + $0xa8] ss:$16 sps:$4 sm:$0xff]  }
 0xf68   :  { %v5571_v37 = vpop.permute.xlu1 %5570  ;;  %v5569_v36 = vpop.permute.xlu0 %5568 }
 0xf69   :  { %v5580_v11 = vsel %vm16186_vm4, %v5569_v36, %v5571_v37  ;;  %vm16192_vm4 = vmmov %vm16191_vm1  ;;  %v10271_v36 = vld [vmem:[%s15950_s5 + $0xc8] ss:$16 sps:$4 sm:$0xff]  }
 0xf6a   :  { %5697 = vmatmul.mubr.bf16.vlgmr.msra.gmra.mrb[72].mxu1 %v10045_v47  ;;  %5803 = vmatmul.mubr.bf16.vlgmr.msra.gmra.mrb[64].mxu0 %v10045_v47  ;;  %v5588_v24 = vsel %vm2496_vm15, %v13587_v59, %v5580_v11  ;;  %v10268_v47 = vld [vmem:[%s15950_s5 + $0xc4] ss:$16 sps:$4 sm:$0xff]  }
 0xf6b   :  { %5717 = vmatprep.subr.bf16.mxu1 %v5588_v24  ;;  %5706 = vmatprep.mubr.bf16.mxu1 %v10048_v6  ;;  %v10272_v11 = vld [vmem:[%s15950_s5 + $0xe4] ss:$16 sps:$4 sm:$0xff]   ;;  %v10273_v24 = vld [vmem:[%s15950_s5 + $0xec] ss:$16 sps:$4 sm:$0xff]  }
 0xf6c   :  { %v5561_v61 = vpop.permute.xlu1 %5560  ;;  %v5573_v44 = vpop.permute.xlu0 %5572  ;;  %5810 = vmatprep.mubr.bf16.mxu0 %v10048_v6  ;;  %v10269_v6 = vld [vmem:[%s15950_s5 + $0xcc] ss:$16 sps:$4 sm:$0xff]  }
 0xf6d   :  { %v5564_v12 = vsel %vm2491_vm11, %v5561_v61, %v13587_v59  ;;  %v5581_v35 = vsel %vm16187_vm6, %v5571_v37, %v5573_v44  ;;  %vm16193_vm6 = vmmov %vm16191_vm1  ;;  %v10270_v37 = vld [vmem:[%s15950_s5 + $0xc0] ss:$16 sps:$4 sm:$0xff]   ;;  %v10275_v44 = vld [vmem:[%s15950_s5 + $0xe8] ss:$16 sps:$4 sm:$0xff]  }
 0xf6e   :  { %5718 = vmatpush1.bf16.msra.mxu1 %v5564_v12  ;;  %9339 = vmatprep.subr.bf16.mxu0 %v5581_v35  ;;  %v10274_v61 = vld [vmem:[%s15950_s5 + $0xe0] ss:$16 sps:$4 sm:$0xff]   ;;  %v10276_v12 = vld [vmem:[%s15950_s5 + $0x104] ss:$16 sps:$4 sm:$0xff]  }
 0xf6f   :  { %9340 = vmatpush3.bf16.msra.mxu0 %v5581_v35  ;;  %v10277_v35 = vld [vmem:[%s15950_s5 + $0x10c] ss:$16 sps:$4 sm:$0xff]  }
 0xf70   :  { %v5577_v30 = vpop.permute.xlu1 %5576  ;;  %v5575_v34 = vpop.permute.xlu0 %5574 }
 0xf71   :  { %v5582_v25 = vsel %vm16188_vm8, %v5575_v34, %v5577_v30  ;;  %v10280_v34 = vld [vmem:[%s15950_s5 + $0x124] ss:$16 sps:$4 sm:$0xff]   ;;  %vm16194_vm8 = vcmask 736256  }
 0xf72   :  { %5707 = vmatmul.mubr.bf16.gmra.mrb[76].mxu1 %v10050_v29  ;;  %5811 = vmatmul.mubr.bf16.gmra.mrb[68].mxu0 %v10050_v29  ;;  %v5592_v59 = vsel %vm2496_vm15, %v13675_v13, %v5582_v25  ;;  %v10278_v29 = vld [vmem:[%s15950_s5 + $0x100] ss:$16 sps:$4 sm:$0xff]  }
 0xf73   :  { %5719 = vmatprep.subr.bf16.mxu1 %v5592_v59  ;;  %5749 = vmatprep.mubr.bf16.mxu1 %v16084_v42  ;;  %v10282_v25 = vld [vmem:[%s15950_s5 + $0x120] ss:$16 sps:$4 sm:$0xff]   ;;  %v10283_v59 = vld [vmem:[%s15950_s5 + $0x128] ss:$16 sps:$4 sm:$0xff]  }
 0xf74   :  { %v5563_v5 = vpop.permute.xlu1 %5562  ;;  %v5579_v26 = vpop.permute.xlu0 %5578  ;;  %9343 = vmatprep.mubr.msk.bf16.mxu0 %vm16189_vm9, %v10051_v33  ;;  %vm16195_vm9 = vmmov %vm16194_vm8 }
 0xf75   :  { %v5565_v63 = vsel %vm2491_vm11, %v5563_v5, %v13675_v13  ;;  %v5583_v51 = vsel %vm16190_vm10, %v5577_v30, %v5579_v26  ;;  %v10246_v13 = vld [vmem:[%s15950_s5] ss:$16 sps:$4 sm:$0xff]   ;;  %v10279_v30 = vld [vmem:[%s15950_s5 + $0x108] ss:$16 sps:$4 sm:$0xff]   ;;  %v10284_v5 = vld [vmem:[%s15950_s5 + $0x144] ss:$16 sps:$4 sm:$0xff]  }
 0xf76   :  { %5720 = vmatpush1.bf16.msra.mxu1 %v5565_v63  ;;  %9341 = vmatprep.subr.bf16.mxu0 %v5583_v51  ;;  %v10285_v26 = vld [vmem:[%s15950_s5 + $0x14c] ss:$16 sps:$4 sm:$0xff]   ;;  %v10286_v63 = vld [vmem:[%s15950_s5 + $0x140] ss:$16 sps:$4 sm:$0xff]   ;;  %vm16196_vm10 = vmmov %vm16194_vm8 }
 0xf77   :  { %9342 = vmatpush3.bf16.msra.mxu0 %v5583_v51  ;;  %6274 = vmatprep.subr.bf16.mxu1 %v10244_v21  ;;  %v10287_v51 = vld [vmem:[%s15950_s5 + $0x148] ss:$16 sps:$4 sm:$0xff]   ;;  %v10289_v21 = vld [vmem:[%s15950_s5 + $0x16c] ss:$16 sps:$4 sm:$0xff]  }
 0xf78   :  { %6168 = vmatprep.subr.bf16.mxu0 %v10245_v17  ;;  %v10290_v17 = vld [vmem:[%s15950_s5 + $0x160] ss:$16 sps:$4 sm:$0xff]  }
 0xf7a   :  { %9039 = vmatmul.mubr.msk.bf16.vlgmr.msra.gmra.mrb[72].mxu1 %vm16191_vm1, %v10051_v33  ;;  %9344 = vmatmul.mubr.msk.bf16.vlgmr.msra.gmra.mrb[72].mxu0 %vm16192_vm4, %v10052_v52  ;;  %v10281_v33 = vld [vmem:[%s15950_s5 + $0x12c] ss:$16 sps:$4 sm:$0xff]   ;;  %vm16197_vm1 = vmmov %vm16194_vm8 }
 0xf7b   :  { %5759 = vmatprep.mubr.bf16.mxu1 %v16084_v42  ;;  %6169 = vmatpush1.bf16.msra.mxu0 %v10246_v13  ;;  %v10291_v13 = vld [vmem:[%s15950_s5 + $0x168] ss:$16 sps:$4 sm:$0xff]   ;;  %vm16198_vm4 = vmmov %vm16197_vm1 }
 0xf7c   :  { %6275 = vmatpush1.bf16.msra.mxu1 %v10247_v16  ;;  %6170 = vmatprep.subr.bf16.mxu0 %v10248_v0  ;;  %v10292_v16 = vld [vmem:[%s15950_s5 + $0x184] ss:$16 sps:$4 sm:$0xff]   ;;  %v10293_v0 = vld [vmem:[%s15950_s5 + $0x18c] ss:$16 sps:$4 sm:$0xff]  }
 0xf7d   :  { %6276 = vmatprep.subr.bf16.mxu1 %v10249_v38  ;;  %v10294_v38 = vld [vmem:[%s15950_s5 + $0x180] ss:$16 sps:$4 sm:$0xff]  }
 0xf7f   :  { %6171 = vmatpush1.bf16.msra.mxu0 %v10250_v45  ;;  %v10295_v45 = vld [vmem:[%s15950_s5 + $0x188] ss:$16 sps:$4 sm:$0xff]  }
 0xf80   :  { %6277 = vmatpush1.bf16.msra.mxu1 %v10251_v56  ;;  %6172 = vmatprep.subr.bf16.mxu0 %v10252_v19  ;;  %v10296_v56 = vld [vmem:[%s15950_s5 + $0x1a4] ss:$16 sps:$4 sm:$0xff]   ;;  %v10297_v19 = vld [vmem:[%s15950_s5 + $0x1ac] ss:$16 sps:$4 sm:$0xff]  }
 0xf81   :  { %6278 = vmatprep.subr.bf16.mxu1 %v10253_v18  ;;  %v10298_v18 = vld [vmem:[%s15950_s5 + $0x1a0] ss:$16 sps:$4 sm:$0xff]  }
 0xf82   :  { %9040 = vmatmul.mubr.msk.bf16.gmra.mrb[76].mxu1 %vm16193_vm6, %v10052_v52  ;;  %v10288_v52 = vld [vmem:[%s15950_s5 + $0x164] ss:$16 sps:$4 sm:$0xff]   ;;  %vm16199_vm6 = vmmov %vm16197_vm1 }
 0xf83   :  { %6173 = vmatpush1.bf16.msra.mxu0 %v10254_v40  ;;  %v10299_v40 = vld [vmem:[%s15950_s5 + $0x1a8] ss:$16 sps:$4 sm:$0xff]  }
 0xf84   :  { %6279 = vmatpush1.bf16.msra.mxu1 %v10255_v49  ;;  %6174 = vmatprep.subr.bf16.mxu0 %v10256_v8  ;;  %v10300_v49 = vld [vmem:[%s15950_s5 + $0x1c4] ss:$16 sps:$4 sm:$0xff]   ;;  %v10301_v8 = vld [vmem:[%s15950_s5 + $0x1cc] ss:$16 sps:$4 sm:$0xff]  }
 0xf85   :  { %6280 = vmatprep.subr.bf16.mxu1 %v10257_v23  ;;  %v10302_v23 = vld [vmem:[%s15950_s5 + $0x1c0] ss:$16 sps:$4 sm:$0xff]  }
 0xf87   :  { %6175 = vmatpush1.bf16.msra.mxu0 %v10258_v20  ;;  %v10303_v20 = vld [vmem:[%s15950_s5 + $0x1c8] ss:$16 sps:$4 sm:$0xff]  }
 0xf88   :  { %6281 = vmatpush1.bf16.msra.mxu1 %v10259_v9  ;;  %6176 = vmatprep.subr.bf16.mxu0 %v10260_v54  ;;  %v10304_v9 = vld [vmem:[%s15950_s5 + $0x1e4] ss:$16 sps:$4 sm:$0xff]   ;;  %v10305_v54 = vld [vmem:[%s15950_s5 + $0x1ec] ss:$16 sps:$4 sm:$0xff]  }
 0xf89   :  { %6282 = vmatprep.subr.bf16.mxu1 %v10261_v32  ;;  %v10306_v32 = vld [vmem:[%s15950_s5 + $0x1e0] ss:$16 sps:$4 sm:$0xff]  }
 0xf8b   :  { %6177 = vmatpush1.bf16.msra.mxu0 %v10262_v60  ;;  %v10307_v60 = vld [vmem:[%s15950_s5 + $0x1e8] ss:$16 sps:$4 sm:$0xff]  }
 0xf8c   :  { %6283 = vmatpush1.bf16.msra.mxu1 %v10263_v39  ;;  %6178 = vmatprep.subr.bf16.mxu0 %v10264_v3  ;;  %v10308_v39 = vld [vmem:[%s15950_s5 + $0x204] ss:$16 sps:$4 sm:$0xff]   ;;  %v10309_v3 = vld [vmem:[%s15950_s5 + $0x20c] ss:$16 sps:$4 sm:$0xff]  }
 0xf8d   :  { %6284 = vmatprep.subr.bf16.mxu1 %v10265_v50 }
 0xf8f   :  { %6179 = vmatpush1.bf16.msra.mxu0 %v10266_v27 }
 0xf90   :  { %6285 = vmatpush1.bf16.msra.mxu1 %v10267_v43  ;;  %6180 = vmatprep.subr.bf16.mxu0 %v10268_v47 }
 0xf91   :  { %6286 = vmatprep.subr.bf16.mxu1 %v10269_v6 }
 0xf93   :  { %6181 = vmatpush1.bf16.msra.mxu0 %v10270_v37 }
 0xf94   :  { %6287 = vmatpush1.bf16.msra.mxu1 %v10271_v36  ;;  %6182 = vmatprep.subr.bf16.mxu0 %v10272_v11  ;;  %v5611_v36 = vpop.permute.xlu0 %5610 }
 0xf95   :  { %6288 = vmatprep.subr.bf16.mxu1 %v10273_v24  ;;  %v14007_v24 = vpop.permute.xlu1 %5615 }
 0xf97   :  { %6183 = vmatpush1.bf16.msra.mxu0 %v10274_v61 }
 0xf98   :  { %6289 = vmatpush1.bf16.msra.mxu1 %v10275_v44  ;;  %6184 = vmatprep.subr.bf16.mxu0 %v10276_v12 }
 0xf99   :  { %6290 = vmatprep.subr.bf16.mxu1 %v10277_v35 }
 0xf9b   :  { %6185 = vmatpush1.bf16.msra.mxu0 %v10278_v29 }
 0xf9c   :  { %6291 = vmatpush1.bf16.msra.mxu1 %v10279_v30  ;;  %6186 = vmatprep.subr.bf16.mxu0 %v10280_v34  ;;  %v5621_v30 = vpop.permute.xlu0 %5620  ;;  %v14009_v34 = vpop.permute.xlu1 %5625 }
 0xf9d   :  { %6292 = vmatprep.subr.bf16.mxu1 %v10281_v33 }
 0xf9f   :  { %6187 = vmatpush1.bf16.msra.mxu0 %v10282_v25 }
 0xfa0   :  { %6293 = vmatpush1.bf16.msra.mxu1 %v10283_v59  ;;  %6188 = vmatprep.subr.bf16.mxu0 %v10284_v5 }
 0xfa1   :  { %6294 = vmatprep.subr.bf16.mxu1 %v10285_v26 }
 0xfa3   :  { %6189 = vmatpush1.bf16.msra.mxu0 %v10286_v63 }
 0xfa4   :  { %6295 = vmatpush1.bf16.msra.mxu1 %v10287_v51  ;;  %6190 = vmatprep.subr.bf16.mxu0 %v10288_v52 }
 0xfa5   :  { %6296 = vmatprep.subr.bf16.mxu1 %v10289_v21 }
 0xfa7   :  { %6191 = vmatpush1.bf16.msra.mxu0 %v10290_v17 }
 0xfa8   :  { %6297 = vmatpush1.bf16.msra.mxu1 %v10291_v13  ;;  %6192 = vmatprep.subr.bf16.mxu0 %v10292_v16 }
 0xfa9   :  { %6298 = vmatprep.subr.bf16.mxu1 %v10293_v0 }
 0xfab   :  { %6193 = vmatpush1.bf16.msra.mxu0 %v10294_v38 }
 0xfac   :  { %6299 = vmatpush1.bf16.msra.mxu1 %v10295_v45  ;;  %6194 = vmatprep.subr.bf16.mxu0 %v10296_v56 }
 0xfad   :  { %6300 = vmatprep.subr.bf16.mxu1 %v10297_v19 }
 0xfaf   :  { %6195 = vmatpush1.bf16.msra.mxu0 %v10298_v18 }
 0xfb0   :  { %6301 = vmatpush1.bf16.msra.mxu1 %v10299_v40  ;;  %6196 = vmatprep.subr.bf16.mxu0 %v10300_v49 }
 0xfb1   :  { %6302 = vmatprep.subr.bf16.mxu1 %v10301_v8 }
 0xfb3   :  { %6197 = vmatpush1.bf16.msra.mxu0 %v10302_v23 }
 0xfb4   :  { %6303 = vmatpush1.bf16.msra.mxu1 %v10303_v20  ;;  %6198 = vmatprep.subr.bf16.mxu0 %v10304_v9 }
 0xfb5   :  { %6304 = vmatprep.subr.bf16.mxu1 %v10305_v54 }
 0xfb7   :  { %6199 = vmatpush1.bf16.msra.mxu0 %v10306_v32 }
 0xfb8   :  { %6305 = vmatpush1.bf16.msra.mxu1 %v10307_v60  ;;  %6221 = vmatprep.subr.bf16.mxu0 %v10308_v39 }
 0xfb9   :  { %6327 = vmatprep.subr.bf16.mxu1 %v10309_v3 }
0x103d   :  { %v9231_v50 = vpop.f32.mrb[64].mxu0 }
0x103e   :  { %v9232_v27 = vpop.f32.mrb[65].mxu0 }
0x103f   :  { %v9233_v43 = vadd.f32 %v9232_v27, %v9231_v50  ;;  %v9234_v47 = vpop.f32.mrb[66].mxu0 }
0x1040   :  { %v9235_v6 = vpop.f32.mrb[67].mxu0 }
0x1041   :  { %v9236_v37 = vadd.f32 %v9235_v6, %v9234_v47  ;;  %v5805_v5 = vadd.f32 %v9233_v43, %v5611_v36 }
0x1043   :  { %v5808_v0 = vadd.f32 %v9236_v37, %v14007_v24 }
0x1045   :  { %v9237_v11 = vpop.f32.mrb[68].mxu0 }
0x1046   :  { %v9238_v61 = vpop.f32.mrb[69].mxu0 }
0x1047   :  { %v9239_v44 = vadd.f32 %v9238_v61, %v9237_v11  ;;  %v9240_v12 = vpop.f32.mrb[70].mxu0 }
0x1048   :  { %v9241_v35 = vpop.f32.mrb[71].mxu0 }
0x1049   :  { %v9242_v29 = vadd.f32 %v9241_v35, %v9240_v12  ;;  %v5813_v33 = vadd.f32 %v9239_v44, %v5621_v30 }
0x104b   :  { %v5816_v52 = vadd.f32 %v9242_v29, %v14009_v34 }
0x104d   :  { %v5751_v25 = vpop.f32.mrb[72].mxu1  ;;  %v9345_v59 = vpop.f32.mrb[72].mxu0 }
0x104e   :  { %v14011_v26 = vadd.f32 %v9345_v59, %v5813_v33  ;;  %v5753_v63 = vpop.f32.mrb[73].mxu1  ;;  %v5853_v51 = vpop.f32.mrb[73].mxu0  ;;  %v14059_v12 = vadd.f32 %v5751_v25, %v5611_v36 }
0x104f   :  { %v14014_v21 = vadd.f32 %v5753_v63, %v5611_v36  ;;  %v14016_v17 = vadd.f32 %v5853_v51, %v5805_v5  ;;  %v5755_v13 = vpop.f32.mrb[74].mxu1  ;;  %v9346_v16 = vpop.f32.mrb[74].mxu0 }
0x1050   :  { %v14019_v38 = vadd.f32 %v9346_v16, %v5816_v52  ;;  %v5757_v45 = vpop.f32.mrb[75].mxu1  ;;  %v5856_v56 = vpop.f32.mrb[75].mxu0  ;;  %v5961_v39 = vmul.f32 %v14011_v26, %v16129_v7  ;;  %v5868_v52 = vmul.f32 %v14059_v12, %v16133_v15 }
0x1051   :  { %v5957_v19 = vmul.f32 %v14016_v17, %v16129_v7  ;;  %v14024_v18 = vadd.f32 %v5757_v45, %v14007_v24  ;;  %v14026_v40 = vadd.f32 %v5856_v56, %v5808_v0  ;;  %v5956_v49 = vmul.f32 %v14014_v21, %v16131_v58 }
0x1052   :  { %v5963_v27 = vmul.f32 %v14019_v38, %v16129_v7  ;;  %v5869_v44 = vmul.f32 %v14014_v21, %v16132_v31 }
0x1053   :  { %5972 = vrot.lane.b32.xlu0 %v5956_v49, %s16130_s23  ;;  %5974 = vrot.lane.b32.xlu1 %v5957_v19, %s16130_s23  ;;  %v5959_v8 = vmul.f32 %v14026_v40, %v16129_v7  ;;  %v5958_v20 = vmul.f32 %v14024_v18, %v16131_v58 }
0x1054   :  { %v5876_v63 = vsel %vm2496_vm15, %v5869_v44, 0.0 }
0x1055   :  { %v5761_v23 = vpop.f32.mrb[76].mxu1  ;;  %v5877_v19 = vadd.f32 %v5876_v63, %v5868_v52 }
0x1056   :  { %v5763_v9 = vpop.f32.mrb[77].mxu1  ;;  %v14068_v16 = vadd.f32 %v5761_v23, %v5621_v30 }
0x1057   :  { %v14036_v54 = vadd.f32 %v5763_v9, %v5621_v30  ;;  %v5765_v32 = vpop.f32.mrb[78].mxu1  ;;  %5976 = vrot.lane.b32.xlu0 %v5958_v20, %s16130_s23  ;;  %5978 = vrot.lane.b32.xlu1 %v5959_v8, %s16130_s23  ;;  %v5871_v8 = vmul.f32 %v14024_v18, %v16132_v31  ;;  %v14076_v20 = vadd.f32 %v5755_v13, %v14007_v24 }
0x1058   :  { %v5767_v60 = vpop.f32.mrb[79].mxu1  ;;  %v5872_v30 = vmul.f32 %v14068_v16, %v16133_v15  ;;  %v14088_v13 = vadd.f32 %v5765_v32, %v14009_v34 }
0x1059   :  { %v14043_v3 = vadd.f32 %v5767_v60, %v14009_v34  ;;  %v5960_v50 = vmul.f32 %v14036_v54, %v16131_v58  ;;  %v5873_v51 = vmul.f32 %v14036_v54, %v16132_v31  ;;  %v5870_v24 = vmul.f32 %v14076_v20, %v16133_v15 }
0x105b   :  { %5980 = vrot.lane.b32.xlu0 %v5960_v50, %s16130_s23  ;;  %5982 = vrot.lane.b32.xlu1 %v5961_v39, %s16130_s23  ;;  %v5962_v43 = vmul.f32 %v14043_v3, %v16131_v58  ;;  %v5884_v49 = vsel %vm2496_vm15, %v5873_v51, 0.0 }
0x105f   :  { %5984 = vrot.lane.b32.xlu0 %v5962_v43, %s16130_s23  ;;  %5986 = vrot.lane.b32.xlu1 %v5963_v27, %s16130_s23  ;;  %v5885_v27 = vadd.f32 %v5884_v49, %v5872_v30  ;;  %v5880_v43 = vsel %vm2496_vm15, %v5871_v8, 0.0 }
0x10c5   :  { %v5975_v47 = vpop.permute.xlu1 %5974  ;;  %v5973_v6 = vpop.permute.xlu0 %5972 }
0x10c6   :  { %v6000_v37 = vsel %vm2496_vm15, %v5975_v47, 0.0  ;;  %v5988_v11 = vsel %vm16194_vm8, %v5973_v6, %v5975_v47  ;;  %v5875_v47 = vmul.f32 %v14043_v3, %v16132_v31  ;;  %v5881_v6 = vadd.f32 %v5880_v43, %v5870_v24  ;;  %vm16200_vm8 = vmmov %vm16197_vm1 }
0x10c7   :  { %v6001_v61 = vadd.f32 %v6000_v37, %v5988_v11  ;;  %v5874_v11 = vmul.f32 %v14088_v13, %v16133_v15 }
0x10c8   :  { %v5888_v37 = vsel %vm2496_vm15, %v5875_v47, 0.0 }
0x10c9   :  { %v5979_v35 = vpop.permute.xlu1 %5978  ;;  %6002 = vadd.xlane.f32.xlu0 %v6001_v61  ;;  %v5977_v29 = vpop.permute.xlu0 %5976  ;;  %v5889_v61 = vadd.f32 %v5888_v37, %v5874_v11 }
0x10ca   :  { %v6004_v33 = vsel %vm2496_vm15, %v5979_v35, 0.0  ;;  %v5989_v59 = vsel %vm16195_vm9, %v5977_v29, %v5979_v35  ;;  %vm16201_vm9 = vmmov %vm16197_vm1 }
0x10cb   :  { %v6005_v5 = vadd.f32 %v6004_v33, %v5989_v59 }
0x10cd   :  { %v5983_v36 = vpop.permute.xlu1 %5982  ;;  %6006 = vadd.xlane.f32.xlu1 %v6005_v5  ;;  %v5981_v25 = vpop.permute.xlu0 %5980 }
0x10ce   :  { %v6008_v0 = vsel %vm2496_vm15, %v5983_v36, 0.0  ;;  %v5990_v45 = vsel %vm16196_vm10, %v5981_v25, %v5983_v36 }
0x10cf   :  { %v6009_v56 = vadd.f32 %v6008_v0, %v5990_v45 }
0x10d1   :  { %v5987_v23 = vpop.permute.xlu1 %5986  ;;  %5878 = vadd.xlane.f32.xlu1 %v5877_v19  ;;  %6010 = vadd.xlane.f32.xlu0 %v6009_v56  ;;  %v5985_v9 = vpop.permute.xlu0 %5984 }
0x10d2   :  { %v6012_v60 = vsel %vm2496_vm15, %v5987_v23, 0.0  ;;  %v5991_v39 = vsel %vm16197_vm1, %v5985_v9, %v5987_v23 }
0x10d3   :  { %v6013_v50 = vadd.f32 %v6012_v60, %v5991_v39 }
0x10d5   :  { %5886 = vadd.xlane.f32.xlu1 %v5885_v27  ;;  %6014 = vadd.xlane.f32.xlu0 %v6013_v50 }
0x10d9   :  { %5882 = vadd.xlane.f32.xlu0 %v5881_v6 }
0x10dd   :  { %5890 = vadd.xlane.f32.xlu0 %v5889_v61 }
0x1156   :  { %v6003_v44 = vpop.xlane.xlu0 %6002 }
0x1157   :  { %v6016_v35 = vmul.f32 0.0069444445, %v6003_v44 }
0x1159   :  { %v6020_v29 = vsub.f32 %v14014_v21, %v6016_v35  ;;  %v6021_v33 = vsub.f32 %v14016_v17, %v6016_v35 }
0x115a   :  { %v6007_v59 = vpop.xlane.xlu1 %6006 }
0x115b   :  { %v14096_v34 = vmul.f32 %v6020_v29, %v16131_v58  ;;  %v14099_v32 = vmul.f32 %v6021_v33, %v16129_v7  ;;  %v6017_v5 = vmul.f32 0.0069444445, %v6007_v59 }
0x115d   :  { %v6022_v63 = vsub.f32 %v14024_v18, %v6017_v5  ;;  %v6037_v51 = vmul.f32 %v14099_v32, %v14099_v32  ;;  %v6036_v52 = vmul.f32 %v14096_v34, %v14096_v34  ;;  %v6023_v36 = vsub.f32 %v14026_v40, %v6017_v5 }
0x115e   :  { %v6011_v25 = vpop.xlane.xlu0 %6010  ;;  %v5879_v24 = vpop.xlane.xlu1 %5878 }
0x115f   :  { %v14108_v17 = vmul.f32 %v6022_v63, %v16131_v58  ;;  %v6018_v0 = vmul.f32 0.0069444445, %v6011_v25  ;;  %6054 = vrot.lane.b32.xlu0 %v6037_v51, %s16130_s23  ;;  %6052 = vrot.lane.b32.xlu1 %v6036_v52, %s16130_s23  ;;  %v14114_v56 = vmul.f32 %v6023_v36, %v16129_v7  ;;  %v5892_v6 = vmul.f32 0.0069444445, %v5879_v24 }
0x1161   :  { %v6024_v45 = vsub.f32 %v14036_v54, %v6018_v0  ;;  %v6025_v19 = vsub.f32 %v14011_v26, %v6018_v0  ;;  %v6038_v40 = vmul.f32 %v14108_v17, %v14108_v17  ;;  %v6039_v39 = vmul.f32 %v14114_v56, %v14114_v56 }
0x1162   :  { %v6015_v49 = vpop.xlane.xlu0 %6014  ;;  %v5897_v37 = vsub.f32 %v14014_v21, %v5892_v6  ;;  %v5896_v61 = vsub.f32 %v14059_v12, %v5892_v6  ;;  %v5887_v29 = vpop.xlane.xlu1 %5886 }
0x1163   :  { %v14120_v8 = vmul.f32 %v6024_v45, %v16131_v58  ;;  %v6019_v30 = vmul.f32 0.0069444445, %v6015_v49  ;;  %6056 = vrot.lane.b32.xlu1 %v6038_v40, %s16130_s23  ;;  %v14126_v9 = vmul.f32 %v6025_v19, %v16129_v7  ;;  %v5894_v5 = vmul.f32 0.0069444445, %v5887_v29 }
0x1164   :  { %v14152_v44 = vmul.f32 %v5897_v37, %v16132_v31  ;;  %v14155_v33 = vmul.f32 %v5896_v61, %v16133_v15 }
0x1165   :  { %v6040_v23 = vmul.f32 %v14120_v8, %v14120_v8  ;;  %v6026_v60 = vsub.f32 %v14043_v3, %v6019_v30  ;;  %v6027_v26 = vsub.f32 %v14019_v38, %v6019_v30  ;;  %v6041_v43 = vmul.f32 %v14126_v9, %v14126_v9 }
0x1166   :  { %v5883_v11 = vpop.xlane.xlu0 %5882  ;;  %v5913_v59 = vmul.f32 %v14152_v44, %v14152_v44  ;;  %v5912_v21 = vmul.f32 %v14155_v33, %v14155_v33  ;;  %v5901_v52 = vsub.f32 %v14036_v54, %v5894_v5  ;;  %v5900_v0 = vsub.f32 %v14068_v16, %v5894_v5 }
0x1167   :  { %6060 = vrot.lane.b32.xlu0 %v6040_v23, %s16130_s23  ;;  %v14134_v50 = vmul.f32 %v6026_v60, %v16131_v58  ;;  %6058 = vrot.lane.b32.xlu1 %v6039_v39, %s16130_s23  ;;  %v14138_v27 = vmul.f32 %v6027_v26, %v16129_v7  ;;  %v5893_v35 = vmul.f32 0.0069444445, %v5883_v11 }
0x1168   :  { %v5920_v12 = vsel %vm2496_vm15, %v5913_v59, 0.0  ;;  %v14178_v19 = vmul.f32 %v5900_v0, %v16133_v15 }
0x1169   :  { %v6042_v47 = vmul.f32 %v14134_v50, %v14134_v50  ;;  %v6043_v38 = vmul.f32 %v14138_v27, %v14138_v27  ;;  %v5899_v63 = vsub.f32 %v14024_v18, %v5893_v35  ;;  %v5898_v51 = vsub.f32 %v14076_v20, %v5893_v35 }
0x116a   :  { %v5921_v25 = vadd.f32 %v5920_v12, %v5912_v21  ;;  %v14173_v18 = vmul.f32 %v5901_v52, %v16132_v31  ;;  %v5916_v30 = vmul.f32 %v14178_v19, %v14178_v19  ;;  %v5891_v26 = vpop.xlane.xlu0 %5890 }
0x116b   :  { %6062 = vrot.lane.b32.xlu1 %v6041_v43, %s16130_s23  ;;  %6064 = vrot.lane.b32.xlu0 %v6042_v47, %s16130_s23  ;;  %v14166_v36 = vmul.f32 %v5899_v63, %v16132_v31  ;;  %v14170_v45 = vmul.f32 %v5898_v51, %v16133_v15  ;;  %v5895_v39 = vmul.f32 0.0069444445, %v5891_v26 }
0x116c   :  { %v5917_v16 = vmul.f32 %v14173_v18, %v14173_v18 }
0x116d   :  { %v5915_v20 = vmul.f32 %v14166_v36, %v14166_v36  ;;  %v5914_v54 = vmul.f32 %v14170_v45, %v14170_v45  ;;  %v5903_v43 = vsub.f32 %v14043_v3, %v5895_v39  ;;  %v5902_v11 = vsub.f32 %v14088_v13, %v5895_v39 }
0x116e   :  { %v5928_v23 = vsel %vm2496_vm15, %v5917_v16, 0.0 }
0x116f   :  { %6066 = vrot.lane.b32.xlu1 %v6043_v38, %s16130_s23  ;;  %v5924_v49 = vsel %vm2496_vm15, %v5915_v20, 0.0  ;;  %v5929_v60 = vadd.f32 %v5928_v23, %v5916_v30  ;;  %v14193_v61 = vmul.f32 %v5903_v43, %v16132_v31  ;;  %v14196_v29 = vmul.f32 %v5902_v11, %v16133_v15 }
0x1170   :  { %v5925_v40 = vadd.f32 %v5924_v49, %v5914_v54 }
0x1171   :  { %v5919_v3 = vmul.f32 %v14193_v61, %v14193_v61  ;;  %v5918_v13 = vmul.f32 %v14196_v29, %v14196_v29 }
0x1173   :  { %v5932_v12 = vsel %vm2496_vm15, %v5919_v3, 0.0 }
0x1174   :  { %v5933_v20 = vadd.f32 %v5932_v12, %v5918_v13 }
0x118a   :  { %5922 = vadd.xlane.f32.xlu0 %v5921_v25 }
0x1193   :  { %5926 = vadd.xlane.f32.xlu1 %v5925_v40 }
0x1197   :  { %5930 = vadd.xlane.f32.xlu1 %v5929_v60 }
0x11d1   :  { %v6053_v47 = vpop.permute.xlu1 %6052  ;;  %v6055_v38 = vpop.permute.xlu0 %6054 }
0x11d2   :  { %v6068_v24 = vsel %vm16198_vm4, %v6053_v47, %v6055_v38  ;;  %v6080_v6 = vsel %vm2496_vm15, %v6055_v38, 0.0 }
0x11d3   :  { %v6081_v37 = vadd.f32 %v6080_v6, %v6068_v24 }
0x11d5   :  { %6082 = vadd.xlane.f32.xlu0 %v6081_v37  ;;  %v6057_v35 = vpop.permute.xlu1 %6056 }
0x11d9   :  { %v6059_v59 = vpop.permute.xlu1 %6058  ;;  %v6061_v21 = vpop.permute.xlu0 %6060 }
0x11da   :  { %v6069_v5 = vsel %vm16199_vm6, %v6057_v35, %v6059_v59  ;;  %v6084_v63 = vsel %vm2496_vm15, %v6059_v59, 0.0 }
0x11db   :  { %v6085_v51 = vadd.f32 %v6084_v63, %v6069_v5 }
0x11dd   :  { %v6063_v52 = vpop.permute.xlu1 %6062  ;;  %6086 = vadd.xlane.f32.xlu0 %v6085_v51  ;;  %v6065_v49 = vpop.permute.xlu0 %6064 }
0x11de   :  { %v6070_v25 = vsel %vm16200_vm8, %v6061_v21, %v6063_v52  ;;  %v6088_v0 = vsel %vm2496_vm15, %v6063_v52, 0.0 }
0x11df   :  { %v6089_v54 = vadd.f32 %v6088_v0, %v6070_v25 }
0x11e1   :  { %v6067_v16 = vpop.permute.xlu1 %6066  ;;  %5934 = vadd.xlane.f32.xlu0 %v5933_v20  ;;  %6090 = vadd.xlane.f32.xlu1 %v6089_v54 }
0x11e2   :  { %v6071_v40 = vsel %vm16201_vm9, %v6065_v49, %v6067_v16  ;;  %v6092_v30 = vsel %vm2496_vm15, %v6067_v16, 0.0 }
0x11e3   :  { %v6093_v23 = vadd.f32 %v6092_v30, %v6071_v40 }
0x11e5   :  { %6094 = vadd.xlane.f32.xlu0 %v6093_v23 }
0x1217   :  { %v5923_v60 = vpop.xlane.xlu0 %5922 }
0x1218   :  { %v5936_v39 = vmul.f32 0.0069444445, %v5923_v60 }
0x121a   :  { %v5940_v24 = vadd.f32 1e-05, %v5936_v39 }
0x1220   :  { %v5927_v26 = vpop.xlane.xlu1 %5926 }
0x1221   :  { %v5937_v43 = vmul.f32 0.0069444445, %v5927_v26 }
0x1223   :  { %v5941_v37 = vadd.f32 1e-05, %v5937_v43 }
0x1224   :  { %v5931_v11 = vpop.xlane.xlu1 %5930 }
0x1225   :  { %v5938_v35 = vmul.f32 0.0069444445, %v5931_v11 }
0x1227   :  { %v5942_v5 = vadd.f32 1e-05, %v5938_v35 }
0x1262   :  { %v6083_v47 = vpop.xlane.xlu0 %6082 }
0x1263   :  { %v6096_v38 = vmul.f32 0.0069444445, %v6083_v47 }
0x1265   :  { %v6100_v6 = vadd.f32 1e-05, %v6096_v38 }
0x1267   :  { %10154 = vrsqrt.f32 %v6100_v6 }
0x1268   :  { %10156 = vrsqrt.f32 %v5940_v24 }
0x1269   :  { %10158 = vrsqrt.f32 %v5941_v37 }
0x126a   :  { %v6087_v3 = vpop.xlane.xlu0 %6086 }
0x126b   :  { %v6097_v59 = vmul.f32 0.0069444445, %v6087_v3 }
0x126d   :  { %v6101_v63 = vadd.f32 1e-05, %v6097_v59 }
0x126e   :  { %v6091_v21 = vpop.xlane.xlu1 %6090  ;;  %v5935_v51 = vpop.xlane.xlu0 %5934 }
0x126f   :  { %10160 = vrsqrt.f32 %v6101_v63  ;;  %v6098_v13 = vmul.f32 0.0069444445, %v6091_v21  ;;  %v5939_v12 = vmul.f32 0.0069444445, %v5935_v51 }
0x1270   :  { %10162 = vrsqrt.f32 %v5942_v5 }
0x1271   :  { %v14209_v52 = vpop.eup %10154  ;;  %v6102_v25 = vadd.f32 1e-05, %v6098_v13  ;;  %v5943_v0 = vadd.f32 1e-05, %v5939_v12 }
0x1272   :  { %v10157_v20 = vpop.eup %10156  ;;  %v6095_v54 = vpop.xlane.xlu0 %6094  ;;  %v6108_v40 = vmul.f32 %v14209_v52, %v14096_v34 }
0x1273   :  { %v10159_v49 = vpop.eup %10158  ;;  %10164 = vrsqrt.f32 %v6102_v25  ;;  %v6099_v16 = vmul.f32 0.0069444445, %v6095_v54  ;;  %v5949_v23 = vmul.f32 %v10157_v20, %v14152_v44  ;;  %v5948_v39 = vmul.f32 %v10157_v20, %v14155_v33  ;;  %v10310_v20 = vld [vmem:[%s15950_s5 + $0x200] ss:$16 sps:$4 sm:$0xff]  }
0x1274   :  { %10166 = vrsqrt.f32 %v5943_v0  ;;  %v5950_v60 = vmul.f32 %v10159_v49, %v14170_v45  ;;  %v5951_v47 = vmul.f32 %v10159_v49, %v14166_v36  ;;  %v10313_v49 = vld [vmem:[%s15950_s5 + $0x22c] ss:$16 sps:$4 sm:$0xff]  }
0x1275   :  { %v6103_v30 = vadd.f32 1e-05, %v6099_v16  ;;  %v6116_v26 = vsel %vm2496_vm15, %v5949_v23, %v6108_v40  ;;  %v6132_v45 = vmul.f32 0.2, %v5948_v39  ;;  %vm6120_vm6 = vcmp.ge.f32.partialorder %v5948_v39, 0.0 }
0x1276   :  { %v6135_v24 = vmul.f32 0.2, %v5950_v60  ;;  %v6133_v34 = vmul.f32 0.2, %v6116_v26  ;;  %vm6123_vm10 = vcmp.ge.f32.partialorder %v5950_v60, 0.0  ;;  %vm6121_vm1 = vcmp.ge.f32.partialorder %v6116_v26, 0.0 }
0x1277   :  { %10168 = vrsqrt.f32 %v6103_v30  ;;  %v6144_v21 = vsel %vm6120_vm6, %v5948_v39, %v6132_v45  ;;  %v10318_v45 = vld [vmem:[%s15950_s5 + $0x240] ss:$16 sps:$4 sm:$0xff]  }
0x1278   :  { %v6147_v35 = vsel %vm6123_vm10, %v5950_v60, %v6135_v24  ;;  %v6145_v3 = vsel %vm6121_vm1, %v6116_v26, %v6133_v34  ;;  %v10314_v60 = vld [vmem:[%s15950_s5 + $0x220] ss:$16 sps:$4 sm:$0xff]   ;;  %v10315_v26 = vld [vmem:[%s15950_s5 + $0x228] ss:$16 sps:$4 sm:$0xff]   ;;  %v10317_v24 = vld [vmem:[%s15950_s5 + $0x24c] ss:$16 sps:$4 sm:$0xff]  }
0x1279   :  { %v14217_v43 = vpop.eup %10160  ;;  %v6156_v25 = vpack.c.bf16 %v6147_v35, %v6144_v21  ;;  %v10323_v35 = vld [vmem:[%s15950_s5 + $0x268] ss:$16 sps:$4 sm:$0xff]  }
0x127a   :  { %v6110_v38 = vmul.f32 %v14217_v43, %v14108_v17  ;;  %v10163_v6 = vpop.eup %10162  ;;  %v6111_v34 = vmul.f32 %v14217_v43, %v14114_v56  ;;  %v10320_v56 = vld [vmem:[%s15950_s5 + $0x264] ss:$16 sps:$4 sm:$0xff]   ;;  %v10321_v43 = vld [vmem:[%s15950_s5 + $0x26c] ss:$16 sps:$4 sm:$0xff]  }
0x127b   :  { %v5953_v36 = vmul.f32 %v10163_v6, %v14173_v18  ;;  %v5952_v13 = vmul.f32 %v10163_v6, %v14178_v19  ;;  %v10311_v19 = vld [vmem:[%s15950_s5 + $0x208] ss:$16 sps:$4 sm:$0xff]  }
0x127c   :  { %v6117_v44 = vsel %vm2496_vm15, %v5951_v47, %v6110_v38  ;;  %v10316_v38 = vld [vmem:[%s15950_s5 + $0x244] ss:$16 sps:$4 sm:$0xff]  }
0x127d   :  { %v14223_v37 = vpop.eup %10164  ;;  %vm6124_vm4 = vcmp.ge.f32.partialorder %v6117_v44, 0.0  ;;  %v6136_v11 = vmul.f32 0.2, %v6117_v44  ;;  %v6138_v54 = vmul.f32 0.2, %v5952_v13  ;;  %vm6126_vm1 = vcmp.ge.f32.partialorder %v5952_v13, 0.0 }
0x127e   :  { %v10167_v33 = vpop.eup %10166  ;;  %v6112_v17 = vmul.f32 %v14223_v37, %v14120_v8 }
0x127f   :  { %v6148_v59 = vsel %vm6124_vm4, %v6117_v44, %v6136_v11  ;;  %v5954_v5 = vmul.f32 %v10167_v33, %v14196_v29  ;;  %v5955_v18 = vmul.f32 %v10167_v33, %v14193_v61  ;;  %v6150_v47 = vsel %vm6126_vm1, %v5952_v13, %v6138_v54  ;;  %v10319_v11 = vld [vmem:[%s15950_s5 + $0x248] ss:$16 sps:$4 sm:$0xff]   ;;  %v10322_v33 = vld [vmem:[%s15950_s5 + $0x260] ss:$16 sps:$4 sm:$0xff]  }
0x1280   :  { %v6157_v63 = vpack.c.bf16 %v6148_v59, %v6145_v3  ;;  %v6118_v51 = vsel %vm2496_vm15, %v5953_v36, %v6112_v17  ;;  %v6109_v44 = vmul.f32 %v14209_v52, %v14099_v32  ;;  %v6137_v32 = vmul.f32 0.2, %v6111_v34  ;;  %v10324_v36 = vld [vmem:[%s15950_s5 + $0x284] ss:$16 sps:$4 sm:$0x3f]  }
0x1281   :  { %v14231_v12 = vpop.eup %10168  ;;  %v6141_v0 = vmul.f32 0.2, %v5954_v5  ;;  %v6139_v29 = vmul.f32 0.2, %v6118_v51  ;;  %vm6129_vm8 = vcmp.ge.f32.partialorder %v5954_v5, 0.0  ;;  %vm6127_vm9 = vcmp.ge.f32.partialorder %v6118_v51, 0.0 }
0x1282   :  { %6200 = vmatprep.mubr.bf16.mxu0 %v6157_v63  ;;  %6306 = vmatprep.mubr.bf16.mxu1 %v6157_v63  ;;  %v6114_v8 = vmul.f32 %v14231_v12, %v14134_v50  ;;  %v10312_v50 = vld [vmem:[%s15950_s5 + $0x224] ss:$16 sps:$4 sm:$0xff]   ;;  %vm6125_vm4 = vcmp.ge.f32.partialorder %v6111_v34, 0.0  ;;  %v6134_v52 = vmul.f32 0.2, %v6109_v44  ;;  %vm6122_vm6 = vcmp.ge.f32.partialorder %v6109_v44, 0.0 }
0x1283   :  { %6201 = vmatmul.mubr.bf16.vlgmr.msra.gmra.mrb[76].mxu0 %v6156_v25  ;;  %6307 = vmatmul.mubr.bf16.vlgmr.msra.gmra.mrb[80].mxu1 %v6156_v25  ;;  %v6153_v40 = vsel %vm6129_vm8, %v5954_v5, %v6141_v0  ;;  %v6151_v30 = vsel %vm6127_vm9, %v6118_v51, %v6139_v29  ;;  %v10325_v17 = vld [vmem:[%s15950_s5 + $0x28c] ss:$16 sps:$4 sm:$0x3f]   ;;  %v6149_v3 = vsel %vm6125_vm4, %v6111_v34, %v6137_v32  ;;  %vm16208_vm4 = vcmask 924672  }
0x1284   :  { %6222 = vmatpush1.bf16.msra.mxu0 %v10310_v20  ;;  %6328 = vmatpush1.bf16.msra.mxu1 %v10311_v19  ;;  %v6119_v61 = vsel %vm2496_vm15, %v5955_v18, %v6114_v8  ;;  %v6159_v6 = vpack.c.bf16 %v6153_v40, %v6150_v47  ;;  %v6115_v59 = vmul.f32 %v14231_v12, %v14138_v27 }
0x1285   :  { %6223 = vmatprep.subr.bf16.mxu0 %v10312_v50  ;;  %6329 = vmatprep.subr.bf16.mxu1 %v10313_v49  ;;  %vm6130_vm10 = vcmp.ge.f32.partialorder %v6119_v61, 0.0  ;;  %v6142_v16 = vmul.f32 0.2, %v6119_v61  ;;  %v6146_v5 = vsel %vm6122_vm6, %v6109_v44, %v6134_v52  ;;  %v6113_v63 = vmul.f32 %v14223_v37, %v14126_v9  ;;  %v10055_v44 = vld [vmem:[%s15947_s6 + $0x94] ss:$12 sps:$4 sm:$0xff]  }
0x1286   :  { %v6158_v21 = vpack.c.bf16 %v6149_v3, %v6146_v5  ;;  %v6143_v51 = vmul.f32 0.2, %v6115_v59  ;;  %vm6131_vm8 = vcmp.ge.f32.partialorder %v6115_v59, 0.0  ;;  %v9057_v5 = vld [vmem:[%s15948_s7 + $0x60] sm:$0xff]  ;;  %vm16209_vm6 = vcmask 670720  }
0x1287   :  { %v6154_v23 = vsel %vm6130_vm10, %v6119_v61, %v6142_v16  ;;  %v6140_v27 = vmul.f32 0.2, %v6113_v63  ;;  %vm6128_vm9 = vcmp.ge.f32.partialorder %v6113_v63, 0.0  ;;  %vm16206_vm10 = vcmask 572416  }
0x1288   :  { %6224 = vmatpush1.bf16.msra.mxu0 %v10314_v60  ;;  %6330 = vmatpush1.bf16.msra.mxu1 %v10315_v26  ;;  %v6160_v39 = vpack.c.bf16 %v6154_v23, %v6151_v30  ;;  %v6155_v13 = vsel %vm6131_vm8, %v6115_v59, %v6143_v51  ;;  %v9059_v51 = vld [vmem:[%s15948_s7 + $0x70] sm:$0xff]  ;;  %vm16210_vm8 = vmmov %vm16208_vm4 }
0x1289   :  { %6225 = vmatprep.subr.bf16.mxu0 %v10316_v38  ;;  %6331 = vmatprep.subr.bf16.mxu1 %v10317_v24  ;;  %v6152_v12 = vsel %vm6128_vm9, %v6113_v63, %v6140_v27  ;;  %vm16211_vm9 = vcmask 916480  }
0x128a   :  { %6210 = vmatprep.mubr.bf16.mxu0 %v6160_v39  ;;  %6316 = vmatprep.mubr.bf16.mxu1 %v6160_v39  ;;  %v6161_v25 = vpack.c.bf16 %v6155_v13, %v6152_v12 }
0x128b   :  { %6211 = vmatmul.mubr.bf16.gmra.mrb[80].mxu0 %v6159_v6  ;;  %6317 = vmatmul.mubr.bf16.gmra.mrb[84].mxu1 %v6159_v6 }
0x128c   :  { %6226 = vmatpush1.bf16.msra.mxu0 %v10318_v45  ;;  %6332 = vmatpush1.bf16.msra.mxu1 %v10319_v11 }
0x128d   :  { %6227 = vmatprep.subr.bf16.mxu0 %v10320_v56  ;;  %6333 = vmatprep.subr.bf16.mxu1 %v10321_v43 }
0x128e   :  { %6253 = vmatprep.mubr.bf16.mxu0 %v16084_v42  ;;  %6359 = vmatprep.mubr.bf16.mxu1 %v16084_v42 }
0x1290   :  { %6228 = vmatpush1.bf16.msra.mxu0 %v10322_v33  ;;  %6334 = vmatpush1.bf16.msra.mxu1 %v10323_v35 }
0x1291   :  { %9043 = vmatprep.subr.msk.bf16.mxu0 %vm3885_vm12, %v10324_v36  ;;  %9046 = vmatprep.subr.msk.bf16.mxu1 %vm3885_vm12, %v10325_v17 }
0x1294   :  { %6230 = vmatpush1.bf16.msra.mxu0 %v16158_v41  ;;  %6336 = vmatpush1.bf16.msra.mxu1 %v16159_v28 }
0x1297   :  { %9044 = vmatmul.mubr.msk.bf16.vlgmr.msra.gmra.mrb[76].mxu0 %vm3878_vm0, %v6158_v21  ;;  %9047 = vmatmul.mubr.msk.bf16.vlgmr.msra.gmra.mrb[80].mxu1 %vm3878_vm0, %v6158_v21 }
0x1298   :  { %6263 = vmatprep.mubr.bf16.mxu0 %v16084_v42  ;;  %6369 = vmatprep.mubr.bf16.mxu1 %v16084_v42 }
0x129f   :  { %9045 = vmatmul.mubr.msk.bf16.gmra.mrb[80].mxu0 %vm3878_vm0, %v6161_v25  ;;  %9048 = vmatmul.mubr.msk.bf16.gmra.mrb[84].mxu1 %vm3878_vm0, %v6161_v25 }
0x12a0   :  { %6894 = vmatprep.mubr.bf16.mxu1 %v10055_v44  ;;  %6788 = vmatprep.mubr.bf16.mxu0 %v10055_v44 }
0x136a   :  { %v6255_v9 = vpop.f32.mrb[76].mxu0  ;;  %v6361_v37 = vpop.f32.mrb[80].mxu1 }
0x136b   :  { %v6257_v18 = vpop.f32.mrb[77].mxu0  ;;  %v6363_v8 = vpop.f32.mrb[81].mxu1 }
0x136c   :  { %v6259_v0 = vpop.f32.mrb[78].mxu0  ;;  %v6365_v29 = vpop.f32.mrb[82].mxu1 }
0x136d   :  { %v14305_v20 = vpack.c.bf16 %v6259_v0, %v6255_v9  ;;  %v14307_v19 = vpack.c.bf16 %v6365_v29, %v6361_v37  ;;  %v6261_v61 = vpop.f32.mrb[79].mxu0  ;;  %v6367_v54 = vpop.f32.mrb[83].mxu1  ;;  %v9058_v9 = vld [vmem:[%s15948_s7 + $0x68] sm:$0xff]  ;;  %v9060_v29 = vld [vmem:[%s15948_s7 + $0x78] sm:$0xff]  ;;  %s10461_s7 = smov 55  }
0x136e   :  { %v14309_v50 = vpack.c.bf16 %v6261_v61, %v6257_v18  ;;  %v14311_v49 = vpack.c.bf16 %v6367_v54, %v6363_v8 }
0x136f   :  { %6428 = vrot.lane.b32.xlu1 %v14307_v19, %s16040_s27  ;;  %6394 = vrot.lane.b32.xlu0 %v14307_v19, %s10440_s4 }
0x1372   :  { %v6265_v16 = vpop.f32.mrb[80].mxu0  ;;  %v6371_v40 = vpop.f32.mrb[84].mxu1 }
0x1373   :  { %v6373_v30 = vpop.f32.mrb[85].mxu1  ;;  %6414 = vrot.lane.b32.xlu1 %v14305_v20, %s10410_s0  ;;  %6426 = vrot.lane.b32.xlu0 %v14309_v50, %s16040_s27  ;;  %v6267_v23 = vpop.f32.mrb[81].mxu0 }
0x1374   :  { %v6269_v60 = vpop.f32.mrb[82].mxu0  ;;  %v6375_v26 = vpop.f32.mrb[86].mxu1 }
0x1375   :  { %v14321_v39 = vpack.c.bf16 %v6269_v60, %v6265_v16  ;;  %v14323_v47 = vpack.c.bf16 %v6375_v26, %v6371_v40  ;;  %v6271_v38 = vpop.f32.mrb[83].mxu0  ;;  %v6377_v24 = vpop.f32.mrb[87].mxu1 }
0x1376   :  { %v14325_v6 = vpack.c.bf16 %v6271_v38, %v6267_v23  ;;  %v14327_v34 = vpack.c.bf16 %v6377_v24, %v6373_v30 }
0x1377   :  { %6460 = vrot.lane.b32.xlu1 %v14307_v19, %s10443_s2  ;;  %6416 = vrot.lane.b32.xlu0 %v14309_v50, %s10410_s0 }
0x137b   :  { %6446 = vrot.lane.b32.xlu1 %v14305_v20, %s10444_s28  ;;  %6458 = vrot.lane.b32.xlu0 %v14309_v50, %s10443_s2 }
0x137f   :  { %6492 = vrot.lane.b32.xlu1 %v14307_v19, %s10445_s1  ;;  %6448 = vrot.lane.b32.xlu0 %v14309_v50, %s10444_s28 }
0x1383   :  { %6478 = vrot.lane.b32.xlu1 %v14305_v20, %s10430_s22  ;;  %6490 = vrot.lane.b32.xlu0 %v14309_v50, %s10445_s1 }
0x1387   :  { %6524 = vrot.lane.b32.xlu1 %v14307_v19, %s10446_s13  ;;  %6480 = vrot.lane.b32.xlu0 %v14309_v50, %s10430_s22 }
0x138b   :  { %6510 = vrot.lane.b32.xlu1 %v14305_v20, %s16202_s3  ;;  %6522 = vrot.lane.b32.xlu0 %v14309_v50, %s10446_s13 }
0x138f   :  { %6512 = vrot.lane.b32.xlu0 %v14309_v50, %s16202_s3  ;;  %6392 = vrot.lane.b32.xlu1 %v14309_v50, %s10440_s4 }
0x1393   :  { %6554 = vrot.lane.b32.xlu0 %v14309_v50, %s16203_s17  ;;  %6398 = vrot.lane.b32.xlu1 %v14323_v47, %s10440_s4 }
0x1397   :  { %6544 = vrot.lane.b32.xlu0 %v14309_v50, %s16164_s24  ;;  %6432 = vrot.lane.b32.xlu1 %v14323_v47, %s16040_s27 }
0x139b   :  { %6588 = vrot.lane.b32.xlu0 %v14309_v50, %s16165_s11  ;;  %6418 = vrot.lane.b32.xlu1 %v14321_v39, %s10410_s0 }
0x139f   :  { %6576 = vrot.lane.b32.xlu0 %v14309_v50, %s16204_s16  ;;  %6464 = vrot.lane.b32.xlu1 %v14323_v47, %s10443_s2 }
0x13a3   :  { %6574 = vrot.lane.b32.xlu0 %v14305_v20, %s16204_s16  ;;  %6450 = vrot.lane.b32.xlu1 %v14321_v39, %s10444_s28 }
0x13a7   :  { %6596 = vrot.lane.b32.xlu0 %v14323_v47, %s16165_s11  ;;  %6496 = vrot.lane.b32.xlu1 %v14323_v47, %s10445_s1 }
0x13ab   :  { %6626 = vrot.lane.b32.xlu0 %v14309_v50, %s16166_s18  ;;  %6482 = vrot.lane.b32.xlu1 %v14321_v39, %s10430_s22 }
0x13af   :  { %6616 = vrot.lane.b32.xlu0 %v14309_v50, %s16086_s20  ;;  %6528 = vrot.lane.b32.xlu1 %v14323_v47, %s10446_s13 }
0x13b3   :  { %6430 = vrot.lane.b32.xlu0 %v14325_v6, %s16040_s27  ;;  %6396 = vrot.lane.b32.xlu1 %v14325_v6, %s10440_s4 }
0x13b7   :  { %6420 = vrot.lane.b32.xlu0 %v14325_v6, %s10410_s0  ;;  %6514 = vrot.lane.b32.xlu1 %v14321_v39, %s16202_s3 }
0x13bb   :  { %6462 = vrot.lane.b32.xlu0 %v14325_v6, %s10443_s2  ;;  %6556 = vrot.lane.b32.xlu1 %v14307_v19, %s16203_s17  ;;  %s10460_s2 = smov 66  }
0x13bf   :  { %6452 = vrot.lane.b32.xlu0 %v14325_v6, %s10444_s28  ;;  %6542 = vrot.lane.b32.xlu1 %v14305_v20, %s16164_s24 }
0x13c3   :  { %6494 = vrot.lane.b32.xlu0 %v14325_v6, %s10445_s1  ;;  %6560 = vrot.lane.b32.xlu1 %v14323_v47, %s16203_s17 }
0x13c7   :  { %6484 = vrot.lane.b32.xlu0 %v14325_v6, %s10430_s22  ;;  %6546 = vrot.lane.b32.xlu1 %v14321_v39, %s16164_s24 }
0x13cb   :  { %6526 = vrot.lane.b32.xlu0 %v14325_v6, %s10446_s13  ;;  %6590 = vrot.lane.b32.xlu1 %v14307_v19, %s16165_s11 }
0x13cf   :  { %6516 = vrot.lane.b32.xlu0 %v14325_v6, %s16202_s3  ;;  %6592 = vrot.lane.b32.xlu1 %v14311_v49, %s16165_s11 }
0x13d3   :  { %6558 = vrot.lane.b32.xlu0 %v14325_v6, %s16203_s17  ;;  %6578 = vrot.lane.b32.xlu1 %v14321_v39, %s16204_s16 }
0x13d7   :  { %6548 = vrot.lane.b32.xlu0 %v14325_v6, %s16164_s24  ;;  %6628 = vrot.lane.b32.xlu1 %v14307_v19, %s16166_s18 }
0x13db   :  { %6614 = vrot.lane.b32.xlu0 %v14305_v20, %s16086_s20  ;;  %6630 = vrot.lane.b32.xlu1 %v14311_v49, %s16166_s18 }
0x13df   :  { %6598 = vrot.lane.b32.xlu0 %v14327_v34, %s16165_s11  ;;  %6594 = vrot.lane.b32.xlu1 %v14325_v6, %s16165_s11  ;;  %s10463_s11 = smov 53  }
0x13e1   :  { %v14440_v45 = vpop.permute.xlu1 %6428  ;;  %v6395_v11 = vpop.permute.xlu0 %6394 }
0x13e3   :  { %6634 = vrot.lane.b32.xlu0 %v14323_v47, %s16166_s18  ;;  %6580 = vrot.lane.b32.xlu1 %v14325_v6, %s16204_s16 }
0x13e5   :  { %v14446_v56 = vpop.permute.xlu1 %6414  ;;  %v14448_v43 = vpop.permute.xlu0 %6426 }
0x13e7   :  { %6636 = vrot.lane.b32.xlu0 %v14327_v34, %s16166_s18  ;;  %6632 = vrot.lane.b32.xlu1 %v14325_v6, %s16166_s18 }
0x13e9   :  { %v14454_v32 = vpop.permute.xlu1 %6460  ;;  %v14456_v52 = vpop.permute.xlu0 %6416 }
0x13eb   :  { %6660 = vrot.lane.b32.xlu0 %v14309_v50, %s16087_s21  ;;  %6620 = vrot.lane.b32.xlu1 %v14325_v6, %s16086_s20 }
0x13ed   :  { %v14462_v33 = vpop.permute.xlu1 %6446  ;;  %v14464_v35 = vpop.permute.xlu0 %6458 }
0x13ef   :  { %6664 = vrot.lane.b32.xlu0 %v14311_v49, %s16087_s21  ;;  %6618 = vrot.lane.b32.xlu1 %v14321_v39, %s16086_s20 }
0x13f1   :  { %v14470_v36 = vpop.permute.xlu1 %6492  ;;  %v14472_v17 = vpop.permute.xlu0 %6448 }
0x13f3   :  { %6666 = vrot.lane.b32.xlu0 %v14325_v6, %s16087_s21  ;;  %6662 = vrot.lane.b32.xlu1 %v14307_v19, %s16087_s21 }
0x13f5   :  { %v14478_v3 = vpop.permute.xlu1 %6478  ;;  %v14480_v59 = vpop.permute.xlu0 %6490 }
0x13f7   :  { %6670 = vrot.lane.b32.xlu0 %v14327_v34, %s16087_s21  ;;  %6652 = vrot.lane.b32.xlu1 %v14305_v20, %s10440_s4 }
0x13f9   :  { %v14489_v63 = vpop.permute.xlu1 %6524  ;;  %v14491_v21 = vpop.permute.xlu0 %6480 }
0x13fa   :  { %9247 = vmatprep.subr.bf16.mxu1 %v14489_v63 }
0x13fb   :  { %9248 = vmatpush3.bf16.msra.mxu1 %v6395_v11  ;;  %6702 = vperm.xlu0 %9572, %v9057_v5   ;;  %v6434_v5 = vsel %vm2527_vm13, %v14448_v43, %v14440_v45 }
0x13fc   :  { %6668 = vrot.lane.b32.xlu1 %v14323_v47, %s16087_s21 }
0x13fd   :  { %v14499_v27 = vpop.permute.xlu1 %6510  ;;  %v14501_v13 = vpop.permute.xlu0 %6522 }
0x13ff   :  { %6712 = vperm.xlu0 %9572, %v9059_v51  }
0x1400   :  { %6654 = vrot.lane.b32.xlu1 %v14321_v39, %s10440_s4 }
0x1401   :  { %v14505_v12 = vpop.permute.xlu0 %6512  ;;  %v14507_v25 = vpop.permute.xlu1 %6392 }
0x1402   :  { %v6400_v37 = vsel %vm2491_vm11, %v14507_v25, %v6395_v11 }
0x1403   :  { %v6406_v18 = vsel %vm2496_vm15, %v14309_v50, %v6400_v37  ;;  %v6440_v37 = vsel %vm2496_vm15, %v14456_v52, %v6434_v5 }
0x1404   :  { %6707 = vperm.xlu1 %9571, %v9058_v9   ;;  %6756 = vmatprep.subr.bf16.mxu0 %v6406_v18 }
0x1405   :  { %v14516_v8 = vpop.permute.xlu0 %6554  ;;  %6757 = vmatpush1.bf16.msra.mxu0 %v14305_v20  ;;  %v6399_v0 = vpop.permute.xlu1 %6398 }
0x1408   :  { %6717 = vperm.xlu1 %9571, %v9060_v29  }
0x1409   :  { %v14522_v19 = vpop.permute.xlu0 %6544  ;;  %v6433_v61 = vpop.permute.xlu1 %6432 }
0x140d   :  { %v14524_v54 = vpop.permute.xlu0 %6588  ;;  %v6419_v49 = vpop.permute.xlu1 %6418 }
0x1411   :  { %v14526_v16 = vpop.permute.xlu0 %6576  ;;  %v14528_v50 = vpop.permute.xlu1 %6464 }
0x1415   :  { %v14530_v40 = vpop.permute.xlu0 %6574  ;;  %v6451_v30 = vpop.permute.xlu1 %6450 }
0x1419   :  { %v14532_v20 = vpop.permute.xlu0 %6596  ;;  %v14534_v23 = vpop.permute.xlu1 %6496 }
0x141d   :  { %v14536_v60 = vpop.permute.xlu0 %6626  ;;  %v6483_v26 = vpop.permute.xlu1 %6482 }
0x1421   :  { %v14538_v47 = vpop.permute.xlu0 %6616  ;;  %v14540_v38 = vpop.permute.xlu1 %6528 }
0x1422   :  { %9249 = vmatprep.subr.bf16.mxu1 %v14540_v38 }
0x1423   :  { %9250 = vmatpush3.bf16.msra.mxu1 %v6399_v0 }
0x1425   :  { %v6431_v24 = vpop.permute.xlu0 %6430  ;;  %v14543_v34 = vpop.permute.xlu1 %6396 }
0x1426   :  { %v6401_v44 = vsel %vm2491_vm11, %v14543_v34, %v6399_v0  ;;  %v6435_v18 = vsel %vm2527_vm13, %v6431_v24, %v6433_v61  ;;  %v6422_v0 = vsel %vm1318_vm3, %v14446_v56, %v14456_v52 }
0x1427   :  { %v6410_v11 = vsel %vm2496_vm15, %v14325_v6, %v6401_v44 }
0x1428   :  { %6758 = vmatprep.subr.bf16.mxu0 %v6410_v11 }
0x1429   :  { %v6421_v51 = vpop.permute.xlu0 %6420  ;;  %6759 = vmatpush1.bf16.msra.mxu0 %v14321_v39  ;;  %v6515_v9 = vpop.permute.xlu1 %6514  ;;  %v6466_v39 = vsel %vm2561_vm5, %v14464_v35, %v14454_v32 }
0x142a   :  { %6760 = vmatprep.subr.bf16.mxu0 %v6440_v37  ;;  %v6444_v43 = vsel %vm2496_vm15, %v6421_v51, %v6435_v18  ;;  %v6423_v44 = vsel %vm1318_vm3, %v6419_v49, %v6421_v51  ;;  %v6472_v56 = vsel %vm2496_vm15, %v14472_v17, %v6466_v39  ;;  %v6498_v49 = vsel %vm2594_vm2, %v14480_v59, %v14470_v36 }
0x142d   :  { %v6463_v6 = vpop.permute.xlu0 %6462  ;;  %6761 = vmatpush1.bf16.msra.mxu0 %v6422_v0  ;;  %v6557_v29 = vpop.permute.xlu1 %6556 }
0x142e   :  { %6762 = vmatprep.subr.bf16.mxu0 %v6444_v43  ;;  %9251 = vmatprep.subr.bf16.mxu1 %v6557_v29  ;;  %v6467_v52 = vsel %vm2561_vm5, %v6463_v6, %v14528_v50  ;;  %vm16205_vm5 = vcmask 678912  }
0x142f   :  { %9252 = vmatpush3.bf16.msra.mxu1 %v14440_v45  ;;  %v6454_v45 = vsel %vm2548_vm7, %v14462_v33, %v14472_v17  ;;  %v6504_v33 = vsel %vm2496_vm15, %v14491_v21, %v6498_v49  ;;  %vm16207_vm1 = vmmov %vm16205_vm5 }
0x1431   :  { %v6453_v24 = vpop.permute.xlu0 %6452  ;;  %6763 = vmatpush1.bf16.msra.mxu0 %v6423_v44  ;;  %v6543_v11 = vpop.permute.xlu1 %6542 }
0x1432   :  { %6764 = vmatprep.subr.bf16.mxu0 %v6472_v56  ;;  %v6476_v35 = vsel %vm2496_vm15, %v6453_v24, %v6467_v52  ;;  %v6455_v51 = vsel %vm2548_vm7, %v6451_v30, %v6453_v24  ;;  %v6530_v30 = vsel %vm16205_vm5, %v14501_v13, %v14489_v63  ;;  %v6518_v63 = vsel %vm16208_vm4, %v14499_v27, %v14505_v12  ;;  %vm16212_vm5 = vmmov %vm16209_vm6 }
0x1433   :  { %v6536_v56 = vsel %vm2496_vm15, %v14505_v12, %v6530_v30  ;;  %v6550_v27 = vsel %vm16211_vm9, %v6543_v11, %v14522_v19  ;;  %vm16214_vm4 = vmmov %vm16206_vm10 }
0x1435   :  { %v6495_v5 = vpop.permute.xlu0 %6494  ;;  %6765 = vmatpush1.bf16.msra.mxu0 %v6454_v45  ;;  %v6561_v37 = vpop.permute.xlu1 %6560  ;;  %v6562_v45 = vsel %vm16209_vm6, %v14516_v8, %v6557_v29  ;;  %vm16215_vm6 = vcmask 818176  }
0x1436   :  { %6766 = vmatprep.subr.bf16.mxu0 %v6476_v35  ;;  %9253 = vmatprep.subr.bf16.mxu1 %v6561_v37  ;;  %v6499_v17 = vsel %vm2594_vm2, %v6495_v5, %v14534_v23  ;;  %v6582_v11 = vsel %vm16215_vm6, %v14530_v40, %v14526_v16 }
0x1437   :  { %9254 = vmatpush3.bf16.msra.mxu1 %v6433_v61  ;;  %v6486_v61 = vsel %vm1479_vm14, %v14478_v3, %v14491_v21 }
0x1439   :  { %v6485_v18 = vpop.permute.xlu0 %6484  ;;  %6767 = vmatpush1.bf16.msra.mxu0 %v6455_v51  ;;  %v6547_v0 = vpop.permute.xlu1 %6546 }
0x143a   :  { %6768 = vmatprep.subr.bf16.mxu0 %v6504_v33  ;;  %v6508_v59 = vsel %vm2496_vm15, %v6485_v18, %v6499_v17  ;;  %v6487_v39 = vsel %vm1479_vm14, %v6483_v26, %v6485_v18 }
0x143d   :  { %v6527_v6 = vpop.permute.xlu0 %6526  ;;  %6769 = vmatpush1.bf16.msra.mxu0 %v6486_v61  ;;  %v6591_v43 = vpop.permute.xlu1 %6590 }
0x143e   :  { %6770 = vmatprep.subr.bf16.mxu0 %v6508_v59  ;;  %v6531_v21 = vsel %vm16207_vm1, %v6527_v6, %v14540_v38  ;;  %vm16213_vm1 = vmmov %vm16211_vm9 }
0x143f   :  { %vm16217_vm9 = vmmov %vm16214_vm4 }
0x1441   :  { %v6517_v44 = vpop.permute.xlu0 %6516  ;;  %6771 = vmatpush1.bf16.msra.mxu0 %v6487_v39  ;;  %v6593_v24 = vpop.permute.xlu1 %6592 }
0x1442   :  { %6772 = vmatprep.subr.bf16.mxu0 %v6536_v56  ;;  %v6601_v3 = vsel %vm16206_vm10, %v6591_v43, %v6593_v24  ;;  %v6540_v52 = vsel %vm2496_vm15, %v6517_v44, %v6531_v21  ;;  %v6519_v5 = vsel %vm16210_vm8, %v6515_v9, %v6517_v44  ;;  %v6600_v9 = vsel %vm16206_vm10, %v14524_v54, %v6591_v43  ;;  %vm16219_vm10 = vmmov %vm16215_vm6 }
0x1443   :  { %9255 = vmatprep.subr.bf16.mxu1 %v6601_v3  ;;  %v6608_v17 = vsel %vm2496_vm15, %v14526_v16, %v6600_v9  ;;  %vm16216_vm8 = vcmask 564224   ;;  %v10326_v9 = vld [vmem:[%s15950_s5 + $0x4] ss:$16 sps:$4 sm:$0xff]  }
0x1444   :  { %9256 = vmatpush3.bf16.msra.mxu1 %v14454_v32  ;;  %v6568_v32 = vsel %vm2496_vm15, %v14522_v19, %v6562_v45 }
0x1445   :  { %v6559_v13 = vpop.permute.xlu0 %6558  ;;  %6773 = vmatpush1.bf16.msra.mxu0 %v6518_v63  ;;  %v6579_v26 = vpop.permute.xlu1 %6578 }
0x1446   :  { %6774 = vmatprep.subr.bf16.mxu0 %v6540_v52  ;;  %v6563_v12 = vsel %vm16212_vm5, %v6559_v13, %v6561_v37  ;;  %vm16218_vm5 = vmmov %vm16216_vm8  ;;  %v10059_v13 = vld [vmem:[%s15947_s6 + $0x98] ss:$12 sps:$4 sm:$0xff]  }
0x1449   :  { %v6549_v35 = vpop.permute.xlu0 %6548  ;;  %6775 = vmatpush1.bf16.msra.mxu0 %v6519_v5  ;;  %v6629_v38 = vpop.permute.xlu1 %6628 }
0x144a   :  { %6776 = vmatprep.subr.bf16.mxu0 %v6568_v32  ;;  %v6572_v8 = vsel %vm2496_vm15, %v6549_v35, %v6563_v12  ;;  %v6551_v29 = vsel %vm16213_vm1, %v6547_v0, %v6549_v35  ;;  %v6638_v6 = vsel %vm16218_vm5, %v14536_v60, %v6629_v38  ;;  %vm16220_vm1 = vmmov %vm16218_vm5  ;;  %v10053_v60 = vld [vmem:[%s15947_s6 + $0x90] ss:$12 sps:$4 sm:$0xff]  }
0x144b   :  { %vm16222_vm6 = vmmov %vm16220_vm1 }
0x144d   :  { %v6615_v49 = vpop.permute.xlu0 %6614  ;;  %6777 = vmatpush1.bf16.msra.mxu0 %v6550_v27  ;;  %v6631_v51 = vpop.permute.xlu1 %6630 }
0x144e   :  { %6778 = vmatprep.subr.bf16.mxu0 %v6572_v8  ;;  %v6639_v54 = vsel %vm16216_vm8, %v6629_v38, %v6631_v51  ;;  %v10060_v8 = vld [vmem:[%s15947_s6 + $0xb0] ss:$12 sps:$4 sm:$0xff]  }
0x1451   :  { %v6599_v18 = vpop.permute.xlu0 %6598  ;;  %6779 = vmatpush1.bf16.msra.mxu0 %v6551_v29  ;;  %v6595_v33 = vpop.permute.xlu1 %6594 }
0x1452   :  { %6780 = vmatprep.subr.bf16.mxu0 %v6608_v17  ;;  %v6603_v19 = vsel %vm16214_vm4, %v14532_v20, %v6599_v18  ;;  %v6602_v37 = vsel %vm16217_vm9, %v6595_v33, %v14532_v20  ;;  %v6646_v20 = vsel %vm2496_vm15, %v14538_v47, %v6638_v6  ;;  %vm16221_vm4 = vcmask 809984   ;;  %v10327_v18 = vld [vmem:[%s15950_s5 + $0xc] ss:$16 sps:$4 sm:$0xff]   ;;  %v10328_v33 = vld [vmem:[%s15950_s5] ss:$16 sps:$4 sm:$0xff]  }
0x1453   :  { %9257 = vmatprep.subr.bf16.mxu1 %v6603_v19  ;;  %v6622_v30 = vsel %vm16221_vm4, %v6615_v49, %v14538_v47  ;;  %vm16223_vm8 = vmmov %vm16221_vm4  ;;  %vm16224_vm9 = vcmask 556032   ;;  %v10329_v17 = vld [vmem:[%s15950_s5 + $0x24] ss:$16 sps:$4 sm:$0xff]   ;;  %v10331_v19 = vld [vmem:[%s15950_s5 + $0x2c] ss:$16 sps:$4 sm:$0xff]  }
0x1454   :  { %9258 = vmatpush3.bf16.msra.mxu1 %v14528_v50  ;;  %vm16225_vm5 = vmmov %vm16224_vm9  ;;  %v10337_v6 = vld [vmem:[%s15950_s5 + $0x64] ss:$16 sps:$4 sm:$0xff]  }
0x1455   :  { %v6635_v0 = vpop.permute.xlu0 %6634  ;;  %6781 = vmatpush1.bf16.msra.mxu0 %v6582_v11  ;;  %9259 = vmatprep.subr.bf16.mxu1 %v6639_v54  ;;  %v6581_v61 = vpop.permute.xlu1 %6580  ;;  %v10332_v11 = vld [vmem:[%s15950_s5 + $0x20] ss:$16 sps:$4 sm:$0xff]   ;;  %v10333_v54 = vld [vmem:[%s15950_s5 + $0x44] ss:$16 sps:$4 sm:$0xff]  }
0x1456   :  { %v6612_v43 = vsel %vm2496_vm15, %v6581_v61, %v6602_v37  ;;  %v6583_v16 = vsel %vm16219_vm10, %v6579_v26, %v6581_v61  ;;  %vm16226_vm10 = vcmask 261120   ;;  %v10334_v37 = vld [vmem:[%s15950_s5 + $0x28] ss:$16 sps:$4 sm:$0xff]   ;;  %v10336_v61 = vld [vmem:[%s15950_s5 + $0x40] ss:$16 sps:$4 sm:$0xff]  }
0x1457   :  { %6782 = vmatprep.subr.bf16.mxu0 %v6612_v43  ;;  %v10338_v43 = vld [vmem:[%s15950_s5 + $0x48] ss:$16 sps:$4 sm:$0xff]  }
0x1458   :  { %9260 = vmatpush3.bf16.msra.mxu1 %v14470_v36  ;;  %v10056_v36 = vld [vmem:[%s15947_s6 + $0xac] ss:$12 sps:$4 sm:$0xff]  }
0x1459   :  { %v6637_v50 = vpop.permute.xlu0 %6636  ;;  %6783 = vmatpush1.bf16.msra.mxu0 %v6583_v16  ;;  %v6633_v40 = vpop.permute.xlu1 %6632  ;;  %v10339_v16 = vld [vmem:[%s15950_s5 + $0x6c] ss:$16 sps:$4 sm:$0xff]  }
0x145a   :  { %6784 = vmatprep.subr.bf16.mxu0 %v6646_v20  ;;  %v6641_v59 = vsel %vm16220_vm1, %v6635_v0, %v6637_v50  ;;  %v6640_v39 = vsel %vm16222_vm6, %v6633_v40, %v6635_v0  ;;  %vm16227_vm1 = vmmov %vm16225_vm5  ;;  %v10335_v0 = vld [vmem:[%s15950_s5 + $0x4c] ss:$16 sps:$4 sm:$0xff]   ;;  %v10340_v50 = vld [vmem:[%s15950_s5 + $0x60] ss:$16 sps:$4 sm:$0xff]  }
0x145b   :  { %9261 = vmatprep.subr.bf16.mxu1 %v6641_v59  ;;  %vm16228_vm4 = vmmov %vm16227_vm1  ;;  %v10341_v40 = vld [vmem:[%s15950_s5 + $0x84] ss:$16 sps:$4 sm:$0xff]   ;;  %v10342_v20 = vld [vmem:[%s15950_s5 + $0x68] ss:$16 sps:$4 sm:$0xff]  }
0x145c   :  { %9262 = vmatpush3.bf16.msra.mxu1 %v14534_v23  ;;  %v10058_v23 = vld [vmem:[%s15947_s6 + $0xa8] ss:$12 sps:$4 sm:$0xff]   ;;  %vm16229_vm6 = vmmov %vm16226_vm10  ;;  %v10343_v59 = vld [vmem:[%s15950_s5 + $0x8c] ss:$16 sps:$4 sm:$0xff]   ;;  %s10465_s6 = smov 41  }
0x145d   :  { %v6661_v44 = vpop.permute.xlu0 %6660  ;;  %6785 = vmatpush1.bf16.msra.mxu0 %v6622_v30  ;;  %v6621_v24 = vpop.permute.xlu1 %6620  ;;  %v10345_v30 = vld [vmem:[%s15950_s5 + $0xa4] ss:$16 sps:$4 sm:$0xff]  }
0x145e   :  { %v6650_v56 = vsel %vm2496_vm15, %v6621_v24, %v6640_v39  ;;  %v10347_v39 = vld [vmem:[%s15950_s5 + $0xac] ss:$16 sps:$4 sm:$0xff]  }
0x145f   :  { %6786 = vmatprep.subr.bf16.mxu0 %v6650_v56  ;;  %6895 = vmatmul.mubr.bf16.vlgmr.msra.gmra.mrb[88].mxu1 %v10053_v60  ;;  %v10350_v56 = vld [vmem:[%s15950_s5 + $0xa8] ss:$16 sps:$4 sm:$0xff]  }
0x1460   :  { %6902 = vmatprep.mubr.bf16.mxu1 %v10056_v36 }
0x1461   :  { %v6619_v3 = vpop.permute.xlu1 %6618  ;;  %v6665_v21 = vpop.permute.xlu0 %6664 }
0x1462   :  { %v6623_v47 = vsel %vm16223_vm8, %v6619_v3, %v6621_v24  ;;  %vm16230_vm8 = vmmov %vm16229_vm6  ;;  %v10349_v24 = vld [vmem:[%s15950_s5 + $0xc4] ss:$16 sps:$4 sm:$0xff]   ;;  %v10351_v3 = vld [vmem:[%s15950_s5 + $0xcc] ss:$16 sps:$4 sm:$0xff]  }
0x1463   :  { %6787 = vmatpush1.bf16.msra.mxu0 %v6623_v47  ;;  %v10353_v47 = vld [vmem:[%s15950_s5 + $0xe4] ss:$16 sps:$4 sm:$0xff]  }
0x1465   :  { %v6663_v63 = vpop.permute.xlu1 %6662  ;;  %v6667_v5 = vpop.permute.xlu0 %6666 }
0x1466   :  { %v6672_v26 = vsel %vm16224_vm9, %v6661_v44, %v6663_v63  ;;  %6789 = vmatmul.mubr.bf16.vlgmr.msra.gmra.mrb[84].mxu0 %v10053_v60  ;;  %v6673_v52 = vsel %vm16225_vm5, %v6663_v63, %v6665_v21  ;;  %vm16231_vm9 = vmmov %vm16229_vm6  ;;  %v10344_v60 = vld [vmem:[%s15950_s5 + $0x80] ss:$16 sps:$4 sm:$0xff]   ;;  %v10355_v63 = vld [vmem:[%s15950_s5 + $0xec] ss:$16 sps:$4 sm:$0xff]   ;;  %vm16232_vm5 = vcmask 736256  }
0x1467   :  { %6903 = vmatmul.mubr.bf16.gmra.mrb[92].mxu1 %v10058_v23  ;;  %9347 = vmatprep.subr.bf16.mxu1 %v6673_v52  ;;  %v6680_v45 = vsel %vm2496_vm15, %v14507_v25, %v6672_v26  ;;  %v10348_v44 = vld [vmem:[%s15950_s5 + $0xa0] ss:$16 sps:$4 sm:$0xff]   ;;  %v10357_v26 = vld [vmem:[%s15950_s5 + $0x104] ss:$16 sps:$4 sm:$0xff]  }
0x1468   :  { %6809 = vmatprep.subr.bf16.mxu0 %v6680_v45  ;;  %9348 = vmatpush3.bf16.msra.mxu1 %v6673_v52  ;;  %v10352_v21 = vld [vmem:[%s15950_s5 + $0xc0] ss:$16 sps:$4 sm:$0xff]   ;;  %v10358_v52 = vld [vmem:[%s15950_s5 + $0xe8] ss:$16 sps:$4 sm:$0xff]   ;;  %v10359_v45 = vld [vmem:[%s15950_s5 + $0x10c] ss:$16 sps:$4 sm:$0xff]  }
0x1469   :  { %v6653_v35 = vpop.permute.xlu1 %6652  ;;  %6798 = vmatprep.mubr.bf16.mxu0 %v10056_v36  ;;  %9351 = vmatprep.mubr.msk.bf16.mxu1 %vm16226_vm10, %v10059_v13  ;;  %v6671_v32 = vpop.permute.xlu0 %6670  ;;  %v10346_v36 = vld [vmem:[%s15950_s5 + $0x88] ss:$16 sps:$4 sm:$0xff]   ;;  %vm16233_vm10 = vmmov %vm16232_vm5 }
0x146a   :  { %v6656_v38 = vsel %vm2491_vm11, %v6653_v35, %v14507_v25  ;;  %v10361_v35 = vld [vmem:[%s15950_s5 + $0x124] ss:$16 sps:$4 sm:$0xff]  }
0x146b   :  { %6810 = vmatpush1.bf16.msra.mxu0 %v6656_v38  ;;  %v10362_v38 = vld [vmem:[%s15950_s5 + $0x108] ss:$16 sps:$4 sm:$0xff]  }
0x146e   :  { %v6669_v27 = vpop.permute.xlu1 %6668  ;;  %6799 = vmatmul.mubr.bf16.gmra.mrb[88].mxu0 %v10058_v23  ;;  %v10354_v23 = vld [vmem:[%s15950_s5 + $0xc8] ss:$16 sps:$4 sm:$0xff]  }
0x146f   :  { %v6674_v12 = vsel %vm16227_vm1, %v6667_v5, %v6669_v27  ;;  %v6675_v49 = vsel %vm16228_vm4, %v6669_v27, %v6671_v32  ;;  %6841 = vmatprep.mubr.bf16.mxu0 %v16084_v42  ;;  %v10360_v5 = vld [vmem:[%s15950_s5 + $0x100] ss:$16 sps:$4 sm:$0xff]   ;;  %v10363_v32 = vld [vmem:[%s15950_s5 + $0x12c] ss:$16 sps:$4 sm:$0xff]   ;;  %vm16234_vm1 = vmmov %vm16232_vm5 }
0x1470   :  { %9349 = vmatprep.subr.bf16.mxu1 %v6675_v49  ;;  %v6684_v51 = vsel %vm2496_vm15, %v14543_v34, %v6674_v12  ;;  %v10364_v27 = vld [vmem:[%s15950_s5 + $0x120] ss:$16 sps:$4 sm:$0xff]   ;;  %v10365_v12 = vld [vmem:[%s15950_s5 + $0x144] ss:$16 sps:$4 sm:$0xff]   ;;  %vm16235_vm4 = vmmov %vm16234_vm1 }
0x1471   :  { %6811 = vmatprep.subr.bf16.mxu0 %v6684_v51  ;;  %9350 = vmatpush3.bf16.msra.mxu1 %v6675_v49  ;;  %v10366_v49 = vld [vmem:[%s15950_s5 + $0x128] ss:$16 sps:$4 sm:$0xff]   ;;  %v10367_v51 = vld [vmem:[%s15950_s5 + $0x14c] ss:$16 sps:$4 sm:$0xff]  }
0x1472   :  { %v6655_v25 = vpop.permute.xlu1 %6654  ;;  %7344 = vmatprep.subr.bf16.mxu1 %v10326_v9  ;;  %v10370_v9 = vld [vmem:[%s15950_s5 + $0x148] ss:$16 sps:$4 sm:$0xff]  }
0x1473   :  { %v6657_v29 = vsel %vm2491_vm11, %v6655_v25, %v14543_v34  ;;  %v10330_v34 = vld [vmem:[%s15950_s5 + $0x8] ss:$16 sps:$4 sm:$0xff]   ;;  %v10369_v25 = vld [vmem:[%s15950_s5 + $0x164] ss:$16 sps:$4 sm:$0xff]  }
0x1474   :  { %6812 = vmatpush1.bf16.msra.mxu0 %v6657_v29  ;;  %9352 = vmatmul.mubr.msk.bf16.vlgmr.msra.gmra.mrb[96].mxu1 %vm16229_vm6, %v10060_v8  ;;  %v10371_v29 = vld [vmem:[%s15950_s5 + $0x16c] ss:$16 sps:$4 sm:$0xff]   ;;  %vm16236_vm6 = vmmov %vm16234_vm1 }
0x1475   :  { %7450 = vmatprep.subr.bf16.mxu0 %v10327_v18  ;;  %7345 = vmatpush1.bf16.msra.mxu1 %v10328_v33  ;;  %v10372_v18 = vld [vmem:[%s15950_s5 + $0x160] ss:$16 sps:$4 sm:$0xff]   ;;  %v10373_v33 = vld [vmem:[%s15950_s5 + $0x184] ss:$16 sps:$4 sm:$0xff]  }
0x1476   :  { %7346 = vmatprep.subr.bf16.mxu1 %v10329_v17  ;;  %v10374_v17 = vld [vmem:[%s15950_s5 + $0x168] ss:$16 sps:$4 sm:$0xff]  }
0x1477   :  { %9067 = vmatmul.mubr.msk.bf16.vlgmr.msra.gmra.mrb[84].mxu0 %vm16230_vm8, %v10059_v13  ;;  %v10356_v13 = vld [vmem:[%s15950_s5 + $0xe0] ss:$16 sps:$4 sm:$0xff]   ;;  %vm16237_vm8 = vmmov %vm16234_vm1 }
0x1478   :  { %6851 = vmatprep.mubr.bf16.mxu0 %v16084_v42  ;;  %7451 = vmatpush1.bf16.msra.mxu0 %v10330_v34  ;;  %v10375_v34 = vld [vmem:[%s15950_s5 + $0x18c] ss:$16 sps:$4 sm:$0xff]  }
0x1479   :  { %7452 = vmatprep.subr.bf16.mxu0 %v10331_v19  ;;  %7347 = vmatpush1.bf16.msra.mxu1 %v10332_v11  ;;  %v10376_v19 = vld [vmem:[%s15950_s5 + $0x180] ss:$16 sps:$4 sm:$0xff]   ;;  %v10377_v11 = vld [vmem:[%s15950_s5 + $0x1a4] ss:$16 sps:$4 sm:$0xff]  }
0x147a   :  { %7348 = vmatprep.subr.bf16.mxu1 %v10333_v54  ;;  %v10378_v54 = vld [vmem:[%s15950_s5 + $0x188] ss:$16 sps:$4 sm:$0xff]  }
0x147c   :  { %7453 = vmatpush1.bf16.msra.mxu0 %v10334_v37  ;;  %v10379_v37 = vld [vmem:[%s15950_s5 + $0x1ac] ss:$16 sps:$4 sm:$0xff]  }
0x147d   :  { %7454 = vmatprep.subr.bf16.mxu0 %v10335_v0  ;;  %7349 = vmatpush1.bf16.msra.mxu1 %v10336_v61  ;;  %v10380_v0 = vld [vmem:[%s15950_s5 + $0x1a0] ss:$16 sps:$4 sm:$0xff]   ;;  %v10381_v61 = vld [vmem:[%s15950_s5 + $0x1c4] ss:$16 sps:$4 sm:$0xff]  }
0x147e   :  { %7350 = vmatprep.subr.bf16.mxu1 %v10337_v6  ;;  %v10382_v6 = vld [vmem:[%s15950_s5 + $0x1a8] ss:$16 sps:$4 sm:$0xff]  }
0x147f   :  { %9068 = vmatmul.mubr.msk.bf16.gmra.mrb[88].mxu0 %vm16231_vm9, %v10060_v8  ;;  %v10368_v8 = vld [vmem:[%s15950_s5 + $0x140] ss:$16 sps:$4 sm:$0xff]   ;;  %vm16238_vm9 = vmmov %vm16234_vm1 }
0x1480   :  { %7455 = vmatpush1.bf16.msra.mxu0 %v10338_v43  ;;  %v10383_v43 = vld [vmem:[%s15950_s5 + $0x1cc] ss:$16 sps:$4 sm:$0xff]  }
0x1481   :  { %7456 = vmatprep.subr.bf16.mxu0 %v10339_v16  ;;  %7351 = vmatpush1.bf16.msra.mxu1 %v10340_v50  ;;  %v10384_v16 = vld [vmem:[%s15950_s5 + $0x1c0] ss:$16 sps:$4 sm:$0xff]   ;;  %v10385_v50 = vld [vmem:[%s15950_s5 + $0x1e4] ss:$16 sps:$4 sm:$0xff]  }
0x1482   :  { %7352 = vmatprep.subr.bf16.mxu1 %v10341_v40  ;;  %v10386_v40 = vld [vmem:[%s15950_s5 + $0x1c8] ss:$16 sps:$4 sm:$0xff]  }
0x1484   :  { %7457 = vmatpush1.bf16.msra.mxu0 %v10342_v20  ;;  %v10387_v20 = vld [vmem:[%s15950_s5 + $0x1ec] ss:$16 sps:$4 sm:$0xff]  }
0x1485   :  { %7458 = vmatprep.subr.bf16.mxu0 %v10343_v59  ;;  %7353 = vmatpush1.bf16.msra.mxu1 %v10344_v60  ;;  %v10388_v59 = vld [vmem:[%s15950_s5 + $0x1e0] ss:$16 sps:$4 sm:$0xff]   ;;  %v10389_v60 = vld [vmem:[%s15950_s5 + $0x204] ss:$16 sps:$4 sm:$0xff]  }
0x1486   :  { %7354 = vmatprep.subr.bf16.mxu1 %v10345_v30  ;;  %v10390_v30 = vld [vmem:[%s15950_s5 + $0x1e8] ss:$16 sps:$4 sm:$0xff]  }
0x1488   :  { %7459 = vmatpush1.bf16.msra.mxu0 %v10346_v36  ;;  %v10391_v36 = vld [vmem:[%s15950_s5 + $0x20c] ss:$16 sps:$4 sm:$0xff]  }
0x1489   :  { %7460 = vmatprep.subr.bf16.mxu0 %v10347_v39  ;;  %7355 = vmatpush1.bf16.msra.mxu1 %v10348_v44 }
0x148a   :  { %7356 = vmatprep.subr.bf16.mxu1 %v10349_v24 }
0x148c   :  { %7461 = vmatpush1.bf16.msra.mxu0 %v10350_v56 }
0x148d   :  { %7462 = vmatprep.subr.bf16.mxu0 %v10351_v3  ;;  %7357 = vmatpush1.bf16.msra.mxu1 %v10352_v21 }
0x148e   :  { %7358 = vmatprep.subr.bf16.mxu1 %v10353_v47 }
0x1490   :  { %7463 = vmatpush1.bf16.msra.mxu0 %v10354_v23 }
0x1491   :  { %7464 = vmatprep.subr.bf16.mxu0 %v10355_v63  ;;  %7359 = vmatpush1.bf16.msra.mxu1 %v10356_v13 }
0x1492   :  { %7360 = vmatprep.subr.bf16.mxu1 %v10357_v26 }
0x1494   :  { %7465 = vmatpush1.bf16.msra.mxu0 %v10358_v52 }
0x1495   :  { %7466 = vmatprep.subr.bf16.mxu0 %v10359_v45  ;;  %7361 = vmatpush1.bf16.msra.mxu1 %v10360_v5  ;;  %v6703_v45 = vpop.permute.xlu0 %6702  ;;  %v6708_v5 = vpop.permute.xlu1 %6707 }
0x1496   :  { %7362 = vmatprep.subr.bf16.mxu1 %v10361_v35 }
0x1498   :  { %7467 = vmatpush1.bf16.msra.mxu0 %v10362_v38 }
0x1499   :  { %7468 = vmatprep.subr.bf16.mxu0 %v10363_v32  ;;  %7363 = vmatpush1.bf16.msra.mxu1 %v10364_v27  ;;  %v6713_v35 = vpop.permute.xlu0 %6712  ;;  %v6718_v32 = vpop.permute.xlu1 %6717 }
0x149a   :  { %7364 = vmatprep.subr.bf16.mxu1 %v10365_v12 }
0x149c   :  { %7469 = vmatpush1.bf16.msra.mxu0 %v10366_v49 }
0x149d   :  { %7470 = vmatprep.subr.bf16.mxu0 %v10367_v51  ;;  %7365 = vmatpush1.bf16.msra.mxu1 %v10368_v8 }
0x149e   :  { %7366 = vmatprep.subr.bf16.mxu1 %v10369_v25 }
0x14a0   :  { %7471 = vmatpush1.bf16.msra.mxu0 %v10370_v9 }
0x14a1   :  { %7472 = vmatprep.subr.bf16.mxu0 %v10371_v29  ;;  %7367 = vmatpush1.bf16.msra.mxu1 %v10372_v18 }
0x14a2   :  { %7368 = vmatprep.subr.bf16.mxu1 %v10373_v33 }
0x14a4   :  { %7473 = vmatpush1.bf16.msra.mxu0 %v10374_v17 }
0x14a5   :  { %7474 = vmatprep.subr.bf16.mxu0 %v10375_v34  ;;  %7369 = vmatpush1.bf16.msra.mxu1 %v10376_v19 }
0x14a6   :  { %7370 = vmatprep.subr.bf16.mxu1 %v10377_v11 }
0x14a8   :  { %7475 = vmatpush1.bf16.msra.mxu0 %v10378_v54 }
0x14a9   :  { %7476 = vmatprep.subr.bf16.mxu0 %v10379_v37  ;;  %7371 = vmatpush1.bf16.msra.mxu1 %v10380_v0 }
0x14aa   :  { %7372 = vmatprep.subr.bf16.mxu1 %v10381_v61 }
0x14ac   :  { %7477 = vmatpush1.bf16.msra.mxu0 %v10382_v6 }
0x14ad   :  { %7478 = vmatprep.subr.bf16.mxu0 %v10383_v43  ;;  %7373 = vmatpush1.bf16.msra.mxu1 %v10384_v16 }
0x14ae   :  { %7374 = vmatprep.subr.bf16.mxu1 %v10385_v50 }
0x14b0   :  { %7479 = vmatpush1.bf16.msra.mxu0 %v10386_v40 }
0x14b1   :  { %7480 = vmatprep.subr.bf16.mxu0 %v10387_v20  ;;  %7375 = vmatpush1.bf16.msra.mxu1 %v10388_v59 }
0x14b2   :  { %7397 = vmatprep.subr.bf16.mxu1 %v10389_v60 }
0x14b4   :  { %7481 = vmatpush1.bf16.msra.mxu0 %v10390_v30 }
0x14b5   :  { %7503 = vmatprep.subr.bf16.mxu0 %v10391_v36 }
0x1532   :  { %v9263_v39 = vpop.f32.mrb[88].mxu1 }
0x1533   :  { %v9264_v44 = vpop.f32.mrb[89].mxu1 }
0x1534   :  { %v9265_v24 = vadd.f32 %v9264_v44, %v9263_v39  ;;  %v9266_v56 = vpop.f32.mrb[90].mxu1 }
0x1535   :  { %v9267_v3 = vpop.f32.mrb[91].mxu1 }
0x1536   :  { %v9268_v21 = vadd.f32 %v9267_v3, %v9266_v56  ;;  %v6897_v12 = vadd.f32 %v9265_v24, %v6703_v45 }
0x1538   :  { %v6900_v29 = vadd.f32 %v9268_v21, %v6708_v5 }
0x153a   :  { %v9269_v47 = vpop.f32.mrb[92].mxu1 }
0x153b   :  { %v9270_v23 = vpop.f32.mrb[93].mxu1 }
0x153c   :  { %v9271_v63 = vadd.f32 %v9270_v23, %v9269_v47  ;;  %v9272_v13 = vpop.f32.mrb[94].mxu1 }
0x153d   :  { %v9273_v26 = vpop.f32.mrb[95].mxu1 }
0x153e   :  { %v9274_v52 = vadd.f32 %v9273_v26, %v9272_v13  ;;  %v6905_v38 = vadd.f32 %v9271_v63, %v6713_v35 }
0x1540   :  { %v6908_v8 = vadd.f32 %v9274_v52, %v6718_v32 }
0x1547   :  { %v9353_v27 = vpop.f32.mrb[96].mxu1 }
0x1548   :  { %v14867_v49 = vadd.f32 %v9353_v27, %v6905_v38  ;;  %v6945_v51 = vpop.f32.mrb[97].mxu1 }
0x1549   :  { %v14869_v25 = vadd.f32 %v6945_v51, %v6897_v12  ;;  %v9354_v9 = vpop.f32.mrb[98].mxu1 }
0x154a   :  { %v14871_v18 = vadd.f32 %v9354_v9, %v6908_v8  ;;  %v6843_v33 = vpop.f32.mrb[84].mxu0  ;;  %v6948_v17 = vpop.f32.mrb[99].mxu1  ;;  %v7053_v40 = vmul.f32 %v14867_v49, %v16129_v7 }
0x154b   :  { %v7049_v34 = vmul.f32 %v14869_v25, %v16129_v7  ;;  %v14875_v19 = vadd.f32 %v6948_v17, %v6900_v29  ;;  %v6845_v11 = vpop.f32.mrb[85].mxu0  ;;  %v9387_v47 = vadd.f32 %v6843_v33, %v6703_v45 }
0x154c   :  { %v14877_v54 = vadd.f32 %v6845_v11, %v6703_v45  ;;  %v6847_v37 = vpop.f32.mrb[86].mxu0  ;;  %v7055_v30 = vmul.f32 %v14871_v18, %v16129_v7 }
0x154d   :  { %7066 = vrot.lane.b32.xlu1 %v7049_v34, %s16130_s23  ;;  %v6849_v0 = vpop.f32.mrb[87].mxu0  ;;  %v7051_v43 = vmul.f32 %v14875_v19, %v16129_v7  ;;  %v9389_v39 = vadd.f32 %v6847_v37, %v6708_v5  ;;  %v6960_v13 = vmul.f32 %v9387_v47, %v16133_v15 }
0x154e   :  { %v14880_v61 = vadd.f32 %v6849_v0, %v6708_v5  ;;  %v7048_v6 = vmul.f32 %v14877_v54, %v16131_v58  ;;  %v6961_v21 = vmul.f32 %v14877_v54, %v16132_v31 }
0x154f   :  { %v6962_v24 = vmul.f32 %v9389_v39, %v16133_v15 }
0x1550   :  { %7064 = vrot.lane.b32.xlu0 %v7048_v6, %s16130_s23  ;;  %v7050_v50 = vmul.f32 %v14880_v61, %v16131_v58  ;;  %v6963_v36 = vmul.f32 %v14880_v61, %v16132_v31  ;;  %v6968_v23 = vsel %vm2496_vm15, %v6961_v21, 0.0 }
0x1551   :  { %7070 = vrot.lane.b32.xlu1 %v7051_v43, %s16130_s23  ;;  %v6969_v52 = vadd.f32 %v6968_v23, %v6960_v13 }
0x1552   :  { %v6853_v16 = vpop.f32.mrb[88].mxu0  ;;  %v6972_v44 = vsel %vm2496_vm15, %v6963_v36, 0.0 }
0x1553   :  { %v6855_v20 = vpop.f32.mrb[89].mxu0  ;;  %v6973_v56 = vadd.f32 %v6972_v44, %v6962_v24  ;;  %v14909_v26 = vadd.f32 %v6853_v16, %v6713_v35 }
0x1554   :  { %v6857_v59 = vpop.f32.mrb[90].mxu0  ;;  %7068 = vrot.lane.b32.xlu0 %v7050_v50, %s16130_s23  ;;  %v14901_v3 = vadd.f32 %v6855_v20, %v6713_v35 }
0x1555   :  { %v6859_v60 = vpop.f32.mrb[91].mxu0  ;;  %7074 = vrot.lane.b32.xlu1 %v7053_v40, %s16130_s23  ;;  %v6964_v38 = vmul.f32 %v14909_v26, %v16133_v15  ;;  %v14924_v8 = vadd.f32 %v6857_v59, %v6718_v32 }
0x1556   :  { %v6965_v63 = vmul.f32 %v14901_v3, %v16132_v31  ;;  %v14914_v12 = vadd.f32 %v6859_v60, %v6718_v32  ;;  %v7052_v45 = vmul.f32 %v14901_v3, %v16131_v58 }
0x1557   :  { %v6966_v29 = vmul.f32 %v14924_v8, %v16133_v15 }
0x1558   :  { %v6976_v5 = vsel %vm2496_vm15, %v6965_v63, 0.0  ;;  %v7054_v35 = vmul.f32 %v14914_v12, %v16131_v58  ;;  %v6967_v51 = vmul.f32 %v14914_v12, %v16132_v31 }
0x1559   :  { %7078 = vrot.lane.b32.xlu1 %v7055_v30, %s16130_s23  ;;  %v6977_v27 = vadd.f32 %v6976_v5, %v6964_v38 }
0x155a   :  { %v6980_v9 = vsel %vm2496_vm15, %v6967_v51, 0.0 }
0x155b   :  { %v6981_v33 = vadd.f32 %v6980_v9, %v6966_v29 }
0x1573   :  { %6974 = vadd.xlane.f32.xlu0 %v6973_v56 }
0x157d   :  { %6970 = vadd.xlane.f32.xlu1 %v6969_v52 }
0x1581   :  { %6978 = vadd.xlane.f32.xlu1 %v6977_v27 }
0x1589   :  { %7072 = vrot.lane.b32.xlu0 %v7052_v45, %s16130_s23 }
0x158d   :  { %7076 = vrot.lane.b32.xlu0 %v7054_v35, %s16130_s23 }
0x15ac   :  { %6982 = vadd.xlane.f32.xlu0 %v6981_v33 }
0x15bf   :  { %v7067_v17 = vpop.permute.xlu1 %7066 }
0x15c0   :  { %v7092_v11 = vsel %vm2496_vm15, %v7067_v17, 0.0 }
0x15c2   :  { %v7065_v34 = vpop.permute.xlu0 %7064 }
0x15c3   :  { %v7080_v37 = vsel %vm16232_vm5, %v7065_v34, %v7067_v17  ;;  %v7071_v6 = vpop.permute.xlu1 %7070  ;;  %vm16239_vm5 = vmmov %vm16234_vm1 }
0x15c4   :  { %v7093_v0 = vadd.f32 %v7092_v11, %v7080_v37  ;;  %v7096_v32 = vsel %vm2496_vm15, %v7071_v6, 0.0 }
0x15c6   :  { %v7069_v43 = vpop.permute.xlu0 %7068  ;;  %7094 = vadd.xlane.f32.xlu0 %v7093_v0 }
0x15c7   :  { %v7081_v16 = vsel %vm16233_vm10, %v7069_v43, %v7071_v6  ;;  %v7075_v40 = vpop.permute.xlu1 %7074  ;;  %vm16240_vm10 = vcmask 678912  }
0x15c8   :  { %v7097_v50 = vadd.f32 %v7096_v32, %v7081_v16  ;;  %v7100_v44 = vsel %vm2496_vm15, %v7075_v40, 0.0 }
0x15ca   :  { %7098 = vadd.xlane.f32.xlu1 %v7097_v50 }
0x15cb   :  { %v7079_v23 = vpop.permute.xlu1 %7078 }
0x15cc   :  { %v7104_v5 = vsel %vm2496_vm15, %v7079_v23, 0.0 }
0x1600   :  { %v6975_v20 = vpop.xlane.xlu0 %6974 }
0x1601   :  { %v6985_v59 = vmul.f32 0.0069444445, %v6975_v20 }
0x1603   :  { %v6990_v60 = vsub.f32 %v9389_v39, %v6985_v59  ;;  %v6991_v30 = vsub.f32 %v14880_v61, %v6985_v59 }
0x1604   :  { %v7073_v36 = vpop.permute.xlu0 %7072 }
0x1605   :  { %v14936_v24 = vmul.f32 %v6990_v60, %v16133_v15  ;;  %v14939_v56 = vmul.f32 %v6991_v30, %v16132_v31  ;;  %v7082_v21 = vsel %vm16234_vm1, %v7073_v36, %v7075_v40  ;;  %vm16241_vm1 = vcmask 924672  }
0x1606   :  { %v7101_v63 = vadd.f32 %v7100_v44, %v7082_v21 }
0x1607   :  { %v7006_v13 = vmul.f32 %v14936_v24, %v14936_v24  ;;  %v7007_v39 = vmul.f32 %v14939_v56, %v14939_v56 }
0x1608   :  { %v7077_v52 = vpop.permute.xlu0 %7076  ;;  %7102 = vadd.xlane.f32.xlu0 %v7101_v63 }
0x1609   :  { %v7083_v38 = vsel %vm16235_vm4, %v7077_v52, %v7079_v23  ;;  %v7016_v27 = vsel %vm2496_vm15, %v7007_v39, 0.0  ;;  %vm16242_vm4 = vmmov %vm16241_vm1 }
0x160a   :  { %v7105_v45 = vadd.f32 %v7104_v5, %v7083_v38  ;;  %v6971_v35 = vpop.xlane.xlu1 %6970  ;;  %v7017_v51 = vadd.f32 %v7016_v27, %v7006_v13 }
0x160b   :  { %v6984_v9 = vmul.f32 0.0069444445, %v6971_v35 }
0x160c   :  { %7018 = vadd.xlane.f32.xlu1 %v7017_v51  ;;  %7106 = vadd.xlane.f32.xlu0 %v7105_v45 }
0x160d   :  { %v6988_v29 = vsub.f32 %v9387_v47, %v6984_v9  ;;  %v6989_v33 = vsub.f32 %v14877_v54, %v6984_v9 }
0x160e   :  { %v6979_v47 = vpop.xlane.xlu1 %6978 }
0x160f   :  { %v14951_v17 = vmul.f32 %v6988_v29, %v16133_v15  ;;  %v14954_v34 = vmul.f32 %v6989_v33, %v16132_v31 }
0x1611   :  { %v7004_v11 = vmul.f32 %v14951_v17, %v14951_v17  ;;  %v7005_v37 = vmul.f32 %v14954_v34, %v14954_v34 }
0x1613   :  { %v7012_v0 = vsel %vm2496_vm15, %v7005_v37, 0.0 }
0x1614   :  { %v7013_v6 = vadd.f32 %v7012_v0, %v7004_v11  ;;  %v6986_v0 = vmul.f32 0.0069444445, %v6979_v47 }
0x1616   :  { %7014 = vadd.xlane.f32.xlu0 %v7013_v6 }
0x1639   :  { %v6983_v43 = vpop.xlane.xlu0 %6982 }
0x163a   :  { %v6987_v37 = vmul.f32 0.0069444445, %v6983_v43 }
0x1653   :  { %v7095_v32 = vpop.xlane.xlu0 %7094 }
0x1654   :  { %v7108_v16 = vmul.f32 0.0069444445, %v7095_v32  ;;  %v6993_v32 = vsub.f32 %v14901_v3, %v6986_v0 }
0x1656   :  { %v7112_v50 = vsub.f32 %v14877_v54, %v7108_v16  ;;  %v7113_v40 = vsub.f32 %v14869_v25, %v7108_v16  ;;  %v15030_v43 = vmul.f32 %v6993_v32, %v16132_v31 }
0x1657   :  { %v7099_v20 = vpop.xlane.xlu1 %7098 }
0x1658   :  { %v14964_v59 = vmul.f32 %v7112_v50, %v16131_v58  ;;  %v14967_v60 = vmul.f32 %v7113_v40, %v16129_v7  ;;  %v7109_v30 = vmul.f32 0.0069444445, %v7099_v20  ;;  %v6992_v40 = vsub.f32 %v14909_v26, %v6986_v0 }
0x165a   :  { %v7114_v36 = vsub.f32 %v14880_v61, %v7109_v30  ;;  %v7115_v44 = vsub.f32 %v14875_v19, %v7109_v30  ;;  %v7128_v21 = vmul.f32 %v14964_v59, %v14964_v59  ;;  %v7129_v54 = vmul.f32 %v14967_v60, %v14967_v60 }
0x165b   :  { %v15036_v47 = vmul.f32 %v6992_v40, %v16133_v15 }
0x165c   :  { %v14976_v25 = vmul.f32 %v7114_v36, %v16131_v58  ;;  %7144 = vrot.lane.b32.xlu1 %v7128_v21, %s16130_s23  ;;  %7146 = vrot.lane.b32.xlu0 %v7129_v54, %s16130_s23  ;;  %v14981_v23 = vmul.f32 %v7115_v44, %v16129_v7 }
0x165d   :  { %v7008_v30 = vmul.f32 %v15036_v47, %v15036_v47 }
0x165e   :  { %v7130_v61 = vmul.f32 %v14976_v25, %v14976_v25  ;;  %v7131_v19 = vmul.f32 %v14981_v23, %v14981_v23 }
0x1660   :  { %7148 = vrot.lane.b32.xlu1 %v7130_v61, %s16130_s23 }
0x1664   :  { %7150 = vrot.lane.b32.xlu1 %v7131_v19, %s16130_s23 }
0x1695   :  { %v7103_v63 = vpop.xlane.xlu0 %7102 }
0x1696   :  { %v7110_v13 = vmul.f32 0.0069444445, %v7103_v63 }
0x1698   :  { %v7116_v39 = vsub.f32 %v14901_v3, %v7110_v13  ;;  %v7117_v52 = vsub.f32 %v14867_v49, %v7110_v13  ;;  %v7009_v3 = vmul.f32 %v15030_v43, %v15030_v43 }
0x1699   :  { %v7107_v5 = vpop.xlane.xlu0 %7106 }
0x169a   :  { %v14992_v38 = vmul.f32 %v7116_v39, %v16131_v58  ;;  %v14995_v27 = vmul.f32 %v7117_v52, %v16129_v7  ;;  %v7111_v45 = vmul.f32 0.0069444445, %v7107_v5  ;;  %v7020_v26 = vsel %vm2496_vm15, %v7009_v3, 0.0 }
0x169c   :  { %v7118_v35 = vsub.f32 %v14914_v12, %v7111_v45  ;;  %v7119_v51 = vsub.f32 %v14871_v18, %v7111_v45  ;;  %v7132_v9 = vmul.f32 %v14992_v38, %v14992_v38  ;;  %v7133_v29 = vmul.f32 %v14995_v27, %v14995_v27 }
0x169e   :  { %v15004_v49 = vmul.f32 %v7118_v35, %v16131_v58  ;;  %v15007_v33 = vmul.f32 %v7119_v51, %v16129_v7  ;;  %7152 = vrot.lane.b32.xlu0 %v7132_v9, %s16130_s23  ;;  %7154 = vrot.lane.b32.xlu1 %v7133_v29, %s16130_s23  ;;  %v6995_v58 = vsub.f32 %v14914_v12, %v6987_v37 }
0x169f   :  { %v6994_v7 = vsub.f32 %v14924_v8, %v6987_v37 }
0x16a0   :  { %v7134_v11 = vmul.f32 %v15004_v49, %v15004_v49  ;;  %v7135_v18 = vmul.f32 %v15007_v33, %v15007_v33  ;;  %v15020_v6 = vmul.f32 %v6995_v58, %v16132_v31  ;;  %v7021_v31 = vadd.f32 %v7020_v26, %v7008_v30 }
0x16a1   :  { %v15024_v16 = vmul.f32 %v6994_v7, %v16133_v15  ;;  %v7019_v15 = vpop.xlane.xlu1 %7018 }
0x16a2   :  { %7156 = vrot.lane.b32.xlu0 %v7134_v11, %s16130_s23  ;;  %7158 = vrot.lane.b32.xlu1 %v7135_v18, %s16130_s23  ;;  %v7011_v50 = vmul.f32 %v15020_v6, %v15020_v6  ;;  %v7029_v18 = vmul.f32 0.0069444445, %v7019_v15  ;;  %s16248_s23 = smov 111  }
0x16a3   :  { %v7010_v12 = vmul.f32 %v15024_v16, %v15024_v16 }
0x16a4   :  { %v7024_v8 = vsel %vm2496_vm15, %v7011_v50, 0.0  ;;  %v7033_v7 = vadd.f32 1e-05, %v7029_v18 }
0x16a5   :  { %v7025_v20 = vadd.f32 %v7024_v8, %v7010_v12 }
0x16a6   :  { %10170 = vrsqrt.f32 %v7033_v7 }
0x16b0   :  { %v10171_v30 = vpop.eup %10170 }
0x16c1   :  { %7026 = vadd.xlane.f32.xlu0 %v7025_v20 }
0x16c6   :  { %7022 = vadd.xlane.f32.xlu1 %v7021_v31 }
0x16d7   :  { %7254 = vrot.lane.b32.xlu0 %v13410_v2, %s10446_s13  ;;  %7252 = vrot.lane.b32.xlu1 %v13412_v62, %s10446_s13  ;;  %v7015_v2 = vpop.xlane.xlu0 %7014 }
0x16d8   :  { %v7028_v58 = vmul.f32 0.0069444445, %v7015_v2 }
0x16da   :  { %v7032_v32 = vadd.f32 1e-05, %v7028_v58 }
0x16db   :  { %7222 = vrot.lane.b32.xlu0 %v13412_v62, %s16202_s3  ;;  %7256 = vrot.lane.b32.xlu1 %v13426_v1, %s10446_s13 }
0x16dc   :  { %10172 = vrsqrt.f32 %v7032_v32 }
0x16df   :  { %7220 = vrot.lane.b32.xlu0 %v13408_v14, %s16202_s3  ;;  %7258 = vrot.lane.b32.xlu1 %v13416_v57, %s10446_s13  ;;  %v7145_v14 = vpop.permute.xlu1 %7144  ;;  %v7147_v57 = vpop.permute.xlu0 %7146 }
0x16e0   :  { %v7172_v36 = vsel %vm2496_vm15, %v7147_v57, 0.0  ;;  %v7160_v44 = vsel %vm16236_vm6, %v7145_v14, %v7147_v57  ;;  %v7042_v57 = vmul.f32 %v10171_v30, %v14936_v24  ;;  %vm16243_vm6 = vmmov %vm16240_vm10 }
0x16e3   :  { %7260 = vrot.lane.b32.xlu0 %v13446_v22, %s10446_s13  ;;  %7226 = vrot.lane.b32.xlu1 %v13426_v1, %s16202_s3  ;;  %v7149_v62 = vpop.permute.xlu1 %7148  ;;  %v7173_v1 = vadd.f32 %v7172_v36, %v7160_v44 }
0x16e6   :  { %v10173_v31 = vpop.eup %10172 }
0x16e7   :  { %7224 = vrot.lane.b32.xlu1 %v13414_v53, %s16202_s3  ;;  %v7151_v21 = vpop.permute.xlu1 %7150 }
0x16e8   :  { %v7161_v54 = vsel %vm16237_vm8, %v7149_v62, %v7151_v21  ;;  %v7176_v53 = vsel %vm2496_vm15, %v7151_v21, 0.0  ;;  %v7041_v62 = vmul.f32 %v10173_v31, %v14954_v34  ;;  %v7040_v21 = vmul.f32 %v10173_v31, %v14951_v17  ;;  %v10400_v31 = vld [vmem:[%s15950_s5 + $0x240] ss:$16 sps:$4 sm:$0xff]  }
0x16eb   :  { %7262 = vrot.lane.b32.xlu1 %v13440_v55, %s10446_s13  ;;  %v7177_v55 = vadd.f32 %v7176_v53, %v7161_v54 }
0x16ef   :  { %7266 = vrot.lane.b32.xlu1 %v13450_v46, %s10446_s13 }
0x1702   :  { %7174 = vadd.xlane.f32.xlu0 %v7173_v1 }
0x1706   :  { %7178 = vadd.xlane.f32.xlu0 %v7177_v55 }
0x1710   :  { %v7153_v61 = vpop.permute.xlu0 %7152  ;;  %v7155_v19 = vpop.permute.xlu1 %7154 }
0x1711   :  { %v7162_v46 = vsel %vm16238_vm9, %v7153_v61, %v7155_v19  ;;  %v7180_v63 = vsel %vm2496_vm15, %v7155_v19, 0.0 }
0x1712   :  { %v7181_v13 = vadd.f32 %v7180_v63, %v7162_v46  ;;  %v7043_v46 = vmul.f32 %v10171_v30, %v14939_v56  ;;  %v10399_v30 = vld [vmem:[%s15950_s5 + $0x24c] ss:$16 sps:$4 sm:$0xff]  }
0x1714   :  { %7182 = vadd.xlane.f32.xlu1 %v7181_v13  ;;  %v7157_v39 = vpop.permute.xlu0 %7156  ;;  %v7159_v52 = vpop.permute.xlu1 %7158 }
0x1715   :  { %v7163_v5 = vsel %vm16239_vm5, %v7157_v39, %v7159_v52  ;;  %v7184_v45 = vsel %vm2496_vm15, %v7159_v52, 0.0 }
0x1716   :  { %v7185_v35 = vadd.f32 %v7184_v45, %v7163_v5 }
0x171c   :  { %7264 = vrot.lane.b32.xlu0 %v13460_v48, %s10446_s13 }
0x1725   :  { %7234 = vrot.lane.b32.xlu1 %v13460_v48, %s16202_s3 }
0x1729   :  { %7232 = vrot.lane.b32.xlu1 %v13448_v4, %s16202_s3 }
0x173b   :  { %7186 = vadd.xlane.f32.xlu0 %v7185_v35 }
0x174e   :  { %v15083_v51 = vpop.xlane.xlu0 %7026 }
0x1751   :  { %7230 = vrot.lane.b32.xlu0 %v13446_v22, %s16202_s3 }
0x1752   :  { %v7255_v48 = vpop.permute.xlu0 %7254 }
0x1753   :  { %v15085_v9 = vpop.xlane.xlu1 %7022 }
0x1755   :  { %7228 = vrot.lane.b32.xlu0 %v13438_v10, %s16202_s3 }
0x1756   :  { %v7223_v4 = vpop.permute.xlu0 %7222 }
0x1757   :  { %v7253_v29 = vpop.permute.xlu1 %7252 }
0x1758   :  { %v7268_v14 = vsel %vm16240_vm10, %v7253_v29, %v7255_v48 }
0x1759   :  { %v7280_v54 = vsel %vm2496_vm15, %v7223_v4, %v7268_v14  ;;  %v10402_v14 = vld [vmem:[%s15950_s5 + $0x264] ss:$16 sps:$4 sm:$0xff]  }
0x175a   :  { %v7221_v11 = vpop.permute.xlu0 %7220 }
0x175b   :  { %v7257_v37 = vpop.permute.xlu1 %7256  ;;  %v7236_v1 = vsel %vm16242_vm4, %v7221_v11, %v7223_v4 }
0x175c   :  { %v7284_v63 = vadd.f32 %v7236_v1, %v7040_v21  ;;  %v10407_v21 = vld [vmem:[%s15950_s5 + $0x28c] ss:$16 sps:$4 sm:$0x3f]  }
0x175e   :  { %v15087_v0 = vpop.permute.xlu0 %7260  ;;  %v7308_v56 = vmul.f32 0.2, %v7284_v63 }
0x175f   :  { %v7259_v50 = vpop.permute.xlu1 %7258 }
0x1760   :  { %v7269_v24 = vsel %vm16243_vm6, %v7257_v37, %v7259_v50 }
0x1763   :  { %v7227_v3 = vpop.permute.xlu1 %7226 }
0x1764   :  { %v7281_v17 = vsel %vm2496_vm15, %v7227_v3, %v7269_v24 }
0x1767   :  { %v7225_v26 = vpop.permute.xlu1 %7224 }
0x1768   :  { %v7237_v2 = vsel %vm16241_vm1, %v7225_v26, %v7227_v3  ;;  %vm7296_vm1 = vcmp.ge.f32.partialorder %v7284_v63, 0.0  ;;  %v10397_v3 = vld [vmem:[%s15950_s5 + $0x228] ss:$16 sps:$4 sm:$0xff]  }
0x1769   :  { %v7287_v53 = vadd.f32 %v7237_v2, %v7042_v57  ;;  %v7320_v58 = vsel %vm7296_vm1, %v7284_v63, %v7308_v56  ;;  %v10403_v2 = vld [vmem:[%s15950_s5 + $0x26c] ss:$16 sps:$4 sm:$0xff]   ;;  %v10404_v57 = vld [vmem:[%s15950_s5 + $0x260] ss:$16 sps:$4 sm:$0xff]  }
0x176b   :  { %v7311_v13 = vmul.f32 0.2, %v7287_v53  ;;  %vm7299_vm8 = vcmp.ge.f32.partialorder %v7287_v53, 0.0 }
0x176d   :  { %v7323_v4 = vsel %vm7299_vm8, %v7287_v53, %v7311_v13  ;;  %v7031_v53 = vmul.f32 0.0069444445, %v15083_v51 }
0x176e   :  { %v7332_v32 = vpack.c.bf16 %v7323_v4, %v7320_v58 }
0x178f   :  { %v7175_v22 = vpop.xlane.xlu0 %7174 }
0x1790   :  { %v7188_v40 = vmul.f32 0.0069444445, %v7175_v22  ;;  %v10393_v22 = vld [vmem:[%s15950_s5 + $0x208] ss:$16 sps:$4 sm:$0xff]  }
0x1792   :  { %v7192_v10 = vadd.f32 1e-05, %v7188_v40  ;;  %v15113_v40 = vpop.permute.xlu1 %7262 }
0x1793   :  { %v7179_v12 = vpop.xlane.xlu0 %7178 }
0x1794   :  { %10174 = vrsqrt.f32 %v7192_v10  ;;  %v7189_v8 = vmul.f32 0.0069444445, %v7179_v12  ;;  %v10394_v10 = vld [vmem:[%s15950_s5 + $0x224] ss:$16 sps:$4 sm:$0xff]   ;;  %v10395_v12 = vld [vmem:[%s15950_s5 + $0x22c] ss:$16 sps:$4 sm:$0xff]  }
0x1796   :  { %v7193_v20 = vadd.f32 1e-05, %v7189_v8  ;;  %v10396_v8 = vld [vmem:[%s15950_s5 + $0x220] ss:$16 sps:$4 sm:$0xff]   ;;  %v15133_v26 = vpop.permute.xlu1 %7266 }
0x1798   :  { %10176 = vrsqrt.f32 %v7193_v20  ;;  %v10398_v20 = vld [vmem:[%s15950_s5 + $0x244] ss:$16 sps:$4 sm:$0xff]  }
0x179e   :  { %v10175_v15 = vpop.eup %10174 }
0x179f   :  { %v7200_v36 = vmul.f32 %v10175_v15, %v14964_v59  ;;  %v7201_v44 = vmul.f32 %v10175_v15, %v14967_v60  ;;  %v10401_v15 = vld [vmem:[%s15950_s5 + $0x248] ss:$16 sps:$4 sm:$0xff]  }
0x17a1   :  { %v7286_v55 = vadd.f32 %v7255_v48, %v7201_v44  ;;  %v7208_v61 = vsel %vm2496_vm15, %v7041_v62, %v7200_v36  ;;  %v7183_v62 = vpop.xlane.xlu1 %7182  ;;  %v10405_v36 = vld [vmem:[%s15950_s5 + $0x268] ss:$16 sps:$4 sm:$0xff]   ;;  %v10406_v44 = vld [vmem:[%s15950_s5 + $0x284] ss:$16 sps:$4 sm:$0x3f]  }
0x17a2   :  { %v10177_v19 = vpop.eup %10176  ;;  %v7285_v34 = vadd.f32 %v7280_v54, %v7208_v61  ;;  %v7190_v1 = vmul.f32 0.0069444445, %v7183_v62  ;;  %v7030_v54 = vmul.f32 0.0069444445, %v15085_v9 }
0x17a3   :  { %v7202_v59 = vmul.f32 %v10177_v19, %v14976_v25  ;;  %v7203_v60 = vmul.f32 %v10177_v19, %v14981_v23  ;;  %v7310_v39 = vmul.f32 0.2, %v7286_v55  ;;  %vm7298_vm9 = vcmp.ge.f32.partialorder %v7286_v55, 0.0  ;;  %v7265_v19 = vpop.permute.xlu0 %7264 }
0x17a4   :  { %v7309_v35 = vmul.f32 0.2, %v7285_v34  ;;  %vm7297_vm10 = vcmp.ge.f32.partialorder %v7285_v34, 0.0  ;;  %v7034_v61 = vadd.f32 1e-05, %v7030_v54 }
0x17a5   :  { %v7289_v52 = vadd.f32 %v7259_v50, %v7203_v60  ;;  %v7209_v5 = vsel %vm2496_vm15, %v7043_v46, %v7202_v59  ;;  %v7322_v23 = vsel %vm7298_vm9, %v7286_v55, %v7310_v39  ;;  %v10392_v50 = vld [vmem:[%s15950_s5 + $0x200] ss:$16 sps:$4 sm:$0xff]   ;;  %v7194_v55 = vadd.f32 1e-05, %v7190_v1  ;;  %v7235_v59 = vpop.permute.xlu1 %7234  ;;  %s10456_s5 = smov 81  }
0x17a6   :  { %v7288_v45 = vadd.f32 %v7281_v17, %v7209_v5  ;;  %v7321_v11 = vsel %vm7297_vm10, %v7285_v34, %v7309_v35  ;;  %v7035_v46 = vadd.f32 1e-05, %v7031_v53 }
0x17a7   :  { %vm7301_vm5 = vcmp.ge.f32.partialorder %v7289_v52, 0.0  ;;  %v7313_v48 = vmul.f32 0.2, %v7289_v52  ;;  %10178 = vrsqrt.f32 %v7194_v55 }
0x17a8   :  { %vm7300_vm4 = vcmp.ge.f32.partialorder %v7288_v45, 0.0  ;;  %v7312_v25 = vmul.f32 0.2, %v7288_v45  ;;  %10180 = vrsqrt.f32 %v7034_v61 }
0x17a9   :  { %v7325_v29 = vsel %vm7301_vm5, %v7289_v52, %v7313_v48  ;;  %10182 = vrsqrt.f32 %v7035_v46  ;;  %v7233_v13 = vpop.permute.xlu1 %7232 }
0x17aa   :  { %v7324_v18 = vsel %vm7300_vm4, %v7288_v45, %v7312_v25  ;;  %v15105_v37 = vpack.c.bf16 %v7325_v29, %v7322_v23 }
0x17ab   :  { %v7333_v7 = vpack.c.bf16 %v7324_v18, %v7321_v11 }
0x17ad   :  { %7376 = vmatprep.mubr.bf16.mxu1 %v7333_v7  ;;  %7482 = vmatprep.mubr.bf16.mxu0 %v7333_v7 }
0x17ae   :  { %7377 = vmatmul.mubr.bf16.vlgmr.msra.gmra.mrb[100].mxu1 %v7332_v32  ;;  %7483 = vmatmul.mubr.bf16.vlgmr.msra.gmra.mrb[92].mxu0 %v7332_v32 }
0x17af   :  { %7398 = vmatpush1.bf16.msra.mxu1 %v10392_v50  ;;  %7504 = vmatpush1.bf16.msra.mxu0 %v10393_v22 }
0x17b0   :  { %7399 = vmatprep.subr.bf16.mxu1 %v10394_v10  ;;  %7505 = vmatprep.subr.bf16.mxu0 %v10395_v12 }
0x17b1   :  { %v10179_v9 = vpop.eup %10178 }
0x17b3   :  { %7400 = vmatpush1.bf16.msra.mxu1 %v10396_v8  ;;  %7506 = vmatpush1.bf16.msra.mxu0 %v10397_v3 }
0x17b4   :  { %7401 = vmatprep.subr.bf16.mxu1 %v10398_v20  ;;  %7507 = vmatprep.subr.bf16.mxu0 %v10399_v30  ;;  %v7205_v20 = vmul.f32 %v10179_v9, %v14995_v27 }
0x17b7   :  { %7402 = vmatpush1.bf16.msra.mxu1 %v10400_v31  ;;  %7508 = vmatpush1.bf16.msra.mxu0 %v10401_v15  ;;  %v7292_v31 = vadd.f32 %v15113_v40, %v7205_v20 }
0x17b8   :  { %7403 = vmatprep.subr.bf16.mxu1 %v10402_v14  ;;  %7509 = vmatprep.subr.bf16.mxu0 %v10403_v2 }
0x17b9   :  { %v7316_v27 = vmul.f32 0.2, %v7292_v31 }
0x17bb   :  { %7404 = vmatpush1.bf16.msra.mxu1 %v10404_v57  ;;  %7510 = vmatpush1.bf16.msra.mxu0 %v10405_v36 }
0x17bc   :  { %9071 = vmatprep.subr.msk.bf16.mxu1 %vm3885_vm12, %v10406_v44  ;;  %9074 = vmatprep.subr.msk.bf16.mxu0 %vm3885_vm12, %v10407_v21  ;;  %vm16244_vm12 = vmmov %vm16243_vm6  ;;  %vm16245_vm6 = vcmask 924672  }
0x17bd   :  { %v7270_v39 = vsel %vm16244_vm12, %v15087_v0, %v15113_v40  ;;  %vm16246_vm8 = vmmov %vm16245_vm6 }
0x17be   :  { %v7239_v56 = vsel %vm16246_vm8, %v7233_v13, %v7235_v59  ;;  %vm16247_vm9 = vmmov %vm16244_vm12  ;;  %vm16252_vm8 = vcmask 187392  }
0x17bf   :  { %7406 = vmatpush1.bf16.msra.mxu1 %v16158_v41  ;;  %7512 = vmatpush1.bf16.msra.mxu0 %v16159_v28  ;;  %v10181_v41 = vpop.eup %10180  ;;  %v7204_v28 = vmul.f32 %v10179_v9, %v14992_v38 }
0x17c0   :  { %v10183_v51 = vpop.eup %10182  ;;  %v7045_v5 = vmul.f32 %v10181_v41, %v15030_v43  ;;  %v7044_v35 = vmul.f32 %v10181_v41, %v15036_v47  ;;  %v7271_v43 = vsel %vm16247_vm9, %v7265_v19, %v15133_v26 }
0x17c1   :  { %v7046_v48 = vmul.f32 %v10183_v51, %v15024_v16  ;;  %v7047_v29 = vmul.f32 %v10183_v51, %v15020_v6  ;;  %v7283_v18 = vsel %vm2496_vm15, %v7235_v59, %v7271_v43 }
0x17c2   :  { %v7210_v25 = vsel %vm2496_vm15, %v7045_v5, %v7204_v28 }
0x17c3   :  { %v7293_v0 = vadd.f32 %v7239_v56, %v7046_v48 }
0x17c5   :  { %v7317_v32 = vmul.f32 0.2, %v7293_v0  ;;  %vm7305_vm4 = vcmp.ge.f32.partialorder %v7293_v0, 0.0 }
0x17c7   :  { %v7329_v12 = vsel %vm7305_vm4, %v7293_v0, %v7317_v32  ;;  %vm16258_vm4 = vmmov %vm16252_vm8 }
0x17c8   :  { %v7187_v34 = vpop.xlane.xlu0 %7186 }
0x17c9   :  { %v7191_v63 = vmul.f32 0.0069444445, %v7187_v34 }
0x17cb   :  { %v7195_v24 = vadd.f32 1e-05, %v7191_v63 }
0x17cc   :  { %v7231_v60 = vpop.permute.xlu0 %7230 }
0x17cd   :  { %10184 = vrsqrt.f32 %v7195_v24  ;;  %v7282_v45 = vsel %vm2496_vm15, %v7231_v60, %v7270_v39 }
0x17ce   :  { %v7291_v23 = vadd.f32 %v7282_v45, %v7210_v25 }
0x17d0   :  { %v7229_v17 = vpop.permute.xlu0 %7228  ;;  %v7315_v7 = vmul.f32 0.2, %v7291_v23  ;;  %vm7303_vm10 = vcmp.ge.f32.partialorder %v7291_v23, 0.0 }
0x17d1   :  { %v7238_v52 = vsel %vm16245_vm6, %v7229_v17, %v7231_v60  ;;  %vm7304_vm6 = vcmp.ge.f32.partialorder %v7292_v31, 0.0 }
0x17d2   :  { %v7290_v38 = vadd.f32 %v7238_v52, %v7044_v35  ;;  %v7327_v22 = vsel %vm7303_vm10, %v7291_v23, %v7315_v7  ;;  %v7328_v14 = vsel %vm7304_vm6, %v7292_v31, %v7316_v27  ;;  %vm16256_vm10 = vmmov %vm16252_vm8 }
0x17d3   :  { %vm16262_vm6 = vmmov %vm16258_vm4 }
0x17d4   :  { %v7314_v47 = vmul.f32 0.2, %v7290_v38  ;;  %vm7302_vm5 = vcmp.ge.f32.partialorder %v7290_v38, 0.0 }
0x17d6   :  { %v7326_v6 = vsel %vm7302_vm5, %v7290_v38, %v7314_v47  ;;  %vm16255_vm5 = vcmask 809984  }
0x17d7   :  { %v10185_v4 = vpop.eup %10184  ;;  %v7335_v8 = vpack.c.bf16 %v7329_v12, %v7326_v6  ;;  %v15423_v6 = vld [vmem:[%s15951_s8] sm:$0xff] }
0x17d8   :  { %v7206_v11 = vmul.f32 %v10185_v4, %v15004_v49  ;;  %v7207_v3 = vmul.f32 %v10185_v4, %v15007_v33 }
0x17da   :  { %v7211_v58 = vsel %vm2496_vm15, %v7047_v29, %v7206_v11  ;;  %v7295_v30 = vadd.f32 %v15133_v26, %v7207_v3 }
0x17db   :  { %v7294_v16 = vadd.f32 %v7283_v18, %v7211_v58 }
0x17dc   :  { %v7319_v15 = vmul.f32 0.2, %v7295_v30  ;;  %vm7307_vm12 = vcmp.ge.f32.partialorder %v7295_v30, 0.0 }
0x17dd   :  { %vm7306_vm1 = vcmp.ge.f32.partialorder %v7294_v16, 0.0  ;;  %v7318_v50 = vmul.f32 0.2, %v7294_v16 }
0x17de   :  { %v7331_v33 = vsel %vm7307_vm12, %v7295_v30, %v7319_v15  ;;  %vm7939_vm12 = vcmask 424960  }
0x17df   :  { %v7330_v10 = vsel %vm7306_vm1, %v7294_v16, %v7318_v50  ;;  %v7337_v2 = vpack.c.bf16 %v7331_v33, %v7328_v14  ;;  %vm7906_vm1 = vcmask 433152  }
0x17e0   :  { %v7336_v49 = vpack.c.bf16 %v7330_v10, %v7327_v22  ;;  %v9078_v10 = vcombine.high %v15423_v6, %v15423_v6 }
0x17e2   :  { %7386 = vmatprep.mubr.bf16.mxu1 %v7336_v49  ;;  %7492 = vmatprep.mubr.bf16.mxu0 %v7336_v49 }
0x17e3   :  { %7387 = vmatmul.mubr.bf16.gmra.mrb[104].mxu1 %v7335_v8  ;;  %7493 = vmatmul.mubr.bf16.gmra.mrb[96].mxu0 %v7335_v8 }
0x17e4   :  { %7429 = vmatprep.mubr.bf16.mxu1 %v16084_v42  ;;  %7535 = vmatprep.mubr.bf16.mxu0 %v16084_v42 }
0x17eb   :  { %9072 = vmatmul.mubr.msk.bf16.vlgmr.msra.gmra.mrb[100].mxu1 %vm3878_vm0, %v15105_v37  ;;  %9075 = vmatmul.mubr.msk.bf16.vlgmr.msra.gmra.mrb[92].mxu0 %vm3878_vm0, %v15105_v37 }
0x17ec   :  { %7439 = vmatprep.mubr.bf16.mxu1 %v16084_v42  ;;  %7545 = vmatprep.mubr.bf16.mxu0 %v16084_v42 }
0x17f3   :  { %9073 = vmatmul.mubr.msk.bf16.gmra.mrb[104].mxu1 %vm3878_vm0, %v7337_v2  ;;  %9076 = vmatmul.mubr.msk.bf16.gmra.mrb[96].mxu0 %vm3878_vm0, %v7337_v2  ;;  %vm16251_vm0 = vmmov %vm16247_vm9  ;;  %vm16254_vm9 = vcmask 441344  }
0x17f4   :  { %8243 = vmatprep.mubr.bf16.mxu0 %v9078_v10  ;;  %8161 = vmatprep.mubr.bf16.mxu1 %v9078_v10 }
0x18be   :  { %v7431_v40 = vpop.f32.mrb[100].mxu1  ;;  %v7537_v26 = vpop.f32.mrb[92].mxu0 }
0x18bf   :  { %v7433_v62 = vpop.f32.mrb[101].mxu1  ;;  %v7539_v57 = vpop.f32.mrb[93].mxu0 }
0x18c0   :  { %v7435_v36 = vpop.f32.mrb[102].mxu1  ;;  %v7541_v37 = vpop.f32.mrb[94].mxu0 }
0x18c1   :  { %v15196_v44 = vpack.c.bf16 %v7435_v36, %v7431_v40  ;;  %v15198_v21 = vpack.c.bf16 %v7541_v37, %v7537_v26  ;;  %v7437_v1 = vpop.f32.mrb[103].mxu1  ;;  %v7543_v54 = vpop.f32.mrb[95].mxu0 }
0x18c2   :  { %v15200_v53 = vpack.c.bf16 %v7437_v1, %v7433_v62  ;;  %v15202_v55 = vpack.c.bf16 %v7543_v54, %v7539_v57 }
0x18c3   :  { %7570 = vrot.lane.b32.xlu1 %v15198_v21, %s10446_s13 }
0x18c4   :  { %7568 = vrot.lane.b32.xlu0 %v15200_v53, %s10446_s13 }
0x18c6   :  { %v7441_v61 = vpop.f32.mrb[104].mxu1  ;;  %v7547_v19 = vpop.f32.mrb[96].mxu0 }
0x18c7   :  { %7605 = vrot.lane.b32.xlu1 %v15198_v21, %s16203_s17  ;;  %v7443_v46 = vpop.f32.mrb[105].mxu1  ;;  %v7549_v34 = vpop.f32.mrb[97].mxu0 }
0x18c8   :  { %v7551_v63 = vpop.f32.mrb[98].mxu0  ;;  %7603 = vrot.lane.b32.xlu0 %v15200_v53, %s16203_s17  ;;  %v7445_v24 = vpop.f32.mrb[106].mxu1 }
0x18c9   :  { %v15212_v59 = vpack.c.bf16 %v7551_v63, %v7547_v19  ;;  %v15214_v60 = vpack.c.bf16 %v7445_v24, %v7441_v61  ;;  %v7447_v9 = vpop.f32.mrb[107].mxu1  ;;  %v7553_v17 = vpop.f32.mrb[99].mxu0 }
0x18ca   :  { %v15216_v41 = vpack.c.bf16 %v7447_v9, %v7443_v46  ;;  %v15218_v13 = vpack.c.bf16 %v7553_v17, %v7549_v34 }
0x18cb   :  { %7591 = vrot.lane.b32.xlu1 %v15196_v44, %s10410_s0 }
0x18cc   :  { %7593 = vrot.lane.b32.xlu0 %v15200_v53, %s10410_s0 }
0x18cf   :  { %7637 = vrot.lane.b32.xlu1 %v15198_v21, %s10456_s5 }
0x18d0   :  { %7635 = vrot.lane.b32.xlu0 %v15200_v53, %s10456_s5 }
0x18d3   :  { %7623 = vrot.lane.b32.xlu1 %v15196_v44, %s10444_s28 }
0x18d4   :  { %7625 = vrot.lane.b32.xlu0 %v15200_v53, %s10444_s28 }
0x18d7   :  { %7671 = vrot.lane.b32.xlu1 %v15198_v21, %s10457_s14 }
0x18d8   :  { %7669 = vrot.lane.b32.xlu0 %v15200_v53, %s10457_s14 }
0x18db   :  { %7656 = vrot.lane.b32.xlu1 %v15196_v44, %s10458_s15 }
0x18dc   :  { %7658 = vrot.lane.b32.xlu0 %v15200_v53, %s10458_s15 }
0x18df   :  { %7704 = vrot.lane.b32.xlu1 %v15198_v21, %s16166_s18 }
0x18e0   :  { %7702 = vrot.lane.b32.xlu0 %v15200_v53, %s16166_s18 }
0x18e3   :  { %7690 = vrot.lane.b32.xlu1 %v15196_v44, %s10430_s22 }
0x18e4   :  { %7692 = vrot.lane.b32.xlu0 %v15200_v53, %s10430_s22 }
0x18e7   :  { %7736 = vrot.lane.b32.xlu1 %v15198_v21, %s16087_s21 }
0x18e8   :  { %7734 = vrot.lane.b32.xlu0 %v15200_v53, %s16087_s21 }
0x18eb   :  { %7722 = vrot.lane.b32.xlu1 %v15196_v44, %s16202_s3 }
0x18ec   :  { %7724 = vrot.lane.b32.xlu0 %v15200_v53, %s16202_s3 }
0x18ef   :  { %7768 = vrot.lane.b32.xlu1 %v15198_v21, %s10459_s25 }
0x18f0   :  { %7766 = vrot.lane.b32.xlu0 %v15200_v53, %s10459_s25 }
0x18f3   :  { %7754 = vrot.lane.b32.xlu1 %v15196_v44, %s16164_s24 }
0x18f4   :  { %7756 = vrot.lane.b32.xlu0 %v15200_v53, %s16164_s24 }
0x18f7   :  { %7801 = vrot.lane.b32.xlu1 %v15198_v21, %s10460_s2 }
0x18f8   :  { %7799 = vrot.lane.b32.xlu0 %v15200_v53, %s10460_s2 }
0x18fb   :  { %7787 = vrot.lane.b32.xlu1 %v15196_v44, %s16248_s23 }
0x18fc   :  { %7789 = vrot.lane.b32.xlu0 %v15200_v53, %s16248_s23 }
0x18ff   :  { %7834 = vrot.lane.b32.xlu1 %v15198_v21, %s10461_s7 }
0x1900   :  { %7832 = vrot.lane.b32.xlu0 %v15200_v53, %s10461_s7 }
0x1903   :  { %7820 = vrot.lane.b32.xlu1 %v15196_v44, %s16204_s16 }
0x1904   :  { %7822 = vrot.lane.b32.xlu0 %v15200_v53, %s16204_s16 }
0x1907   :  { %7867 = vrot.lane.b32.xlu1 %v15198_v21, %s10462_s29 }
0x1908   :  { %7865 = vrot.lane.b32.xlu0 %v15200_v53, %s10462_s29 }
0x190b   :  { %7853 = vrot.lane.b32.xlu1 %v15196_v44, %s16086_s20 }
0x190c   :  { %7855 = vrot.lane.b32.xlu0 %v15200_v53, %s16086_s20 }
0x190f   :  { %7900 = vrot.lane.b32.xlu1 %v15198_v21, %s10463_s11 }
0x1910   :  { %7898 = vrot.lane.b32.xlu0 %v15200_v53, %s10463_s11 }
0x1913   :  { %7886 = vrot.lane.b32.xlu1 %v15196_v44, %s10440_s4 }
0x1914   :  { %7888 = vrot.lane.b32.xlu0 %v15200_v53, %s10440_s4 }
0x1917   :  { %7933 = vrot.lane.b32.xlu1 %v15198_v21, %s16042_s30 }
0x1918   :  { %7931 = vrot.lane.b32.xlu0 %v15200_v53, %s16042_s30  ;;  %s10468_s30 = smov 39  }
0x191b   :  { %7919 = vrot.lane.b32.xlu1 %v15196_v44, %s16040_s27 }
0x191c   :  { %7921 = vrot.lane.b32.xlu0 %v15200_v53, %s16040_s27  ;;  %s10467_s27 = smov 85  }
0x191f   :  { %7968 = vrot.lane.b32.xlu1 %v15198_v21, %s10465_s6 }
0x1920   :  { %7966 = vrot.lane.b32.xlu0 %v15200_v53, %s10465_s6 }
0x1923   :  { %7952 = vrot.lane.b32.xlu1 %v15196_v44, %s16249_s19 }
0x1924   :  { %7954 = vrot.lane.b32.xlu0 %v15200_v53, %s16249_s19 }
0x1927   :  { %8008 = vrot.lane.b32.xlu1 %v15198_v21, %s10466_s26 }
0x1928   :  { %8006 = vrot.lane.b32.xlu0 %v15200_v53, %s10466_s26 }
0x192b   :  { %7993 = vrot.lane.b32.xlu1 %v15196_v44, %s10467_s27 }
0x192c   :  { %7995 = vrot.lane.b32.xlu0 %v15200_v53, %s10467_s27 }
0x192f   :  { %8047 = vrot.lane.b32.xlu1 %v15198_v21, %s10468_s30 }
0x1930   :  { %7970 = vrot.lane.b32.xlu0 %v15202_v55, %s10465_s6 }
0x1933   :  { %8033 = vrot.lane.b32.xlu1 %v15196_v44, %s10445_s1 }
0x1934   :  { %8045 = vrot.lane.b32.xlu0 %v15200_v53, %s10468_s30 }
0x1935   :  { %v7571_v28 = vpop.permute.xlu1 %7570 }
0x1936   :  { %v15328_v51 = vpop.permute.xlu0 %7568 }
0x1937   :  { %16250 = vst [vmem:[#allocation20_spill] sm:$0xff] %v15328_v51  ;;  %7574 = vrot.lane.b32.xlu1 %v15212_v59, %s10446_s13  ;;  %v7576_v39 = vsel %vm16251_vm0, %v15328_v51, %v7571_v28  ;;  %vm7978_vm0 = vcmask 334848  }
0x1938   :  { %8035 = vrot.lane.b32.xlu0 %v15200_v53, %s10445_s1  ;;  %v7583_v52 = vsel %vm16252_vm8, %v15200_v53, %v7576_v39  ;;  %vm16263_vm8 = vcmask 703488  }
0x1939   :  { %v15338_v5 = vpop.permute.xlu1 %7605  ;;  %8129 = vmatprep.subr.bf16.mxu1 %v7583_v52 }
0x193a   :  { %8130 = vmatpush1.bf16.msra.mxu1 %v15196_v44  ;;  %v15341_v45 = vpop.permute.xlu0 %7603 }
0x193b   :  { %7609 = vrot.lane.b32.xlu1 %v15212_v59, %s16203_s17 }
0x193c   :  { %8014 = vrot.lane.b32.xlu0 %v15212_v59, %s10466_s26 }
0x193d   :  { %v15347_v35 = vpop.permute.xlu1 %7591 }
0x193e   :  { %v15349_v56 = vpop.permute.xlu0 %7593 }
0x193f   :  { %7595 = vrot.lane.b32.xlu1 %v15214_v60, %s10410_s0 }
0x1940   :  { %7997 = vrot.lane.b32.xlu0 %v15214_v60, %s10467_s27 }
0x1941   :  { %v15355_v48 = vpop.permute.xlu1 %7637 }
0x1942   :  { %v15357_v25 = vpop.permute.xlu0 %7635 }
0x1943   :  { %7641 = vrot.lane.b32.xlu1 %v15212_v59, %s10456_s5 }
0x1944   :  { %7572 = vrot.lane.b32.xlu0 %v15216_v41, %s10446_s13 }
0x1945   :  { %v15363_v38 = vpop.permute.xlu1 %7623 }
0x1946   :  { %v15365_v4 = vpop.permute.xlu0 %7625 }
0x1947   :  { %7627 = vrot.lane.b32.xlu1 %v15214_v60, %s10444_s28 }
0x1948   :  { %7607 = vrot.lane.b32.xlu0 %v15216_v41, %s16203_s17 }
0x1949   :  { %v15371_v23 = vpop.permute.xlu1 %7671 }
0x194a   :  { %v15373_v29 = vpop.permute.xlu0 %7669 }
0x194b   :  { %7675 = vrot.lane.b32.xlu1 %v15212_v59, %s10457_s14 }
0x194c   :  { %7597 = vrot.lane.b32.xlu0 %v15216_v41, %s10410_s0 }
0x194d   :  { %v15379_v0 = vpop.permute.xlu1 %7656 }
0x194e   :  { %v15381_v11 = vpop.permute.xlu0 %7658 }
0x194f   :  { %7660 = vrot.lane.b32.xlu1 %v15214_v60, %s10458_s15 }
0x1950   :  { %7639 = vrot.lane.b32.xlu0 %v15216_v41, %s10456_s5 }
0x1951   :  { %v15387_v43 = vpop.permute.xlu1 %7704 }
0x1952   :  { %9279 = vmatprep.subr.bf16.mxu0 %v15387_v43  ;;  %v15390_v18 = vpop.permute.xlu0 %7702 }
0x1953   :  { %9280 = vmatpush3.bf16.msra.mxu0 %v7571_v28  ;;  %7708 = vrot.lane.b32.xlu1 %v15212_v59, %s16166_s18 }
0x1954   :  { %7629 = vrot.lane.b32.xlu0 %v15216_v41, %s10444_s28 }
0x1955   :  { %v15396_v47 = vpop.permute.xlu1 %7690 }
0x1956   :  { %v15398_v58 = vpop.permute.xlu0 %7692 }
0x1957   :  { %7694 = vrot.lane.b32.xlu1 %v15214_v60, %s10430_s22 }
0x1958   :  { %7673 = vrot.lane.b32.xlu0 %v15216_v41, %s10457_s14 }
0x1959   :  { %v15404_v7 = vpop.permute.xlu1 %7736 }
0x195a   :  { %v15406_v16 = vpop.permute.xlu0 %7734 }
0x195b   :  { %7740 = vrot.lane.b32.xlu1 %v15212_v59, %s16087_s21 }
0x195c   :  { %7662 = vrot.lane.b32.xlu0 %v15216_v41, %s10458_s15 }
0x195d   :  { %v15412_v32 = vpop.permute.xlu1 %7722 }
0x195e   :  { %v15414_v50 = vpop.permute.xlu0 %7724 }
0x195f   :  { %7726 = vrot.lane.b32.xlu1 %v15214_v60, %s16202_s3 }
0x1960   :  { %7706 = vrot.lane.b32.xlu0 %v15216_v41, %s16166_s18 }
0x1961   :  { %v15425_v22 = vpop.permute.xlu1 %7768 }
0x1962   :  { %v15429_v49 = vpop.permute.xlu0 %7766 }
0x1963   :  { %7772 = vrot.lane.b32.xlu1 %v15212_v59, %s10459_s25 }
0x1964   :  { %7696 = vrot.lane.b32.xlu0 %v15216_v41, %s10430_s22  ;;  %s16260_s22 = smov 52  }
0x1965   :  { %v15435_v12 = vpop.permute.xlu1 %7754 }
0x1966   :  { %v15437_v8 = vpop.permute.xlu0 %7756 }
0x1967   :  { %7758 = vrot.lane.b32.xlu1 %v15214_v60, %s16164_s24 }
0x1968   :  { %7738 = vrot.lane.b32.xlu0 %v15216_v41, %s16087_s21  ;;  %s16261_s21 = smov 97  }
0x1969   :  { %v15443_v3 = vpop.permute.xlu1 %7801 }
0x196a   :  { %v15445_v20 = vpop.permute.xlu0 %7799 }
0x196b   :  { %7805 = vrot.lane.b32.xlu1 %v15212_v59, %s10460_s2 }
0x196c   :  { %7728 = vrot.lane.b32.xlu0 %v15216_v41, %s16202_s3 }
0x196d   :  { %v15451_v30 = vpop.permute.xlu1 %7787 }
0x196e   :  { %v15453_v31 = vpop.permute.xlu0 %7789 }
0x196f   :  { %7791 = vrot.lane.b32.xlu1 %v15214_v60, %s16248_s23 }
0x1970   :  { %7770 = vrot.lane.b32.xlu0 %v15216_v41, %s10459_s25 }
0x1971   :  { %v15459_v15 = vpop.permute.xlu1 %7834 }
0x1972   :  { %v15461_v27 = vpop.permute.xlu0 %7832 }
0x1973   :  { %7838 = vrot.lane.b32.xlu1 %v15212_v59, %s10461_s7 }
0x1974   :  { %7760 = vrot.lane.b32.xlu0 %v15216_v41, %s16164_s24 }
0x1975   :  { %v15467_v33 = vpop.permute.xlu1 %7820 }
0x1976   :  { %v15469_v14 = vpop.permute.xlu0 %7822 }
0x1977   :  { %7824 = vrot.lane.b32.xlu1 %v15214_v60, %s16204_s16 }
0x1978   :  { %7803 = vrot.lane.b32.xlu0 %v15216_v41, %s10460_s2 }
0x1979   :  { %v15475_v2 = vpop.permute.xlu1 %7867 }
0x197a   :  { %16253 = vst [vmem:[#allocation21_spill] sm:$0xff] %v15475_v2  ;;  %v7866_v40 = vpop.permute.xlu0 %7865 }
0x197b   :  { %7871 = vrot.lane.b32.xlu1 %v15212_v59, %s10462_s29  ;;  %v7874_v62 = vsel %vm16254_vm9, %v7866_v40, %v15475_v2  ;;  %vm16264_vm9 = vmmov %vm16258_vm4 }
0x197c   :  { %7793 = vrot.lane.b32.xlu0 %v15216_v41, %s16248_s23 }
0x197d   :  { %v7854_v26 = vpop.permute.xlu1 %7853 }
0x197e   :  { %v7856_v57 = vpop.permute.xlu0 %7855 }
0x197f   :  { %v15484_v36 = vsel %vm16255_vm5, %v7854_v26, %v7856_v57  ;;  %7857 = vrot.lane.b32.xlu1 %v15214_v60, %s16086_s20  ;;  %v15489_v37 = vsel %vm16256_vm10, %v7856_v57, %v7874_v62  ;;  %vm8018_vm5 = vcmask 326656   ;;  %vm8001_vm10 = vcmask 695296  }
0x1980   :  { %7836 = vrot.lane.b32.xlu0 %v15216_v41, %s10461_s7 }
0x1981   :  { %v15493_v1 = vpop.permute.xlu1 %7900 }
0x1982   :  { %16257 = vst [vmem:[#allocation22_spill] sm:$0xff] %v15493_v1  ;;  %v7899_v54 = vpop.permute.xlu0 %7898 }
0x1983   :  { %7904 = vrot.lane.b32.xlu1 %v15212_v59, %s10463_s11  ;;  %v7907_v19 = vsel %vm7906_vm1, %v7899_v54, %v15493_v1 }
0x1984   :  { %7826 = vrot.lane.b32.xlu0 %v15216_v41, %s16204_s16 }
0x1985   :  { %v7887_v61 = vpop.permute.xlu1 %7886 }
0x1986   :  { %v7889_v46 = vpop.permute.xlu0 %7888 }
0x1987   :  { %v15502_v34 = vsel %vm2491_vm11, %v7887_v61, %v7889_v46  ;;  %7890 = vrot.lane.b32.xlu1 %v15214_v60, %s10440_s4  ;;  %v15507_v63 = vsel %vm16258_vm4, %v7889_v46, %v7907_v19 }
0x1988   :  { %7869 = vrot.lane.b32.xlu0 %v15216_v41, %s10462_s29 }
0x1989   :  { %v15511_v24 = vpop.permute.xlu1 %7933 }
0x198a   :  { %16259 = vst [vmem:[#allocation23_spill] sm:$0xff] %v15511_v24  ;;  %v7932_v9 = vpop.permute.xlu0 %7931 }
0x198b   :  { %7937 = vrot.lane.b32.xlu1 %v15212_v59, %s16260_s22  ;;  %v7940_v28 = vsel %vm7939_vm12, %v7932_v9, %v15511_v24 }
0x198c   :  { %7859 = vrot.lane.b32.xlu0 %v15216_v41, %s16086_s20  ;;  %s16265_s20 = smov 38  }
0x198d   :  { %v7920_v17 = vpop.permute.xlu1 %7919 }
0x198e   :  { %v7922_v39 = vpop.permute.xlu0 %7921 }
0x198f   :  { %v15520_v52 = vsel %vm2527_vm13, %v7920_v17, %v7922_v39  ;;  %7923 = vrot.lane.b32.xlu1 %v15214_v60, %s16261_s21  ;;  %v15525_v10 = vsel %vm16262_vm6, %v7922_v39, %v7940_v28  ;;  %vm8057_vm6 = vcmask 318464  }
0x1990   :  { %7902 = vrot.lane.b32.xlu0 %v15216_v41, %s10463_s11 }
0x1991   :  { %v15529_v40 = vpop.permute.xlu1 %7968 }
0x1992   :  { %v7967_v26 = vpop.permute.xlu0 %7966 }
0x1993   :  { %v7979_v62 = vsel %vm7978_vm0, %v7967_v26, %v15529_v40  ;;  %7974 = vrot.lane.b32.xlu1 %v15212_v59, %s10465_s6 }
0x1994   :  { %7892 = vrot.lane.b32.xlu0 %v15216_v41, %s10440_s4 }
0x1995   :  { %v7953_v57 = vpop.permute.xlu1 %7952 }
0x1996   :  { %v7955_v54 = vpop.permute.xlu0 %7954 }
0x1997   :  { %v15538_v61 = vsel %vm16263_vm8, %v7953_v57, %v7955_v54  ;;  %7956 = vrot.lane.b32.xlu1 %v15214_v60, %s16249_s19  ;;  %v15543_v19 = vsel %vm16264_vm9, %v7955_v54, %v7979_v62  ;;  %vm16268_vm8 = vmmov %vm16258_vm4  ;;  %vm16271_vm9 = vcmask 678912  }
0x1998   :  { %7935 = vrot.lane.b32.xlu0 %v15216_v41, %s16260_s22 }
0x1999   :  { %v15547_v46 = vpop.permute.xlu1 %8008 }
0x199a   :  { %v8007_v9 = vpop.permute.xlu0 %8006 }
0x199b   :  { %8082 = vrot.lane.b32.xlu1 %v15198_v21, %s16265_s20  ;;  %v8019_v28 = vsel %vm8018_vm5, %v8007_v9, %v15547_v46 }
0x199c   :  { %7925 = vrot.lane.b32.xlu0 %v15216_v41, %s16261_s21 }
0x199d   :  { %v7994_v17 = vpop.permute.xlu1 %7993 }
0x199e   :  { %v7996_v39 = vpop.permute.xlu0 %7995 }
0x199f   :  { %v15556_v26 = vsel %vm8001_vm10, %v7994_v17, %v7996_v39  ;;  %8049 = vrot.lane.b32.xlu1 %v15202_v55, %s10468_s30  ;;  %v15561_v62 = vsel %vm16258_vm4, %v7996_v39, %v8019_v28 }
0x19a0   :  { %7972 = vrot.lane.b32.xlu0 %v15216_v41, %s10465_s6 }
0x19a1   :  { %v15565_v21 = vpop.permute.xlu1 %8047 }
0x19a2   :  { %16266 = vst [vmem:[#allocation24_spill] sm:$0xff] %v15565_v21  ;;  %v15567_v57 = vpop.permute.xlu0 %7970 }
0x19a3   :  { %8012 = vrot.lane.b32.xlu1 %v15216_v41, %s10466_s26 }
0x19a4   :  { %7958 = vrot.lane.b32.xlu0 %v15216_v41, %s16249_s19 }
0x19a5   :  { %v8034_v54 = vpop.permute.xlu1 %8033 }
0x19a6   :  { %v8046_v9 = vpop.permute.xlu0 %8045 }
0x19a7   :  { %7999 = vrot.lane.b32.xlu1 %v15216_v41, %s10467_s27  ;;  %v8058_v28 = vsel %vm8057_vm6, %v8046_v9, %v15565_v21 }
0x19a8   :  { %8010 = vrot.lane.b32.xlu0 %v15202_v55, %s10466_s26 }
0x19a9   :  { %v7575_v17 = vpop.permute.xlu1 %7574 }
0x19aa   :  { %v8036_v39 = vpop.permute.xlu0 %8035 }
0x19ab   :  { %v15580_v42 = vsel %vm2594_vm2, %v8034_v54, %v8036_v39  ;;  %7976 = vrot.lane.b32.xlu1 %v15218_v13, %s10465_s6  ;;  %v15585_v24 = vsel %vm16268_vm8, %v8036_v39, %v8058_v28  ;;  %vm16272_vm8 = vcmask 670720  }
0x19ac   :  { %16267 = vst [vmem:[#allocation25_spill] sm:$0xff] %v15580_v42  ;;  %16269 = vst [vmem:[#allocation26_spill] sm:$0xff] %v15585_v24  ;;  %8053 = vrot.lane.b32.xlu0 %v15212_v59, %s10468_s30 }
0x19ad   :  { %v15589_v1 = vpop.permute.xlu1 %7609 }
0x19ae   :  { %v15591_v51 = vpop.permute.xlu0 %8014 }
0x19af   :  { %8051 = vrot.lane.b32.xlu1 %v15216_v41, %s10468_s30 }
0x19b0   :  { %8037 = vrot.lane.b32.xlu0 %v15214_v60, %s10445_s1 }
0x19b1   :  { %v7596_v54 = vpop.permute.xlu1 %7595 }
0x19b2   :  { %v15597_v9 = vpop.permute.xlu0 %7997 }
0x19b3   :  { %8039 = vrot.lane.b32.xlu1 %v15216_v41, %s10445_s1 }
0x19b4   :  { %8080 = vrot.lane.b32.xlu0 %v15200_v53, %s16265_s20  ;;  %v7611_v53 = vsel %vm16272_vm8, %v15341_v45, %v15338_v5  ;;  %v7599_v45 = vsel %vm1318_vm3, %v15347_v35, %v15349_v56 }
0x19b5   :  { %v15603_v28 = vpop.permute.xlu1 %7641 }
0x19b6   :  { %v15605_v39 = vpop.permute.xlu0 %7572 }
0x19b7   :  { %16270 = vst [vmem:[#allocation27_spill] sm:$0xff] %v15605_v39  ;;  %v7577_v21 = vsel %vm16271_vm9, %v15605_v39, %v7575_v17  ;;  %8016 = vrot.lane.b32.xlu1 %v15218_v13, %s10466_s26  ;;  %vm16273_vm9 = vmmov %vm16258_vm4 }
0x19b8   :  { %8072 = vrot.lane.b32.xlu0 %v15196_v44, %s10446_s13  ;;  %v7587_v42 = vsel %vm16258_vm4, %v15216_v41, %v7577_v21  ;;  %v7617_v39 = vsel %vm16273_vm9, %v15349_v56, %v7611_v53  ;;  %vm7643_vm4 = vcmask 662528  }
0x19b9   :  { %v7628_v2 = vpop.permute.xlu1 %7627  ;;  %8131 = vmatprep.subr.bf16.mxu1 %v7587_v42 }
0x19ba   :  { %8132 = vmatpush1.bf16.msra.mxu1 %v15214_v60  ;;  %v7608_v24 = vpop.permute.xlu0 %7607 }
0x19bb   :  { %8088 = vrot.lane.b32.xlu1 %v15212_v59, %s16265_s20  ;;  %8133 = vmatprep.subr.bf16.mxu1 %v7617_v39  ;;  %v7612_v42 = vsel %vm16272_vm8, %v7608_v24, %v15589_v1  ;;  %vm16274_vm8 = vmmov %vm16273_vm9 }
0x19bc   :  { %8086 = vrot.lane.b32.xlu0 %v15216_v41, %s16265_s20  ;;  %v7644_v41 = vsel %vm7643_vm4, %v15357_v25, %v15355_v48  ;;  %v7631_v25 = vsel %vm2548_vm7, %v15363_v38, %v15365_v4 }
0x19bd   :  { %v15625_v44 = vpop.permute.xlu1 %7675  ;;  %v7650_v39 = vsel %vm16274_vm8, %v15365_v4, %v7644_v41 }
0x19be   :  { %8134 = vmatpush1.bf16.msra.mxu1 %v7599_v45  ;;  %v7598_v21 = vpop.permute.xlu0 %7597 }
0x19bf   :  { %8055 = vrot.lane.b32.xlu1 %v15218_v13, %s10468_s30  ;;  %v7621_v59 = vsel %vm16273_vm9, %v7598_v21, %v7612_v42  ;;  %v7600_v35 = vsel %vm1318_vm3, %v7596_v54, %v7598_v21  ;;  %v8109_v54 = vld [vmem:[%s15952_s9] sm:$0xff]  ;;  %vm7677_vm3 = vcmask 654336   ;;  %vm16275_vm9 = vmmov %vm16274_vm8 }
0x19c0   :  { %8074 = vrot.lane.b32.xlu0 %v15214_v60, %s10446_s13  ;;  %8135 = vmatprep.subr.bf16.mxu1 %v7621_v59 }
0x19c1   :  { %v7661_v56 = vpop.permute.xlu1 %7660 }
0x19c2   :  { %8136 = vmatpush1.bf16.msra.mxu1 %v7600_v35  ;;  %v7640_v24 = vpop.permute.xlu0 %7639 }
0x19c3   :  { %8090 = vrot.lane.b32.xlu1 %v15218_v13, %s16265_s20  ;;  %8137 = vmatprep.subr.bf16.mxu1 %v7650_v39  ;;  %v7645_v53 = vsel %vm7643_vm4, %v7640_v24, %v15603_v28  ;;  %vm16276_vm4 = vmmov %vm16274_vm8  ;;  %vm7664_vm8 = vcmask 1022976   ;;  %v7698_v39 = vsel %vm1479_vm14, %v15396_v47, %v15398_v58 }
0x19c4   :  { %8084 = vrot.lane.b32.xlu0 %v15202_v55, %s16265_s20  ;;  %v7678_v55 = vsel %vm7677_vm3, %v15373_v29, %v15371_v23  ;;  %v7665_v59 = vsel %vm7664_vm8, %v15379_v0, %v15381_v11 }
0x19c5   :  { %v7709_v60 = vpop.permute.xlu1 %7708  ;;  %v7684_v21 = vsel %vm16276_vm4, %v15381_v11, %v7678_v55 }
0x19c6   :  { %8138 = vmatpush1.bf16.msra.mxu1 %v7631_v25  ;;  %9281 = vmatprep.subr.bf16.mxu0 %v7709_v60  ;;  %v7630_v13 = vpop.permute.xlu0 %7629 }
0x19c7   :  { %9282 = vmatpush3.bf16.msra.mxu0 %v7575_v17  ;;  %v7654_v45 = vsel %vm16275_vm9, %v7630_v13, %v7645_v53  ;;  %v7632_v38 = vsel %vm2548_vm7, %v7628_v2, %v7630_v13  ;;  %vm16277_vm7 = vmmov %vm16276_vm4  ;;  %vm16278_vm9 = vcmask 564224  }
0x19c8   :  { %9283 = vmatprep.subr.bf16.mxu0 %v15404_v7  ;;  %8112 = vperm.xlu0 %9572, %v8109_v54  }
0x19c9   :  { %8139 = vmatprep.subr.bf16.mxu1 %v7654_v45  ;;  %v7695_v4 = vpop.permute.xlu1 %7694 }
0x19ca   :  { %8140 = vmatpush1.bf16.msra.mxu1 %v7632_v38  ;;  %v7674_v42 = vpop.permute.xlu0 %7673 }
0x19cb   :  { %8141 = vmatprep.subr.bf16.mxu1 %v7684_v21  ;;  %9284 = vmatpush3.bf16.msra.mxu0 %v15338_v5  ;;  %v7679_v29 = vsel %vm7677_vm3, %v7674_v42, %v15625_v44  ;;  %v7710_v5 = vsel %vm16278_vm9, %v15390_v18, %v15387_v43  ;;  %vm16279_vm3 = vmmov %vm16276_vm4 }
0x19cc   :  { %v7716_v11 = vsel %vm16279_vm3, %v15398_v58, %v7710_v5  ;;  %vm16280_vm4 = vmmov %vm16278_vm9 }
0x19cd   :  { %v7741_v17 = vpop.permute.xlu1 %7740  ;;  %vm16283_vm9 = vmmov %vm16279_vm3 }
0x19ce   :  { %8142 = vmatpush1.bf16.msra.mxu1 %v7665_v59  ;;  %9285 = vmatprep.subr.bf16.mxu0 %v7741_v17  ;;  %v7663_v2 = vpop.permute.xlu0 %7662 }
0x19cf   :  { %9286 = vmatpush3.bf16.msra.mxu0 %v15589_v1  ;;  %v7688_v41 = vsel %vm16277_vm7, %v7663_v2, %v7679_v29  ;;  %v7666_v35 = vsel %vm7664_vm8, %v7661_v56, %v7663_v2  ;;  %vm16281_vm8 = vmmov %vm16279_vm3  ;;  %vm16282_vm7 = vcmask 556032   ;;  %vm16284_vm3 = vcmask 924672  }
0x19d0   :  { %8143 = vmatprep.subr.bf16.mxu1 %v7688_v41  ;;  %9287 = vmatprep.subr.bf16.mxu0 %v15425_v22 }
0x19d1   :  { %v7727_v24 = vpop.permute.xlu1 %7726 }
0x19d2   :  { %8144 = vmatpush1.bf16.msra.mxu1 %v7666_v35  ;;  %v7707_v0 = vpop.permute.xlu0 %7706 }
0x19d3   :  { %8145 = vmatprep.subr.bf16.mxu1 %v7716_v11  ;;  %9288 = vmatpush3.bf16.msra.mxu0 %v15355_v48  ;;  %v7711_v25 = vsel %vm16280_vm4, %v7707_v0, %v7709_v60  ;;  %v7742_v48 = vsel %vm16282_vm7, %v15406_v16, %v15404_v7  ;;  %v7730_v60 = vsel %vm16284_vm3, %v15412_v32, %v15414_v50  ;;  %vm7774_vm4 = vcmask 547840   ;;  %v15705_v32 = vld [vmem:[%s15951_s8 + $0x8] sm:$0xff] }
0x19d4   :  { %v7748_v58 = vsel %vm16283_vm9, %v15414_v50, %v7742_v48  ;;  %v9077_v16 = vcombine.low %v15423_v6, %v15423_v6  ;;  %v7775_v50 = vsel %vm7774_vm4, %v15429_v49, %v15425_v22 }
0x19d5   :  { %v7773_v1 = vpop.permute.xlu1 %7772 }
0x19d6   :  { %8146 = vmatpush1.bf16.msra.mxu1 %v7698_v39  ;;  %9289 = vmatprep.subr.bf16.mxu0 %v7773_v1  ;;  %v7697_v43 = vpop.permute.xlu0 %7696 }
0x19d7   :  { %9290 = vmatpush3.bf16.msra.mxu0 %v15603_v28  ;;  %v7720_v18 = vsel %vm16281_vm8, %v7697_v43, %v7711_v25  ;;  %v7699_v56 = vsel %vm1479_vm14, %v7695_v4, %v7697_v43  ;;  %vm16285_vm8 = vmmov %vm16282_vm7 }
0x19d8   :  { %8147 = vmatprep.subr.bf16.mxu1 %v7720_v18  ;;  %9291 = vmatprep.subr.bf16.mxu0 %v15443_v3  ;;  %vm16286_vm14 = vmmov %vm16283_vm9 }
0x19d9   :  { %v7759_v54 = vpop.permute.xlu1 %7758  ;;  %vm16287_vm7 = vmmov %vm16284_vm3  ;;  %vm16288_vm3 = vcmask 916480  }
0x19da   :  { %8148 = vmatpush1.bf16.msra.mxu1 %v7699_v56  ;;  %v7739_v47 = vpop.permute.xlu0 %7738  ;;  %v7762_v22 = vsel %vm16288_vm3, %v15435_v12, %v15437_v8 }
0x19db   :  { %8149 = vmatprep.subr.bf16.mxu1 %v7748_v58  ;;  %9292 = vmatpush3.bf16.msra.mxu0 %v15371_v23  ;;  %v7743_v53 = vsel %vm16285_vm8, %v7739_v47, %v7741_v17  ;;  %v7980_v23 = vsel %vm7978_vm0, %v15529_v40, %v15567_v57  ;;  %v7781_v40 = vsel %vm16283_vm9, %v15437_v8, %v7775_v50  ;;  %vm7807_vm8 = vcmask 539648  }
0x19dc   :  { %v9080_v57 = vcombine.high %v15705_v32, %v15705_v32  ;;  %v7808_v42 = vsel %vm7807_vm8, %v15445_v20, %v15443_v3 }
0x19dd   :  { %v7806_v28 = vpop.permute.xlu1 %7805  ;;  %v7814_v12 = vsel %vm16283_vm9, %v15453_v31, %v7808_v42 }
0x19de   :  { %8150 = vmatpush1.bf16.msra.mxu1 %v7730_v60  ;;  %9293 = vmatprep.subr.bf16.mxu0 %v7806_v28  ;;  %v7729_v7 = vpop.permute.xlu0 %7728 }
0x19df   :  { %9294 = vmatpush3.bf16.msra.mxu0 %v15625_v44  ;;  %v7752_v13 = vsel %vm16286_vm14, %v7729_v7, %v7743_v53  ;;  %v7731_v6 = vsel %vm16287_vm7, %v7727_v24, %v7729_v7  ;;  %vm16289_vm14 = vmmov %vm16283_vm9 }
0x19e0   :  { %8151 = vmatprep.subr.bf16.mxu1 %v7752_v13  ;;  %9301 = vmatprep.subr.bf16.mxu0 %v7980_v23  ;;  %vm16290_vm7 = vmmov %vm16288_vm3  ;;  %vm7840_vm3 = vcmask 449536  }
0x19e1   :  { %v7792_v44 = vpop.permute.xlu1 %7791  ;;  %v7841_v41 = vsel %vm7840_vm3, %v15461_v27, %v15459_v15 }
0x19e2   :  { %8152 = vmatpush1.bf16.msra.mxu1 %v7731_v6  ;;  %8244 = vmatmul.mubr.bf16.vlgmr.msra.gmra.mrb[100].mxu0 %v9077_v16  ;;  %v7771_v45 = vpop.permute.xlu0 %7770 }
0x19e3   :  { %8153 = vmatprep.subr.bf16.mxu1 %v7781_v40  ;;  %9302 = vmatpush3.bf16.msra.mxu0 %v15459_v15  ;;  %v7776_v49 = vsel %vm7774_vm4, %v7771_v45, %v7773_v1  ;;  %vm16291_vm4 = vcmask 908288  }
0x19e4   :  { %8283 = vmatprep.mubr.bf16.mxu0 %v9080_v57  ;;  %v7795_v29 = vsel %vm16291_vm4, %v15451_v30, %v15453_v31  ;;  %v7847_v30 = vsel %vm16283_vm9, %v15469_v14, %v7841_v41  ;;  %v16309_v41 = vld [vmem:[#allocation20_spill] sm:$0xff] }
0x19e5   :  { %v15716_v55 = vpop.permute.xlu1 %7838 }
0x19e6   :  { %8154 = vmatpush1.bf16.msra.mxu1 %v7762_v22  ;;  %v7761_v38 = vpop.permute.xlu0 %7760 }
0x19e7   :  { %v7785_v4 = vsel %vm16289_vm14, %v7761_v38, %v7776_v49  ;;  %v7763_v21 = vsel %vm16290_vm7, %v7759_v54, %v7761_v38  ;;  %vm16292_vm14 = vmmov %vm16283_vm9 }
0x19e8   :  { %8155 = vmatprep.subr.bf16.mxu1 %v7785_v4  ;;  %vm16293_vm7 = vmmov %vm16291_vm4 }
0x19e9   :  { %v7825_v17 = vpop.permute.xlu1 %7824  ;;  %vm16295_vm4 = vmmov %vm16283_vm9  ;;  %vm16299_vm9 = vcmask 809984  }
0x19ea   :  { %8156 = vmatpush1.bf16.msra.mxu1 %v7763_v21  ;;  %v7804_v59 = vpop.permute.xlu0 %7803 }
0x19eb   :  { %8157 = vmatprep.subr.bf16.mxu1 %v7814_v12  ;;  %v7809_v2 = vsel %vm7807_vm8, %v7804_v59, %v7806_v28  ;;  %vm16294_vm8 = vcmask 818176  }
0x19ec   :  { %v7828_v0 = vsel %vm16294_vm8, %v15467_v33, %v15469_v14 }
0x19ed   :  { %v15729_v8 = vpop.permute.xlu1 %7871 }
0x19ee   :  { %8158 = vmatpush1.bf16.msra.mxu1 %v7795_v29  ;;  %v7794_v3 = vpop.permute.xlu0 %7793  ;;  %v16307_v29 = vld [vmem:[#allocation25_spill] sm:$0xff] }
0x19ef   :  { %v7818_v20 = vsel %vm16292_vm14, %v7794_v3, %v7809_v2  ;;  %v7796_v5 = vsel %vm16293_vm7, %v7792_v44, %v7794_v3  ;;  %vm16296_vm14 = vmmov %vm16294_vm8  ;;  %vm16297_vm7 = vcmask 441344  }
0x19f0   :  { %8159 = vmatprep.subr.bf16.mxu1 %v7818_v20 }
0x19f1   :  { %v7858_v35 = vpop.permute.xlu1 %7857 }
0x19f2   :  { %8160 = vmatpush1.bf16.msra.mxu1 %v7796_v5  ;;  %v7837_v24 = vpop.permute.xlu0 %7836 }
0x19f3   :  { %8170 = vmatprep.subr.bf16.mxu1 %v7847_v30  ;;  %v7842_v11 = vsel %vm7840_vm3, %v7837_v24, %v15716_v55  ;;  %vm16298_vm3 = vmmov %vm16295_vm4  ;;  %v16311_v24 = vld [vmem:[#allocation24_spill] sm:$0xff] }
0x19f4   :  { %vm16300_vm8 = vmmov %vm16298_vm3 }
0x19f5   :  { %v15742_v31 = vpop.permute.xlu1 %7904  ;;  %8162 = vmatmul.mubr.bf16.vlgmr.msra.gmra.mrb[108].mxu1 %v9077_v16 }
0x19f6   :  { %8171 = vmatpush1.bf16.msra.mxu1 %v7828_v0  ;;  %v7827_v15 = vpop.permute.xlu0 %7826  ;;  %8202 = vmatprep.mubr.bf16.mxu1 %v9080_v57 }
0x19f7   :  { %v7851_v27 = vsel %vm16295_vm4, %v7827_v15, %v7842_v11  ;;  %v7829_v1 = vsel %vm16296_vm14, %v7825_v17, %v7827_v15  ;;  %v16306_v17 = vld [vmem:[#allocation21_spill] sm:$0xff]  ;;  %vm16312_vm4 = vcmask 678912  }
0x19f8   :  { %8172 = vmatprep.subr.bf16.mxu1 %v7851_v27 }
0x19f9   :  { %v7891_v39 = vpop.permute.xlu1 %7890 }
0x19fa   :  { %8173 = vmatpush1.bf16.msra.mxu1 %v7829_v1  ;;  %v7870_v25 = vpop.permute.xlu0 %7869  ;;  %v16313_v1 = vld [vmem:[#allocation22_spill] sm:$0xff] }
0x19fb   :  { %8174 = vmatprep.subr.bf16.mxu1 %v15489_v37  ;;  %v7875_v33 = vsel %vm16297_vm7, %v7870_v25, %v15729_v8 }
0x19fd   :  { %v15752_v43 = vpop.permute.xlu1 %7937 }
0x19fe   :  { %8175 = vmatpush1.bf16.msra.mxu1 %v15484_v36  ;;  %v7860_v14 = vpop.permute.xlu0 %7859 }
0x19ff   :  { %v7884_v18 = vsel %vm16298_vm3, %v7860_v14, %v7875_v33  ;;  %v7862_v48 = vsel %vm16299_vm9, %v7858_v35, %v7860_v14 }
0x1a00   :  { %8176 = vmatprep.subr.bf16.mxu1 %v7884_v18  ;;  %v9079_v18 = vcombine.low %v15705_v32, %v15705_v32  ;;  %v10065_v32 = vld [vmem:[%s15953_s10] ss:$8 sps:$4 sm:$0xff]  }
0x1a01   :  { %v7924_v56 = vpop.permute.xlu1 %7923 }
0x1a02   :  { %8177 = vmatpush1.bf16.msra.mxu1 %v7862_v48  ;;  %v7903_v54 = vpop.permute.xlu0 %7902 }
0x1a03   :  { %8178 = vmatprep.subr.bf16.mxu1 %v15507_v63  ;;  %v7908_v37 = vsel %vm7906_vm1, %v7903_v54, %v15742_v31  ;;  %vm16301_vm1 = vmmov %vm16298_vm3 }
0x1a05   :  { %v7975_v47 = vpop.permute.xlu1 %7974 }
0x1a06   :  { %8179 = vmatpush1.bf16.msra.mxu1 %v15502_v34  ;;  %v7893_v58 = vpop.permute.xlu0 %7892 }
0x1a07   :  { %v7917_v36 = vsel %vm16300_vm8, %v7893_v58, %v7908_v37  ;;  %v7895_v28 = vsel %vm2491_vm11, %v7891_v39, %v7893_v58  ;;  %vm16302_vm11 = vmmov %vm16301_vm1  ;;  %v16314_v39 = vld [vmem:[#allocation27_spill] sm:$0xff] }
0x1a08   :  { %8180 = vmatprep.subr.bf16.mxu1 %v7917_v36  ;;  %v10067_v58 = vld [vmem:[%s15953_s10 + $0x4] ss:$8 sps:$4 sm:$0xff]   ;;  %v10068_v36 = vld [vmem:[%s15953_s10 + $0x10] ss:$8 sps:$4 sm:$0xff]  }
0x1a09   :  { %v7957_v60 = vpop.permute.xlu1 %7956 }
0x1a0a   :  { %8181 = vmatpush1.bf16.msra.mxu1 %v7895_v28  ;;  %v7936_v53 = vpop.permute.xlu0 %7935  ;;  %v10071_v28 = vld [vmem:[%s15953_s10 + $0x20] ss:$8 sps:$4 sm:$0xff]  }
0x1a0b   :  { %8182 = vmatprep.subr.bf16.mxu1 %v15525_v10  ;;  %v7941_v63 = vsel %vm7939_vm12, %v7936_v53, %v15752_v43  ;;  %vm16303_vm12 = vcmask 703488   ;;  %v10074_v53 = vld [vmem:[%s15953_s10 + $0x30] ss:$8 sps:$4 sm:$0xff]  }
0x1a0d   :  { %v15766_v7 = vpop.permute.xlu1 %8082 }
0x1a0e   :  { %8183 = vmatpush1.bf16.msra.mxu1 %v15520_v52  ;;  %v7926_v16 = vpop.permute.xlu0 %7925 }
0x1a0f   :  { %v7950_v34 = vsel %vm16301_vm1, %v7926_v16, %v7941_v63  ;;  %v7928_v13 = vsel %vm2527_vm13, %v7924_v56, %v7926_v16  ;;  %vm16304_vm13 = vmmov %vm16301_vm1  ;;  %v10077_v63 = vld [vmem:[%s15953_s10 + $0x40] ss:$8 sps:$4 sm:$0xff]   ;;  %v10082_v16 = vld [vmem:[%s15953_s10 + $0x54] ss:$8 sps:$4 sm:$0xff]  }
0x1a10   :  { %8184 = vmatprep.subr.bf16.mxu1 %v7950_v34  ;;  %v10080_v34 = vld [vmem:[%s15953_s10 + $0x50] ss:$8 sps:$4 sm:$0xff]  }
0x1a11   :  { %v8050_v23 = vpop.permute.xlu1 %8049 }
0x1a12   :  { %8185 = vmatpush1.bf16.msra.mxu1 %v7928_v13  ;;  %v7973_v50 = vpop.permute.xlu0 %7972  ;;  %v8059_v30 = vsel %vm8057_vm6, %v16311_v24, %v8050_v23  ;;  %v10085_v13 = vld [vmem:[%s15953_s10 + $0x64] ss:$8 sps:$4 sm:$0xff]   ;;  %v10083_v23 = vld [vmem:[%s15953_s10 + $0x60] ss:$8 sps:$4 sm:$0xff]  }
0x1a13   :  { %8186 = vmatprep.subr.bf16.mxu1 %v15543_v19  ;;  %v7981_v10 = vsel %vm7978_vm0, %v7973_v50, %v7975_v47  ;;  %v10088_v50 = vld [vmem:[%s15953_s10 + $0x74] ss:$8 sps:$4 sm:$0xff]  }
0x1a15   :  { %v8013_v6 = vpop.permute.xlu1 %8012 }
0x1a16   :  { %8187 = vmatpush1.bf16.msra.mxu1 %v15538_v61  ;;  %v7959_v44 = vpop.permute.xlu0 %7958  ;;  %v8021_v22 = vsel %vm8018_vm5, %v8013_v6, %v15591_v51  ;;  %v10086_v6 = vld [vmem:[%s15953_s10 + $0x70] ss:$8 sps:$4 sm:$0xff]  }
0x1a17   :  { %v7991_v45 = vsel %vm16302_vm11, %v7959_v44, %v7981_v10  ;;  %v7961_v52 = vsel %vm16303_vm12, %v7957_v60, %v7959_v44  ;;  %v10076_v60 = vld [vmem:[%s15953_s10 + $0x34] ss:$8 sps:$4 sm:$0xff]   ;;  %v10091_v10 = vld [vmem:[%s15953_s10 + $0x84] ss:$8 sps:$4 sm:$0xff]   ;;  %v10089_v44 = vld [vmem:[%s15953_s10 + $0x80] ss:$8 sps:$4 sm:$0xff]  }
0x1a18   :  { %8188 = vmatprep.subr.bf16.mxu1 %v7991_v45  ;;  %v10094_v45 = vld [vmem:[%s15953_s10 + $0x94] ss:$8 sps:$4 sm:$0xff]  }
0x1a19   :  { %v8000_v40 = vpop.permute.xlu1 %7999 }
0x1a1a   :  { %8189 = vmatpush1.bf16.msra.mxu1 %v7961_v52  ;;  %v8011_v57 = vpop.permute.xlu0 %8010  ;;  %v8031_v61 = vsel %vm16304_vm13, %v8000_v40, %v8021_v22  ;;  %v10092_v52 = vld [vmem:[%s15953_s10 + $0x90] ss:$8 sps:$4 sm:$0xff]   ;;  %v10100_v22 = vld [vmem:[%s15953_s10 + $0xb4] ss:$8 sps:$4 sm:$0xff]  }
0x1a1b   :  { %8190 = vmatprep.subr.bf16.mxu1 %v15561_v62  ;;  %v8020_v4 = vsel %vm8018_vm5, %v15547_v46, %v8011_v57  ;;  %v8003_v62 = vsel %vm8001_vm10, %v15597_v9, %v8000_v40  ;;  %v10097_v40 = vld [vmem:[%s15953_s10 + $0xa4] ss:$8 sps:$4 sm:$0xff]   ;;  %v10095_v57 = vld [vmem:[%s15953_s10 + $0xa0] ss:$8 sps:$4 sm:$0xff]  }
0x1a1d   :  { %v7977_v19 = vpop.permute.xlu1 %7976 }
0x1a1e   :  { %8191 = vmatpush1.bf16.msra.mxu1 %v15556_v26  ;;  %v8054_v49 = vpop.permute.xlu0 %8053  ;;  %v7982_v38 = vsel %vm7978_vm0, %v7975_v47, %v7977_v19  ;;  %v16305_v26 = vld [vmem:[#allocation26_spill] sm:$0xff]  ;;  %vm16308_vm0 = vmmov %vm16301_vm1  ;;  %v16317_v47 = vld [vmem:[#allocation23_spill] sm:$0xff] }
0x1a1f   :  { %8192 = vmatprep.subr.bf16.mxu1 %v8031_v61  ;;  %9303 = vmatprep.subr.bf16.mxu0 %v7982_v38  ;;  %vm16310_vm10 = vmmov %vm16308_vm0  ;;  %v10098_v19 = vld [vmem:[%s15953_s10 + $0xb0] ss:$8 sps:$4 sm:$0xff]   ;;  %v10101_v61 = vld [vmem:[%s15953_s10 + $0xc0] ss:$8 sps:$4 sm:$0xff]  }
0x1a20   :  { %9304 = vmatpush3.bf16.msra.mxu0 %v15716_v55  ;;  %v10106_v38 = vld [vmem:[%s15953_s10 + $0xd4] ss:$8 sps:$4 sm:$0xff]  }
0x1a21   :  { %v8052_v42 = vpop.permute.xlu1 %8051  ;;  %9305 = vmatprep.subr.bf16.mxu0 %v8020_v4  ;;  %v10104_v4 = vld [vmem:[%s15953_s10 + $0xd0] ss:$8 sps:$4 sm:$0xff]  }
0x1a22   :  { %8193 = vmatpush1.bf16.msra.mxu1 %v8003_v62  ;;  %v8038_v21 = vpop.permute.xlu0 %8037  ;;  %v8060_v59 = vsel %vm8057_vm6, %v8052_v42, %v8054_v49  ;;  %v10109_v62 = vld [vmem:[%s15953_s10 + $0xe4] ss:$8 sps:$4 sm:$0xff]   ;;  %v10107_v42 = vld [vmem:[%s15953_s10 + $0xe0] ss:$8 sps:$4 sm:$0xff]  }
0x1a23   :  { %8194 = vmatprep.subr.bf16.mxu1 %v16305_v26  ;;  %v10110_v26 = vld [vmem:[%s15953_s10 + $0xf0] ss:$8 sps:$4 sm:$0xff]  }
0x1a24   :  { %9306 = vmatpush3.bf16.msra.mxu0 %v16306_v17  ;;  %v10115_v17 = vld [vmem:[%s15953_s10 + $0x104] ss:$8 sps:$4 sm:$0xff]  }
0x1a25   :  { %v8040_v12 = vpop.permute.xlu1 %8039 }
0x1a26   :  { %8195 = vmatpush1.bf16.msra.mxu1 %v16307_v29  ;;  %v8081_v55 = vpop.permute.xlu0 %8080  ;;  %v8070_v2 = vsel %vm16308_vm0, %v8040_v12, %v8060_v59  ;;  %v8042_v9 = vsel %vm2594_vm2, %v8038_v21, %v8040_v12  ;;  %vm16315_vm2 = vmmov %vm16308_vm0  ;;  %v10112_v21 = vld [vmem:[%s15953_s10 + $0xf4] ss:$8 sps:$4 sm:$0xff]  }
0x1a27   :  { %v8093_v46 = vsel %vm2496_vm15, %v8081_v55, %v15766_v7  ;;  %8196 = vmatprep.subr.bf16.mxu1 %v8070_v2 }
0x1a28   :  { %v8101_v5 = vsel %vm16310_vm10, %v16309_v41, %v8093_v46 }
0x1a29   :  { %v8017_v3 = vpop.permute.xlu1 %8016 }
0x1a2a   :  { %8197 = vmatpush1.bf16.msra.mxu1 %v8042_v9  ;;  %v8073_v20 = vpop.permute.xlu0 %8072  ;;  %v8022_v35 = vsel %vm8018_vm5, %v15591_v51, %v8017_v3  ;;  %vm16316_vm5 = vmmov %vm16312_vm4 }
0x1a2b   :  { %8198 = vmatprep.subr.bf16.mxu1 %v8101_v5  ;;  %9307 = vmatprep.subr.bf16.mxu0 %v8022_v35  ;;  %v8076_v0 = vsel %vm16312_vm4, %v8073_v20, %v16309_v41 }
0x1a2c   :  { %9308 = vmatpush3.bf16.msra.mxu0 %v15729_v8 }
0x1a2d   :  { %v8089_v11 = vpop.permute.xlu1 %8088  ;;  %9309 = vmatprep.subr.bf16.mxu0 %v8059_v30  ;;  %v10113_v30 = vld [vmem:[%s15953_s10 + $0x100] ss:$8 sps:$4 sm:$0xff]  }
0x1a2e   :  { %8199 = vmatpush1.bf16.msra.mxu1 %v8076_v0  ;;  %v8087_v15 = vpop.permute.xlu0 %8086 }
0x1a2f   :  { %v8095_v27 = vsel %vm2496_vm15, %v8087_v15, %v8089_v11  ;;  %v10116_v15 = vld [vmem:[%s15953_s10 + $0x110] ss:$8 sps:$4 sm:$0xff]  }
0x1a30   :  { %9310 = vmatpush3.bf16.msra.mxu0 %v16313_v1  ;;  %v8105_v51 = vsel %vm16315_vm2, %v16314_v39, %v8095_v27  ;;  %v10119_v27 = vld [vmem:[%s15953_s10 + $0x124] ss:$8 sps:$4 sm:$0x7f]   ;;  %v16318_v1 = vmov 0  }
0x1a31   :  { %v8056_v25 = vpop.permute.xlu1 %8055  ;;  %8200 = vmatprep.subr.bf16.mxu1 %v8105_v51  ;;  %v10121_v51 = vld [vmem:[%s15953_s10 + $0x120] ss:$8 sps:$4 sm:$0x7f]  }
0x1a32   :  { %v8075_v8 = vpop.permute.xlu0 %8074  ;;  %v8061_v33 = vsel %vm8057_vm6, %v8054_v49, %v8056_v25  ;;  %v10103_v49 = vld [vmem:[%s15953_s10 + $0xc4] ss:$8 sps:$4 sm:$0xff]   ;;  %vm16319_vm6 = vcmask 375808  }
0x1a33   :  { %v8077_v14 = vsel %vm16316_vm5, %v8075_v8, %v16314_v39  ;;  %9311 = vmatprep.subr.bf16.mxu0 %v8061_v33 }
0x1a34   :  { %8201 = vmatpush1.bf16.msra.mxu1 %v8077_v14  ;;  %9312 = vmatpush3.bf16.msra.mxu0 %v15742_v31  ;;  %v10070_v31 = vld [vmem:[%s15953_s10 + $0x14] ss:$8 sps:$4 sm:$0xff]  }
0x1a35   :  { %v8091_v48 = vpop.permute.xlu1 %8090 }
0x1a36   :  { %v8085_v56 = vpop.permute.xlu0 %8084  ;;  %v8096_v37 = vsel %vm2496_vm15, %v8089_v11, %v8091_v48  ;;  %v10118_v11 = vld [vmem:[%s15953_s10 + $0x114] ss:$8 sps:$4 sm:$0xff]  }
0x1a37   :  { %8203 = vmatmul.mubr.bf16.vlgmr.msra.gmra.mrb[108].mxu1 %v9079_v18  ;;  %v8094_v54 = vsel %vm2496_vm15, %v15766_v7, %v8085_v56  ;;  %v10079_v7 = vld [vmem:[%s15953_s10 + $0x44] ss:$8 sps:$4 sm:$0xff]   ;;  %vm8524_vm15 = vcmask 1046528  }
0x1a38   :  { %9313 = vmatprep.subr.bf16.mxu0 %v8094_v54  ;;  %v8526_v56 = vsel %vm8524_vm15, %v10121_v51, 0 }
0x1a39   :  { %9314 = vmatpush3.bf16.msra.mxu0 %v16317_v47 }
0x1a3a   :  { %9315 = vmatprep.subr.bf16.mxu0 %v8096_v37 }
0x1a3d   :  { %9316 = vmatpush3.bf16.msra.mxu0 %v15752_v43  ;;  %v10073_v43 = vld [vmem:[%s15953_s10 + $0x24] ss:$8 sps:$4 sm:$0xff]  }
0x1a3e   :  { %8531 = vmatprep.subr.bf16.mxu0 %v10067_v58 }
0x1a40   :  { %8284 = vmatmul.mubr.bf16.vlgmr.msra.gmra.mrb[104].mxu0 %v9079_v18 }
0x1a41   :  { %8532 = vmatpush1.bf16.msra.mxu0 %v10065_v32 }
0x1a42   :  { %8533 = vmatprep.subr.bf16.mxu0 %v10070_v31 }
0x1a45   :  { %8534 = vmatpush1.bf16.msra.mxu0 %v10068_v36 }
0x1a46   :  { %8535 = vmatprep.subr.bf16.mxu0 %v10073_v43 }
0x1a47   :  { %v8113_v46 = vpop.permute.xlu0 %8112 }
0x1a49   :  { %8536 = vmatpush1.bf16.msra.mxu0 %v10071_v28 }
0x1a4a   :  { %8537 = vmatprep.subr.bf16.mxu0 %v10076_v60 }
0x1a4d   :  { %8538 = vmatpush1.bf16.msra.mxu0 %v10074_v53 }
0x1a4e   :  { %8539 = vmatprep.subr.bf16.mxu0 %v10079_v7  ;;  %v10469_v7 = vmov 1966171168  }
0x1a51   :  { %8540 = vmatpush1.bf16.msra.mxu0 %v10077_v63  ;;  %v8629_v63 = vunpack.c.l.s4 %v10469_v7 }
0x1a52   :  { %8541 = vmatprep.subr.bf16.mxu0 %v10082_v16 }
0x1a53   :  { %v8630_v16 = vunpack.c.0.s8 %v8629_v63 }
0x1a55   :  { %8542 = vmatpush1.bf16.msra.mxu0 %v10080_v34 }
0x1a56   :  { %8543 = vmatprep.subr.bf16.mxu0 %v10085_v13  ;;  %v16320_v13 = vld [vmem:[#allocation14_spill] sm:$0xff] }
0x1a59   :  { %8544 = vmatpush1.bf16.msra.mxu0 %v10083_v23  ;;  %v8633_v23 = vsub.s32 %v8630_v16, %v16320_v13 }
0x1a5a   :  { %8545 = vmatprep.subr.bf16.mxu0 %v10088_v50 }
0x1a5d   :  { %8546 = vmatpush1.bf16.msra.mxu0 %v10086_v6 }
0x1a5e   :  { %8547 = vmatprep.subr.bf16.mxu0 %v10091_v10 }
0x1a61   :  { %8548 = vmatpush1.bf16.msra.mxu0 %v10089_v44  ;;  %v16321_v44 = vlaneseq }
0x1a62   :  { %8549 = vmatprep.subr.bf16.mxu0 %v10094_v45 }
0x1a63   :  { %vm8645_vm14 = vcmp.lt.s32.totalorder %v16321_v44, 256 }
0x1a65   :  { %8550 = vmatpush1.bf16.msra.mxu0 %v10092_v52 }
0x1a66   :  { %8551 = vmatprep.subr.bf16.mxu0 %v10097_v40 }
0x1a69   :  { %8552 = vmatpush1.bf16.msra.mxu0 %v10095_v57 }
0x1a6a   :  { %8553 = vmatprep.subr.bf16.mxu0 %v10100_v22 }
0x1a6d   :  { %8554 = vmatpush1.bf16.msra.mxu0 %v10098_v19 }
0x1a6e   :  { %8555 = vmatprep.subr.bf16.mxu0 %v10103_v49 }
0x1a71   :  { %8556 = vmatpush1.bf16.msra.mxu0 %v10101_v61 }
0x1a72   :  { %8557 = vmatprep.subr.bf16.mxu0 %v10106_v38 }
0x1a75   :  { %8558 = vmatpush1.bf16.msra.mxu0 %v10104_v4 }
0x1a76   :  { %8559 = vmatprep.subr.bf16.mxu0 %v10109_v62 }
0x1a79   :  { %8560 = vmatpush1.bf16.msra.mxu0 %v10107_v42 }
0x1a7a   :  { %8561 = vmatprep.subr.bf16.mxu0 %v10112_v21 }
0x1a7d   :  { %8562 = vmatpush1.bf16.msra.mxu0 %v10110_v26 }
0x1a7e   :  { %8572 = vmatprep.subr.bf16.mxu0 %v10115_v17 }
0x1ab5   :  { %v9295_v59 = vpop.f32.mrb[100].mxu0 }
0x1ab6   :  { %v9296_v12 = vpop.f32.mrb[101].mxu0 }
0x1ab7   :  { %v9297_v29 = vadd.f32 %v9296_v12, %v9295_v59  ;;  %v9298_v55 = vpop.f32.mrb[102].mxu0 }
0x1ab8   :  { %v9299_v2 = vpop.f32.mrb[103].mxu0 }
0x1ab9   :  { %v8246_v8 = vadd.f32 %v9297_v29, %v8113_v46 }
0x1b0a   :  { %v8204_v9 = vpop.f32.mrb[108].mxu1 }
0x1b0b   :  { %v9395_v3 = vadd.f32 %v8204_v9, %v8113_v46  ;;  %v8206_v20 = vpop.f32.mrb[109].mxu1 }
0x1b0c   :  { %v9396_v41 = vadd.f32 %v8206_v20, %v8113_v46  ;;  %v8208_v5 = vpop.f32.mrb[110].mxu1 }
0x1b0d   :  { %v8209_v35 = vpop.f32.mrb[111].mxu1  ;;  %v8291_v0 = vpack.c.bf16 %v9395_v3, %v9395_v3 }
0x1b0e   :  { %v8292_v24 = vpack.c.bf16 %v9396_v41, %v9396_v41 }
0x1b10   :  { %8563 = vmatprep.mubr.bf16.mxu0 %v8292_v24 }
0x1b11   :  { %8564 = vmatmul.mubr.bf16.vlgmr.msra.gmra.mrb[108].mxu0 %v8291_v0 }
0x1b12   :  { %8573 = vmatpush1.bf16.msra.mxu0 %v10113_v30  ;;  %8604 = vmatprep.mubr.bf16.mxu0 %v16318_v1 }
0x1b13   :  { %v9317_v39 = vpop.f32.mrb[104].mxu0  ;;  %8574 = vmatprep.subr.bf16.mxu0 %v10118_v11 }
0x1b14   :  { %v9318_v25 = vpop.f32.mrb[105].mxu0 }
0x1b15   :  { %v9319_v33 = vadd.f32 %v9318_v25, %v9317_v39  ;;  %v9320_v14 = vpop.f32.mrb[106].mxu0 }
0x1b16   :  { %8575 = vmatpush1.bf16.msra.mxu0 %v10116_v15  ;;  %v9321_v18 = vpop.f32.mrb[107].mxu0 }
0x1b17   :  { %v8286_v48 = vadd.f32 %v9319_v33, %v8246_v8  ;;  %9119 = vmatprep.subr.msk.bf16.mxu0 %vm8524_vm15, %v10119_v27 }
0x1b19   :  { %v8293_v54 = vpack.c.bf16 %v8286_v48, %v8286_v48 }
0x1b1a   :  { %8577 = vmatpush1.bf16.msra.mxu0 %v8526_v56 }
0x1b1d   :  { %9120 = vmatmul.mubr.msk.bf16.vlgmr.msra.gmra.mrb[108].mxu0 %vm16319_vm6, %v8293_v54 }
0x1bf0   :  { %v8606_v47 = vpop.f32.mrb[108].mxu0 }
0x1bf1   :  { %v9121_v37 = vmul.f32 -1.442695, %v8606_v47  ;;  %v8608_v58 = vpop.f32.mrb[109].mxu0 }
0x1bf2   :  { %v9122_v32 = vmul.f32 -1.442695, %v8608_v58  ;;  %v8610_v31 = vpop.f32.mrb[110].mxu0 }
0x1bf3   :  { %10186 = vpow2.f32 %v9121_v37  ;;  %v8611_v36 = vpop.f32.mrb[111].mxu0 }
0x1bf4   :  { %10188 = vpow2.f32 %v9122_v32 }
0x1bfd   :  { %v10187_v43 = vpop.eup %10186 }
0x1bfe   :  { %v10189_v28 = vpop.eup %10188  ;;  %v8619_v60 = vadd.f32 1.0, %v10187_v43 }
0x1bff   :  { %v8620_v53 = vadd.f32 1.0, %v10189_v28 }
0x1c00   :  { %10190 = vrcp.f32 %v8619_v60 }
0x1c01   :  { %10192 = vrcp.f32 %v8620_v53 }
0x1c0a   :  { %v10191_v34 = vpop.eup %10190 }
0x1c0b   :  { %v10193_v50 = vpop.eup %10192 }
0x1c0c   :  { %v8627_v6 = vcombine.low %v10191_v34, %v10193_v50 }
0x1c0e   :  { %v8634_v10 = vrot.slane %v8627_v6, %v8633_v23 }
0x1c10   :  { %v8641_v45 = vrot.slane %v8634_v10, %v8633_v23 }
0x1c12   :  { %8647 = vst.msk [vmem:[%s15954_s12] sm:$0x3] %vm8645_vm14, %v8641_v45 }

</bundles_post_ra>
